<compile_context>
chip_gen: v7x
topology: tpu7x:2x2x1
jax: 0.10.0
libtpu: 0.0.40
codegen_flags: <defaults>
</compile_context>

<pallas_src>
import functools

import jax
import jax.numpy as jnp
from jax import lax
from jax.experimental import pallas as pl
from jax.experimental.pallas import tpu as pltpu


# ----------------------------------------------------------------------------
# The single fused Pallas kernel
# ----------------------------------------------------------------------------
def _fused_forward_kernel(
    # inputs (all VMEM refs; weights pre-transposed / merged in the wrapper)
    x_ref, a_ref,
    wp_ref, bp_ref, wl00_ref, wl01_ref, wr0_ref, bl0_ref,
    ln0g_ref, ln0b_ref,
    wl10_ref, wl11_ref, wr1_ref, bl1_ref,
    wih0_ref, bih0_ref, whh0_ref, bhh0_ref,
    wih1_ref, bih1_ref, whh1_ref, bhh1_ref,
    rng_ref, rnb_ref,
    w1_ref, b1_ref, lng_ref, lnb_ref, w2_ref, b2_ref,
    cwr_ref, cwg_ref, cb_ref,
    # output
    o_ref,
    # VMEM scratch
    gx_scr, outf_scr, outb_scr,
    *, din, hid, batch):
    hg = hid // 2
    T = batch
    f32 = jnp.float32

    def dot(a, b):
        return jnp.dot(a, b, preferred_element_type=f32)

    def layer_norm(v, g_ref, b_ref):
        mu = jnp.mean(v, axis=-1, keepdims=True)
        vc = v - mu
        var = jnp.mean(vc * vc, axis=-1, keepdims=True)
        return vc * lax.rsqrt(var + 1e-5) * g_ref[...] + b_ref[...]

    def l2norm(v):
        # F.normalize(v, p=2, dim=-1): v / max(||v||, 1e-12) == v * rsqrt(max(ss, 1e-24))
        ss = jnp.sum(v * v, axis=-1, keepdims=True)
        return v * lax.rsqrt(jnp.maximum(ss, 1e-24))

    x = x_ref[...]                                               # (N, DIN)

    # ---- GNN layer 0: SAGEConv(project=True, normalize=True) per edge type ----
    # Both edge types fused into lane-wider matmuls; HeteroConv mean + ReLU + LayerNorm.
    xp = jnp.maximum(dot(x, wp_ref[...]) + bp_ref[...], 0.0)     # (N, 2*DIN) projections
    agg0 = dot(a_ref[0], xp[:, :din])                            # (N, DIN) mean-agg, edge 0
    agg1 = dot(a_ref[1], xp[:, din:])                            # (N, DIN) mean-agg, edge 1
    xr = dot(x, wr0_ref[...]) + bl0_ref[...]                     # (N, 2*HID) root terms + lin_l bias
    y0 = l2norm(dot(agg0, wl00_ref[...]) + xr[:, :hid])
    y1 = l2norm(dot(agg1, wl01_ref[...]) + xr[:, hid:])
    h = jnp.maximum((y0 + y1) * 0.5, 0.0)                        # HeteroConv mean -> ReLU
    h = layer_norm(h, ln0g_ref, ln0b_ref)
    # TODO(synk): dropout layers are identity (inference semantics), not sampled.

    # ---- GNN layer 1: plain SAGEConv per edge type, HeteroConv mean (no act) ----
    aggA = dot(a_ref[0], h)
    aggB = dot(a_ref[1], h)
    hr = dot(h, wr1_ref[...]) + bl1_ref[...]                     # (N, 2*HID)
    z0 = dot(aggA, wl10_ref[...]) + hr[:, :hid]
    z1 = dot(aggB, wl11_ref[...]) + hr[:, hid:]
    x_gnn = ((z0 + z1) * 0.5)[:batch]                            # (B, HID)

    # ---- RNN branch: 2-layer bidirectional GRU, both directions fused ----
    # Block-diagonal recurrent weight -> one (1,2hg)@(2hg,6hg) matmul per step.
    def gru_bidir(inp, wih_r, bih_r, whh_r, bhh_r):
        gx_scr[...] = dot(inp, wih_r[...]) + bih_r[...]          # (T, 6*hg) all input gates
        whh = whh_r[...]
        bhh = bhh_r[...]

        def step(t, hs):
            rt = T - 1 - t
            gh = dot(hs, whh) + bhh                              # (1, 6*hg)  [fwd | bwd] gates
            gf = gx_scr[pl.ds(t, 1), :]                          # fwd uses cols [:3hg]
            gb = gx_scr[pl.ds(rt, 1), :]                         # bwd uses cols [3hg:]
            h_f = hs[:, 0:hg]
            h_b = hs[:, hg:2 * hg]
            r_f = jax.nn.sigmoid(gf[:, 0:hg] + gh[:, 0:hg])
            z_f = jax.nn.sigmoid(gf[:, hg:2 * hg] + gh[:, hg:2 * hg])
            n_f = jnp.tanh(gf[:, 2 * hg:3 * hg] + r_f * gh[:, 2 * hg:3 * hg])
            hf = (1.0 - z_f) * n_f + z_f * h_f
            r_b = jax.nn.sigmoid(gb[:, 3 * hg:4 * hg] + gh[:, 3 * hg:4 * hg])
            z_b = jax.nn.sigmoid(gb[:, 4 * hg:5 * hg] + gh[:, 4 * hg:5 * hg])
            n_b = jnp.tanh(gb[:, 5 * hg:6 * hg] + r_b * gh[:, 5 * hg:6 * hg])
            hb = (1.0 - z_b) * n_b + z_b * h_b
            outf_scr[pl.ds(t, 1), :] = hf                        # forward output at time t
            outb_scr[pl.ds(rt, 1), :] = hb                       # backward output at time rt
            return jnp.concatenate([hf, hb], axis=-1)

        lax.fori_loop(0, T, step, jnp.zeros((1, 2 * hg), f32), unroll=True)
        return jnp.concatenate([outf_scr[...], outb_scr[...]], axis=-1)   # (T, HID)

    r = x[:batch]                                                # (T, DIN) single sequence
    r = gru_bidir(r, wih0_ref, bih0_ref, whh0_ref, bhh0_ref)
    r = gru_bidir(r, wih1_ref, bih1_ref, whh1_ref, bhh1_ref)
    r = layer_norm(r, rng_ref, rnb_ref)                          # rnn_norm
    r = jnp.maximum(dot(r, w1_ref[...]) + b1_ref[...], 0.0)      # MLP linear1 + ReLU
    r = layer_norm(r, lng_ref, lnb_ref)                          # MLP LayerNorm
    r = dot(r, w2_ref[...]) + b2_ref[...]                        # MLP linear2

    # ---- cat_proj(concat([rnn, gnn])) without materializing the concat ----
    o_ref[...] = dot(r, cwr_ref[...]) + dot(x_gnn, cwg_ref[...]) + cb_ref[...]


# ----------------------------------------------------------------------------
# Parameter init (deterministic, PyTorch-style uniform fan-in scaling)
# ----------------------------------------------------------------------------
def init_params(key, din, hidden, num_edge_types=2):
    keys = iter(jax.random.split(key, 64))

    def U(shape, fan_in):
        s = 1.0 / (fan_in ** 0.5)
        return jax.random.uniform(next(keys), shape, jnp.float32, -s, s)

    params = {}
    gnn0 = [dict(wp=U((din, din), din), bp=U((din,), din),
                 wl=U((hidden, din), din), bl=U((hidden,), din),
                 wr=U((hidden, din), din)) for _ in range(num_edge_types)]
    gnn1 = [dict(wl=U((hidden, hidden), hidden), bl=U((hidden,), hidden),
                 wr=U((hidden, hidden), hidden)) for _ in range(num_edge_types)]
    params['gnn'] = [gnn0, gnn1]
    params['ln0_g'] = jnp.ones((hidden,), jnp.float32)
    params['ln0_b'] = jnp.zeros((hidden,), jnp.float32)

    hg = hidden // 2
    gru = []
    for lin in (din, hidden):
        layer = {}
        for d in ('f', 'b'):
            layer['wih_' + d] = U((3 * hg, lin), hg)
            layer['whh_' + d] = U((3 * hg, hg), hg)
            layer['bih_' + d] = U((3 * hg,), hg)
            layer['bhh_' + d] = U((3 * hg,), hg)
        gru.append(layer)
    params['gru'] = gru

    params['rnn_norm_g'] = jnp.ones((hidden,), jnp.float32)
    params['rnn_norm_b'] = jnp.zeros((hidden,), jnp.float32)
    params['mlp_w1'] = U((hidden, hidden), hidden)
    params['mlp_b1'] = U((hidden,), hidden)
    params['mlp_ln_g'] = jnp.ones((hidden,), jnp.float32)
    params['mlp_ln_b'] = jnp.zeros((hidden,), jnp.float32)
    params['mlp_w2'] = U((hidden, hidden), hidden)
    params['mlp_b2'] = U((hidden,), hidden)
    params['cat_w'] = U((hidden, 2 * hidden), 2 * hidden)
    params['cat_b'] = U((hidden,), 2 * hidden)
    return params


# ----------------------------------------------------------------------------
# One-time weight preparation: transpose / merge edge types & GRU directions
# (done outside the kernel so the kernel never transposes on the XLU)
# ----------------------------------------------------------------------------
def prepare_params(params, din, hid):
    hg = hid // 2
    p0, p1 = params['gnn']
    prep = {}
    # GNN layer 0 (merged across the two edge types along the output axis)
    prep['wp'] = jnp.concatenate([p0[0]['wp'].T, p0[1]['wp'].T], axis=1)      # (DIN, 2*DIN)
    prep['bp'] = jnp.concatenate([p0[0]['bp'], p0[1]['bp']]).reshape(1, -1)
    prep['wl00'] = p0[0]['wl'].T                                              # (DIN, HID)
    prep['wl01'] = p0[1]['wl'].T
    prep['wr0'] = jnp.concatenate([p0[0]['wr'].T, p0[1]['wr'].T], axis=1)     # (DIN, 2*HID)
    prep['bl0'] = jnp.concatenate([p0[0]['bl'], p0[1]['bl']]).reshape(1, -1)  # (1, 2*HID)
    prep['ln0_g'] = params['ln0_g'].reshape(1, -1)
    prep['ln0_b'] = params['ln0_b'].reshape(1, -1)
    # GNN layer 1
    prep['wl10'] = p1[0]['wl'].T
    prep['wl11'] = p1[1]['wl'].T
    prep['wr1'] = jnp.concatenate([p1[0]['wr'].T, p1[1]['wr'].T], axis=1)     # (HID, 2*HID)
    prep['bl1'] = jnp.concatenate([p1[0]['bl'], p1[1]['bl']]).reshape(1, -1)
    # GRU: merge both directions; recurrent weight is block-diagonal (2hg, 6hg)
    for li, layer in enumerate(params['gru']):
        prep[f'wih{li}'] = jnp.concatenate([layer['wih_f'].T, layer['wih_b'].T], axis=1)
        prep[f'bih{li}'] = jnp.concatenate([layer['bih_f'], layer['bih_b']]).reshape(1, -1)
        whh_bd = jnp.zeros((2 * hg, 6 * hg), jnp.float32)
        whh_bd = whh_bd.at[:hg, :3 * hg].set(layer['whh_f'].T)
        whh_bd = whh_bd.at[hg:, 3 * hg:].set(layer['whh_b'].T)
        prep[f'whh{li}'] = whh_bd
        prep[f'bhh{li}'] = jnp.concatenate([layer['bhh_f'], layer['bhh_b']]).reshape(1, -1)
    # LayerNorms / MLP / cat_proj (cat weight split so no in-kernel concat needed)
    prep['rnn_g'] = params['rnn_norm_g'].reshape(1, -1)
    prep['rnn_b'] = params['rnn_norm_b'].reshape(1, -1)
    prep['w1'] = params['mlp_w1'].T
    prep['b1'] = params['mlp_b1'].reshape(1, -1)
    prep['mlp_ln_g'] = params['mlp_ln_g'].reshape(1, -1)
    prep['mlp_ln_b'] = params['mlp_ln_b'].reshape(1, -1)
    prep['w2'] = params['mlp_w2'].T
    prep['b2'] = params['mlp_b2'].reshape(1, -1)
    prep['cwr'] = params['cat_w'][:, :hid].T                                  # (HID, HID) for rnn half
    prep['cwg'] = params['cat_w'][:, hid:].T                                  # (HID, HID) for gnn half
    prep['cb'] = params['cat_b'].reshape(1, -1)
    return prep


# ----------------------------------------------------------------------------
# Forward pass wrapper: single fused pallas_call
# ----------------------------------------------------------------------------
def hybrid_gnn_forward(prep, x_note, a_stack, *, batch_size, din, hidden):
    hg = hidden // 2
    args = (
        x_note, a_stack,
        prep['wp'], prep['bp'], prep['wl00'], prep['wl01'], prep['wr0'], prep['bl0'],
        prep['ln0_g'], prep['ln0_b'],
        prep['wl10'], prep['wl11'], prep['wr1'], prep['bl1'],
        prep['wih0'], prep['bih0'], prep['whh0'], prep['bhh0'],
        prep['wih1'], prep['bih1'], prep['whh1'], prep['bhh1'],
        prep['rnn_g'], prep['rnn_b'],
        prep['w1'], prep['b1'], prep['mlp_ln_g'], prep['mlp_ln_b'], prep['w2'], prep['b2'],
        prep['cwr'], prep['cwg'], prep['cb'],
    )
    kernel = functools.partial(_fused_forward_kernel, din=din, hid=hidden, batch=batch_size)
    # TODO(synk): for realistic graph sizes the dense (N,N) adjacency must be tiled with
    # a BlockSpec grid (row tiles "parallel" for v7x's 2 TCs, reduction axis "arbitrary")
    # or kept in HBM (memory_space=pl.ANY) with double-buffered DMA; at these demo shapes
    # everything fits in a few KiB of VMEM so one grid-less fused call is optimal.
    return pl.pallas_call(
        kernel,
        out_shape=jax.ShapeDtypeStruct((batch_size, hidden), jnp.float32),
        in_specs=[pl.BlockSpec(memory_space=pltpu.MemorySpace.VMEM) for _ in args],
        out_specs=pl.BlockSpec(memory_space=pltpu.MemorySpace.VMEM),
        scratch_shapes=[
            pltpu.VMEM((batch_size, 6 * hg), jnp.float32),   # GRU input-gate pre-activations
            pltpu.VMEM((batch_size, hg), jnp.float32),       # forward-direction hidden states
            pltpu.VMEM((batch_size, hg), jnp.float32),       # backward-direction hidden states
        ],
    )(*args)


# ----------------------------------------------------------------------------
if __name__ == "__main__":
    key = jax.random.PRNGKey(0)
    DIN, HID = 16, 32            # input_channels, hidden_channels
    N_NOTE, BATCH = 24, 16       # total 'note' nodes, batch_size (target notes)

    kx, ke1, ke2, kp = jax.random.split(key, 4)
    x_note = jax.random.normal(kx, (N_NOTE, DIN), jnp.float32)

    # Two ('note', *, 'note') edge types -> dense row-normalised (mean) adjacency
    def make_adj(k, n, e):
        ks, kd = jax.random.split(k)
        src = jax.random.randint(ks, (e,), 0, n)
        dst = jax.random.randint(kd, (e,), 0, n)
        a = jnp.zeros((n, n), jnp.float32).at[dst, src].add(1.0)
        deg = a.sum(axis=-1, keepdims=True)
        return a / jnp.maximum(deg, 1.0)

    a_stack = jnp.stack([make_adj(ke1, N_NOTE, 48), make_adj(ke2, N_NOTE, 48)])
    params = init_params(kp, DIN, HID, num_edge_types=2)
    prep = prepare_params(params, DIN, HID)

    fwd = jax.jit(functools.partial(hybrid_gnn_forward,
                                    batch_size=BATCH, din=DIN, hidden=HID))
    out = fwd(prep, x_note, a_stack)
    out = jax.block_until_ready(out)
    assert out.shape == (BATCH, HID) and out.dtype == jnp.float32
    print("KERNEL_OK")
</pallas_src>

<mosaic_0001>
module attributes {stable_mosaic.version = 11 : i64} {
  func.func @_fused_forward_kernel(%arg0: memref<24x16xf32, #tpu.memory_space<vmem>>, %arg1: memref<2x24x24xf32, #tpu.memory_space<vmem>>, %arg2: memref<16x32xf32, #tpu.memory_space<vmem>>, %arg3: memref<1x32xf32, #tpu.memory_space<vmem>>, %arg4: memref<16x32xf32, #tpu.memory_space<vmem>>, %arg5: memref<16x32xf32, #tpu.memory_space<vmem>>, %arg6: memref<16x64xf32, #tpu.memory_space<vmem>>, %arg7: memref<1x64xf32, #tpu.memory_space<vmem>>, %arg8: memref<1x32xf32, #tpu.memory_space<vmem>>, %arg9: memref<1x32xf32, #tpu.memory_space<vmem>>, %arg10: memref<32x32xf32, #tpu.memory_space<vmem>>, %arg11: memref<32x32xf32, #tpu.memory_space<vmem>>, %arg12: memref<32x64xf32, #tpu.memory_space<vmem>>, %arg13: memref<1x64xf32, #tpu.memory_space<vmem>>, %arg14: memref<16x96xf32, #tpu.memory_space<vmem>>, %arg15: memref<1x96xf32, #tpu.memory_space<vmem>>, %arg16: memref<32x96xf32, #tpu.memory_space<vmem>>, %arg17: memref<1x96xf32, #tpu.memory_space<vmem>>, %arg18: memref<32x96xf32, #tpu.memory_space<vmem>>, %arg19: memref<1x96xf32, #tpu.memory_space<vmem>>, %arg20: memref<32x96xf32, #tpu.memory_space<vmem>>, %arg21: memref<1x96xf32, #tpu.memory_space<vmem>>, %arg22: memref<1x32xf32, #tpu.memory_space<vmem>>, %arg23: memref<1x32xf32, #tpu.memory_space<vmem>>, %arg24: memref<32x32xf32, #tpu.memory_space<vmem>>, %arg25: memref<1x32xf32, #tpu.memory_space<vmem>>, %arg26: memref<1x32xf32, #tpu.memory_space<vmem>>, %arg27: memref<1x32xf32, #tpu.memory_space<vmem>>, %arg28: memref<32x32xf32, #tpu.memory_space<vmem>>, %arg29: memref<1x32xf32, #tpu.memory_space<vmem>>, %arg30: memref<32x32xf32, #tpu.memory_space<vmem>>, %arg31: memref<32x32xf32, #tpu.memory_space<vmem>>, %arg32: memref<1x32xf32, #tpu.memory_space<vmem>>, %arg33: memref<16x32xf32, #tpu.memory_space<vmem>>, %arg34: memref<16x96xf32, #tpu.memory_space<vmem>>, %arg35: memref<16x16xf32, #tpu.memory_space<vmem>>, %arg36: memref<16x16xf32, #tpu.memory_space<vmem>>) attributes {dimension_semantics = [], scalar_prefetch = 0 : i64, scratch_operands = 3 : i64, tpu.core_type = #tpu.core_type<tc>} {
    %c0 = arith.constant 0 : index
    %c0_0 = arith.constant 0 : index
    %0 = vector.load %arg0[%c0, %c0_0] : memref<24x16xf32, #tpu.memory_space<vmem>>, vector<24x16xf32>
    %c0_1 = arith.constant 0 : index
    %c0_2 = arith.constant 0 : index
    %1 = vector.load %arg2[%c0_1, %c0_2] : memref<16x32xf32, #tpu.memory_space<vmem>>, vector<16x32xf32>
    %cst = arith.constant dense<0.000000e+00> : vector<24x32xf32>
    %2 = tpu.matmul %0, %1, %cst {dimension_numbers = #tpu.dot_dimension_numbers<[1], [0], [0], [1], [0, 0, 1, 1], [], []>} : vector<24x16xf32>, vector<16x32xf32>, vector<24x32xf32> -> vector<24x32xf32>
    %c0_3 = arith.constant 0 : index
    %c0_4 = arith.constant 0 : index
    %3 = vector.load %arg3[%c0_3, %c0_4] : memref<1x32xf32, #tpu.memory_space<vmem>>, vector<1x32xf32>
    %4 = vector.broadcast %3 : vector<1x32xf32> to vector<24x32xf32>
    %5 = arith.addf %2, %4 : vector<24x32xf32>
    %cst_5 = arith.constant 0.000000e+00 : f32
    %6 = vector.broadcast %cst_5 : f32 to vector<24x32xf32>
    %7 = arith.maximumf %5, %6 : vector<24x32xf32>
    %c0_6 = arith.constant 0 : index
    %c0_7 = arith.constant 0 : index
    %c0_8 = arith.constant 0 : index
    %8 = vector.load %arg1[%c0_6, %c0_7, %c0_8] : memref<2x24x24xf32, #tpu.memory_space<vmem>>, vector<1x24x24xf32>
    %9 = vector.shape_cast %8 : vector<1x24x24xf32> to vector<24x24xf32>
    %10 = vector.extract_strided_slice %7 {offsets = [0, 0], sizes = [24, 16], strides = [1, 1]} : vector<24x32xf32> to vector<24x16xf32>
    %cst_9 = arith.constant dense<0.000000e+00> : vector<24x16xf32>
    %11 = tpu.matmul %9, %10, %cst_9 {dimension_numbers = #tpu.dot_dimension_numbers<[1], [0], [0], [1], [0, 0, 1, 1], [], []>} : vector<24x24xf32>, vector<24x16xf32>, vector<24x16xf32> -> vector<24x16xf32>
    %c1 = arith.constant 1 : index
    %c0_10 = arith.constant 0 : index
    %c0_11 = arith.constant 0 : index
    %12 = vector.load %arg1[%c1, %c0_10, %c0_11] : memref<2x24x24xf32, #tpu.memory_space<vmem>>, vector<1x24x24xf32>
    %13 = vector.shape_cast %12 : vector<1x24x24xf32> to vector<24x24xf32>
    %14 = vector.extract_strided_slice %7 {offsets = [0, 16], sizes = [24, 16], strides = [1, 1]} : vector<24x32xf32> to vector<24x16xf32>
    %cst_12 = arith.constant dense<0.000000e+00> : vector<24x16xf32>
    %15 = tpu.matmul %13, %14, %cst_12 {dimension_numbers = #tpu.dot_dimension_numbers<[1], [0], [0], [1], [0, 0, 1, 1], [], []>} : vector<24x24xf32>, vector<24x16xf32>, vector<24x16xf32> -> vector<24x16xf32>
    %c0_13 = arith.constant 0 : index
    %c0_14 = arith.constant 0 : index
    %16 = vector.load %arg6[%c0_13, %c0_14] : memref<16x64xf32, #tpu.memory_space<vmem>>, vector<16x64xf32>
    %cst_15 = arith.constant dense<0.000000e+00> : vector<24x64xf32>
    %17 = tpu.matmul %0, %16, %cst_15 {dimension_numbers = #tpu.dot_dimension_numbers<[1], [0], [0], [1], [0, 0, 1, 1], [], []>} : vector<24x16xf32>, vector<16x64xf32>, vector<24x64xf32> -> vector<24x64xf32>
    %c0_16 = arith.constant 0 : index
    %c0_17 = arith.constant 0 : index
    %18 = vector.load %arg7[%c0_16, %c0_17] : memref<1x64xf32, #tpu.memory_space<vmem>>, vector<1x64xf32>
    %19 = vector.broadcast %18 : vector<1x64xf32> to vector<24x64xf32>
    %20 = arith.addf %17, %19 : vector<24x64xf32>
    %c0_18 = arith.constant 0 : index
    %c0_19 = arith.constant 0 : index
    %21 = vector.load %arg4[%c0_18, %c0_19] : memref<16x32xf32, #tpu.memory_space<vmem>>, vector<16x32xf32>
    %cst_20 = arith.constant dense<0.000000e+00> : vector<24x32xf32>
    %22 = tpu.matmul %11, %21, %cst_20 {dimension_numbers = #tpu.dot_dimension_numbers<[1], [0], [0], [1], [0, 0, 1, 1], [], []>} : vector<24x16xf32>, vector<16x32xf32>, vector<24x32xf32> -> vector<24x32xf32>
    %23 = vector.extract_strided_slice %20 {offsets = [0, 0], sizes = [24, 32], strides = [1, 1]} : vector<24x64xf32> to vector<24x32xf32>
    %24 = arith.addf %22, %23 : vector<24x32xf32>
    %25 = arith.mulf %24, %24 : vector<24x32xf32>
    %cst_21 = arith.constant dense<0.000000e+00> : vector<24xf32>
    %26 = vector.multi_reduction <add>, %25, %cst_21 [1] : vector<24x32xf32> to vector<24xf32>
    %27 = vector.shape_cast %26 : vector<24xf32> to vector<24x1xf32>
    %cst_22 = arith.constant 1.000000e-24 : f32
    %28 = vector.broadcast %cst_22 : f32 to vector<24x1xf32>
    %29 = arith.maximumf %27, %28 : vector<24x1xf32>
    %30 = math.rsqrt %29 : vector<24x1xf32>
    %31 = vector.broadcast %30 : vector<24x1xf32> to vector<24x32xf32>
    %32 = arith.mulf %24, %31 : vector<24x32xf32>
    %c0_23 = arith.constant 0 : index
    %c0_24 = arith.constant 0 : index
    %33 = vector.load %arg5[%c0_23, %c0_24] : memref<16x32xf32, #tpu.memory_space<vmem>>, vector<16x32xf32>
    %cst_25 = arith.constant dense<0.000000e+00> : vector<24x32xf32>
    %34 = tpu.matmul %15, %33, %cst_25 {dimension_numbers = #tpu.dot_dimension_numbers<[1], [0], [0], [1], [0, 0, 1, 1], [], []>} : vector<24x16xf32>, vector<16x32xf32>, vector<24x32xf32> -> vector<24x32xf32>
    %35 = vector.extract_strided_slice %20 {offsets = [0, 32], sizes = [24, 32], strides = [1, 1]} : vector<24x64xf32> to vector<24x32xf32>
    %36 = arith.addf %34, %35 : vector<24x32xf32>
    %37 = arith.mulf %36, %36 : vector<24x32xf32>
    %cst_26 = arith.constant dense<0.000000e+00> : vector<24xf32>
    %38 = vector.multi_reduction <add>, %37, %cst_26 [1] : vector<24x32xf32> to vector<24xf32>
    %39 = vector.shape_cast %38 : vector<24xf32> to vector<24x1xf32>
    %cst_27 = arith.constant 1.000000e-24 : f32
    %40 = vector.broadcast %cst_27 : f32 to vector<24x1xf32>
    %41 = arith.maximumf %39, %40 : vector<24x1xf32>
    %42 = math.rsqrt %41 : vector<24x1xf32>
    %43 = vector.broadcast %42 : vector<24x1xf32> to vector<24x32xf32>
    %44 = arith.mulf %36, %43 : vector<24x32xf32>
    %45 = arith.addf %32, %44 : vector<24x32xf32>
    %cst_28 = arith.constant 5.000000e-01 : f32
    %46 = vector.broadcast %cst_28 : f32 to vector<24x32xf32>
    %47 = arith.mulf %45, %46 : vector<24x32xf32>
    %cst_29 = arith.constant 0.000000e+00 : f32
    %48 = vector.broadcast %cst_29 : f32 to vector<24x32xf32>
    %49 = arith.maximumf %47, %48 : vector<24x32xf32>
    %cst_30 = arith.constant dense<0.000000e+00> : vector<24xf32>
    %50 = vector.multi_reduction <add>, %49, %cst_30 [1] : vector<24x32xf32> to vector<24xf32>
    %51 = vector.shape_cast %50 : vector<24xf32> to vector<24x1xf32>
    %cst_31 = arith.constant 3.200000e+01 : f32
    %52 = vector.broadcast %cst_31 : f32 to vector<24x1xf32>
    %53 = arith.divf %51, %52 : vector<24x1xf32>
    %54 = vector.broadcast %53 : vector<24x1xf32> to vector<24x32xf32>
    %55 = arith.subf %49, %54 : vector<24x32xf32>
    %56 = arith.mulf %55, %55 : vector<24x32xf32>
    %cst_32 = arith.constant dense<0.000000e+00> : vector<24xf32>
    %57 = vector.multi_reduction <add>, %56, %cst_32 [1] : vector<24x32xf32> to vector<24xf32>
    %58 = vector.shape_cast %57 : vector<24xf32> to vector<24x1xf32>
    %cst_33 = arith.constant 3.200000e+01 : f32
    %59 = vector.broadcast %cst_33 : f32 to vector<24x1xf32>
    %60 = arith.divf %58, %59 : vector<24x1xf32>
    %cst_34 = arith.constant 9.99999974E-6 : f32
    %61 = vector.broadcast %cst_34 : f32 to vector<24x1xf32>
    %62 = arith.addf %60, %61 : vector<24x1xf32>
    %63 = math.rsqrt %62 : vector<24x1xf32>
    %64 = vector.broadcast %63 : vector<24x1xf32> to vector<24x32xf32>
    %65 = arith.mulf %55, %64 : vector<24x32xf32>
    %c0_35 = arith.constant 0 : index
    %c0_36 = arith.constant 0 : index
    %66 = vector.load %arg8[%c0_35, %c0_36] : memref<1x32xf32, #tpu.memory_space<vmem>>, vector<1x32xf32>
    %67 = vector.broadcast %66 : vector<1x32xf32> to vector<24x32xf32>
    %68 = arith.mulf %65, %67 : vector<24x32xf32>
    %c0_37 = arith.constant 0 : index
    %c0_38 = arith.constant 0 : index
    %69 = vector.load %arg9[%c0_37, %c0_38] : memref<1x32xf32, #tpu.memory_space<vmem>>, vector<1x32xf32>
    %70 = vector.broadcast %69 : vector<1x32xf32> to vector<24x32xf32>
    %71 = arith.addf %68, %70 : vector<24x32xf32>
    %c0_39 = arith.constant 0 : index
    %c0_40 = arith.constant 0 : index
    %c0_41 = arith.constant 0 : index
    %72 = vector.load %arg1[%c0_39, %c0_40, %c0_41] : memref<2x24x24xf32, #tpu.memory_space<vmem>>, vector<1x24x24xf32>
    %73 = vector.shape_cast %72 : vector<1x24x24xf32> to vector<24x24xf32>
    %cst_42 = arith.constant dense<0.000000e+00> : vector<24x32xf32>
    %74 = tpu.matmul %73, %71, %cst_42 {dimension_numbers = #tpu.dot_dimension_numbers<[1], [0], [0], [1], [0, 0, 1, 1], [], []>} : vector<24x24xf32>, vector<24x32xf32>, vector<24x32xf32> -> vector<24x32xf32>
    %c1_43 = arith.constant 1 : index
    %c0_44 = arith.constant 0 : index
    %c0_45 = arith.constant 0 : index
    %75 = vector.load %arg1[%c1_43, %c0_44, %c0_45] : memref<2x24x24xf32, #tpu.memory_space<vmem>>, vector<1x24x24xf32>
    %76 = vector.shape_cast %75 : vector<1x24x24xf32> to vector<24x24xf32>
    %cst_46 = arith.constant dense<0.000000e+00> : vector<24x32xf32>
    %77 = tpu.matmul %76, %71, %cst_46 {dimension_numbers = #tpu.dot_dimension_numbers<[1], [0], [0], [1], [0, 0, 1, 1], [], []>} : vector<24x24xf32>, vector<24x32xf32>, vector<24x32xf32> -> vector<24x32xf32>
    %c0_47 = arith.constant 0 : index
    %c0_48 = arith.constant 0 : index
    %78 = vector.load %arg12[%c0_47, %c0_48] : memref<32x64xf32, #tpu.memory_space<vmem>>, vector<32x64xf32>
    %cst_49 = arith.constant dense<0.000000e+00> : vector<24x64xf32>
    %79 = tpu.matmul %71, %78, %cst_49 {dimension_numbers = #tpu.dot_dimension_numbers<[1], [0], [0], [1], [0, 0, 1, 1], [], []>} : vector<24x32xf32>, vector<32x64xf32>, vector<24x64xf32> -> vector<24x64xf32>
    %c0_50 = arith.constant 0 : index
    %c0_51 = arith.constant 0 : index
    %80 = vector.load %arg13[%c0_50, %c0_51] : memref<1x64xf32, #tpu.memory_space<vmem>>, vector<1x64xf32>
    %81 = vector.broadcast %80 : vector<1x64xf32> to vector<24x64xf32>
    %82 = arith.addf %79, %81 : vector<24x64xf32>
    %c0_52 = arith.constant 0 : index
    %c0_53 = arith.constant 0 : index
    %83 = vector.load %arg10[%c0_52, %c0_53] : memref<32x32xf32, #tpu.memory_space<vmem>>, vector<32x32xf32>
    %cst_54 = arith.constant dense<0.000000e+00> : vector<24x32xf32>
    %84 = tpu.matmul %74, %83, %cst_54 {dimension_numbers = #tpu.dot_dimension_numbers<[1], [0], [0], [1], [0, 0, 1, 1], [], []>} : vector<24x32xf32>, vector<32x32xf32>, vector<24x32xf32> -> vector<24x32xf32>
    %85 = vector.extract_strided_slice %82 {offsets = [0, 0], sizes = [24, 32], strides = [1, 1]} : vector<24x64xf32> to vector<24x32xf32>
    %86 = arith.addf %84, %85 : vector<24x32xf32>
    %c0_55 = arith.constant 0 : index
    %c0_56 = arith.constant 0 : index
    %87 = vector.load %arg11[%c0_55, %c0_56] : memref<32x32xf32, #tpu.memory_space<vmem>>, vector<32x32xf32>
    %cst_57 = arith.constant dense<0.000000e+00> : vector<24x32xf32>
    %88 = tpu.matmul %77, %87, %cst_57 {dimension_numbers = #tpu.dot_dimension_numbers<[1], [0], [0], [1], [0, 0, 1, 1], [], []>} : vector<24x32xf32>, vector<32x32xf32>, vector<24x32xf32> -> vector<24x32xf32>
    %89 = vector.extract_strided_slice %82 {offsets = [0, 32], sizes = [24, 32], strides = [1, 1]} : vector<24x64xf32> to vector<24x32xf32>
    %90 = arith.addf %88, %89 : vector<24x32xf32>
    %91 = arith.addf %86, %90 : vector<24x32xf32>
    %cst_58 = arith.constant 5.000000e-01 : f32
    %92 = vector.broadcast %cst_58 : f32 to vector<24x32xf32>
    %93 = arith.mulf %91, %92 : vector<24x32xf32>
    %94 = vector.extract_strided_slice %93 {offsets = [0, 0], sizes = [16, 32], strides = [1, 1]} : vector<24x32xf32> to vector<16x32xf32>
    %95 = vector.extract_strided_slice %0 {offsets = [0, 0], sizes = [16, 16], strides = [1, 1]} : vector<24x16xf32> to vector<16x16xf32>
    %c0_59 = arith.constant 0 : index
    %c0_60 = arith.constant 0 : index
    %96 = vector.load %arg14[%c0_59, %c0_60] : memref<16x96xf32, #tpu.memory_space<vmem>>, vector<16x96xf32>
    %cst_61 = arith.constant dense<0.000000e+00> : vector<16x96xf32>
    %97 = tpu.matmul %95, %96, %cst_61 {dimension_numbers = #tpu.dot_dimension_numbers<[1], [0], [0], [1], [0, 0, 1, 1], [], []>} : vector<16x16xf32>, vector<16x96xf32>, vector<16x96xf32> -> vector<16x96xf32>
    %c0_62 = arith.constant 0 : index
    %c0_63 = arith.constant 0 : index
    %98 = vector.load %arg15[%c0_62, %c0_63] : memref<1x96xf32, #tpu.memory_space<vmem>>, vector<1x96xf32>
    %99 = vector.broadcast %98 : vector<1x96xf32> to vector<16x96xf32>
    %100 = arith.addf %97, %99 : vector<16x96xf32>
    %c0_64 = arith.constant 0 : index
    %c0_65 = arith.constant 0 : index
    %101 = vector.load %arg34[%c0_64, %c0_65] : memref<16x96xf32, #tpu.memory_space<vmem>>, vector<16x96xf32>
    tpu.vector_store %arg34[%c0_64, %c0_65], %100 {strides = array<i32>} : memref<16x96xf32, #tpu.memory_space<vmem>>, vector<16x96xf32>,
    %c0_66 = arith.constant 0 : index
    %c0_67 = arith.constant 0 : index
    %102 = vector.load %arg16[%c0_66, %c0_67] : memref<32x96xf32, #tpu.memory_space<vmem>>, vector<32x96xf32>
    %c0_68 = arith.constant 0 : index
    %c0_69 = arith.constant 0 : index
    %103 = vector.load %arg17[%c0_68, %c0_69] : memref<1x96xf32, #tpu.memory_space<vmem>>, vector<1x96xf32>
    %cst_70 = arith.constant 0.000000e+00 : f32
    %104 = vector.broadcast %cst_70 : f32 to vector<1x32xf32>
    %c0_i32 = arith.constant 0 : i32
    %c15_i32 = arith.constant 15 : i32
    %105 = arith.subi %c15_i32, %c0_i32 : i32
    %cst_71 = arith.constant dense<0.000000e+00> : vector<1x96xf32>
    %106 = tpu.matmul %104, %102, %cst_71 {dimension_numbers = #tpu.dot_dimension_numbers<[1], [0], [0], [1], [0, 0, 1, 1], [], []>} : vector<1x32xf32>, vector<32x96xf32>, vector<1x96xf32> -> vector<1x96xf32>
    %107 = arith.addf %106, %103 : vector<1x96xf32>
    %108 = arith.index_cast %c0_i32 : i32 to index
    %c0_72 = arith.constant 0 : index
    %109 = vector.load %arg34[%108, %c0_72] : memref<16x96xf32, #tpu.memory_space<vmem>>, vector<1x96xf32>
    %110 = arith.index_cast %105 : i32 to index
    %c0_73 = arith.constant 0 : index
    %111 = vector.load %arg34[%110, %c0_73] : memref<16x96xf32, #tpu.memory_space<vmem>>, vector<1x96xf32>
    %112 = vector.extract_strided_slice %104 {offsets = [0, 0], sizes = [1, 16], strides = [1, 1]} : vector<1x32xf32> to vector<1x16xf32>
    %113 = vector.extract_strided_slice %104 {offsets = [0, 16], sizes = [1, 16], strides = [1, 1]} : vector<1x32xf32> to vector<1x16xf32>
    %114 = vector.extract_strided_slice %109 {offsets = [0, 0], sizes = [1, 16], strides = [1, 1]} : vector<1x96xf32> to vector<1x16xf32>
    %115 = vector.extract_strided_slice %107 {offsets = [0, 0], sizes = [1, 16], strides = [1, 1]} : vector<1x96xf32> to vector<1x16xf32>
    %116 = arith.addf %114, %115 : vector<1x16xf32>
    %117 = arith.negf %116 : vector<1x16xf32>
    %118 = math.exp %117 : vector<1x16xf32>
    %cst_74 = arith.constant 1.000000e+00 : f32
    %119 = vector.broadcast %cst_74 : f32 to vector<1x16xf32>
    %120 = arith.addf %119, %118 : vector<1x16xf32>
    %121 = arith.divf %119, %120 : vector<1x16xf32>
    %122 = vector.extract_strided_slice %109 {offsets = [0, 16], sizes = [1, 16], strides = [1, 1]} : vector<1x96xf32> to vector<1x16xf32>
    %123 = vector.extract_strided_slice %107 {offsets = [0, 16], sizes = [1, 16], strides = [1, 1]} : vector<1x96xf32> to vector<1x16xf32>
    %124 = arith.addf %122, %123 : vector<1x16xf32>
    %125 = arith.negf %124 : vector<1x16xf32>
    %126 = math.exp %125 : vector<1x16xf32>
    %cst_75 = arith.constant 1.000000e+00 : f32
    %127 = vector.broadcast %cst_75 : f32 to vector<1x16xf32>
    %128 = arith.addf %127, %126 : vector<1x16xf32>
    %129 = arith.divf %127, %128 : vector<1x16xf32>
    %130 = vector.extract_strided_slice %109 {offsets = [0, 32], sizes = [1, 16], strides = [1, 1]} : vector<1x96xf32> to vector<1x16xf32>
    %131 = vector.extract_strided_slice %107 {offsets = [0, 32], sizes = [1, 16], strides = [1, 1]} : vector<1x96xf32> to vector<1x16xf32>
    %132 = arith.mulf %121, %131 : vector<1x16xf32>
    %133 = arith.addf %130, %132 : vector<1x16xf32>
    %134 = math.tanh %133 : vector<1x16xf32>
    %cst_76 = arith.constant 1.000000e+00 : f32
    %135 = vector.broadcast %cst_76 : f32 to vector<1x16xf32>
    %136 = arith.subf %135, %129 : vector<1x16xf32>
    %137 = arith.mulf %136, %134 : vector<1x16xf32>
    %138 = arith.mulf %129, %112 : vector<1x16xf32>
    %139 = arith.addf %137, %138 : vector<1x16xf32>
    %140 = vector.extract_strided_slice %111 {offsets = [0, 48], sizes = [1, 16], strides = [1, 1]} : vector<1x96xf32> to vector<1x16xf32>
    %141 = vector.extract_strided_slice %107 {offsets = [0, 48], sizes = [1, 16], strides = [1, 1]} : vector<1x96xf32> to vector<1x16xf32>
    %142 = arith.addf %140, %141 : vector<1x16xf32>
    %143 = arith.negf %142 : vector<1x16xf32>
    %144 = math.exp %143 : vector<1x16xf32>
    %cst_77 = arith.constant 1.000000e+00 : f32
    %145 = vector.broadcast %cst_77 : f32 to vector<1x16xf32>
    %146 = arith.addf %145, %144 : vector<1x16xf32>
    %147 = arith.divf %145, %146 : vector<1x16xf32>
    %148 = vector.extract_strided_slice %111 {offsets = [0, 64], sizes = [1, 16], strides = [1, 1]} : vector<1x96xf32> to vector<1x16xf32>
    %149 = vector.extract_strided_slice %107 {offsets = [0, 64], sizes = [1, 16], strides = [1, 1]} : vector<1x96xf32> to vector<1x16xf32>
    %150 = arith.addf %148, %149 : vector<1x16xf32>
    %151 = arith.negf %150 : vector<1x16xf32>
    %152 = math.exp %151 : vector<1x16xf32>
    %cst_78 = arith.constant 1.000000e+00 : f32
    %153 = vector.broadcast %cst_78 : f32 to vector<1x16xf32>
    %154 = arith.addf %153, %152 : vector<1x16xf32>
    %155 = arith.divf %153, %154 : vector<1x16xf32>
    %156 = vector.extract_strided_slice %111 {offsets = [0, 80], sizes = [1, 16], strides = [1, 1]} : vector<1x96xf32> to vector<1x16xf32>
    %157 = vector.extract_strided_slice %107 {offsets = [0, 80], sizes = [1, 16], strides = [1, 1]} : vector<1x96xf32> to vector<1x16xf32>
    %158 = arith.mulf %147, %157 : vector<1x16xf32>
    %159 = arith.addf %156, %158 : vector<1x16xf32>
    %160 = math.tanh %159 : vector<1x16xf32>
    %cst_79 = arith.constant 1.000000e+00 : f32
    %161 = vector.broadcast %cst_79 : f32 to vector<1x16xf32>
    %162 = arith.subf %161, %155 : vector<1x16xf32>
    %163 = arith.mulf %162, %160 : vector<1x16xf32>
    %164 = arith.mulf %155, %113 : vector<1x16xf32>
    %165 = arith.addf %163, %164 : vector<1x16xf32>
    %166 = arith.index_cast %c0_i32 : i32 to index
    %c0_80 = arith.constant 0 : index
    %167 = vector.load %arg35[%166, %c0_80] : memref<16x16xf32, #tpu.memory_space<vmem>>, vector<1x16xf32>
    tpu.vector_store %arg35[%166, %c0_80], %139 {strides = array<i32>} : memref<16x16xf32, #tpu.memory_space<vmem>>, vector<1x16xf32>,
    %168 = arith.index_cast %105 : i32 to index
    %c0_81 = arith.constant 0 : index
    %169 = vector.load %arg36[%168, %c0_81] : memref<16x16xf32, #tpu.memory_space<vmem>>, vector<1x16xf32>
    tpu.vector_store %arg36[%168, %c0_81], %165 {strides = array<i32>} : memref<16x16xf32, #tpu.memory_space<vmem>>, vector<1x16xf32>,
    %170 = tpu.concatenate %139, %165 in 1 : vector<1x16xf32>, vector<1x16xf32> -> vector<1x32xf32>
    %c1_i32 = arith.constant 1 : i32
    %c15_i32_82 = arith.constant 15 : i32
    %171 = arith.subi %c15_i32_82, %c1_i32 : i32
    %cst_83 = arith.constant dense<0.000000e+00> : vector<1x96xf32>
    %172 = tpu.matmul %170, %102, %cst_83 {dimension_numbers = #tpu.dot_dimension_numbers<[1], [0], [0], [1], [0, 0, 1, 1], [], []>} : vector<1x32xf32>, vector<32x96xf32>, vector<1x96xf32> -> vector<1x96xf32>
    %173 = arith.addf %172, %103 : vector<1x96xf32>
    %174 = arith.index_cast %c1_i32 : i32 to index
    %c0_84 = arith.constant 0 : index
    %175 = vector.load %arg34[%174, %c0_84] : memref<16x96xf32, #tpu.memory_space<vmem>>, vector<1x96xf32>
    %176 = arith.index_cast %171 : i32 to index
    %c0_85 = arith.constant 0 : index
    %177 = vector.load %arg34[%176, %c0_85] : memref<16x96xf32, #tpu.memory_space<vmem>>, vector<1x96xf32>
    %178 = vector.extract_strided_slice %170 {offsets = [0, 0], sizes = [1, 16], strides = [1, 1]} : vector<1x32xf32> to vector<1x16xf32>
    %179 = vector.extract_strided_slice %170 {offsets = [0, 16], sizes = [1, 16], strides = [1, 1]} : vector<1x32xf32> to vector<1x16xf32>
    %180 = vector.extract_strided_slice %175 {offsets = [0, 0], sizes = [1, 16], strides = [1, 1]} : vector<1x96xf32> to vector<1x16xf32>
    %181 = vector.extract_strided_slice %173 {offsets = [0, 0], sizes = [1, 16], strides = [1, 1]} : vector<1x96xf32> to vector<1x16xf32>
    %182 = arith.addf %180, %181 : vector<1x16xf32>
    %183 = arith.negf %182 : vector<1x16xf32>
    %184 = math.exp %183 : vector<1x16xf32>
    %cst_86 = arith.constant 1.000000e+00 : f32
    %185 = vector.broadcast %cst_86 : f32 to vector<1x16xf32>
    %186 = arith.addf %185, %184 : vector<1x16xf32>
    %187 = arith.divf %185, %186 : vector<1x16xf32>
    %188 = vector.extract_strided_slice %175 {offsets = [0, 16], sizes = [1, 16], strides = [1, 1]} : vector<1x96xf32> to vector<1x16xf32>
    %189 = vector.extract_strided_slice %173 {offsets = [0, 16], sizes = [1, 16], strides = [1, 1]} : vector<1x96xf32> to vector<1x16xf32>
    %190 = arith.addf %188, %189 : vector<1x16xf32>
    %191 = arith.negf %190 : vector<1x16xf32>
    %192 = math.exp %191 : vector<1x16xf32>
    %cst_87 = arith.constant 1.000000e+00 : f32
    %193 = vector.broadcast %cst_87 : f32 to vector<1x16xf32>
    %194 = arith.addf %193, %192 : vector<1x16xf32>
    %195 = arith.divf %193, %194 : vector<1x16xf32>
    %196 = vector.extract_strided_slice %175 {offsets = [0, 32], sizes = [1, 16], strides = [1, 1]} : vector<1x96xf32> to vector<1x16xf32>
    %197 = vector.extract_strided_slice %173 {offsets = [0, 32], sizes = [1, 16], strides = [1, 1]} : vector<1x96xf32> to vector<1x16xf32>
    %198 = arith.mulf %187, %197 : vector<1x16xf32>
    %199 = arith.addf %196, %198 : vector<1x16xf32>
    %200 = math.tanh %199 : vector<1x16xf32>
    %cst_88 = arith.constant 1.000000e+00 : f32
    %201 = vector.broadcast %cst_88 : f32 to vector<1x16xf32>
    %202 = arith.subf %201, %195 : vector<1x16xf32>
    %203 = arith.mulf %202, %200 : vector<1x16xf32>
    %204 = arith.mulf %195, %178 : vector<1x16xf32>
    %205 = arith.addf %203, %204 : vector<1x16xf32>
    %206 = vector.extract_strided_slice %177 {offsets = [0, 48], sizes = [1, 16], strides = [1, 1]} : vector<1x96xf32> to vector<1x16xf32>
    %207 = vector.extract_strided_slice %173 {offsets = [0, 48], sizes = [1, 16], strides = [1, 1]} : vector<1x96xf32> to vector<1x16xf32>
    %208 = arith.addf %206, %207 : vector<1x16xf32>
    %209 = arith.negf %208 : vector<1x16xf32>
    %210 = math.exp %209 : vector<1x16xf32>
    %cst_89 = arith.constant 1.000000e+00 : f32
    %211 = vector.broadcast %cst_89 : f32 to vector<1x16xf32>
    %212 = arith.addf %211, %210 : vector<1x16xf32>
    %213 = arith.divf %211, %212 : vector<1x16xf32>
    %214 = vector.extract_strided_slice %177 {offsets = [0, 64], sizes = [1, 16], strides = [1, 1]} : vector<1x96xf32> to vector<1x16xf32>
    %215 = vector.extract_strided_slice %173 {offsets = [0, 64], sizes = [1, 16], strides = [1, 1]} : vector<1x96xf32> to vector<1x16xf32>
    %216 = arith.addf %214, %215 : vector<1x16xf32>
    %217 = arith.negf %216 : vector<1x16xf32>
    %218 = math.exp %217 : vector<1x16xf32>
    %cst_90 = arith.constant 1.000000e+00 : f32
    %219 = vector.broadcast %cst_90 : f32 to vector<1x16xf32>
    %220 = arith.addf %219, %218 : vector<1x16xf32>
    %221 = arith.divf %219, %220 : vector<1x16xf32>
    %222 = vector.extract_strided_slice %177 {offsets = [0, 80], sizes = [1, 16], strides = [1, 1]} : vector<1x96xf32> to vector<1x16xf32>
    %223 = vector.extract_strided_slice %173 {offsets = [0, 80], sizes = [1, 16], strides = [1, 1]} : vector<1x96xf32> to vector<1x16xf32>
    %224 = arith.mulf %213, %223 : vector<1x16xf32>
    %225 = arith.addf %222, %224 : vector<1x16xf32>
    %226 = math.tanh %225 : vector<1x16xf32>
    %cst_91 = arith.constant 1.000000e+00 : f32
    %227 = vector.broadcast %cst_91 : f32 to vector<1x16xf32>
    %228 = arith.subf %227, %221 : vector<1x16xf32>
    %229 = arith.mulf %228, %226 : vector<1x16xf32>
    %230 = arith.mulf %221, %179 : vector<1x16xf32>
    %231 = arith.addf %229, %230 : vector<1x16xf32>
    %232 = arith.index_cast %c1_i32 : i32 to index
    %c0_92 = arith.constant 0 : index
    %233 = vector.load %arg35[%232, %c0_92] : memref<16x16xf32, #tpu.memory_space<vmem>>, vector<1x16xf32>
    tpu.vector_store %arg35[%232, %c0_92], %205 {strides = array<i32>} : memref<16x16xf32, #tpu.memory_space<vmem>>, vector<1x16xf32>,
    %234 = arith.index_cast %171 : i32 to index
    %c0_93 = arith.constant 0 : index
    %235 = vector.load %arg36[%234, %c0_93] : memref<16x16xf32, #tpu.memory_space<vmem>>, vector<1x16xf32>
    tpu.vector_store %arg36[%234, %c0_93], %231 {strides = array<i32>} : memref<16x16xf32, #tpu.memory_space<vmem>>, vector<1x16xf32>,
    %236 = tpu.concatenate %205, %231 in 1 : vector<1x16xf32>, vector<1x16xf32> -> vector<1x32xf32>
    %c2_i32 = arith.constant 2 : i32
    %c15_i32_94 = arith.constant 15 : i32
    %237 = arith.subi %c15_i32_94, %c2_i32 : i32
    %cst_95 = arith.constant dense<0.000000e+00> : vector<1x96xf32>
    %238 = tpu.matmul %236, %102, %cst_95 {dimension_numbers = #tpu.dot_dimension_numbers<[1], [0], [0], [1], [0, 0, 1, 1], [], []>} : vector<1x32xf32>, vector<32x96xf32>, vector<1x96xf32> -> vector<1x96xf32>
    %239 = arith.addf %238, %103 : vector<1x96xf32>
    %240 = arith.index_cast %c2_i32 : i32 to index
    %c0_96 = arith.constant 0 : index
    %241 = vector.load %arg34[%240, %c0_96] : memref<16x96xf32, #tpu.memory_space<vmem>>, vector<1x96xf32>
    %242 = arith.index_cast %237 : i32 to index
    %c0_97 = arith.constant 0 : index
    %243 = vector.load %arg34[%242, %c0_97] : memref<16x96xf32, #tpu.memory_space<vmem>>, vector<1x96xf32>
    %244 = vector.extract_strided_slice %236 {offsets = [0, 0], sizes = [1, 16], strides = [1, 1]} : vector<1x32xf32> to vector<1x16xf32>
    %245 = vector.extract_strided_slice %236 {offsets = [0, 16], sizes = [1, 16], strides = [1, 1]} : vector<1x32xf32> to vector<1x16xf32>
    %246 = vector.extract_strided_slice %241 {offsets = [0, 0], sizes = [1, 16], strides = [1, 1]} : vector<1x96xf32> to vector<1x16xf32>
    %247 = vector.extract_strided_slice %239 {offsets = [0, 0], sizes = [1, 16], strides = [1, 1]} : vector<1x96xf32> to vector<1x16xf32>
    %248 = arith.addf %246, %247 : vector<1x16xf32>
    %249 = arith.negf %248 : vector<1x16xf32>
    %250 = math.exp %249 : vector<1x16xf32>
    %cst_98 = arith.constant 1.000000e+00 : f32
    %251 = vector.broadcast %cst_98 : f32 to vector<1x16xf32>
    %252 = arith.addf %251, %250 : vector<1x16xf32>
    %253 = arith.divf %251, %252 : vector<1x16xf32>
    %254 = vector.extract_strided_slice %241 {offsets = [0, 16], sizes = [1, 16], strides = [1, 1]} : vector<1x96xf32> to vector<1x16xf32>
    %255 = vector.extract_strided_slice %239 {offsets = [0, 16], sizes = [1, 16], strides = [1, 1]} : vector<1x96xf32> to vector<1x16xf32>
    %256 = arith.addf %254, %255 : vector<1x16xf32>
    %257 = arith.negf %256 : vector<1x16xf32>
    %258 = math.exp %257 : vector<1x16xf32>
    %cst_99 = arith.constant 1.000000e+00 : f32
    %259 = vector.broadcast %cst_99 : f32 to vector<1x16xf32>
    %260 = arith.addf %259, %258 : vector<1x16xf32>
    %261 = arith.divf %259, %260 : vector<1x16xf32>
    %262 = vector.extract_strided_slice %241 {offsets = [0, 32], sizes = [1, 16], strides = [1, 1]} : vector<1x96xf32> to vector<1x16xf32>
    %263 = vector.extract_strided_slice %239 {offsets = [0, 32], sizes = [1, 16], strides = [1, 1]} : vector<1x96xf32> to vector<1x16xf32>
    %264 = arith.mulf %253, %263 : vector<1x16xf32>
    %265 = arith.addf %262, %264 : vector<1x16xf32>
    %266 = math.tanh %265 : vector<1x16xf32>
    %cst_100 = arith.constant 1.000000e+00 : f32
    %267 = vector.broadcast %cst_100 : f32 to vector<1x16xf32>
    %268 = arith.subf %267, %261 : vector<1x16xf32>
    %269 = arith.mulf %268, %266 : vector<1x16xf32>
    %270 = arith.mulf %261, %244 : vector<1x16xf32>
    %271 = arith.addf %269, %270 : vector<1x16xf32>
    %272 = vector.extract_strided_slice %243 {offsets = [0, 48], sizes = [1, 16], strides = [1, 1]} : vector<1x96xf32> to vector<1x16xf32>
    %273 = vector.extract_strided_slice %239 {offsets = [0, 48], sizes = [1, 16], strides = [1, 1]} : vector<1x96xf32> to vector<1x16xf32>
    %274 = arith.addf %272, %273 : vector<1x16xf32>
    %275 = arith.negf %274 : vector<1x16xf32>
    %276 = math.exp %275 : vector<1x16xf32>
    %cst_101 = arith.constant 1.000000e+00 : f32
    %277 = vector.broadcast %cst_101 : f32 to vector<1x16xf32>
    %278 = arith.addf %277, %276 : vector<1x16xf32>
    %279 = arith.divf %277, %278 : vector<1x16xf32>
    %280 = vector.extract_strided_slice %243 {offsets = [0, 64], sizes = [1, 16], strides = [1, 1]} : vector<1x96xf32> to vector<1x16xf32>
    %281 = vector.extract_strided_slice %239 {offsets = [0, 64], sizes = [1, 16], strides = [1, 1]} : vector<1x96xf32> to vector<1x16xf32>
    %282 = arith.addf %280, %281 : vector<1x16xf32>
    %283 = arith.negf %282 : vector<1x16xf32>
    %284 = math.exp %283 : vector<1x16xf32>
    %cst_102 = arith.constant 1.000000e+00 : f32
    %285 = vector.broadcast %cst_102 : f32 to vector<1x16xf32>
    %286 = arith.addf %285, %284 : vector<1x16xf32>
    %287 = arith.divf %285, %286 : vector<1x16xf32>
    %288 = vector.extract_strided_slice %243 {offsets = [0, 80], sizes = [1, 16], strides = [1, 1]} : vector<1x96xf32> to vector<1x16xf32>
    %289 = vector.extract_strided_slice %239 {offsets = [0, 80], sizes = [1, 16], strides = [1, 1]} : vector<1x96xf32> to vector<1x16xf32>
    %290 = arith.mulf %279, %289 : vector<1x16xf32>
    %291 = arith.addf %288, %290 : vector<1x16xf32>
    %292 = math.tanh %291 : vector<1x16xf32>
    %cst_103 = arith.constant 1.000000e+00 : f32
    %293 = vector.broadcast %cst_103 : f32 to vector<1x16xf32>
    %294 = arith.subf %293, %287 : vector<1x16xf32>
    %295 = arith.mulf %294, %292 : vector<1x16xf32>
    %296 = arith.mulf %287, %245 : vector<1x16xf32>
    %297 = arith.addf %295, %296 : vector<1x16xf32>
    %298 = arith.index_cast %c2_i32 : i32 to index
    %c0_104 = arith.constant 0 : index
    %299 = vector.load %arg35[%298, %c0_104] : memref<16x16xf32, #tpu.memory_space<vmem>>, vector<1x16xf32>
    tpu.vector_store %arg35[%298, %c0_104], %271 {strides = array<i32>} : memref<16x16xf32, #tpu.memory_space<vmem>>, vector<1x16xf32>,
    %300 = arith.index_cast %237 : i32 to index
    %c0_105 = arith.constant 0 : index
    %301 = vector.load %arg36[%300, %c0_105] : memref<16x16xf32, #tpu.memory_space<vmem>>, vector<1x16xf32>
    tpu.vector_store %arg36[%300, %c0_105], %297 {strides = array<i32>} : memref<16x16xf32, #tpu.memory_space<vmem>>, vector<1x16xf32>,
    %302 = tpu.concatenate %271, %297 in 1 : vector<1x16xf32>, vector<1x16xf32> -> vector<1x32xf32>
    %c3_i32 = arith.constant 3 : i32
    %c15_i32_106 = arith.constant 15 : i32
    %303 = arith.subi %c15_i32_106, %c3_i32 : i32
    %cst_107 = arith.constant dense<0.000000e+00> : vector<1x96xf32>
    %304 = tpu.matmul %302, %102, %cst_107 {dimension_numbers = #tpu.dot_dimension_numbers<[1], [0], [0], [1], [0, 0, 1, 1], [], []>} : vector<1x32xf32>, vector<32x96xf32>, vector<1x96xf32> -> vector<1x96xf32>
    %305 = arith.addf %304, %103 : vector<1x96xf32>
    %306 = arith.index_cast %c3_i32 : i32 to index
    %c0_108 = arith.constant 0 : index
    %307 = vector.load %arg34[%306, %c0_108] : memref<16x96xf32, #tpu.memory_space<vmem>>, vector<1x96xf32>
    %308 = arith.index_cast %303 : i32 to index
    %c0_109 = arith.constant 0 : index
    %309 = vector.load %arg34[%308, %c0_109] : memref<16x96xf32, #tpu.memory_space<vmem>>, vector<1x96xf32>
    %310 = vector.extract_strided_slice %302 {offsets = [0, 0], sizes = [1, 16], strides = [1, 1]} : vector<1x32xf32> to vector<1x16xf32>
    %311 = vector.extract_strided_slice %302 {offsets = [0, 16], sizes = [1, 16], strides = [1, 1]} : vector<1x32xf32> to vector<1x16xf32>
    %312 = vector.extract_strided_slice %307 {offsets = [0, 0], sizes = [1, 16], strides = [1, 1]} : vector<1x96xf32> to vector<1x16xf32>
    %313 = vector.extract_strided_slice %305 {offsets = [0, 0], sizes = [1, 16], strides = [1, 1]} : vector<1x96xf32> to vector<1x16xf32>
    %314 = arith.addf %312, %313 : vector<1x16xf32>
    %315 = arith.negf %314 : vector<1x16xf32>
    %316 = math.exp %315 : vector<1x16xf32>
    %cst_110 = arith.constant 1.000000e+00 : f32
    %317 = vector.broadcast %cst_110 : f32 to vector<1x16xf32>
    %318 = arith.addf %317, %316 : vector<1x16xf32>
    %319 = arith.divf %317, %318 : vector<1x16xf32>
    %320 = vector.extract_strided_slice %307 {offsets = [0, 16], sizes = [1, 16], strides = [1, 1]} : vector<1x96xf32> to vector<1x16xf32>
    %321 = vector.extract_strided_slice %305 {offsets = [0, 16], sizes = [1, 16], strides = [1, 1]} : vector<1x96xf32> to vector<1x16xf32>
    %322 = arith.addf %320, %321 : vector<1x16xf32>
    %323 = arith.negf %322 : vector<1x16xf32>
    %324 = math.exp %323 : vector<1x16xf32>
    %cst_111 = arith.constant 1.000000e+00 : f32
    %325 = vector.broadcast %cst_111 : f32 to vector<1x16xf32>
    %326 = arith.addf %325, %324 : vector<1x16xf32>
    %327 = arith.divf %325, %326 : vector<1x16xf32>
    %328 = vector.extract_strided_slice %307 {offsets = [0, 32], sizes = [1, 16], strides = [1, 1]} : vector<1x96xf32> to vector<1x16xf32>
    %329 = vector.extract_strided_slice %305 {offsets = [0, 32], sizes = [1, 16], strides = [1, 1]} : vector<1x96xf32> to vector<1x16xf32>
    %330 = arith.mulf %319, %329 : vector<1x16xf32>
    %331 = arith.addf %328, %330 : vector<1x16xf32>
    %332 = math.tanh %331 : vector<1x16xf32>
    %cst_112 = arith.constant 1.000000e+00 : f32
    %333 = vector.broadcast %cst_112 : f32 to vector<1x16xf32>
    %334 = arith.subf %333, %327 : vector<1x16xf32>
    %335 = arith.mulf %334, %332 : vector<1x16xf32>
    %336 = arith.mulf %327, %310 : vector<1x16xf32>
    %337 = arith.addf %335, %336 : vector<1x16xf32>
    %338 = vector.extract_strided_slice %309 {offsets = [0, 48], sizes = [1, 16], strides = [1, 1]} : vector<1x96xf32> to vector<1x16xf32>
    %339 = vector.extract_strided_slice %305 {offsets = [0, 48], sizes = [1, 16], strides = [1, 1]} : vector<1x96xf32> to vector<1x16xf32>
    %340 = arith.addf %338, %339 : vector<1x16xf32>
    %341 = arith.negf %340 : vector<1x16xf32>
    %342 = math.exp %341 : vector<1x16xf32>
    %cst_113 = arith.constant 1.000000e+00 : f32
    %343 = vector.broadcast %cst_113 : f32 to vector<1x16xf32>
    %344 = arith.addf %343, %342 : vector<1x16xf32>
    %345 = arith.divf %343, %344 : vector<1x16xf32>
    %346 = vector.extract_strided_slice %309 {offsets = [0, 64], sizes = [1, 16], strides = [1, 1]} : vector<1x96xf32> to vector<1x16xf32>
    %347 = vector.extract_strided_slice %305 {offsets = [0, 64], sizes = [1, 16], strides = [1, 1]} : vector<1x96xf32> to vector<1x16xf32>
    %348 = arith.addf %346, %347 : vector<1x16xf32>
    %349 = arith.negf %348 : vector<1x16xf32>
    %350 = math.exp %349 : vector<1x16xf32>
    %cst_114 = arith.constant 1.000000e+00 : f32
    %351 = vector.broadcast %cst_114 : f32 to vector<1x16xf32>
    %352 = arith.addf %351, %350 : vector<1x16xf32>
    %353 = arith.divf %351, %352 : vector<1x16xf32>
    %354 = vector.extract_strided_slice %309 {offsets = [0, 80], sizes = [1, 16], strides = [1, 1]} : vector<1x96xf32> to vector<1x16xf32>
    %355 = vector.extract_strided_slice %305 {offsets = [0, 80], sizes = [1, 16], strides = [1, 1]} : vector<1x96xf32> to vector<1x16xf32>
    %356 = arith.mulf %345, %355 : vector<1x16xf32>
    %357 = arith.addf %354, %356 : vector<1x16xf32>
    %358 = math.tanh %357 : vector<1x16xf32>
    %cst_115 = arith.constant 1.000000e+00 : f32
    %359 = vector.broadcast %cst_115 : f32 to vector<1x16xf32>
    %360 = arith.subf %359, %353 : vector<1x16xf32>
    %361 = arith.mulf %360, %358 : vector<1x16xf32>
    %362 = arith.mulf %353, %311 : vector<1x16xf32>
    %363 = arith.addf %361, %362 : vector<1x16xf32>
    %364 = arith.index_cast %c3_i32 : i32 to index
    %c0_116 = arith.constant 0 : index
    %365 = vector.load %arg35[%364, %c0_116] : memref<16x16xf32, #tpu.memory_space<vmem>>, vector<1x16xf32>
    tpu.vector_store %arg35[%364, %c0_116], %337 {strides = array<i32>} : memref<16x16xf32, #tpu.memory_space<vmem>>, vector<1x16xf32>,
    %366 = arith.index_cast %303 : i32 to index
    %c0_117 = arith.constant 0 : index
    %367 = vector.load %arg36[%366, %c0_117] : memref<16x16xf32, #tpu.memory_space<vmem>>, vector<1x16xf32>
    tpu.vector_store %arg36[%366, %c0_117], %363 {strides = array<i32>} : memref<16x16xf32, #tpu.memory_space<vmem>>, vector<1x16xf32>,
    %368 = tpu.concatenate %337, %363 in 1 : vector<1x16xf32>, vector<1x16xf32> -> vector<1x32xf32>
    %c4_i32 = arith.constant 4 : i32
    %c15_i32_118 = arith.constant 15 : i32
    %369 = arith.subi %c15_i32_118, %c4_i32 : i32
    %cst_119 = arith.constant dense<0.000000e+00> : vector<1x96xf32>
    %370 = tpu.matmul %368, %102, %cst_119 {dimension_numbers = #tpu.dot_dimension_numbers<[1], [0], [0], [1], [0, 0, 1, 1], [], []>} : vector<1x32xf32>, vector<32x96xf32>, vector<1x96xf32> -> vector<1x96xf32>
    %371 = arith.addf %370, %103 : vector<1x96xf32>
    %372 = arith.index_cast %c4_i32 : i32 to index
    %c0_120 = arith.constant 0 : index
    %373 = vector.load %arg34[%372, %c0_120] : memref<16x96xf32, #tpu.memory_space<vmem>>, vector<1x96xf32>
    %374 = arith.index_cast %369 : i32 to index
    %c0_121 = arith.constant 0 : index
    %375 = vector.load %arg34[%374, %c0_121] : memref<16x96xf32, #tpu.memory_space<vmem>>, vector<1x96xf32>
    %376 = vector.extract_strided_slice %368 {offsets = [0, 0], sizes = [1, 16], strides = [1, 1]} : vector<1x32xf32> to vector<1x16xf32>
    %377 = vector.extract_strided_slice %368 {offsets = [0, 16], sizes = [1, 16], strides = [1, 1]} : vector<1x32xf32> to vector<1x16xf32>
    %378 = vector.extract_strided_slice %373 {offsets = [0, 0], sizes = [1, 16], strides = [1, 1]} : vector<1x96xf32> to vector<1x16xf32>
    %379 = vector.extract_strided_slice %371 {offsets = [0, 0], sizes = [1, 16], strides = [1, 1]} : vector<1x96xf32> to vector<1x16xf32>
    %380 = arith.addf %378, %379 : vector<1x16xf32>
    %381 = arith.negf %380 : vector<1x16xf32>
    %382 = math.exp %381 : vector<1x16xf32>
    %cst_122 = arith.constant 1.000000e+00 : f32
    %383 = vector.broadcast %cst_122 : f32 to vector<1x16xf32>
    %384 = arith.addf %383, %382 : vector<1x16xf32>
    %385 = arith.divf %383, %384 : vector<1x16xf32>
    %386 = vector.extract_strided_slice %373 {offsets = [0, 16], sizes = [1, 16], strides = [1, 1]} : vector<1x96xf32> to vector<1x16xf32>
    %387 = vector.extract_strided_slice %371 {offsets = [0, 16], sizes = [1, 16], strides = [1, 1]} : vector<1x96xf32> to vector<1x16xf32>
    %388 = arith.addf %386, %387 : vector<1x16xf32>
    %389 = arith.negf %388 : vector<1x16xf32>
    %390 = math.exp %389 : vector<1x16xf32>
    %cst_123 = arith.constant 1.000000e+00 : f32
    %391 = vector.broadcast %cst_123 : f32 to vector<1x16xf32>
    %392 = arith.addf %391, %390 : vector<1x16xf32>
    %393 = arith.divf %391, %392 : vector<1x16xf32>
    %394 = vector.extract_strided_slice %373 {offsets = [0, 32], sizes = [1, 16], strides = [1, 1]} : vector<1x96xf32> to vector<1x16xf32>
    %395 = vector.extract_strided_slice %371 {offsets = [0, 32], sizes = [1, 16], strides = [1, 1]} : vector<1x96xf32> to vector<1x16xf32>
    %396 = arith.mulf %385, %395 : vector<1x16xf32>
    %397 = arith.addf %394, %396 : vector<1x16xf32>
    %398 = math.tanh %397 : vector<1x16xf32>
    %cst_124 = arith.constant 1.000000e+00 : f32
    %399 = vector.broadcast %cst_124 : f32 to vector<1x16xf32>
    %400 = arith.subf %399, %393 : vector<1x16xf32>
    %401 = arith.mulf %400, %398 : vector<1x16xf32>
    %402 = arith.mulf %393, %376 : vector<1x16xf32>
    %403 = arith.addf %401, %402 : vector<1x16xf32>
    %404 = vector.extract_strided_slice %375 {offsets = [0, 48], sizes = [1, 16], strides = [1, 1]} : vector<1x96xf32> to vector<1x16xf32>
    %405 = vector.extract_strided_slice %371 {offsets = [0, 48], sizes = [1, 16], strides = [1, 1]} : vector<1x96xf32> to vector<1x16xf32>
    %406 = arith.addf %404, %405 : vector<1x16xf32>
    %407 = arith.negf %406 : vector<1x16xf32>
    %408 = math.exp %407 : vector<1x16xf32>
    %cst_125 = arith.constant 1.000000e+00 : f32
    %409 = vector.broadcast %cst_125 : f32 to vector<1x16xf32>
    %410 = arith.addf %409, %408 : vector<1x16xf32>
    %411 = arith.divf %409, %410 : vector<1x16xf32>
    %412 = vector.extract_strided_slice %375 {offsets = [0, 64], sizes = [1, 16], strides = [1, 1]} : vector<1x96xf32> to vector<1x16xf32>
    %413 = vector.extract_strided_slice %371 {offsets = [0, 64], sizes = [1, 16], strides = [1, 1]} : vector<1x96xf32> to vector<1x16xf32>
    %414 = arith.addf %412, %413 : vector<1x16xf32>
    %415 = arith.negf %414 : vector<1x16xf32>
    %416 = math.exp %415 : vector<1x16xf32>
    %cst_126 = arith.constant 1.000000e+00 : f32
    %417 = vector.broadcast %cst_126 : f32 to vector<1x16xf32>
    %418 = arith.addf %417, %416 : vector<1x16xf32>
    %419 = arith.divf %417, %418 : vector<1x16xf32>
    %420 = vector.extract_strided_slice %375 {offsets = [0, 80], sizes = [1, 16], strides = [1, 1]} : vector<1x96xf32> to vector<1x16xf32>
    %421 = vector.extract_strided_slice %371 {offsets = [0, 80], sizes = [1, 16], strides = [1, 1]} : vector<1x96xf32> to vector<1x16xf32>
    %422 = arith.mulf %411, %421 : vector<1x16xf32>
    %423 = arith.addf %420, %422 : vector<1x16xf32>
    %424 = math.tanh %423 : vector<1x16xf32>
    %cst_127 = arith.constant 1.000000e+00 : f32
    %425 = vector.broadcast %cst_127 : f32 to vector<1x16xf32>
    %426 = arith.subf %425, %419 : vector<1x16xf32>
    %427 = arith.mulf %426, %424 : vector<1x16xf32>
    %428 = arith.mulf %419, %377 : vector<1x16xf32>
    %429 = arith.addf %427, %428 : vector<1x16xf32>
    %430 = arith.index_cast %c4_i32 : i32 to index
    %c0_128 = arith.constant 0 : index
    %431 = vector.load %arg35[%430, %c0_128] : memref<16x16xf32, #tpu.memory_space<vmem>>, vector<1x16xf32>
    tpu.vector_store %arg35[%430, %c0_128], %403 {strides = array<i32>} : memref<16x16xf32, #tpu.memory_space<vmem>>, vector<1x16xf32>,
    %432 = arith.index_cast %369 : i32 to index
    %c0_129 = arith.constant 0 : index
    %433 = vector.load %arg36[%432, %c0_129] : memref<16x16xf32, #tpu.memory_space<vmem>>, vector<1x16xf32>
    tpu.vector_store %arg36[%432, %c0_129], %429 {strides = array<i32>} : memref<16x16xf32, #tpu.memory_space<vmem>>, vector<1x16xf32>,
    %434 = tpu.concatenate %403, %429 in 1 : vector<1x16xf32>, vector<1x16xf32> -> vector<1x32xf32>
    %c5_i32 = arith.constant 5 : i32
    %c15_i32_130 = arith.constant 15 : i32
    %435 = arith.subi %c15_i32_130, %c5_i32 : i32
    %cst_131 = arith.constant dense<0.000000e+00> : vector<1x96xf32>
    %436 = tpu.matmul %434, %102, %cst_131 {dimension_numbers = #tpu.dot_dimension_numbers<[1], [0], [0], [1], [0, 0, 1, 1], [], []>} : vector<1x32xf32>, vector<32x96xf32>, vector<1x96xf32> -> vector<1x96xf32>
    %437 = arith.addf %436, %103 : vector<1x96xf32>
    %438 = arith.index_cast %c5_i32 : i32 to index
    %c0_132 = arith.constant 0 : index
    %439 = vector.load %arg34[%438, %c0_132] : memref<16x96xf32, #tpu.memory_space<vmem>>, vector<1x96xf32>
    %440 = arith.index_cast %435 : i32 to index
    %c0_133 = arith.constant 0 : index
    %441 = vector.load %arg34[%440, %c0_133] : memref<16x96xf32, #tpu.memory_space<vmem>>, vector<1x96xf32>
    %442 = vector.extract_strided_slice %434 {offsets = [0, 0], sizes = [1, 16], strides = [1, 1]} : vector<1x32xf32> to vector<1x16xf32>
    %443 = vector.extract_strided_slice %434 {offsets = [0, 16], sizes = [1, 16], strides = [1, 1]} : vector<1x32xf32> to vector<1x16xf32>
    %444 = vector.extract_strided_slice %439 {offsets = [0, 0], sizes = [1, 16], strides = [1, 1]} : vector<1x96xf32> to vector<1x16xf32>
    %445 = vector.extract_strided_slice %437 {offsets = [0, 0], sizes = [1, 16], strides = [1, 1]} : vector<1x96xf32> to vector<1x16xf32>
    %446 = arith.addf %444, %445 : vector<1x16xf32>
    %447 = arith.negf %446 : vector<1x16xf32>
    %448 = math.exp %447 : vector<1x16xf32>
    %cst_134 = arith.constant 1.000000e+00 : f32
    %449 = vector.broadcast %cst_134 : f32 to vector<1x16xf32>
    %450 = arith.addf %449, %448 : vector<1x16xf32>
    %451 = arith.divf %449, %450 : vector<1x16xf32>
    %452 = vector.extract_strided_slice %439 {offsets = [0, 16], sizes = [1, 16], strides = [1, 1]} : vector<1x96xf32> to vector<1x16xf32>
    %453 = vector.extract_strided_slice %437 {offsets = [0, 16], sizes = [1, 16], strides = [1, 1]} : vector<1x96xf32> to vector<1x16xf32>
    %454 = arith.addf %452, %453 : vector<1x16xf32>
    %455 = arith.negf %454 : vector<1x16xf32>
    %456 = math.exp %455 : vector<1x16xf32>
    %cst_135 = arith.constant 1.000000e+00 : f32
    %457 = vector.broadcast %cst_135 : f32 to vector<1x16xf32>
    %458 = arith.addf %457, %456 : vector<1x16xf32>
    %459 = arith.divf %457, %458 : vector<1x16xf32>
    %460 = vector.extract_strided_slice %439 {offsets = [0, 32], sizes = [1, 16], strides = [1, 1]} : vector<1x96xf32> to vector<1x16xf32>
    %461 = vector.extract_strided_slice %437 {offsets = [0, 32], sizes = [1, 16], strides = [1, 1]} : vector<1x96xf32> to vector<1x16xf32>
    %462 = arith.mulf %451, %461 : vector<1x16xf32>
    %463 = arith.addf %460, %462 : vector<1x16xf32>
    %464 = math.tanh %463 : vector<1x16xf32>
    %cst_136 = arith.constant 1.000000e+00 : f32
    %465 = vector.broadcast %cst_136 : f32 to vector<1x16xf32>
    %466 = arith.subf %465, %459 : vector<1x16xf32>
    %467 = arith.mulf %466, %464 : vector<1x16xf32>
    %468 = arith.mulf %459, %442 : vector<1x16xf32>
    %469 = arith.addf %467, %468 : vector<1x16xf32>
    %470 = vector.extract_strided_slice %441 {offsets = [0, 48], sizes = [1, 16], strides = [1, 1]} : vector<1x96xf32> to vector<1x16xf32>
    %471 = vector.extract_strided_slice %437 {offsets = [0, 48], sizes = [1, 16], strides = [1, 1]} : vector<1x96xf32> to vector<1x16xf32>
    %472 = arith.addf %470, %471 : vector<1x16xf32>
    %473 = arith.negf %472 : vector<1x16xf32>
    %474 = math.exp %473 : vector<1x16xf32>
    %cst_137 = arith.constant 1.000000e+00 : f32
    %475 = vector.broadcast %cst_137 : f32 to vector<1x16xf32>
    %476 = arith.addf %475, %474 : vector<1x16xf32>
    %477 = arith.divf %475, %476 : vector<1x16xf32>
    %478 = vector.extract_strided_slice %441 {offsets = [0, 64], sizes = [1, 16], strides = [1, 1]} : vector<1x96xf32> to vector<1x16xf32>
    %479 = vector.extract_strided_slice %437 {offsets = [0, 64], sizes = [1, 16], strides = [1, 1]} : vector<1x96xf32> to vector<1x16xf32>
    %480 = arith.addf %478, %479 : vector<1x16xf32>
    %481 = arith.negf %480 : vector<1x16xf32>
    %482 = math.exp %481 : vector<1x16xf32>
    %cst_138 = arith.constant 1.000000e+00 : f32
    %483 = vector.broadcast %cst_138 : f32 to vector<1x16xf32>
    %484 = arith.addf %483, %482 : vector<1x16xf32>
    %485 = arith.divf %483, %484 : vector<1x16xf32>
    %486 = vector.extract_strided_slice %441 {offsets = [0, 80], sizes = [1, 16], strides = [1, 1]} : vector<1x96xf32> to vector<1x16xf32>
    %487 = vector.extract_strided_slice %437 {offsets = [0, 80], sizes = [1, 16], strides = [1, 1]} : vector<1x96xf32> to vector<1x16xf32>
    %488 = arith.mulf %477, %487 : vector<1x16xf32>
    %489 = arith.addf %486, %488 : vector<1x16xf32>
    %490 = math.tanh %489 : vector<1x16xf32>
    %cst_139 = arith.constant 1.000000e+00 : f32
    %491 = vector.broadcast %cst_139 : f32 to vector<1x16xf32>
    %492 = arith.subf %491, %485 : vector<1x16xf32>
    %493 = arith.mulf %492, %490 : vector<1x16xf32>
    %494 = arith.mulf %485, %443 : vector<1x16xf32>
    %495 = arith.addf %493, %494 : vector<1x16xf32>
    %496 = arith.index_cast %c5_i32 : i32 to index
    %c0_140 = arith.constant 0 : index
    %497 = vector.load %arg35[%496, %c0_140] : memref<16x16xf32, #tpu.memory_space<vmem>>, vector<1x16xf32>
    tpu.vector_store %arg35[%496, %c0_140], %469 {strides = array<i32>} : memref<16x16xf32, #tpu.memory_space<vmem>>, vector<1x16xf32>,
    %498 = arith.index_cast %435 : i32 to index
    %c0_141 = arith.constant 0 : index
    %499 = vector.load %arg36[%498, %c0_141] : memref<16x16xf32, #tpu.memory_space<vmem>>, vector<1x16xf32>
    tpu.vector_store %arg36[%498, %c0_141], %495 {strides = array<i32>} : memref<16x16xf32, #tpu.memory_space<vmem>>, vector<1x16xf32>,
    %500 = tpu.concatenate %469, %495 in 1 : vector<1x16xf32>, vector<1x16xf32> -> vector<1x32xf32>
    %c6_i32 = arith.constant 6 : i32
    %c15_i32_142 = arith.constant 15 : i32
    %501 = arith.subi %c15_i32_142, %c6_i32 : i32
    %cst_143 = arith.constant dense<0.000000e+00> : vector<1x96xf32>
    %502 = tpu.matmul %500, %102, %cst_143 {dimension_numbers = #tpu.dot_dimension_numbers<[1], [0], [0], [1], [0, 0, 1, 1], [], []>} : vector<1x32xf32>, vector<32x96xf32>, vector<1x96xf32> -> vector<1x96xf32>
    %503 = arith.addf %502, %103 : vector<1x96xf32>
    %504 = arith.index_cast %c6_i32 : i32 to index
    %c0_144 = arith.constant 0 : index
    %505 = vector.load %arg34[%504, %c0_144] : memref<16x96xf32, #tpu.memory_space<vmem>>, vector<1x96xf32>
    %506 = arith.index_cast %501 : i32 to index
    %c0_145 = arith.constant 0 : index
    %507 = vector.load %arg34[%506, %c0_145] : memref<16x96xf32, #tpu.memory_space<vmem>>, vector<1x96xf32>
    %508 = vector.extract_strided_slice %500 {offsets = [0, 0], sizes = [1, 16], strides = [1, 1]} : vector<1x32xf32> to vector<1x16xf32>
    %509 = vector.extract_strided_slice %500 {offsets = [0, 16], sizes = [1, 16], strides = [1, 1]} : vector<1x32xf32> to vector<1x16xf32>
    %510 = vector.extract_strided_slice %505 {offsets = [0, 0], sizes = [1, 16], strides = [1, 1]} : vector<1x96xf32> to vector<1x16xf32>
    %511 = vector.extract_strided_slice %503 {offsets = [0, 0], sizes = [1, 16], strides = [1, 1]} : vector<1x96xf32> to vector<1x16xf32>
    %512 = arith.addf %510, %511 : vector<1x16xf32>
    %513 = arith.negf %512 : vector<1x16xf32>
    %514 = math.exp %513 : vector<1x16xf32>
    %cst_146 = arith.constant 1.000000e+00 : f32
    %515 = vector.broadcast %cst_146 : f32 to vector<1x16xf32>
    %516 = arith.addf %515, %514 : vector<1x16xf32>
    %517 = arith.divf %515, %516 : vector<1x16xf32>
    %518 = vector.extract_strided_slice %505 {offsets = [0, 16], sizes = [1, 16], strides = [1, 1]} : vector<1x96xf32> to vector<1x16xf32>
    %519 = vector.extract_strided_slice %503 {offsets = [0, 16], sizes = [1, 16], strides = [1, 1]} : vector<1x96xf32> to vector<1x16xf32>
    %520 = arith.addf %518, %519 : vector<1x16xf32>
    %521 = arith.negf %520 : vector<1x16xf32>
    %522 = math.exp %521 : vector<1x16xf32>
    %cst_147 = arith.constant 1.000000e+00 : f32
    %523 = vector.broadcast %cst_147 : f32 to vector<1x16xf32>
    %524 = arith.addf %523, %522 : vector<1x16xf32>
    %525 = arith.divf %523, %524 : vector<1x16xf32>
    %526 = vector.extract_strided_slice %505 {offsets = [0, 32], sizes = [1, 16], strides = [1, 1]} : vector<1x96xf32> to vector<1x16xf32>
    %527 = vector.extract_strided_slice %503 {offsets = [0, 32], sizes = [1, 16], strides = [1, 1]} : vector<1x96xf32> to vector<1x16xf32>
    %528 = arith.mulf %517, %527 : vector<1x16xf32>
    %529 = arith.addf %526, %528 : vector<1x16xf32>
    %530 = math.tanh %529 : vector<1x16xf32>
    %cst_148 = arith.constant 1.000000e+00 : f32
    %531 = vector.broadcast %cst_148 : f32 to vector<1x16xf32>
    %532 = arith.subf %531, %525 : vector<1x16xf32>
    %533 = arith.mulf %532, %530 : vector<1x16xf32>
    %534 = arith.mulf %525, %508 : vector<1x16xf32>
    %535 = arith.addf %533, %534 : vector<1x16xf32>
    %536 = vector.extract_strided_slice %507 {offsets = [0, 48], sizes = [1, 16], strides = [1, 1]} : vector<1x96xf32> to vector<1x16xf32>
    %537 = vector.extract_strided_slice %503 {offsets = [0, 48], sizes = [1, 16], strides = [1, 1]} : vector<1x96xf32> to vector<1x16xf32>
    %538 = arith.addf %536, %537 : vector<1x16xf32>
    %539 = arith.negf %538 : vector<1x16xf32>
    %540 = math.exp %539 : vector<1x16xf32>
    %cst_149 = arith.constant 1.000000e+00 : f32
    %541 = vector.broadcast %cst_149 : f32 to vector<1x16xf32>
    %542 = arith.addf %541, %540 : vector<1x16xf32>
    %543 = arith.divf %541, %542 : vector<1x16xf32>
    %544 = vector.extract_strided_slice %507 {offsets = [0, 64], sizes = [1, 16], strides = [1, 1]} : vector<1x96xf32> to vector<1x16xf32>
    %545 = vector.extract_strided_slice %503 {offsets = [0, 64], sizes = [1, 16], strides = [1, 1]} : vector<1x96xf32> to vector<1x16xf32>
    %546 = arith.addf %544, %545 : vector<1x16xf32>
    %547 = arith.negf %546 : vector<1x16xf32>
    %548 = math.exp %547 : vector<1x16xf32>
    %cst_150 = arith.constant 1.000000e+00 : f32
    %549 = vector.broadcast %cst_150 : f32 to vector<1x16xf32>
    %550 = arith.addf %549, %548 : vector<1x16xf32>
    %551 = arith.divf %549, %550 : vector<1x16xf32>
    %552 = vector.extract_strided_slice %507 {offsets = [0, 80], sizes = [1, 16], strides = [1, 1]} : vector<1x96xf32> to vector<1x16xf32>
    %553 = vector.extract_strided_slice %503 {offsets = [0, 80], sizes = [1, 16], strides = [1, 1]} : vector<1x96xf32> to vector<1x16xf32>
    %554 = arith.mulf %543, %553 : vector<1x16xf32>
    %555 = arith.addf %552, %554 : vector<1x16xf32>
    %556 = math.tanh %555 : vector<1x16xf32>
    %cst_151 = arith.constant 1.000000e+00 : f32
    %557 = vector.broadcast %cst_151 : f32 to vector<1x16xf32>
    %558 = arith.subf %557, %551 : vector<1x16xf32>
    %559 = arith.mulf %558, %556 : vector<1x16xf32>
    %560 = arith.mulf %551, %509 : vector<1x16xf32>
    %561 = arith.addf %559, %560 : vector<1x16xf32>
    %562 = arith.index_cast %c6_i32 : i32 to index
    %c0_152 = arith.constant 0 : index
    %563 = vector.load %arg35[%562, %c0_152] : memref<16x16xf32, #tpu.memory_space<vmem>>, vector<1x16xf32>
    tpu.vector_store %arg35[%562, %c0_152], %535 {strides = array<i32>} : memref<16x16xf32, #tpu.memory_space<vmem>>, vector<1x16xf32>,
    %564 = arith.index_cast %501 : i32 to index
    %c0_153 = arith.constant 0 : index
    %565 = vector.load %arg36[%564, %c0_153] : memref<16x16xf32, #tpu.memory_space<vmem>>, vector<1x16xf32>
    tpu.vector_store %arg36[%564, %c0_153], %561 {strides = array<i32>} : memref<16x16xf32, #tpu.memory_space<vmem>>, vector<1x16xf32>,
    %566 = tpu.concatenate %535, %561 in 1 : vector<1x16xf32>, vector<1x16xf32> -> vector<1x32xf32>
    %c7_i32 = arith.constant 7 : i32
    %c15_i32_154 = arith.constant 15 : i32
    %567 = arith.subi %c15_i32_154, %c7_i32 : i32
    %cst_155 = arith.constant dense<0.000000e+00> : vector<1x96xf32>
    %568 = tpu.matmul %566, %102, %cst_155 {dimension_numbers = #tpu.dot_dimension_numbers<[1], [0], [0], [1], [0, 0, 1, 1], [], []>} : vector<1x32xf32>, vector<32x96xf32>, vector<1x96xf32> -> vector<1x96xf32>
    %569 = arith.addf %568, %103 : vector<1x96xf32>
    %570 = arith.index_cast %c7_i32 : i32 to index
    %c0_156 = arith.constant 0 : index
    %571 = vector.load %arg34[%570, %c0_156] : memref<16x96xf32, #tpu.memory_space<vmem>>, vector<1x96xf32>
    %572 = arith.index_cast %567 : i32 to index
    %c0_157 = arith.constant 0 : index
    %573 = vector.load %arg34[%572, %c0_157] : memref<16x96xf32, #tpu.memory_space<vmem>>, vector<1x96xf32>
    %574 = vector.extract_strided_slice %566 {offsets = [0, 0], sizes = [1, 16], strides = [1, 1]} : vector<1x32xf32> to vector<1x16xf32>
    %575 = vector.extract_strided_slice %566 {offsets = [0, 16], sizes = [1, 16], strides = [1, 1]} : vector<1x32xf32> to vector<1x16xf32>
    %576 = vector.extract_strided_slice %571 {offsets = [0, 0], sizes = [1, 16], strides = [1, 1]} : vector<1x96xf32> to vector<1x16xf32>
    %577 = vector.extract_strided_slice %569 {offsets = [0, 0], sizes = [1, 16], strides = [1, 1]} : vector<1x96xf32> to vector<1x16xf32>
    %578 = arith.addf %576, %577 : vector<1x16xf32>
    %579 = arith.negf %578 : vector<1x16xf32>
    %580 = math.exp %579 : vector<1x16xf32>
    %cst_158 = arith.constant 1.000000e+00 : f32
    %581 = vector.broadcast %cst_158 : f32 to vector<1x16xf32>
    %582 = arith.addf %581, %580 : vector<1x16xf32>
    %583 = arith.divf %581, %582 : vector<1x16xf32>
    %584 = vector.extract_strided_slice %571 {offsets = [0, 16], sizes = [1, 16], strides = [1, 1]} : vector<1x96xf32> to vector<1x16xf32>
    %585 = vector.extract_strided_slice %569 {offsets = [0, 16], sizes = [1, 16], strides = [1, 1]} : vector<1x96xf32> to vector<1x16xf32>
    %586 = arith.addf %584, %585 : vector<1x16xf32>
    %587 = arith.negf %586 : vector<1x16xf32>
    %588 = math.exp %587 : vector<1x16xf32>
    %cst_159 = arith.constant 1.000000e+00 : f32
    %589 = vector.broadcast %cst_159 : f32 to vector<1x16xf32>
    %590 = arith.addf %589, %588 : vector<1x16xf32>
    %591 = arith.divf %589, %590 : vector<1x16xf32>
    %592 = vector.extract_strided_slice %571 {offsets = [0, 32], sizes = [1, 16], strides = [1, 1]} : vector<1x96xf32> to vector<1x16xf32>
    %593 = vector.extract_strided_slice %569 {offsets = [0, 32], sizes = [1, 16], strides = [1, 1]} : vector<1x96xf32> to vector<1x16xf32>
    %594 = arith.mulf %583, %593 : vector<1x16xf32>
    %595 = arith.addf %592, %594 : vector<1x16xf32>
    %596 = math.tanh %595 : vector<1x16xf32>
    %cst_160 = arith.constant 1.000000e+00 : f32
    %597 = vector.broadcast %cst_160 : f32 to vector<1x16xf32>
    %598 = arith.subf %597, %591 : vector<1x16xf32>
    %599 = arith.mulf %598, %596 : vector<1x16xf32>
    %600 = arith.mulf %591, %574 : vector<1x16xf32>
    %601 = arith.addf %599, %600 : vector<1x16xf32>
    %602 = vector.extract_strided_slice %573 {offsets = [0, 48], sizes = [1, 16], strides = [1, 1]} : vector<1x96xf32> to vector<1x16xf32>
    %603 = vector.extract_strided_slice %569 {offsets = [0, 48], sizes = [1, 16], strides = [1, 1]} : vector<1x96xf32> to vector<1x16xf32>
    %604 = arith.addf %602, %603 : vector<1x16xf32>
    %605 = arith.negf %604 : vector<1x16xf32>
    %606 = math.exp %605 : vector<1x16xf32>
    %cst_161 = arith.constant 1.000000e+00 : f32
    %607 = vector.broadcast %cst_161 : f32 to vector<1x16xf32>
    %608 = arith.addf %607, %606 : vector<1x16xf32>
    %609 = arith.divf %607, %608 : vector<1x16xf32>
    %610 = vector.extract_strided_slice %573 {offsets = [0, 64], sizes = [1, 16], strides = [1, 1]} : vector<1x96xf32> to vector<1x16xf32>
    %611 = vector.extract_strided_slice %569 {offsets = [0, 64], sizes = [1, 16], strides = [1, 1]} : vector<1x96xf32> to vector<1x16xf32>
    %612 = arith.addf %610, %611 : vector<1x16xf32>
    %613 = arith.negf %612 : vector<1x16xf32>
    %614 = math.exp %613 : vector<1x16xf32>
    %cst_162 = arith.constant 1.000000e+00 : f32
    %615 = vector.broadcast %cst_162 : f32 to vector<1x16xf32>
    %616 = arith.addf %615, %614 : vector<1x16xf32>
    %617 = arith.divf %615, %616 : vector<1x16xf32>
    %618 = vector.extract_strided_slice %573 {offsets = [0, 80], sizes = [1, 16], strides = [1, 1]} : vector<1x96xf32> to vector<1x16xf32>
    %619 = vector.extract_strided_slice %569 {offsets = [0, 80], sizes = [1, 16], strides = [1, 1]} : vector<1x96xf32> to vector<1x16xf32>
    %620 = arith.mulf %609, %619 : vector<1x16xf32>
    %621 = arith.addf %618, %620 : vector<1x16xf32>
    %622 = math.tanh %621 : vector<1x16xf32>
    %cst_163 = arith.constant 1.000000e+00 : f32
    %623 = vector.broadcast %cst_163 : f32 to vector<1x16xf32>
    %624 = arith.subf %623, %617 : vector<1x16xf32>
    %625 = arith.mulf %624, %622 : vector<1x16xf32>
    %626 = arith.mulf %617, %575 : vector<1x16xf32>
    %627 = arith.addf %625, %626 : vector<1x16xf32>
    %628 = arith.index_cast %c7_i32 : i32 to index
    %c0_164 = arith.constant 0 : index
    %629 = vector.load %arg35[%628, %c0_164] : memref<16x16xf32, #tpu.memory_space<vmem>>, vector<1x16xf32>
    tpu.vector_store %arg35[%628, %c0_164], %601 {strides = array<i32>} : memref<16x16xf32, #tpu.memory_space<vmem>>, vector<1x16xf32>,
    %630 = arith.index_cast %567 : i32 to index
    %c0_165 = arith.constant 0 : index
    %631 = vector.load %arg36[%630, %c0_165] : memref<16x16xf32, #tpu.memory_space<vmem>>, vector<1x16xf32>
    tpu.vector_store %arg36[%630, %c0_165], %627 {strides = array<i32>} : memref<16x16xf32, #tpu.memory_space<vmem>>, vector<1x16xf32>,
    %632 = tpu.concatenate %601, %627 in 1 : vector<1x16xf32>, vector<1x16xf32> -> vector<1x32xf32>
    %c8_i32 = arith.constant 8 : i32
    %c15_i32_166 = arith.constant 15 : i32
    %633 = arith.subi %c15_i32_166, %c8_i32 : i32
    %cst_167 = arith.constant dense<0.000000e+00> : vector<1x96xf32>
    %634 = tpu.matmul %632, %102, %cst_167 {dimension_numbers = #tpu.dot_dimension_numbers<[1], [0], [0], [1], [0, 0, 1, 1], [], []>} : vector<1x32xf32>, vector<32x96xf32>, vector<1x96xf32> -> vector<1x96xf32>
    %635 = arith.addf %634, %103 : vector<1x96xf32>
    %636 = arith.index_cast %c8_i32 : i32 to index
    %c0_168 = arith.constant 0 : index
    %637 = vector.load %arg34[%636, %c0_168] : memref<16x96xf32, #tpu.memory_space<vmem>>, vector<1x96xf32>
    %638 = arith.index_cast %633 : i32 to index
    %c0_169 = arith.constant 0 : index
    %639 = vector.load %arg34[%638, %c0_169] : memref<16x96xf32, #tpu.memory_space<vmem>>, vector<1x96xf32>
    %640 = vector.extract_strided_slice %632 {offsets = [0, 0], sizes = [1, 16], strides = [1, 1]} : vector<1x32xf32> to vector<1x16xf32>
    %641 = vector.extract_strided_slice %632 {offsets = [0, 16], sizes = [1, 16], strides = [1, 1]} : vector<1x32xf32> to vector<1x16xf32>
    %642 = vector.extract_strided_slice %637 {offsets = [0, 0], sizes = [1, 16], strides = [1, 1]} : vector<1x96xf32> to vector<1x16xf32>
    %643 = vector.extract_strided_slice %635 {offsets = [0, 0], sizes = [1, 16], strides = [1, 1]} : vector<1x96xf32> to vector<1x16xf32>
    %644 = arith.addf %642, %643 : vector<1x16xf32>
    %645 = arith.negf %644 : vector<1x16xf32>
    %646 = math.exp %645 : vector<1x16xf32>
    %cst_170 = arith.constant 1.000000e+00 : f32
    %647 = vector.broadcast %cst_170 : f32 to vector<1x16xf32>
    %648 = arith.addf %647, %646 : vector<1x16xf32>
    %649 = arith.divf %647, %648 : vector<1x16xf32>
    %650 = vector.extract_strided_slice %637 {offsets = [0, 16], sizes = [1, 16], strides = [1, 1]} : vector<1x96xf32> to vector<1x16xf32>
    %651 = vector.extract_strided_slice %635 {offsets = [0, 16], sizes = [1, 16], strides = [1, 1]} : vector<1x96xf32> to vector<1x16xf32>
    %652 = arith.addf %650, %651 : vector<1x16xf32>
    %653 = arith.negf %652 : vector<1x16xf32>
    %654 = math.exp %653 : vector<1x16xf32>
    %cst_171 = arith.constant 1.000000e+00 : f32
    %655 = vector.broadcast %cst_171 : f32 to vector<1x16xf32>
    %656 = arith.addf %655, %654 : vector<1x16xf32>
    %657 = arith.divf %655, %656 : vector<1x16xf32>
    %658 = vector.extract_strided_slice %637 {offsets = [0, 32], sizes = [1, 16], strides = [1, 1]} : vector<1x96xf32> to vector<1x16xf32>
    %659 = vector.extract_strided_slice %635 {offsets = [0, 32], sizes = [1, 16], strides = [1, 1]} : vector<1x96xf32> to vector<1x16xf32>
    %660 = arith.mulf %649, %659 : vector<1x16xf32>
    %661 = arith.addf %658, %660 : vector<1x16xf32>
    %662 = math.tanh %661 : vector<1x16xf32>
    %cst_172 = arith.constant 1.000000e+00 : f32
    %663 = vector.broadcast %cst_172 : f32 to vector<1x16xf32>
    %664 = arith.subf %663, %657 : vector<1x16xf32>
    %665 = arith.mulf %664, %662 : vector<1x16xf32>
    %666 = arith.mulf %657, %640 : vector<1x16xf32>
    %667 = arith.addf %665, %666 : vector<1x16xf32>
    %668 = vector.extract_strided_slice %639 {offsets = [0, 48], sizes = [1, 16], strides = [1, 1]} : vector<1x96xf32> to vector<1x16xf32>
    %669 = vector.extract_strided_slice %635 {offsets = [0, 48], sizes = [1, 16], strides = [1, 1]} : vector<1x96xf32> to vector<1x16xf32>
    %670 = arith.addf %668, %669 : vector<1x16xf32>
    %671 = arith.negf %670 : vector<1x16xf32>
    %672 = math.exp %671 : vector<1x16xf32>
    %cst_173 = arith.constant 1.000000e+00 : f32
    %673 = vector.broadcast %cst_173 : f32 to vector<1x16xf32>
    %674 = arith.addf %673, %672 : vector<1x16xf32>
    %675 = arith.divf %673, %674 : vector<1x16xf32>
    %676 = vector.extract_strided_slice %639 {offsets = [0, 64], sizes = [1, 16], strides = [1, 1]} : vector<1x96xf32> to vector<1x16xf32>
    %677 = vector.extract_strided_slice %635 {offsets = [0, 64], sizes = [1, 16], strides = [1, 1]} : vector<1x96xf32> to vector<1x16xf32>
    %678 = arith.addf %676, %677 : vector<1x16xf32>
    %679 = arith.negf %678 : vector<1x16xf32>
    %680 = math.exp %679 : vector<1x16xf32>
    %cst_174 = arith.constant 1.000000e+00 : f32
    %681 = vector.broadcast %cst_174 : f32 to vector<1x16xf32>
    %682 = arith.addf %681, %680 : vector<1x16xf32>
    %683 = arith.divf %681, %682 : vector<1x16xf32>
    %684 = vector.extract_strided_slice %639 {offsets = [0, 80], sizes = [1, 16], strides = [1, 1]} : vector<1x96xf32> to vector<1x16xf32>
    %685 = vector.extract_strided_slice %635 {offsets = [0, 80], sizes = [1, 16], strides = [1, 1]} : vector<1x96xf32> to vector<1x16xf32>
    %686 = arith.mulf %675, %685 : vector<1x16xf32>
    %687 = arith.addf %684, %686 : vector<1x16xf32>
    %688 = math.tanh %687 : vector<1x16xf32>
    %cst_175 = arith.constant 1.000000e+00 : f32
    %689 = vector.broadcast %cst_175 : f32 to vector<1x16xf32>
    %690 = arith.subf %689, %683 : vector<1x16xf32>
    %691 = arith.mulf %690, %688 : vector<1x16xf32>
    %692 = arith.mulf %683, %641 : vector<1x16xf32>
    %693 = arith.addf %691, %692 : vector<1x16xf32>
    %694 = arith.index_cast %c8_i32 : i32 to index
    %c0_176 = arith.constant 0 : index
    %695 = vector.load %arg35[%694, %c0_176] : memref<16x16xf32, #tpu.memory_space<vmem>>, vector<1x16xf32>
    tpu.vector_store %arg35[%694, %c0_176], %667 {strides = array<i32>} : memref<16x16xf32, #tpu.memory_space<vmem>>, vector<1x16xf32>,
    %696 = arith.index_cast %633 : i32 to index
    %c0_177 = arith.constant 0 : index
    %697 = vector.load %arg36[%696, %c0_177] : memref<16x16xf32, #tpu.memory_space<vmem>>, vector<1x16xf32>
    tpu.vector_store %arg36[%696, %c0_177], %693 {strides = array<i32>} : memref<16x16xf32, #tpu.memory_space<vmem>>, vector<1x16xf32>,
    %698 = tpu.concatenate %667, %693 in 1 : vector<1x16xf32>, vector<1x16xf32> -> vector<1x32xf32>
    %c9_i32 = arith.constant 9 : i32
    %c15_i32_178 = arith.constant 15 : i32
    %699 = arith.subi %c15_i32_178, %c9_i32 : i32
    %cst_179 = arith.constant dense<0.000000e+00> : vector<1x96xf32>
    %700 = tpu.matmul %698, %102, %cst_179 {dimension_numbers = #tpu.dot_dimension_numbers<[1], [0], [0], [1], [0, 0, 1, 1], [], []>} : vector<1x32xf32>, vector<32x96xf32>, vector<1x96xf32> -> vector<1x96xf32>
    %701 = arith.addf %700, %103 : vector<1x96xf32>
    %702 = arith.index_cast %c9_i32 : i32 to index
    %c0_180 = arith.constant 0 : index
    %703 = vector.load %arg34[%702, %c0_180] : memref<16x96xf32, #tpu.memory_space<vmem>>, vector<1x96xf32>
    %704 = arith.index_cast %699 : i32 to index
    %c0_181 = arith.constant 0 : index
    %705 = vector.load %arg34[%704, %c0_181] : memref<16x96xf32, #tpu.memory_space<vmem>>, vector<1x96xf32>
    %706 = vector.extract_strided_slice %698 {offsets = [0, 0], sizes = [1, 16], strides = [1, 1]} : vector<1x32xf32> to vector<1x16xf32>
    %707 = vector.extract_strided_slice %698 {offsets = [0, 16], sizes = [1, 16], strides = [1, 1]} : vector<1x32xf32> to vector<1x16xf32>
    %708 = vector.extract_strided_slice %703 {offsets = [0, 0], sizes = [1, 16], strides = [1, 1]} : vector<1x96xf32> to vector<1x16xf32>
    %709 = vector.extract_strided_slice %701 {offsets = [0, 0], sizes = [1, 16], strides = [1, 1]} : vector<1x96xf32> to vector<1x16xf32>
    %710 = arith.addf %708, %709 : vector<1x16xf32>
    %711 = arith.negf %710 : vector<1x16xf32>
    %712 = math.exp %711 : vector<1x16xf32>
    %cst_182 = arith.constant 1.000000e+00 : f32
    %713 = vector.broadcast %cst_182 : f32 to vector<1x16xf32>
    %714 = arith.addf %713, %712 : vector<1x16xf32>
    %715 = arith.divf %713, %714 : vector<1x16xf32>
    %716 = vector.extract_strided_slice %703 {offsets = [0, 16], sizes = [1, 16], strides = [1, 1]} : vector<1x96xf32> to vector<1x16xf32>
    %717 = vector.extract_strided_slice %701 {offsets = [0, 16], sizes = [1, 16], strides = [1, 1]} : vector<1x96xf32> to vector<1x16xf32>
    %718 = arith.addf %716, %717 : vector<1x16xf32>
    %719 = arith.negf %718 : vector<1x16xf32>
    %720 = math.exp %719 : vector<1x16xf32>
    %cst_183 = arith.constant 1.000000e+00 : f32
    %721 = vector.broadcast %cst_183 : f32 to vector<1x16xf32>
    %722 = arith.addf %721, %720 : vector<1x16xf32>
    %723 = arith.divf %721, %722 : vector<1x16xf32>
    %724 = vector.extract_strided_slice %703 {offsets = [0, 32], sizes = [1, 16], strides = [1, 1]} : vector<1x96xf32> to vector<1x16xf32>
    %725 = vector.extract_strided_slice %701 {offsets = [0, 32], sizes = [1, 16], strides = [1, 1]} : vector<1x96xf32> to vector<1x16xf32>
    %726 = arith.mulf %715, %725 : vector<1x16xf32>
    %727 = arith.addf %724, %726 : vector<1x16xf32>
    %728 = math.tanh %727 : vector<1x16xf32>
    %cst_184 = arith.constant 1.000000e+00 : f32
    %729 = vector.broadcast %cst_184 : f32 to vector<1x16xf32>
    %730 = arith.subf %729, %723 : vector<1x16xf32>
    %731 = arith.mulf %730, %728 : vector<1x16xf32>
    %732 = arith.mulf %723, %706 : vector<1x16xf32>
    %733 = arith.addf %731, %732 : vector<1x16xf32>
    %734 = vector.extract_strided_slice %705 {offsets = [0, 48], sizes = [1, 16], strides = [1, 1]} : vector<1x96xf32> to vector<1x16xf32>
    %735 = vector.extract_strided_slice %701 {offsets = [0, 48], sizes = [1, 16], strides = [1, 1]} : vector<1x96xf32> to vector<1x16xf32>
    %736 = arith.addf %734, %735 : vector<1x16xf32>
    %737 = arith.negf %736 : vector<1x16xf32>
    %738 = math.exp %737 : vector<1x16xf32>
    %cst_185 = arith.constant 1.000000e+00 : f32
    %739 = vector.broadcast %cst_185 : f32 to vector<1x16xf32>
    %740 = arith.addf %739, %738 : vector<1x16xf32>
    %741 = arith.divf %739, %740 : vector<1x16xf32>
    %742 = vector.extract_strided_slice %705 {offsets = [0, 64], sizes = [1, 16], strides = [1, 1]} : vector<1x96xf32> to vector<1x16xf32>
    %743 = vector.extract_strided_slice %701 {offsets = [0, 64], sizes = [1, 16], strides = [1, 1]} : vector<1x96xf32> to vector<1x16xf32>
    %744 = arith.addf %742, %743 : vector<1x16xf32>
    %745 = arith.negf %744 : vector<1x16xf32>
    %746 = math.exp %745 : vector<1x16xf32>
    %cst_186 = arith.constant 1.000000e+00 : f32
    %747 = vector.broadcast %cst_186 : f32 to vector<1x16xf32>
    %748 = arith.addf %747, %746 : vector<1x16xf32>
    %749 = arith.divf %747, %748 : vector<1x16xf32>
    %750 = vector.extract_strided_slice %705 {offsets = [0, 80], sizes = [1, 16], strides = [1, 1]} : vector<1x96xf32> to vector<1x16xf32>
    %751 = vector.extract_strided_slice %701 {offsets = [0, 80], sizes = [1, 16], strides = [1, 1]} : vector<1x96xf32> to vector<1x16xf32>
    %752 = arith.mulf %741, %751 : vector<1x16xf32>
    %753 = arith.addf %750, %752 : vector<1x16xf32>
    %754 = math.tanh %753 : vector<1x16xf32>
    %cst_187 = arith.constant 1.000000e+00 : f32
    %755 = vector.broadcast %cst_187 : f32 to vector<1x16xf32>
    %756 = arith.subf %755, %749 : vector<1x16xf32>
    %757 = arith.mulf %756, %754 : vector<1x16xf32>
    %758 = arith.mulf %749, %707 : vector<1x16xf32>
    %759 = arith.addf %757, %758 : vector<1x16xf32>
    %760 = arith.index_cast %c9_i32 : i32 to index
    %c0_188 = arith.constant 0 : index
    %761 = vector.load %arg35[%760, %c0_188] : memref<16x16xf32, #tpu.memory_space<vmem>>, vector<1x16xf32>
    tpu.vector_store %arg35[%760, %c0_188], %733 {strides = array<i32>} : memref<16x16xf32, #tpu.memory_space<vmem>>, vector<1x16xf32>,
    %762 = arith.index_cast %699 : i32 to index
    %c0_189 = arith.constant 0 : index
    %763 = vector.load %arg36[%762, %c0_189] : memref<16x16xf32, #tpu.memory_space<vmem>>, vector<1x16xf32>
    tpu.vector_store %arg36[%762, %c0_189], %759 {strides = array<i32>} : memref<16x16xf32, #tpu.memory_space<vmem>>, vector<1x16xf32>,
    %764 = tpu.concatenate %733, %759 in 1 : vector<1x16xf32>, vector<1x16xf32> -> vector<1x32xf32>
    %c10_i32 = arith.constant 10 : i32
    %c15_i32_190 = arith.constant 15 : i32
    %765 = arith.subi %c15_i32_190, %c10_i32 : i32
    %cst_191 = arith.constant dense<0.000000e+00> : vector<1x96xf32>
    %766 = tpu.matmul %764, %102, %cst_191 {dimension_numbers = #tpu.dot_dimension_numbers<[1], [0], [0], [1], [0, 0, 1, 1], [], []>} : vector<1x32xf32>, vector<32x96xf32>, vector<1x96xf32> -> vector<1x96xf32>
    %767 = arith.addf %766, %103 : vector<1x96xf32>
    %768 = arith.index_cast %c10_i32 : i32 to index
    %c0_192 = arith.constant 0 : index
    %769 = vector.load %arg34[%768, %c0_192] : memref<16x96xf32, #tpu.memory_space<vmem>>, vector<1x96xf32>
    %770 = arith.index_cast %765 : i32 to index
    %c0_193 = arith.constant 0 : index
    %771 = vector.load %arg34[%770, %c0_193] : memref<16x96xf32, #tpu.memory_space<vmem>>, vector<1x96xf32>
    %772 = vector.extract_strided_slice %764 {offsets = [0, 0], sizes = [1, 16], strides = [1, 1]} : vector<1x32xf32> to vector<1x16xf32>
    %773 = vector.extract_strided_slice %764 {offsets = [0, 16], sizes = [1, 16], strides = [1, 1]} : vector<1x32xf32> to vector<1x16xf32>
    %774 = vector.extract_strided_slice %769 {offsets = [0, 0], sizes = [1, 16], strides = [1, 1]} : vector<1x96xf32> to vector<1x16xf32>
    %775 = vector.extract_strided_slice %767 {offsets = [0, 0], sizes = [1, 16], strides = [1, 1]} : vector<1x96xf32> to vector<1x16xf32>
    %776 = arith.addf %774, %775 : vector<1x16xf32>
    %777 = arith.negf %776 : vector<1x16xf32>
    %778 = math.exp %777 : vector<1x16xf32>
    %cst_194 = arith.constant 1.000000e+00 : f32
    %779 = vector.broadcast %cst_194 : f32 to vector<1x16xf32>
    %780 = arith.addf %779, %778 : vector<1x16xf32>
    %781 = arith.divf %779, %780 : vector<1x16xf32>
    %782 = vector.extract_strided_slice %769 {offsets = [0, 16], sizes = [1, 16], strides = [1, 1]} : vector<1x96xf32> to vector<1x16xf32>
    %783 = vector.extract_strided_slice %767 {offsets = [0, 16], sizes = [1, 16], strides = [1, 1]} : vector<1x96xf32> to vector<1x16xf32>
    %784 = arith.addf %782, %783 : vector<1x16xf32>
    %785 = arith.negf %784 : vector<1x16xf32>
    %786 = math.exp %785 : vector<1x16xf32>
    %cst_195 = arith.constant 1.000000e+00 : f32
    %787 = vector.broadcast %cst_195 : f32 to vector<1x16xf32>
    %788 = arith.addf %787, %786 : vector<1x16xf32>
    %789 = arith.divf %787, %788 : vector<1x16xf32>
    %790 = vector.extract_strided_slice %769 {offsets = [0, 32], sizes = [1, 16], strides = [1, 1]} : vector<1x96xf32> to vector<1x16xf32>
    %791 = vector.extract_strided_slice %767 {offsets = [0, 32], sizes = [1, 16], strides = [1, 1]} : vector<1x96xf32> to vector<1x16xf32>
    %792 = arith.mulf %781, %791 : vector<1x16xf32>
    %793 = arith.addf %790, %792 : vector<1x16xf32>
    %794 = math.tanh %793 : vector<1x16xf32>
    %cst_196 = arith.constant 1.000000e+00 : f32
    %795 = vector.broadcast %cst_196 : f32 to vector<1x16xf32>
    %796 = arith.subf %795, %789 : vector<1x16xf32>
    %797 = arith.mulf %796, %794 : vector<1x16xf32>
    %798 = arith.mulf %789, %772 : vector<1x16xf32>
    %799 = arith.addf %797, %798 : vector<1x16xf32>
    %800 = vector.extract_strided_slice %771 {offsets = [0, 48], sizes = [1, 16], strides = [1, 1]} : vector<1x96xf32> to vector<1x16xf32>
    %801 = vector.extract_strided_slice %767 {offsets = [0, 48], sizes = [1, 16], strides = [1, 1]} : vector<1x96xf32> to vector<1x16xf32>
    %802 = arith.addf %800, %801 : vector<1x16xf32>
    %803 = arith.negf %802 : vector<1x16xf32>
    %804 = math.exp %803 : vector<1x16xf32>
    %cst_197 = arith.constant 1.000000e+00 : f32
    %805 = vector.broadcast %cst_197 : f32 to vector<1x16xf32>
    %806 = arith.addf %805, %804 : vector<1x16xf32>
    %807 = arith.divf %805, %806 : vector<1x16xf32>
    %808 = vector.extract_strided_slice %771 {offsets = [0, 64], sizes = [1, 16], strides = [1, 1]} : vector<1x96xf32> to vector<1x16xf32>
    %809 = vector.extract_strided_slice %767 {offsets = [0, 64], sizes = [1, 16], strides = [1, 1]} : vector<1x96xf32> to vector<1x16xf32>
    %810 = arith.addf %808, %809 : vector<1x16xf32>
    %811 = arith.negf %810 : vector<1x16xf32>
    %812 = math.exp %811 : vector<1x16xf32>
    %cst_198 = arith.constant 1.000000e+00 : f32
    %813 = vector.broadcast %cst_198 : f32 to vector<1x16xf32>
    %814 = arith.addf %813, %812 : vector<1x16xf32>
    %815 = arith.divf %813, %814 : vector<1x16xf32>
    %816 = vector.extract_strided_slice %771 {offsets = [0, 80], sizes = [1, 16], strides = [1, 1]} : vector<1x96xf32> to vector<1x16xf32>
    %817 = vector.extract_strided_slice %767 {offsets = [0, 80], sizes = [1, 16], strides = [1, 1]} : vector<1x96xf32> to vector<1x16xf32>
    %818 = arith.mulf %807, %817 : vector<1x16xf32>
    %819 = arith.addf %816, %818 : vector<1x16xf32>
    %820 = math.tanh %819 : vector<1x16xf32>
    %cst_199 = arith.constant 1.000000e+00 : f32
    %821 = vector.broadcast %cst_199 : f32 to vector<1x16xf32>
    %822 = arith.subf %821, %815 : vector<1x16xf32>
    %823 = arith.mulf %822, %820 : vector<1x16xf32>
    %824 = arith.mulf %815, %773 : vector<1x16xf32>
    %825 = arith.addf %823, %824 : vector<1x16xf32>
    %826 = arith.index_cast %c10_i32 : i32 to index
    %c0_200 = arith.constant 0 : index
    %827 = vector.load %arg35[%826, %c0_200] : memref<16x16xf32, #tpu.memory_space<vmem>>, vector<1x16xf32>
    tpu.vector_store %arg35[%826, %c0_200], %799 {strides = array<i32>} : memref<16x16xf32, #tpu.memory_space<vmem>>, vector<1x16xf32>,
    %828 = arith.index_cast %765 : i32 to index
    %c0_201 = arith.constant 0 : index
    %829 = vector.load %arg36[%828, %c0_201] : memref<16x16xf32, #tpu.memory_space<vmem>>, vector<1x16xf32>
    tpu.vector_store %arg36[%828, %c0_201], %825 {strides = array<i32>} : memref<16x16xf32, #tpu.memory_space<vmem>>, vector<1x16xf32>,
    %830 = tpu.concatenate %799, %825 in 1 : vector<1x16xf32>, vector<1x16xf32> -> vector<1x32xf32>
    %c11_i32 = arith.constant 11 : i32
    %c15_i32_202 = arith.constant 15 : i32
    %831 = arith.subi %c15_i32_202, %c11_i32 : i32
    %cst_203 = arith.constant dense<0.000000e+00> : vector<1x96xf32>
    %832 = tpu.matmul %830, %102, %cst_203 {dimension_numbers = #tpu.dot_dimension_numbers<[1], [0], [0], [1], [0, 0, 1, 1], [], []>} : vector<1x32xf32>, vector<32x96xf32>, vector<1x96xf32> -> vector<1x96xf32>
    %833 = arith.addf %832, %103 : vector<1x96xf32>
    %834 = arith.index_cast %c11_i32 : i32 to index
    %c0_204 = arith.constant 0 : index
    %835 = vector.load %arg34[%834, %c0_204] : memref<16x96xf32, #tpu.memory_space<vmem>>, vector<1x96xf32>
    %836 = arith.index_cast %831 : i32 to index
    %c0_205 = arith.constant 0 : index
    %837 = vector.load %arg34[%836, %c0_205] : memref<16x96xf32, #tpu.memory_space<vmem>>, vector<1x96xf32>
    %838 = vector.extract_strided_slice %830 {offsets = [0, 0], sizes = [1, 16], strides = [1, 1]} : vector<1x32xf32> to vector<1x16xf32>
    %839 = vector.extract_strided_slice %830 {offsets = [0, 16], sizes = [1, 16], strides = [1, 1]} : vector<1x32xf32> to vector<1x16xf32>
    %840 = vector.extract_strided_slice %835 {offsets = [0, 0], sizes = [1, 16], strides = [1, 1]} : vector<1x96xf32> to vector<1x16xf32>
    %841 = vector.extract_strided_slice %833 {offsets = [0, 0], sizes = [1, 16], strides = [1, 1]} : vector<1x96xf32> to vector<1x16xf32>
    %842 = arith.addf %840, %841 : vector<1x16xf32>
    %843 = arith.negf %842 : vector<1x16xf32>
    %844 = math.exp %843 : vector<1x16xf32>
    %cst_206 = arith.constant 1.000000e+00 : f32
    %845 = vector.broadcast %cst_206 : f32 to vector<1x16xf32>
    %846 = arith.addf %845, %844 : vector<1x16xf32>
    %847 = arith.divf %845, %846 : vector<1x16xf32>
    %848 = vector.extract_strided_slice %835 {offsets = [0, 16], sizes = [1, 16], strides = [1, 1]} : vector<1x96xf32> to vector<1x16xf32>
    %849 = vector.extract_strided_slice %833 {offsets = [0, 16], sizes = [1, 16], strides = [1, 1]} : vector<1x96xf32> to vector<1x16xf32>
    %850 = arith.addf %848, %849 : vector<1x16xf32>
    %851 = arith.negf %850 : vector<1x16xf32>
    %852 = math.exp %851 : vector<1x16xf32>
    %cst_207 = arith.constant 1.000000e+00 : f32
    %853 = vector.broadcast %cst_207 : f32 to vector<1x16xf32>
    %854 = arith.addf %853, %852 : vector<1x16xf32>
    %855 = arith.divf %853, %854 : vector<1x16xf32>
    %856 = vector.extract_strided_slice %835 {offsets = [0, 32], sizes = [1, 16], strides = [1, 1]} : vector<1x96xf32> to vector<1x16xf32>
    %857 = vector.extract_strided_slice %833 {offsets = [0, 32], sizes = [1, 16], strides = [1, 1]} : vector<1x96xf32> to vector<1x16xf32>
    %858 = arith.mulf %847, %857 : vector<1x16xf32>
    %859 = arith.addf %856, %858 : vector<1x16xf32>
    %860 = math.tanh %859 : vector<1x16xf32>
    %cst_208 = arith.constant 1.000000e+00 : f32
    %861 = vector.broadcast %cst_208 : f32 to vector<1x16xf32>
    %862 = arith.subf %861, %855 : vector<1x16xf32>
    %863 = arith.mulf %862, %860 : vector<1x16xf32>
    %864 = arith.mulf %855, %838 : vector<1x16xf32>
    %865 = arith.addf %863, %864 : vector<1x16xf32>
    %866 = vector.extract_strided_slice %837 {offsets = [0, 48], sizes = [1, 16], strides = [1, 1]} : vector<1x96xf32> to vector<1x16xf32>
    %867 = vector.extract_strided_slice %833 {offsets = [0, 48], sizes = [1, 16], strides = [1, 1]} : vector<1x96xf32> to vector<1x16xf32>
    %868 = arith.addf %866, %867 : vector<1x16xf32>
    %869 = arith.negf %868 : vector<1x16xf32>
    %870 = math.exp %869 : vector<1x16xf32>
    %cst_209 = arith.constant 1.000000e+00 : f32
    %871 = vector.broadcast %cst_209 : f32 to vector<1x16xf32>
    %872 = arith.addf %871, %870 : vector<1x16xf32>
    %873 = arith.divf %871, %872 : vector<1x16xf32>
    %874 = vector.extract_strided_slice %837 {offsets = [0, 64], sizes = [1, 16], strides = [1, 1]} : vector<1x96xf32> to vector<1x16xf32>
    %875 = vector.extract_strided_slice %833 {offsets = [0, 64], sizes = [1, 16], strides = [1, 1]} : vector<1x96xf32> to vector<1x16xf32>
    %876 = arith.addf %874, %875 : vector<1x16xf32>
    %877 = arith.negf %876 : vector<1x16xf32>
    %878 = math.exp %877 : vector<1x16xf32>
    %cst_210 = arith.constant 1.000000e+00 : f32
    %879 = vector.broadcast %cst_210 : f32 to vector<1x16xf32>
    %880 = arith.addf %879, %878 : vector<1x16xf32>
    %881 = arith.divf %879, %880 : vector<1x16xf32>
    %882 = vector.extract_strided_slice %837 {offsets = [0, 80], sizes = [1, 16], strides = [1, 1]} : vector<1x96xf32> to vector<1x16xf32>
    %883 = vector.extract_strided_slice %833 {offsets = [0, 80], sizes = [1, 16], strides = [1, 1]} : vector<1x96xf32> to vector<1x16xf32>
    %884 = arith.mulf %873, %883 : vector<1x16xf32>
    %885 = arith.addf %882, %884 : vector<1x16xf32>
    %886 = math.tanh %885 : vector<1x16xf32>
    %cst_211 = arith.constant 1.000000e+00 : f32
    %887 = vector.broadcast %cst_211 : f32 to vector<1x16xf32>
    %888 = arith.subf %887, %881 : vector<1x16xf32>
    %889 = arith.mulf %888, %886 : vector<1x16xf32>
    %890 = arith.mulf %881, %839 : vector<1x16xf32>
    %891 = arith.addf %889, %890 : vector<1x16xf32>
    %892 = arith.index_cast %c11_i32 : i32 to index
    %c0_212 = arith.constant 0 : index
    %893 = vector.load %arg35[%892, %c0_212] : memref<16x16xf32, #tpu.memory_space<vmem>>, vector<1x16xf32>
    tpu.vector_store %arg35[%892, %c0_212], %865 {strides = array<i32>} : memref<16x16xf32, #tpu.memory_space<vmem>>, vector<1x16xf32>,
    %894 = arith.index_cast %831 : i32 to index
    %c0_213 = arith.constant 0 : index
    %895 = vector.load %arg36[%894, %c0_213] : memref<16x16xf32, #tpu.memory_space<vmem>>, vector<1x16xf32>
    tpu.vector_store %arg36[%894, %c0_213], %891 {strides = array<i32>} : memref<16x16xf32, #tpu.memory_space<vmem>>, vector<1x16xf32>,
    %896 = tpu.concatenate %865, %891 in 1 : vector<1x16xf32>, vector<1x16xf32> -> vector<1x32xf32>
    %c12_i32 = arith.constant 12 : i32
    %c15_i32_214 = arith.constant 15 : i32
    %897 = arith.subi %c15_i32_214, %c12_i32 : i32
    %cst_215 = arith.constant dense<0.000000e+00> : vector<1x96xf32>
    %898 = tpu.matmul %896, %102, %cst_215 {dimension_numbers = #tpu.dot_dimension_numbers<[1], [0], [0], [1], [0, 0, 1, 1], [], []>} : vector<1x32xf32>, vector<32x96xf32>, vector<1x96xf32> -> vector<1x96xf32>
    %899 = arith.addf %898, %103 : vector<1x96xf32>
    %900 = arith.index_cast %c12_i32 : i32 to index
    %c0_216 = arith.constant 0 : index
    %901 = vector.load %arg34[%900, %c0_216] : memref<16x96xf32, #tpu.memory_space<vmem>>, vector<1x96xf32>
    %902 = arith.index_cast %897 : i32 to index
    %c0_217 = arith.constant 0 : index
    %903 = vector.load %arg34[%902, %c0_217] : memref<16x96xf32, #tpu.memory_space<vmem>>, vector<1x96xf32>
    %904 = vector.extract_strided_slice %896 {offsets = [0, 0], sizes = [1, 16], strides = [1, 1]} : vector<1x32xf32> to vector<1x16xf32>
    %905 = vector.extract_strided_slice %896 {offsets = [0, 16], sizes = [1, 16], strides = [1, 1]} : vector<1x32xf32> to vector<1x16xf32>
    %906 = vector.extract_strided_slice %901 {offsets = [0, 0], sizes = [1, 16], strides = [1, 1]} : vector<1x96xf32> to vector<1x16xf32>
    %907 = vector.extract_strided_slice %899 {offsets = [0, 0], sizes = [1, 16], strides = [1, 1]} : vector<1x96xf32> to vector<1x16xf32>
    %908 = arith.addf %906, %907 : vector<1x16xf32>
    %909 = arith.negf %908 : vector<1x16xf32>
    %910 = math.exp %909 : vector<1x16xf32>
    %cst_218 = arith.constant 1.000000e+00 : f32
    %911 = vector.broadcast %cst_218 : f32 to vector<1x16xf32>
    %912 = arith.addf %911, %910 : vector<1x16xf32>
    %913 = arith.divf %911, %912 : vector<1x16xf32>
    %914 = vector.extract_strided_slice %901 {offsets = [0, 16], sizes = [1, 16], strides = [1, 1]} : vector<1x96xf32> to vector<1x16xf32>
    %915 = vector.extract_strided_slice %899 {offsets = [0, 16], sizes = [1, 16], strides = [1, 1]} : vector<1x96xf32> to vector<1x16xf32>
    %916 = arith.addf %914, %915 : vector<1x16xf32>
    %917 = arith.negf %916 : vector<1x16xf32>
    %918 = math.exp %917 : vector<1x16xf32>
    %cst_219 = arith.constant 1.000000e+00 : f32
    %919 = vector.broadcast %cst_219 : f32 to vector<1x16xf32>
    %920 = arith.addf %919, %918 : vector<1x16xf32>
    %921 = arith.divf %919, %920 : vector<1x16xf32>
    %922 = vector.extract_strided_slice %901 {offsets = [0, 32], sizes = [1, 16], strides = [1, 1]} : vector<1x96xf32> to vector<1x16xf32>
    %923 = vector.extract_strided_slice %899 {offsets = [0, 32], sizes = [1, 16], strides = [1, 1]} : vector<1x96xf32> to vector<1x16xf32>
    %924 = arith.mulf %913, %923 : vector<1x16xf32>
    %925 = arith.addf %922, %924 : vector<1x16xf32>
    %926 = math.tanh %925 : vector<1x16xf32>
    %cst_220 = arith.constant 1.000000e+00 : f32
    %927 = vector.broadcast %cst_220 : f32 to vector<1x16xf32>
    %928 = arith.subf %927, %921 : vector<1x16xf32>
    %929 = arith.mulf %928, %926 : vector<1x16xf32>
    %930 = arith.mulf %921, %904 : vector<1x16xf32>
    %931 = arith.addf %929, %930 : vector<1x16xf32>
    %932 = vector.extract_strided_slice %903 {offsets = [0, 48], sizes = [1, 16], strides = [1, 1]} : vector<1x96xf32> to vector<1x16xf32>
    %933 = vector.extract_strided_slice %899 {offsets = [0, 48], sizes = [1, 16], strides = [1, 1]} : vector<1x96xf32> to vector<1x16xf32>
    %934 = arith.addf %932, %933 : vector<1x16xf32>
    %935 = arith.negf %934 : vector<1x16xf32>
    %936 = math.exp %935 : vector<1x16xf32>
    %cst_221 = arith.constant 1.000000e+00 : f32
    %937 = vector.broadcast %cst_221 : f32 to vector<1x16xf32>
    %938 = arith.addf %937, %936 : vector<1x16xf32>
    %939 = arith.divf %937, %938 : vector<1x16xf32>
    %940 = vector.extract_strided_slice %903 {offsets = [0, 64], sizes = [1, 16], strides = [1, 1]} : vector<1x96xf32> to vector<1x16xf32>
    %941 = vector.extract_strided_slice %899 {offsets = [0, 64], sizes = [1, 16], strides = [1, 1]} : vector<1x96xf32> to vector<1x16xf32>
    %942 = arith.addf %940, %941 : vector<1x16xf32>
    %943 = arith.negf %942 : vector<1x16xf32>
    %944 = math.exp %943 : vector<1x16xf32>
    %cst_222 = arith.constant 1.000000e+00 : f32
    %945 = vector.broadcast %cst_222 : f32 to vector<1x16xf32>
    %946 = arith.addf %945, %944 : vector<1x16xf32>
    %947 = arith.divf %945, %946 : vector<1x16xf32>
    %948 = vector.extract_strided_slice %903 {offsets = [0, 80], sizes = [1, 16], strides = [1, 1]} : vector<1x96xf32> to vector<1x16xf32>
    %949 = vector.extract_strided_slice %899 {offsets = [0, 80], sizes = [1, 16], strides = [1, 1]} : vector<1x96xf32> to vector<1x16xf32>
    %950 = arith.mulf %939, %949 : vector<1x16xf32>
    %951 = arith.addf %948, %950 : vector<1x16xf32>
    %952 = math.tanh %951 : vector<1x16xf32>
    %cst_223 = arith.constant 1.000000e+00 : f32
    %953 = vector.broadcast %cst_223 : f32 to vector<1x16xf32>
    %954 = arith.subf %953, %947 : vector<1x16xf32>
    %955 = arith.mulf %954, %952 : vector<1x16xf32>
    %956 = arith.mulf %947, %905 : vector<1x16xf32>
    %957 = arith.addf %955, %956 : vector<1x16xf32>
    %958 = arith.index_cast %c12_i32 : i32 to index
    %c0_224 = arith.constant 0 : index
    %959 = vector.load %arg35[%958, %c0_224] : memref<16x16xf32, #tpu.memory_space<vmem>>, vector<1x16xf32>
    tpu.vector_store %arg35[%958, %c0_224], %931 {strides = array<i32>} : memref<16x16xf32, #tpu.memory_space<vmem>>, vector<1x16xf32>,
    %960 = arith.index_cast %897 : i32 to index
    %c0_225 = arith.constant 0 : index
    %961 = vector.load %arg36[%960, %c0_225] : memref<16x16xf32, #tpu.memory_space<vmem>>, vector<1x16xf32>
    tpu.vector_store %arg36[%960, %c0_225], %957 {strides = array<i32>} : memref<16x16xf32, #tpu.memory_space<vmem>>, vector<1x16xf32>,
    %962 = tpu.concatenate %931, %957 in 1 : vector<1x16xf32>, vector<1x16xf32> -> vector<1x32xf32>
    %c13_i32 = arith.constant 13 : i32
    %c15_i32_226 = arith.constant 15 : i32
    %963 = arith.subi %c15_i32_226, %c13_i32 : i32
    %cst_227 = arith.constant dense<0.000000e+00> : vector<1x96xf32>
    %964 = tpu.matmul %962, %102, %cst_227 {dimension_numbers = #tpu.dot_dimension_numbers<[1], [0], [0], [1], [0, 0, 1, 1], [], []>} : vector<1x32xf32>, vector<32x96xf32>, vector<1x96xf32> -> vector<1x96xf32>
    %965 = arith.addf %964, %103 : vector<1x96xf32>
    %966 = arith.index_cast %c13_i32 : i32 to index
    %c0_228 = arith.constant 0 : index
    %967 = vector.load %arg34[%966, %c0_228] : memref<16x96xf32, #tpu.memory_space<vmem>>, vector<1x96xf32>
    %968 = arith.index_cast %963 : i32 to index
    %c0_229 = arith.constant 0 : index
    %969 = vector.load %arg34[%968, %c0_229] : memref<16x96xf32, #tpu.memory_space<vmem>>, vector<1x96xf32>
    %970 = vector.extract_strided_slice %962 {offsets = [0, 0], sizes = [1, 16], strides = [1, 1]} : vector<1x32xf32> to vector<1x16xf32>
    %971 = vector.extract_strided_slice %962 {offsets = [0, 16], sizes = [1, 16], strides = [1, 1]} : vector<1x32xf32> to vector<1x16xf32>
    %972 = vector.extract_strided_slice %967 {offsets = [0, 0], sizes = [1, 16], strides = [1, 1]} : vector<1x96xf32> to vector<1x16xf32>
    %973 = vector.extract_strided_slice %965 {offsets = [0, 0], sizes = [1, 16], strides = [1, 1]} : vector<1x96xf32> to vector<1x16xf32>
    %974 = arith.addf %972, %973 : vector<1x16xf32>
    %975 = arith.negf %974 : vector<1x16xf32>
    %976 = math.exp %975 : vector<1x16xf32>
    %cst_230 = arith.constant 1.000000e+00 : f32
    %977 = vector.broadcast %cst_230 : f32 to vector<1x16xf32>
    %978 = arith.addf %977, %976 : vector<1x16xf32>
    %979 = arith.divf %977, %978 : vector<1x16xf32>
    %980 = vector.extract_strided_slice %967 {offsets = [0, 16], sizes = [1, 16], strides = [1, 1]} : vector<1x96xf32> to vector<1x16xf32>
    %981 = vector.extract_strided_slice %965 {offsets = [0, 16], sizes = [1, 16], strides = [1, 1]} : vector<1x96xf32> to vector<1x16xf32>
    %982 = arith.addf %980, %981 : vector<1x16xf32>
    %983 = arith.negf %982 : vector<1x16xf32>
    %984 = math.exp %983 : vector<1x16xf32>
    %cst_231 = arith.constant 1.000000e+00 : f32
    %985 = vector.broadcast %cst_231 : f32 to vector<1x16xf32>
    %986 = arith.addf %985, %984 : vector<1x16xf32>
    %987 = arith.divf %985, %986 : vector<1x16xf32>
    %988 = vector.extract_strided_slice %967 {offsets = [0, 32], sizes = [1, 16], strides = [1, 1]} : vector<1x96xf32> to vector<1x16xf32>
    %989 = vector.extract_strided_slice %965 {offsets = [0, 32], sizes = [1, 16], strides = [1, 1]} : vector<1x96xf32> to vector<1x16xf32>
    %990 = arith.mulf %979, %989 : vector<1x16xf32>
    %991 = arith.addf %988, %990 : vector<1x16xf32>
    %992 = math.tanh %991 : vector<1x16xf32>
    %cst_232 = arith.constant 1.000000e+00 : f32
    %993 = vector.broadcast %cst_232 : f32 to vector<1x16xf32>
    %994 = arith.subf %993, %987 : vector<1x16xf32>
    %995 = arith.mulf %994, %992 : vector<1x16xf32>
    %996 = arith.mulf %987, %970 : vector<1x16xf32>
    %997 = arith.addf %995, %996 : vector<1x16xf32>
    %998 = vector.extract_strided_slice %969 {offsets = [0, 48], sizes = [1, 16], strides = [1, 1]} : vector<1x96xf32> to vector<1x16xf32>
    %999 = vector.extract_strided_slice %965 {offsets = [0, 48], sizes = [1, 16], strides = [1, 1]} : vector<1x96xf32> to vector<1x16xf32>
    %1000 = arith.addf %998, %999 : vector<1x16xf32>
    %1001 = arith.negf %1000 : vector<1x16xf32>
    %1002 = math.exp %1001 : vector<1x16xf32>
    %cst_233 = arith.constant 1.000000e+00 : f32
    %1003 = vector.broadcast %cst_233 : f32 to vector<1x16xf32>
    %1004 = arith.addf %1003, %1002 : vector<1x16xf32>
    %1005 = arith.divf %1003, %1004 : vector<1x16xf32>
    %1006 = vector.extract_strided_slice %969 {offsets = [0, 64], sizes = [1, 16], strides = [1, 1]} : vector<1x96xf32> to vector<1x16xf32>
    %1007 = vector.extract_strided_slice %965 {offsets = [0, 64], sizes = [1, 16], strides = [1, 1]} : vector<1x96xf32> to vector<1x16xf32>
    %1008 = arith.addf %1006, %1007 : vector<1x16xf32>
    %1009 = arith.negf %1008 : vector<1x16xf32>
    %1010 = math.exp %1009 : vector<1x16xf32>
    %cst_234 = arith.constant 1.000000e+00 : f32
    %1011 = vector.broadcast %cst_234 : f32 to vector<1x16xf32>
    %1012 = arith.addf %1011, %1010 : vector<1x16xf32>
    %1013 = arith.divf %1011, %1012 : vector<1x16xf32>
    %1014 = vector.extract_strided_slice %969 {offsets = [0, 80], sizes = [1, 16], strides = [1, 1]} : vector<1x96xf32> to vector<1x16xf32>
    %1015 = vector.extract_strided_slice %965 {offsets = [0, 80], sizes = [1, 16], strides = [1, 1]} : vector<1x96xf32> to vector<1x16xf32>
    %1016 = arith.mulf %1005, %1015 : vector<1x16xf32>
    %1017 = arith.addf %1014, %1016 : vector<1x16xf32>
    %1018 = math.tanh %1017 : vector<1x16xf32>
    %cst_235 = arith.constant 1.000000e+00 : f32
    %1019 = vector.broadcast %cst_235 : f32 to vector<1x16xf32>
    %1020 = arith.subf %1019, %1013 : vector<1x16xf32>
    %1021 = arith.mulf %1020, %1018 : vector<1x16xf32>
    %1022 = arith.mulf %1013, %971 : vector<1x16xf32>
    %1023 = arith.addf %1021, %1022 : vector<1x16xf32>
    %1024 = arith.index_cast %c13_i32 : i32 to index
    %c0_236 = arith.constant 0 : index
    %1025 = vector.load %arg35[%1024, %c0_236] : memref<16x16xf32, #tpu.memory_space<vmem>>, vector<1x16xf32>
    tpu.vector_store %arg35[%1024, %c0_236], %997 {strides = array<i32>} : memref<16x16xf32, #tpu.memory_space<vmem>>, vector<1x16xf32>,
    %1026 = arith.index_cast %963 : i32 to index
    %c0_237 = arith.constant 0 : index
    %1027 = vector.load %arg36[%1026, %c0_237] : memref<16x16xf32, #tpu.memory_space<vmem>>, vector<1x16xf32>
    tpu.vector_store %arg36[%1026, %c0_237], %1023 {strides = array<i32>} : memref<16x16xf32, #tpu.memory_space<vmem>>, vector<1x16xf32>,
    %1028 = tpu.concatenate %997, %1023 in 1 : vector<1x16xf32>, vector<1x16xf32> -> vector<1x32xf32>
    %c14_i32 = arith.constant 14 : i32
    %c15_i32_238 = arith.constant 15 : i32
    %1029 = arith.subi %c15_i32_238, %c14_i32 : i32
    %cst_239 = arith.constant dense<0.000000e+00> : vector<1x96xf32>
    %1030 = tpu.matmul %1028, %102, %cst_239 {dimension_numbers = #tpu.dot_dimension_numbers<[1], [0], [0], [1], [0, 0, 1, 1], [], []>} : vector<1x32xf32>, vector<32x96xf32>, vector<1x96xf32> -> vector<1x96xf32>
    %1031 = arith.addf %1030, %103 : vector<1x96xf32>
    %1032 = arith.index_cast %c14_i32 : i32 to index
    %c0_240 = arith.constant 0 : index
    %1033 = vector.load %arg34[%1032, %c0_240] : memref<16x96xf32, #tpu.memory_space<vmem>>, vector<1x96xf32>
    %1034 = arith.index_cast %1029 : i32 to index
    %c0_241 = arith.constant 0 : index
    %1035 = vector.load %arg34[%1034, %c0_241] : memref<16x96xf32, #tpu.memory_space<vmem>>, vector<1x96xf32>
    %1036 = vector.extract_strided_slice %1028 {offsets = [0, 0], sizes = [1, 16], strides = [1, 1]} : vector<1x32xf32> to vector<1x16xf32>
    %1037 = vector.extract_strided_slice %1028 {offsets = [0, 16], sizes = [1, 16], strides = [1, 1]} : vector<1x32xf32> to vector<1x16xf32>
    %1038 = vector.extract_strided_slice %1033 {offsets = [0, 0], sizes = [1, 16], strides = [1, 1]} : vector<1x96xf32> to vector<1x16xf32>
    %1039 = vector.extract_strided_slice %1031 {offsets = [0, 0], sizes = [1, 16], strides = [1, 1]} : vector<1x96xf32> to vector<1x16xf32>
    %1040 = arith.addf %1038, %1039 : vector<1x16xf32>
    %1041 = arith.negf %1040 : vector<1x16xf32>
    %1042 = math.exp %1041 : vector<1x16xf32>
    %cst_242 = arith.constant 1.000000e+00 : f32
    %1043 = vector.broadcast %cst_242 : f32 to vector<1x16xf32>
    %1044 = arith.addf %1043, %1042 : vector<1x16xf32>
    %1045 = arith.divf %1043, %1044 : vector<1x16xf32>
    %1046 = vector.extract_strided_slice %1033 {offsets = [0, 16], sizes = [1, 16], strides = [1, 1]} : vector<1x96xf32> to vector<1x16xf32>
    %1047 = vector.extract_strided_slice %1031 {offsets = [0, 16], sizes = [1, 16], strides = [1, 1]} : vector<1x96xf32> to vector<1x16xf32>
    %1048 = arith.addf %1046, %1047 : vector<1x16xf32>
    %1049 = arith.negf %1048 : vector<1x16xf32>
    %1050 = math.exp %1049 : vector<1x16xf32>
    %cst_243 = arith.constant 1.000000e+00 : f32
    %1051 = vector.broadcast %cst_243 : f32 to vector<1x16xf32>
    %1052 = arith.addf %1051, %1050 : vector<1x16xf32>
    %1053 = arith.divf %1051, %1052 : vector<1x16xf32>
    %1054 = vector.extract_strided_slice %1033 {offsets = [0, 32], sizes = [1, 16], strides = [1, 1]} : vector<1x96xf32> to vector<1x16xf32>
    %1055 = vector.extract_strided_slice %1031 {offsets = [0, 32], sizes = [1, 16], strides = [1, 1]} : vector<1x96xf32> to vector<1x16xf32>
    %1056 = arith.mulf %1045, %1055 : vector<1x16xf32>
    %1057 = arith.addf %1054, %1056 : vector<1x16xf32>
    %1058 = math.tanh %1057 : vector<1x16xf32>
    %cst_244 = arith.constant 1.000000e+00 : f32
    %1059 = vector.broadcast %cst_244 : f32 to vector<1x16xf32>
    %1060 = arith.subf %1059, %1053 : vector<1x16xf32>
    %1061 = arith.mulf %1060, %1058 : vector<1x16xf32>
    %1062 = arith.mulf %1053, %1036 : vector<1x16xf32>
    %1063 = arith.addf %1061, %1062 : vector<1x16xf32>
    %1064 = vector.extract_strided_slice %1035 {offsets = [0, 48], sizes = [1, 16], strides = [1, 1]} : vector<1x96xf32> to vector<1x16xf32>
    %1065 = vector.extract_strided_slice %1031 {offsets = [0, 48], sizes = [1, 16], strides = [1, 1]} : vector<1x96xf32> to vector<1x16xf32>
    %1066 = arith.addf %1064, %1065 : vector<1x16xf32>
    %1067 = arith.negf %1066 : vector<1x16xf32>
    %1068 = math.exp %1067 : vector<1x16xf32>
    %cst_245 = arith.constant 1.000000e+00 : f32
    %1069 = vector.broadcast %cst_245 : f32 to vector<1x16xf32>
    %1070 = arith.addf %1069, %1068 : vector<1x16xf32>
    %1071 = arith.divf %1069, %1070 : vector<1x16xf32>
    %1072 = vector.extract_strided_slice %1035 {offsets = [0, 64], sizes = [1, 16], strides = [1, 1]} : vector<1x96xf32> to vector<1x16xf32>
    %1073 = vector.extract_strided_slice %1031 {offsets = [0, 64], sizes = [1, 16], strides = [1, 1]} : vector<1x96xf32> to vector<1x16xf32>
    %1074 = arith.addf %1072, %1073 : vector<1x16xf32>
    %1075 = arith.negf %1074 : vector<1x16xf32>
    %1076 = math.exp %1075 : vector<1x16xf32>
    %cst_246 = arith.constant 1.000000e+00 : f32
    %1077 = vector.broadcast %cst_246 : f32 to vector<1x16xf32>
    %1078 = arith.addf %1077, %1076 : vector<1x16xf32>
    %1079 = arith.divf %1077, %1078 : vector<1x16xf32>
    %1080 = vector.extract_strided_slice %1035 {offsets = [0, 80], sizes = [1, 16], strides = [1, 1]} : vector<1x96xf32> to vector<1x16xf32>
    %1081 = vector.extract_strided_slice %1031 {offsets = [0, 80], sizes = [1, 16], strides = [1, 1]} : vector<1x96xf32> to vector<1x16xf32>
    %1082 = arith.mulf %1071, %1081 : vector<1x16xf32>
    %1083 = arith.addf %1080, %1082 : vector<1x16xf32>
    %1084 = math.tanh %1083 : vector<1x16xf32>
    %cst_247 = arith.constant 1.000000e+00 : f32
    %1085 = vector.broadcast %cst_247 : f32 to vector<1x16xf32>
    %1086 = arith.subf %1085, %1079 : vector<1x16xf32>
    %1087 = arith.mulf %1086, %1084 : vector<1x16xf32>
    %1088 = arith.mulf %1079, %1037 : vector<1x16xf32>
    %1089 = arith.addf %1087, %1088 : vector<1x16xf32>
    %1090 = arith.index_cast %c14_i32 : i32 to index
    %c0_248 = arith.constant 0 : index
    %1091 = vector.load %arg35[%1090, %c0_248] : memref<16x16xf32, #tpu.memory_space<vmem>>, vector<1x16xf32>
    tpu.vector_store %arg35[%1090, %c0_248], %1063 {strides = array<i32>} : memref<16x16xf32, #tpu.memory_space<vmem>>, vector<1x16xf32>,
    %1092 = arith.index_cast %1029 : i32 to index
    %c0_249 = arith.constant 0 : index
    %1093 = vector.load %arg36[%1092, %c0_249] : memref<16x16xf32, #tpu.memory_space<vmem>>, vector<1x16xf32>
    tpu.vector_store %arg36[%1092, %c0_249], %1089 {strides = array<i32>} : memref<16x16xf32, #tpu.memory_space<vmem>>, vector<1x16xf32>,
    %1094 = tpu.concatenate %1063, %1089 in 1 : vector<1x16xf32>, vector<1x16xf32> -> vector<1x32xf32>
    %c15_i32_250 = arith.constant 15 : i32
    %c15_i32_251 = arith.constant 15 : i32
    %1095 = arith.subi %c15_i32_251, %c15_i32_250 : i32
    %cst_252 = arith.constant dense<0.000000e+00> : vector<1x96xf32>
    %1096 = tpu.matmul %1094, %102, %cst_252 {dimension_numbers = #tpu.dot_dimension_numbers<[1], [0], [0], [1], [0, 0, 1, 1], [], []>} : vector<1x32xf32>, vector<32x96xf32>, vector<1x96xf32> -> vector<1x96xf32>
    %1097 = arith.addf %1096, %103 : vector<1x96xf32>
    %1098 = arith.index_cast %c15_i32_250 : i32 to index
    %c0_253 = arith.constant 0 : index
    %1099 = vector.load %arg34[%1098, %c0_253] : memref<16x96xf32, #tpu.memory_space<vmem>>, vector<1x96xf32>
    %1100 = arith.index_cast %1095 : i32 to index
    %c0_254 = arith.constant 0 : index
    %1101 = vector.load %arg34[%1100, %c0_254] : memref<16x96xf32, #tpu.memory_space<vmem>>, vector<1x96xf32>
    %1102 = vector.extract_strided_slice %1094 {offsets = [0, 0], sizes = [1, 16], strides = [1, 1]} : vector<1x32xf32> to vector<1x16xf32>
    %1103 = vector.extract_strided_slice %1094 {offsets = [0, 16], sizes = [1, 16], strides = [1, 1]} : vector<1x32xf32> to vector<1x16xf32>
    %1104 = vector.extract_strided_slice %1099 {offsets = [0, 0], sizes = [1, 16], strides = [1, 1]} : vector<1x96xf32> to vector<1x16xf32>
    %1105 = vector.extract_strided_slice %1097 {offsets = [0, 0], sizes = [1, 16], strides = [1, 1]} : vector<1x96xf32> to vector<1x16xf32>
    %1106 = arith.addf %1104, %1105 : vector<1x16xf32>
    %1107 = arith.negf %1106 : vector<1x16xf32>
    %1108 = math.exp %1107 : vector<1x16xf32>
    %cst_255 = arith.constant 1.000000e+00 : f32
    %1109 = vector.broadcast %cst_255 : f32 to vector<1x16xf32>
    %1110 = arith.addf %1109, %1108 : vector<1x16xf32>
    %1111 = arith.divf %1109, %1110 : vector<1x16xf32>
    %1112 = vector.extract_strided_slice %1099 {offsets = [0, 16], sizes = [1, 16], strides = [1, 1]} : vector<1x96xf32> to vector<1x16xf32>
    %1113 = vector.extract_strided_slice %1097 {offsets = [0, 16], sizes = [1, 16], strides = [1, 1]} : vector<1x96xf32> to vector<1x16xf32>
    %1114 = arith.addf %1112, %1113 : vector<1x16xf32>
    %1115 = arith.negf %1114 : vector<1x16xf32>
    %1116 = math.exp %1115 : vector<1x16xf32>
    %cst_256 = arith.constant 1.000000e+00 : f32
    %1117 = vector.broadcast %cst_256 : f32 to vector<1x16xf32>
    %1118 = arith.addf %1117, %1116 : vector<1x16xf32>
    %1119 = arith.divf %1117, %1118 : vector<1x16xf32>
    %1120 = vector.extract_strided_slice %1099 {offsets = [0, 32], sizes = [1, 16], strides = [1, 1]} : vector<1x96xf32> to vector<1x16xf32>
    %1121 = vector.extract_strided_slice %1097 {offsets = [0, 32], sizes = [1, 16], strides = [1, 1]} : vector<1x96xf32> to vector<1x16xf32>
    %1122 = arith.mulf %1111, %1121 : vector<1x16xf32>
    %1123 = arith.addf %1120, %1122 : vector<1x16xf32>
    %1124 = math.tanh %1123 : vector<1x16xf32>
    %cst_257 = arith.constant 1.000000e+00 : f32
    %1125 = vector.broadcast %cst_257 : f32 to vector<1x16xf32>
    %1126 = arith.subf %1125, %1119 : vector<1x16xf32>
    %1127 = arith.mulf %1126, %1124 : vector<1x16xf32>
    %1128 = arith.mulf %1119, %1102 : vector<1x16xf32>
    %1129 = arith.addf %1127, %1128 : vector<1x16xf32>
    %1130 = vector.extract_strided_slice %1101 {offsets = [0, 48], sizes = [1, 16], strides = [1, 1]} : vector<1x96xf32> to vector<1x16xf32>
    %1131 = vector.extract_strided_slice %1097 {offsets = [0, 48], sizes = [1, 16], strides = [1, 1]} : vector<1x96xf32> to vector<1x16xf32>
    %1132 = arith.addf %1130, %1131 : vector<1x16xf32>
    %1133 = arith.negf %1132 : vector<1x16xf32>
    %1134 = math.exp %1133 : vector<1x16xf32>
    %cst_258 = arith.constant 1.000000e+00 : f32
    %1135 = vector.broadcast %cst_258 : f32 to vector<1x16xf32>
    %1136 = arith.addf %1135, %1134 : vector<1x16xf32>
    %1137 = arith.divf %1135, %1136 : vector<1x16xf32>
    %1138 = vector.extract_strided_slice %1101 {offsets = [0, 64], sizes = [1, 16], strides = [1, 1]} : vector<1x96xf32> to vector<1x16xf32>
    %1139 = vector.extract_strided_slice %1097 {offsets = [0, 64], sizes = [1, 16], strides = [1, 1]} : vector<1x96xf32> to vector<1x16xf32>
    %1140 = arith.addf %1138, %1139 : vector<1x16xf32>
    %1141 = arith.negf %1140 : vector<1x16xf32>
    %1142 = math.exp %1141 : vector<1x16xf32>
    %cst_259 = arith.constant 1.000000e+00 : f32
    %1143 = vector.broadcast %cst_259 : f32 to vector<1x16xf32>
    %1144 = arith.addf %1143, %1142 : vector<1x16xf32>
    %1145 = arith.divf %1143, %1144 : vector<1x16xf32>
    %1146 = vector.extract_strided_slice %1101 {offsets = [0, 80], sizes = [1, 16], strides = [1, 1]} : vector<1x96xf32> to vector<1x16xf32>
    %1147 = vector.extract_strided_slice %1097 {offsets = [0, 80], sizes = [1, 16], strides = [1, 1]} : vector<1x96xf32> to vector<1x16xf32>
    %1148 = arith.mulf %1137, %1147 : vector<1x16xf32>
    %1149 = arith.addf %1146, %1148 : vector<1x16xf32>
    %1150 = math.tanh %1149 : vector<1x16xf32>
    %cst_260 = arith.constant 1.000000e+00 : f32
    %1151 = vector.broadcast %cst_260 : f32 to vector<1x16xf32>
    %1152 = arith.subf %1151, %1145 : vector<1x16xf32>
    %1153 = arith.mulf %1152, %1150 : vector<1x16xf32>
    %1154 = arith.mulf %1145, %1103 : vector<1x16xf32>
    %1155 = arith.addf %1153, %1154 : vector<1x16xf32>
    %1156 = arith.index_cast %c15_i32_250 : i32 to index
    %c0_261 = arith.constant 0 : index
    %1157 = vector.load %arg35[%1156, %c0_261] : memref<16x16xf32, #tpu.memory_space<vmem>>, vector<1x16xf32>
    tpu.vector_store %arg35[%1156, %c0_261], %1129 {strides = array<i32>} : memref<16x16xf32, #tpu.memory_space<vmem>>, vector<1x16xf32>,
    %1158 = arith.index_cast %1095 : i32 to index
    %c0_262 = arith.constant 0 : index
    %1159 = vector.load %arg36[%1158, %c0_262] : memref<16x16xf32, #tpu.memory_space<vmem>>, vector<1x16xf32>
    tpu.vector_store %arg36[%1158, %c0_262], %1155 {strides = array<i32>} : memref<16x16xf32, #tpu.memory_space<vmem>>, vector<1x16xf32>,
    %1160 = tpu.concatenate %1129, %1155 in 1 : vector<1x16xf32>, vector<1x16xf32> -> vector<1x32xf32>
    %c16_i32 = arith.constant 16 : i32
    %c0_263 = arith.constant 0 : index
    %c0_264 = arith.constant 0 : index
    %1161 = vector.load %arg35[%c0_263, %c0_264] : memref<16x16xf32, #tpu.memory_space<vmem>>, vector<16x16xf32>
    %c0_265 = arith.constant 0 : index
    %c0_266 = arith.constant 0 : index
    %1162 = vector.load %arg36[%c0_265, %c0_266] : memref<16x16xf32, #tpu.memory_space<vmem>>, vector<16x16xf32>
    %1163 = tpu.concatenate %1161, %1162 in 1 : vector<16x16xf32>, vector<16x16xf32> -> vector<16x32xf32>
    %c0_267 = arith.constant 0 : index
    %c0_268 = arith.constant 0 : index
    %1164 = vector.load %arg18[%c0_267, %c0_268] : memref<32x96xf32, #tpu.memory_space<vmem>>, vector<32x96xf32>
    %cst_269 = arith.constant dense<0.000000e+00> : vector<16x96xf32>
    %1165 = tpu.matmul %1163, %1164, %cst_269 {dimension_numbers = #tpu.dot_dimension_numbers<[1], [0], [0], [1], [0, 0, 1, 1], [], []>} : vector<16x32xf32>, vector<32x96xf32>, vector<16x96xf32> -> vector<16x96xf32>
    %c0_270 = arith.constant 0 : index
    %c0_271 = arith.constant 0 : index
    %1166 = vector.load %arg19[%c0_270, %c0_271] : memref<1x96xf32, #tpu.memory_space<vmem>>, vector<1x96xf32>
    %1167 = vector.broadcast %1166 : vector<1x96xf32> to vector<16x96xf32>
    %1168 = arith.addf %1165, %1167 : vector<16x96xf32>
    %c0_272 = arith.constant 0 : index
    %c0_273 = arith.constant 0 : index
    %1169 = vector.load %arg34[%c0_272, %c0_273] : memref<16x96xf32, #tpu.memory_space<vmem>>, vector<16x96xf32>
    tpu.vector_store %arg34[%c0_272, %c0_273], %1168 {strides = array<i32>} : memref<16x96xf32, #tpu.memory_space<vmem>>, vector<16x96xf32>,
    %c0_274 = arith.constant 0 : index
    %c0_275 = arith.constant 0 : index
    %1170 = vector.load %arg20[%c0_274, %c0_275] : memref<32x96xf32, #tpu.memory_space<vmem>>, vector<32x96xf32>
    %c0_276 = arith.constant 0 : index
    %c0_277 = arith.constant 0 : index
    %1171 = vector.load %arg21[%c0_276, %c0_277] : memref<1x96xf32, #tpu.memory_space<vmem>>, vector<1x96xf32>
    %cst_278 = arith.constant 0.000000e+00 : f32
    %1172 = vector.broadcast %cst_278 : f32 to vector<1x32xf32>
    %c0_i32_279 = arith.constant 0 : i32
    %c15_i32_280 = arith.constant 15 : i32
    %1173 = arith.subi %c15_i32_280, %c0_i32_279 : i32
    %cst_281 = arith.constant dense<0.000000e+00> : vector<1x96xf32>
    %1174 = tpu.matmul %1172, %1170, %cst_281 {dimension_numbers = #tpu.dot_dimension_numbers<[1], [0], [0], [1], [0, 0, 1, 1], [], []>} : vector<1x32xf32>, vector<32x96xf32>, vector<1x96xf32> -> vector<1x96xf32>
    %1175 = arith.addf %1174, %1171 : vector<1x96xf32>
    %1176 = arith.index_cast %c0_i32_279 : i32 to index
    %c0_282 = arith.constant 0 : index
    %1177 = vector.load %arg34[%1176, %c0_282] : memref<16x96xf32, #tpu.memory_space<vmem>>, vector<1x96xf32>
    %1178 = arith.index_cast %1173 : i32 to index
    %c0_283 = arith.constant 0 : index
    %1179 = vector.load %arg34[%1178, %c0_283] : memref<16x96xf32, #tpu.memory_space<vmem>>, vector<1x96xf32>
    %1180 = vector.extract_strided_slice %1172 {offsets = [0, 0], sizes = [1, 16], strides = [1, 1]} : vector<1x32xf32> to vector<1x16xf32>
    %1181 = vector.extract_strided_slice %1172 {offsets = [0, 16], sizes = [1, 16], strides = [1, 1]} : vector<1x32xf32> to vector<1x16xf32>
    %1182 = vector.extract_strided_slice %1177 {offsets = [0, 0], sizes = [1, 16], strides = [1, 1]} : vector<1x96xf32> to vector<1x16xf32>
    %1183 = vector.extract_strided_slice %1175 {offsets = [0, 0], sizes = [1, 16], strides = [1, 1]} : vector<1x96xf32> to vector<1x16xf32>
    %1184 = arith.addf %1182, %1183 : vector<1x16xf32>
    %1185 = arith.negf %1184 : vector<1x16xf32>
    %1186 = math.exp %1185 : vector<1x16xf32>
    %cst_284 = arith.constant 1.000000e+00 : f32
    %1187 = vector.broadcast %cst_284 : f32 to vector<1x16xf32>
    %1188 = arith.addf %1187, %1186 : vector<1x16xf32>
    %1189 = arith.divf %1187, %1188 : vector<1x16xf32>
    %1190 = vector.extract_strided_slice %1177 {offsets = [0, 16], sizes = [1, 16], strides = [1, 1]} : vector<1x96xf32> to vector<1x16xf32>
    %1191 = vector.extract_strided_slice %1175 {offsets = [0, 16], sizes = [1, 16], strides = [1, 1]} : vector<1x96xf32> to vector<1x16xf32>
    %1192 = arith.addf %1190, %1191 : vector<1x16xf32>
    %1193 = arith.negf %1192 : vector<1x16xf32>
    %1194 = math.exp %1193 : vector<1x16xf32>
    %cst_285 = arith.constant 1.000000e+00 : f32
    %1195 = vector.broadcast %cst_285 : f32 to vector<1x16xf32>
    %1196 = arith.addf %1195, %1194 : vector<1x16xf32>
    %1197 = arith.divf %1195, %1196 : vector<1x16xf32>
    %1198 = vector.extract_strided_slice %1177 {offsets = [0, 32], sizes = [1, 16], strides = [1, 1]} : vector<1x96xf32> to vector<1x16xf32>
    %1199 = vector.extract_strided_slice %1175 {offsets = [0, 32], sizes = [1, 16], strides = [1, 1]} : vector<1x96xf32> to vector<1x16xf32>
    %1200 = arith.mulf %1189, %1199 : vector<1x16xf32>
    %1201 = arith.addf %1198, %1200 : vector<1x16xf32>
    %1202 = math.tanh %1201 : vector<1x16xf32>
    %cst_286 = arith.constant 1.000000e+00 : f32
    %1203 = vector.broadcast %cst_286 : f32 to vector<1x16xf32>
    %1204 = arith.subf %1203, %1197 : vector<1x16xf32>
    %1205 = arith.mulf %1204, %1202 : vector<1x16xf32>
    %1206 = arith.mulf %1197, %1180 : vector<1x16xf32>
    %1207 = arith.addf %1205, %1206 : vector<1x16xf32>
    %1208 = vector.extract_strided_slice %1179 {offsets = [0, 48], sizes = [1, 16], strides = [1, 1]} : vector<1x96xf32> to vector<1x16xf32>
    %1209 = vector.extract_strided_slice %1175 {offsets = [0, 48], sizes = [1, 16], strides = [1, 1]} : vector<1x96xf32> to vector<1x16xf32>
    %1210 = arith.addf %1208, %1209 : vector<1x16xf32>
    %1211 = arith.negf %1210 : vector<1x16xf32>
    %1212 = math.exp %1211 : vector<1x16xf32>
    %cst_287 = arith.constant 1.000000e+00 : f32
    %1213 = vector.broadcast %cst_287 : f32 to vector<1x16xf32>
    %1214 = arith.addf %1213, %1212 : vector<1x16xf32>
    %1215 = arith.divf %1213, %1214 : vector<1x16xf32>
    %1216 = vector.extract_strided_slice %1179 {offsets = [0, 64], sizes = [1, 16], strides = [1, 1]} : vector<1x96xf32> to vector<1x16xf32>
    %1217 = vector.extract_strided_slice %1175 {offsets = [0, 64], sizes = [1, 16], strides = [1, 1]} : vector<1x96xf32> to vector<1x16xf32>
    %1218 = arith.addf %1216, %1217 : vector<1x16xf32>
    %1219 = arith.negf %1218 : vector<1x16xf32>
    %1220 = math.exp %1219 : vector<1x16xf32>
    %cst_288 = arith.constant 1.000000e+00 : f32
    %1221 = vector.broadcast %cst_288 : f32 to vector<1x16xf32>
    %1222 = arith.addf %1221, %1220 : vector<1x16xf32>
    %1223 = arith.divf %1221, %1222 : vector<1x16xf32>
    %1224 = vector.extract_strided_slice %1179 {offsets = [0, 80], sizes = [1, 16], strides = [1, 1]} : vector<1x96xf32> to vector<1x16xf32>
    %1225 = vector.extract_strided_slice %1175 {offsets = [0, 80], sizes = [1, 16], strides = [1, 1]} : vector<1x96xf32> to vector<1x16xf32>
    %1226 = arith.mulf %1215, %1225 : vector<1x16xf32>
    %1227 = arith.addf %1224, %1226 : vector<1x16xf32>
    %1228 = math.tanh %1227 : vector<1x16xf32>
    %cst_289 = arith.constant 1.000000e+00 : f32
    %1229 = vector.broadcast %cst_289 : f32 to vector<1x16xf32>
    %1230 = arith.subf %1229, %1223 : vector<1x16xf32>
    %1231 = arith.mulf %1230, %1228 : vector<1x16xf32>
    %1232 = arith.mulf %1223, %1181 : vector<1x16xf32>
    %1233 = arith.addf %1231, %1232 : vector<1x16xf32>
    %1234 = arith.index_cast %c0_i32_279 : i32 to index
    %c0_290 = arith.constant 0 : index
    %1235 = vector.load %arg35[%1234, %c0_290] : memref<16x16xf32, #tpu.memory_space<vmem>>, vector<1x16xf32>
    tpu.vector_store %arg35[%1234, %c0_290], %1207 {strides = array<i32>} : memref<16x16xf32, #tpu.memory_space<vmem>>, vector<1x16xf32>,
    %1236 = arith.index_cast %1173 : i32 to index
    %c0_291 = arith.constant 0 : index
    %1237 = vector.load %arg36[%1236, %c0_291] : memref<16x16xf32, #tpu.memory_space<vmem>>, vector<1x16xf32>
    tpu.vector_store %arg36[%1236, %c0_291], %1233 {strides = array<i32>} : memref<16x16xf32, #tpu.memory_space<vmem>>, vector<1x16xf32>,
    %1238 = tpu.concatenate %1207, %1233 in 1 : vector<1x16xf32>, vector<1x16xf32> -> vector<1x32xf32>
    %c1_i32_292 = arith.constant 1 : i32
    %c15_i32_293 = arith.constant 15 : i32
    %1239 = arith.subi %c15_i32_293, %c1_i32_292 : i32
    %cst_294 = arith.constant dense<0.000000e+00> : vector<1x96xf32>
    %1240 = tpu.matmul %1238, %1170, %cst_294 {dimension_numbers = #tpu.dot_dimension_numbers<[1], [0], [0], [1], [0, 0, 1, 1], [], []>} : vector<1x32xf32>, vector<32x96xf32>, vector<1x96xf32> -> vector<1x96xf32>
    %1241 = arith.addf %1240, %1171 : vector<1x96xf32>
    %1242 = arith.index_cast %c1_i32_292 : i32 to index
    %c0_295 = arith.constant 0 : index
    %1243 = vector.load %arg34[%1242, %c0_295] : memref<16x96xf32, #tpu.memory_space<vmem>>, vector<1x96xf32>
    %1244 = arith.index_cast %1239 : i32 to index
    %c0_296 = arith.constant 0 : index
    %1245 = vector.load %arg34[%1244, %c0_296] : memref<16x96xf32, #tpu.memory_space<vmem>>, vector<1x96xf32>
    %1246 = vector.extract_strided_slice %1238 {offsets = [0, 0], sizes = [1, 16], strides = [1, 1]} : vector<1x32xf32> to vector<1x16xf32>
    %1247 = vector.extract_strided_slice %1238 {offsets = [0, 16], sizes = [1, 16], strides = [1, 1]} : vector<1x32xf32> to vector<1x16xf32>
    %1248 = vector.extract_strided_slice %1243 {offsets = [0, 0], sizes = [1, 16], strides = [1, 1]} : vector<1x96xf32> to vector<1x16xf32>
    %1249 = vector.extract_strided_slice %1241 {offsets = [0, 0], sizes = [1, 16], strides = [1, 1]} : vector<1x96xf32> to vector<1x16xf32>
    %1250 = arith.addf %1248, %1249 : vector<1x16xf32>
    %1251 = arith.negf %1250 : vector<1x16xf32>
    %1252 = math.exp %1251 : vector<1x16xf32>
    %cst_297 = arith.constant 1.000000e+00 : f32
    %1253 = vector.broadcast %cst_297 : f32 to vector<1x16xf32>
    %1254 = arith.addf %1253, %1252 : vector<1x16xf32>
    %1255 = arith.divf %1253, %1254 : vector<1x16xf32>
    %1256 = vector.extract_strided_slice %1243 {offsets = [0, 16], sizes = [1, 16], strides = [1, 1]} : vector<1x96xf32> to vector<1x16xf32>
    %1257 = vector.extract_strided_slice %1241 {offsets = [0, 16], sizes = [1, 16], strides = [1, 1]} : vector<1x96xf32> to vector<1x16xf32>
    %1258 = arith.addf %1256, %1257 : vector<1x16xf32>
    %1259 = arith.negf %1258 : vector<1x16xf32>
    %1260 = math.exp %1259 : vector<1x16xf32>
    %cst_298 = arith.constant 1.000000e+00 : f32
    %1261 = vector.broadcast %cst_298 : f32 to vector<1x16xf32>
    %1262 = arith.addf %1261, %1260 : vector<1x16xf32>
    %1263 = arith.divf %1261, %1262 : vector<1x16xf32>
    %1264 = vector.extract_strided_slice %1243 {offsets = [0, 32], sizes = [1, 16], strides = [1, 1]} : vector<1x96xf32> to vector<1x16xf32>
    %1265 = vector.extract_strided_slice %1241 {offsets = [0, 32], sizes = [1, 16], strides = [1, 1]} : vector<1x96xf32> to vector<1x16xf32>
    %1266 = arith.mulf %1255, %1265 : vector<1x16xf32>
    %1267 = arith.addf %1264, %1266 : vector<1x16xf32>
    %1268 = math.tanh %1267 : vector<1x16xf32>
    %cst_299 = arith.constant 1.000000e+00 : f32
    %1269 = vector.broadcast %cst_299 : f32 to vector<1x16xf32>
    %1270 = arith.subf %1269, %1263 : vector<1x16xf32>
    %1271 = arith.mulf %1270, %1268 : vector<1x16xf32>
    %1272 = arith.mulf %1263, %1246 : vector<1x16xf32>
    %1273 = arith.addf %1271, %1272 : vector<1x16xf32>
    %1274 = vector.extract_strided_slice %1245 {offsets = [0, 48], sizes = [1, 16], strides = [1, 1]} : vector<1x96xf32> to vector<1x16xf32>
    %1275 = vector.extract_strided_slice %1241 {offsets = [0, 48], sizes = [1, 16], strides = [1, 1]} : vector<1x96xf32> to vector<1x16xf32>
    %1276 = arith.addf %1274, %1275 : vector<1x16xf32>
    %1277 = arith.negf %1276 : vector<1x16xf32>
    %1278 = math.exp %1277 : vector<1x16xf32>
    %cst_300 = arith.constant 1.000000e+00 : f32
    %1279 = vector.broadcast %cst_300 : f32 to vector<1x16xf32>
    %1280 = arith.addf %1279, %1278 : vector<1x16xf32>
    %1281 = arith.divf %1279, %1280 : vector<1x16xf32>
    %1282 = vector.extract_strided_slice %1245 {offsets = [0, 64], sizes = [1, 16], strides = [1, 1]} : vector<1x96xf32> to vector<1x16xf32>
    %1283 = vector.extract_strided_slice %1241 {offsets = [0, 64], sizes = [1, 16], strides = [1, 1]} : vector<1x96xf32> to vector<1x16xf32>
    %1284 = arith.addf %1282, %1283 : vector<1x16xf32>
    %1285 = arith.negf %1284 : vector<1x16xf32>
    %1286 = math.exp %1285 : vector<1x16xf32>
    %cst_301 = arith.constant 1.000000e+00 : f32
    %1287 = vector.broadcast %cst_301 : f32 to vector<1x16xf32>
    %1288 = arith.addf %1287, %1286 : vector<1x16xf32>
    %1289 = arith.divf %1287, %1288 : vector<1x16xf32>
    %1290 = vector.extract_strided_slice %1245 {offsets = [0, 80], sizes = [1, 16], strides = [1, 1]} : vector<1x96xf32> to vector<1x16xf32>
    %1291 = vector.extract_strided_slice %1241 {offsets = [0, 80], sizes = [1, 16], strides = [1, 1]} : vector<1x96xf32> to vector<1x16xf32>
    %1292 = arith.mulf %1281, %1291 : vector<1x16xf32>
    %1293 = arith.addf %1290, %1292 : vector<1x16xf32>
    %1294 = math.tanh %1293 : vector<1x16xf32>
    %cst_302 = arith.constant 1.000000e+00 : f32
    %1295 = vector.broadcast %cst_302 : f32 to vector<1x16xf32>
    %1296 = arith.subf %1295, %1289 : vector<1x16xf32>
    %1297 = arith.mulf %1296, %1294 : vector<1x16xf32>
    %1298 = arith.mulf %1289, %1247 : vector<1x16xf32>
    %1299 = arith.addf %1297, %1298 : vector<1x16xf32>
    %1300 = arith.index_cast %c1_i32_292 : i32 to index
    %c0_303 = arith.constant 0 : index
    %1301 = vector.load %arg35[%1300, %c0_303] : memref<16x16xf32, #tpu.memory_space<vmem>>, vector<1x16xf32>
    tpu.vector_store %arg35[%1300, %c0_303], %1273 {strides = array<i32>} : memref<16x16xf32, #tpu.memory_space<vmem>>, vector<1x16xf32>,
    %1302 = arith.index_cast %1239 : i32 to index
    %c0_304 = arith.constant 0 : index
    %1303 = vector.load %arg36[%1302, %c0_304] : memref<16x16xf32, #tpu.memory_space<vmem>>, vector<1x16xf32>
    tpu.vector_store %arg36[%1302, %c0_304], %1299 {strides = array<i32>} : memref<16x16xf32, #tpu.memory_space<vmem>>, vector<1x16xf32>,
    %1304 = tpu.concatenate %1273, %1299 in 1 : vector<1x16xf32>, vector<1x16xf32> -> vector<1x32xf32>
    %c2_i32_305 = arith.constant 2 : i32
    %c15_i32_306 = arith.constant 15 : i32
    %1305 = arith.subi %c15_i32_306, %c2_i32_305 : i32
    %cst_307 = arith.constant dense<0.000000e+00> : vector<1x96xf32>
    %1306 = tpu.matmul %1304, %1170, %cst_307 {dimension_numbers = #tpu.dot_dimension_numbers<[1], [0], [0], [1], [0, 0, 1, 1], [], []>} : vector<1x32xf32>, vector<32x96xf32>, vector<1x96xf32> -> vector<1x96xf32>
    %1307 = arith.addf %1306, %1171 : vector<1x96xf32>
    %1308 = arith.index_cast %c2_i32_305 : i32 to index
    %c0_308 = arith.constant 0 : index
    %1309 = vector.load %arg34[%1308, %c0_308] : memref<16x96xf32, #tpu.memory_space<vmem>>, vector<1x96xf32>
    %1310 = arith.index_cast %1305 : i32 to index
    %c0_309 = arith.constant 0 : index
    %1311 = vector.load %arg34[%1310, %c0_309] : memref<16x96xf32, #tpu.memory_space<vmem>>, vector<1x96xf32>
    %1312 = vector.extract_strided_slice %1304 {offsets = [0, 0], sizes = [1, 16], strides = [1, 1]} : vector<1x32xf32> to vector<1x16xf32>
    %1313 = vector.extract_strided_slice %1304 {offsets = [0, 16], sizes = [1, 16], strides = [1, 1]} : vector<1x32xf32> to vector<1x16xf32>
    %1314 = vector.extract_strided_slice %1309 {offsets = [0, 0], sizes = [1, 16], strides = [1, 1]} : vector<1x96xf32> to vector<1x16xf32>
    %1315 = vector.extract_strided_slice %1307 {offsets = [0, 0], sizes = [1, 16], strides = [1, 1]} : vector<1x96xf32> to vector<1x16xf32>
    %1316 = arith.addf %1314, %1315 : vector<1x16xf32>
    %1317 = arith.negf %1316 : vector<1x16xf32>
    %1318 = math.exp %1317 : vector<1x16xf32>
    %cst_310 = arith.constant 1.000000e+00 : f32
    %1319 = vector.broadcast %cst_310 : f32 to vector<1x16xf32>
    %1320 = arith.addf %1319, %1318 : vector<1x16xf32>
    %1321 = arith.divf %1319, %1320 : vector<1x16xf32>
    %1322 = vector.extract_strided_slice %1309 {offsets = [0, 16], sizes = [1, 16], strides = [1, 1]} : vector<1x96xf32> to vector<1x16xf32>
    %1323 = vector.extract_strided_slice %1307 {offsets = [0, 16], sizes = [1, 16], strides = [1, 1]} : vector<1x96xf32> to vector<1x16xf32>
    %1324 = arith.addf %1322, %1323 : vector<1x16xf32>
    %1325 = arith.negf %1324 : vector<1x16xf32>
    %1326 = math.exp %1325 : vector<1x16xf32>
    %cst_311 = arith.constant 1.000000e+00 : f32
    %1327 = vector.broadcast %cst_311 : f32 to vector<1x16xf32>
    %1328 = arith.addf %1327, %1326 : vector<1x16xf32>
    %1329 = arith.divf %1327, %1328 : vector<1x16xf32>
    %1330 = vector.extract_strided_slice %1309 {offsets = [0, 32], sizes = [1, 16], strides = [1, 1]} : vector<1x96xf32> to vector<1x16xf32>
    %1331 = vector.extract_strided_slice %1307 {offsets = [0, 32], sizes = [1, 16], strides = [1, 1]} : vector<1x96xf32> to vector<1x16xf32>
    %1332 = arith.mulf %1321, %1331 : vector<1x16xf32>
    %1333 = arith.addf %1330, %1332 : vector<1x16xf32>
    %1334 = math.tanh %1333 : vector<1x16xf32>
    %cst_312 = arith.constant 1.000000e+00 : f32
    %1335 = vector.broadcast %cst_312 : f32 to vector<1x16xf32>
    %1336 = arith.subf %1335, %1329 : vector<1x16xf32>
    %1337 = arith.mulf %1336, %1334 : vector<1x16xf32>
    %1338 = arith.mulf %1329, %1312 : vector<1x16xf32>
    %1339 = arith.addf %1337, %1338 : vector<1x16xf32>
    %1340 = vector.extract_strided_slice %1311 {offsets = [0, 48], sizes = [1, 16], strides = [1, 1]} : vector<1x96xf32> to vector<1x16xf32>
    %1341 = vector.extract_strided_slice %1307 {offsets = [0, 48], sizes = [1, 16], strides = [1, 1]} : vector<1x96xf32> to vector<1x16xf32>
    %1342 = arith.addf %1340, %1341 : vector<1x16xf32>
    %1343 = arith.negf %1342 : vector<1x16xf32>
    %1344 = math.exp %1343 : vector<1x16xf32>
    %cst_313 = arith.constant 1.000000e+00 : f32
    %1345 = vector.broadcast %cst_313 : f32 to vector<1x16xf32>
    %1346 = arith.addf %1345, %1344 : vector<1x16xf32>
    %1347 = arith.divf %1345, %1346 : vector<1x16xf32>
    %1348 = vector.extract_strided_slice %1311 {offsets = [0, 64], sizes = [1, 16], strides = [1, 1]} : vector<1x96xf32> to vector<1x16xf32>
    %1349 = vector.extract_strided_slice %1307 {offsets = [0, 64], sizes = [1, 16], strides = [1, 1]} : vector<1x96xf32> to vector<1x16xf32>
    %1350 = arith.addf %1348, %1349 : vector<1x16xf32>
    %1351 = arith.negf %1350 : vector<1x16xf32>
    %1352 = math.exp %1351 : vector<1x16xf32>
    %cst_314 = arith.constant 1.000000e+00 : f32
    %1353 = vector.broadcast %cst_314 : f32 to vector<1x16xf32>
    %1354 = arith.addf %1353, %1352 : vector<1x16xf32>
    %1355 = arith.divf %1353, %1354 : vector<1x16xf32>
    %1356 = vector.extract_strided_slice %1311 {offsets = [0, 80], sizes = [1, 16], strides = [1, 1]} : vector<1x96xf32> to vector<1x16xf32>
    %1357 = vector.extract_strided_slice %1307 {offsets = [0, 80], sizes = [1, 16], strides = [1, 1]} : vector<1x96xf32> to vector<1x16xf32>
    %1358 = arith.mulf %1347, %1357 : vector<1x16xf32>
    %1359 = arith.addf %1356, %1358 : vector<1x16xf32>
    %1360 = math.tanh %1359 : vector<1x16xf32>
    %cst_315 = arith.constant 1.000000e+00 : f32
    %1361 = vector.broadcast %cst_315 : f32 to vector<1x16xf32>
    %1362 = arith.subf %1361, %1355 : vector<1x16xf32>
    %1363 = arith.mulf %1362, %1360 : vector<1x16xf32>
    %1364 = arith.mulf %1355, %1313 : vector<1x16xf32>
    %1365 = arith.addf %1363, %1364 : vector<1x16xf32>
    %1366 = arith.index_cast %c2_i32_305 : i32 to index
    %c0_316 = arith.constant 0 : index
    %1367 = vector.load %arg35[%1366, %c0_316] : memref<16x16xf32, #tpu.memory_space<vmem>>, vector<1x16xf32>
    tpu.vector_store %arg35[%1366, %c0_316], %1339 {strides = array<i32>} : memref<16x16xf32, #tpu.memory_space<vmem>>, vector<1x16xf32>,
    %1368 = arith.index_cast %1305 : i32 to index
    %c0_317 = arith.constant 0 : index
    %1369 = vector.load %arg36[%1368, %c0_317] : memref<16x16xf32, #tpu.memory_space<vmem>>, vector<1x16xf32>
    tpu.vector_store %arg36[%1368, %c0_317], %1365 {strides = array<i32>} : memref<16x16xf32, #tpu.memory_space<vmem>>, vector<1x16xf32>,
    %1370 = tpu.concatenate %1339, %1365 in 1 : vector<1x16xf32>, vector<1x16xf32> -> vector<1x32xf32>
    %c3_i32_318 = arith.constant 3 : i32
    %c15_i32_319 = arith.constant 15 : i32
    %1371 = arith.subi %c15_i32_319, %c3_i32_318 : i32
    %cst_320 = arith.constant dense<0.000000e+00> : vector<1x96xf32>
    %1372 = tpu.matmul %1370, %1170, %cst_320 {dimension_numbers = #tpu.dot_dimension_numbers<[1], [0], [0], [1], [0, 0, 1, 1], [], []>} : vector<1x32xf32>, vector<32x96xf32>, vector<1x96xf32> -> vector<1x96xf32>
    %1373 = arith.addf %1372, %1171 : vector<1x96xf32>
    %1374 = arith.index_cast %c3_i32_318 : i32 to index
    %c0_321 = arith.constant 0 : index
    %1375 = vector.load %arg34[%1374, %c0_321] : memref<16x96xf32, #tpu.memory_space<vmem>>, vector<1x96xf32>
    %1376 = arith.index_cast %1371 : i32 to index
    %c0_322 = arith.constant 0 : index
    %1377 = vector.load %arg34[%1376, %c0_322] : memref<16x96xf32, #tpu.memory_space<vmem>>, vector<1x96xf32>
    %1378 = vector.extract_strided_slice %1370 {offsets = [0, 0], sizes = [1, 16], strides = [1, 1]} : vector<1x32xf32> to vector<1x16xf32>
    %1379 = vector.extract_strided_slice %1370 {offsets = [0, 16], sizes = [1, 16], strides = [1, 1]} : vector<1x32xf32> to vector<1x16xf32>
    %1380 = vector.extract_strided_slice %1375 {offsets = [0, 0], sizes = [1, 16], strides = [1, 1]} : vector<1x96xf32> to vector<1x16xf32>
    %1381 = vector.extract_strided_slice %1373 {offsets = [0, 0], sizes = [1, 16], strides = [1, 1]} : vector<1x96xf32> to vector<1x16xf32>
    %1382 = arith.addf %1380, %1381 : vector<1x16xf32>
    %1383 = arith.negf %1382 : vector<1x16xf32>
    %1384 = math.exp %1383 : vector<1x16xf32>
    %cst_323 = arith.constant 1.000000e+00 : f32
    %1385 = vector.broadcast %cst_323 : f32 to vector<1x16xf32>
    %1386 = arith.addf %1385, %1384 : vector<1x16xf32>
    %1387 = arith.divf %1385, %1386 : vector<1x16xf32>
    %1388 = vector.extract_strided_slice %1375 {offsets = [0, 16], sizes = [1, 16], strides = [1, 1]} : vector<1x96xf32> to vector<1x16xf32>
    %1389 = vector.extract_strided_slice %1373 {offsets = [0, 16], sizes = [1, 16], strides = [1, 1]} : vector<1x96xf32> to vector<1x16xf32>
    %1390 = arith.addf %1388, %1389 : vector<1x16xf32>
    %1391 = arith.negf %1390 : vector<1x16xf32>
    %1392 = math.exp %1391 : vector<1x16xf32>
    %cst_324 = arith.constant 1.000000e+00 : f32
    %1393 = vector.broadcast %cst_324 : f32 to vector<1x16xf32>
    %1394 = arith.addf %1393, %1392 : vector<1x16xf32>
    %1395 = arith.divf %1393, %1394 : vector<1x16xf32>
    %1396 = vector.extract_strided_slice %1375 {offsets = [0, 32], sizes = [1, 16], strides = [1, 1]} : vector<1x96xf32> to vector<1x16xf32>
    %1397 = vector.extract_strided_slice %1373 {offsets = [0, 32], sizes = [1, 16], strides = [1, 1]} : vector<1x96xf32> to vector<1x16xf32>
    %1398 = arith.mulf %1387, %1397 : vector<1x16xf32>
    %1399 = arith.addf %1396, %1398 : vector<1x16xf32>
    %1400 = math.tanh %1399 : vector<1x16xf32>
    %cst_325 = arith.constant 1.000000e+00 : f32
    %1401 = vector.broadcast %cst_325 : f32 to vector<1x16xf32>
    %1402 = arith.subf %1401, %1395 : vector<1x16xf32>
    %1403 = arith.mulf %1402, %1400 : vector<1x16xf32>
    %1404 = arith.mulf %1395, %1378 : vector<1x16xf32>
    %1405 = arith.addf %1403, %1404 : vector<1x16xf32>
    %1406 = vector.extract_strided_slice %1377 {offsets = [0, 48], sizes = [1, 16], strides = [1, 1]} : vector<1x96xf32> to vector<1x16xf32>
    %1407 = vector.extract_strided_slice %1373 {offsets = [0, 48], sizes = [1, 16], strides = [1, 1]} : vector<1x96xf32> to vector<1x16xf32>
    %1408 = arith.addf %1406, %1407 : vector<1x16xf32>
    %1409 = arith.negf %1408 : vector<1x16xf32>
    %1410 = math.exp %1409 : vector<1x16xf32>
    %cst_326 = arith.constant 1.000000e+00 : f32
    %1411 = vector.broadcast %cst_326 : f32 to vector<1x16xf32>
    %1412 = arith.addf %1411, %1410 : vector<1x16xf32>
    %1413 = arith.divf %1411, %1412 : vector<1x16xf32>
    %1414 = vector.extract_strided_slice %1377 {offsets = [0, 64], sizes = [1, 16], strides = [1, 1]} : vector<1x96xf32> to vector<1x16xf32>
    %1415 = vector.extract_strided_slice %1373 {offsets = [0, 64], sizes = [1, 16], strides = [1, 1]} : vector<1x96xf32> to vector<1x16xf32>
    %1416 = arith.addf %1414, %1415 : vector<1x16xf32>
    %1417 = arith.negf %1416 : vector<1x16xf32>
    %1418 = math.exp %1417 : vector<1x16xf32>
    %cst_327 = arith.constant 1.000000e+00 : f32
    %1419 = vector.broadcast %cst_327 : f32 to vector<1x16xf32>
    %1420 = arith.addf %1419, %1418 : vector<1x16xf32>
    %1421 = arith.divf %1419, %1420 : vector<1x16xf32>
    %1422 = vector.extract_strided_slice %1377 {offsets = [0, 80], sizes = [1, 16], strides = [1, 1]} : vector<1x96xf32> to vector<1x16xf32>
    %1423 = vector.extract_strided_slice %1373 {offsets = [0, 80], sizes = [1, 16], strides = [1, 1]} : vector<1x96xf32> to vector<1x16xf32>
    %1424 = arith.mulf %1413, %1423 : vector<1x16xf32>
    %1425 = arith.addf %1422, %1424 : vector<1x16xf32>
    %1426 = math.tanh %1425 : vector<1x16xf32>
    %cst_328 = arith.constant 1.000000e+00 : f32
    %1427 = vector.broadcast %cst_328 : f32 to vector<1x16xf32>
    %1428 = arith.subf %1427, %1421 : vector<1x16xf32>
    %1429 = arith.mulf %1428, %1426 : vector<1x16xf32>
    %1430 = arith.mulf %1421, %1379 : vector<1x16xf32>
    %1431 = arith.addf %1429, %1430 : vector<1x16xf32>
    %1432 = arith.index_cast %c3_i32_318 : i32 to index
    %c0_329 = arith.constant 0 : index
    %1433 = vector.load %arg35[%1432, %c0_329] : memref<16x16xf32, #tpu.memory_space<vmem>>, vector<1x16xf32>
    tpu.vector_store %arg35[%1432, %c0_329], %1405 {strides = array<i32>} : memref<16x16xf32, #tpu.memory_space<vmem>>, vector<1x16xf32>,
    %1434 = arith.index_cast %1371 : i32 to index
    %c0_330 = arith.constant 0 : index
    %1435 = vector.load %arg36[%1434, %c0_330] : memref<16x16xf32, #tpu.memory_space<vmem>>, vector<1x16xf32>
    tpu.vector_store %arg36[%1434, %c0_330], %1431 {strides = array<i32>} : memref<16x16xf32, #tpu.memory_space<vmem>>, vector<1x16xf32>,
    %1436 = tpu.concatenate %1405, %1431 in 1 : vector<1x16xf32>, vector<1x16xf32> -> vector<1x32xf32>
    %c4_i32_331 = arith.constant 4 : i32
    %c15_i32_332 = arith.constant 15 : i32
    %1437 = arith.subi %c15_i32_332, %c4_i32_331 : i32
    %cst_333 = arith.constant dense<0.000000e+00> : vector<1x96xf32>
    %1438 = tpu.matmul %1436, %1170, %cst_333 {dimension_numbers = #tpu.dot_dimension_numbers<[1], [0], [0], [1], [0, 0, 1, 1], [], []>} : vector<1x32xf32>, vector<32x96xf32>, vector<1x96xf32> -> vector<1x96xf32>
    %1439 = arith.addf %1438, %1171 : vector<1x96xf32>
    %1440 = arith.index_cast %c4_i32_331 : i32 to index
    %c0_334 = arith.constant 0 : index
    %1441 = vector.load %arg34[%1440, %c0_334] : memref<16x96xf32, #tpu.memory_space<vmem>>, vector<1x96xf32>
    %1442 = arith.index_cast %1437 : i32 to index
    %c0_335 = arith.constant 0 : index
    %1443 = vector.load %arg34[%1442, %c0_335] : memref<16x96xf32, #tpu.memory_space<vmem>>, vector<1x96xf32>
    %1444 = vector.extract_strided_slice %1436 {offsets = [0, 0], sizes = [1, 16], strides = [1, 1]} : vector<1x32xf32> to vector<1x16xf32>
    %1445 = vector.extract_strided_slice %1436 {offsets = [0, 16], sizes = [1, 16], strides = [1, 1]} : vector<1x32xf32> to vector<1x16xf32>
    %1446 = vector.extract_strided_slice %1441 {offsets = [0, 0], sizes = [1, 16], strides = [1, 1]} : vector<1x96xf32> to vector<1x16xf32>
    %1447 = vector.extract_strided_slice %1439 {offsets = [0, 0], sizes = [1, 16], strides = [1, 1]} : vector<1x96xf32> to vector<1x16xf32>
    %1448 = arith.addf %1446, %1447 : vector<1x16xf32>
    %1449 = arith.negf %1448 : vector<1x16xf32>
    %1450 = math.exp %1449 : vector<1x16xf32>
    %cst_336 = arith.constant 1.000000e+00 : f32
    %1451 = vector.broadcast %cst_336 : f32 to vector<1x16xf32>
    %1452 = arith.addf %1451, %1450 : vector<1x16xf32>
    %1453 = arith.divf %1451, %1452 : vector<1x16xf32>
    %1454 = vector.extract_strided_slice %1441 {offsets = [0, 16], sizes = [1, 16], strides = [1, 1]} : vector<1x96xf32> to vector<1x16xf32>
    %1455 = vector.extract_strided_slice %1439 {offsets = [0, 16], sizes = [1, 16], strides = [1, 1]} : vector<1x96xf32> to vector<1x16xf32>
    %1456 = arith.addf %1454, %1455 : vector<1x16xf32>
    %1457 = arith.negf %1456 : vector<1x16xf32>
    %1458 = math.exp %1457 : vector<1x16xf32>
    %cst_337 = arith.constant 1.000000e+00 : f32
    %1459 = vector.broadcast %cst_337 : f32 to vector<1x16xf32>
    %1460 = arith.addf %1459, %1458 : vector<1x16xf32>
    %1461 = arith.divf %1459, %1460 : vector<1x16xf32>
    %1462 = vector.extract_strided_slice %1441 {offsets = [0, 32], sizes = [1, 16], strides = [1, 1]} : vector<1x96xf32> to vector<1x16xf32>
    %1463 = vector.extract_strided_slice %1439 {offsets = [0, 32], sizes = [1, 16], strides = [1, 1]} : vector<1x96xf32> to vector<1x16xf32>
    %1464 = arith.mulf %1453, %1463 : vector<1x16xf32>
    %1465 = arith.addf %1462, %1464 : vector<1x16xf32>
    %1466 = math.tanh %1465 : vector<1x16xf32>
    %cst_338 = arith.constant 1.000000e+00 : f32
    %1467 = vector.broadcast %cst_338 : f32 to vector<1x16xf32>
    %1468 = arith.subf %1467, %1461 : vector<1x16xf32>
    %1469 = arith.mulf %1468, %1466 : vector<1x16xf32>
    %1470 = arith.mulf %1461, %1444 : vector<1x16xf32>
    %1471 = arith.addf %1469, %1470 : vector<1x16xf32>
    %1472 = vector.extract_strided_slice %1443 {offsets = [0, 48], sizes = [1, 16], strides = [1, 1]} : vector<1x96xf32> to vector<1x16xf32>
    %1473 = vector.extract_strided_slice %1439 {offsets = [0, 48], sizes = [1, 16], strides = [1, 1]} : vector<1x96xf32> to vector<1x16xf32>
    %1474 = arith.addf %1472, %1473 : vector<1x16xf32>
    %1475 = arith.negf %1474 : vector<1x16xf32>
    %1476 = math.exp %1475 : vector<1x16xf32>
    %cst_339 = arith.constant 1.000000e+00 : f32
    %1477 = vector.broadcast %cst_339 : f32 to vector<1x16xf32>
    %1478 = arith.addf %1477, %1476 : vector<1x16xf32>
    %1479 = arith.divf %1477, %1478 : vector<1x16xf32>
    %1480 = vector.extract_strided_slice %1443 {offsets = [0, 64], sizes = [1, 16], strides = [1, 1]} : vector<1x96xf32> to vector<1x16xf32>
    %1481 = vector.extract_strided_slice %1439 {offsets = [0, 64], sizes = [1, 16], strides = [1, 1]} : vector<1x96xf32> to vector<1x16xf32>
    %1482 = arith.addf %1480, %1481 : vector<1x16xf32>
    %1483 = arith.negf %1482 : vector<1x16xf32>
    %1484 = math.exp %1483 : vector<1x16xf32>
    %cst_340 = arith.constant 1.000000e+00 : f32
    %1485 = vector.broadcast %cst_340 : f32 to vector<1x16xf32>
    %1486 = arith.addf %1485, %1484 : vector<1x16xf32>
    %1487 = arith.divf %1485, %1486 : vector<1x16xf32>
    %1488 = vector.extract_strided_slice %1443 {offsets = [0, 80], sizes = [1, 16], strides = [1, 1]} : vector<1x96xf32> to vector<1x16xf32>
    %1489 = vector.extract_strided_slice %1439 {offsets = [0, 80], sizes = [1, 16], strides = [1, 1]} : vector<1x96xf32> to vector<1x16xf32>
    %1490 = arith.mulf %1479, %1489 : vector<1x16xf32>
    %1491 = arith.addf %1488, %1490 : vector<1x16xf32>
    %1492 = math.tanh %1491 : vector<1x16xf32>
    %cst_341 = arith.constant 1.000000e+00 : f32
    %1493 = vector.broadcast %cst_341 : f32 to vector<1x16xf32>
    %1494 = arith.subf %1493, %1487 : vector<1x16xf32>
    %1495 = arith.mulf %1494, %1492 : vector<1x16xf32>
    %1496 = arith.mulf %1487, %1445 : vector<1x16xf32>
    %1497 = arith.addf %1495, %1496 : vector<1x16xf32>
    %1498 = arith.index_cast %c4_i32_331 : i32 to index
    %c0_342 = arith.constant 0 : index
    %1499 = vector.load %arg35[%1498, %c0_342] : memref<16x16xf32, #tpu.memory_space<vmem>>, vector<1x16xf32>
    tpu.vector_store %arg35[%1498, %c0_342], %1471 {strides = array<i32>} : memref<16x16xf32, #tpu.memory_space<vmem>>, vector<1x16xf32>,
    %1500 = arith.index_cast %1437 : i32 to index
    %c0_343 = arith.constant 0 : index
    %1501 = vector.load %arg36[%1500, %c0_343] : memref<16x16xf32, #tpu.memory_space<vmem>>, vector<1x16xf32>
    tpu.vector_store %arg36[%1500, %c0_343], %1497 {strides = array<i32>} : memref<16x16xf32, #tpu.memory_space<vmem>>, vector<1x16xf32>,
    %1502 = tpu.concatenate %1471, %1497 in 1 : vector<1x16xf32>, vector<1x16xf32> -> vector<1x32xf32>
    %c5_i32_344 = arith.constant 5 : i32
    %c15_i32_345 = arith.constant 15 : i32
    %1503 = arith.subi %c15_i32_345, %c5_i32_344 : i32
    %cst_346 = arith.constant dense<0.000000e+00> : vector<1x96xf32>
    %1504 = tpu.matmul %1502, %1170, %cst_346 {dimension_numbers = #tpu.dot_dimension_numbers<[1], [0], [0], [1], [0, 0, 1, 1], [], []>} : vector<1x32xf32>, vector<32x96xf32>, vector<1x96xf32> -> vector<1x96xf32>
    %1505 = arith.addf %1504, %1171 : vector<1x96xf32>
    %1506 = arith.index_cast %c5_i32_344 : i32 to index
    %c0_347 = arith.constant 0 : index
    %1507 = vector.load %arg34[%1506, %c0_347] : memref<16x96xf32, #tpu.memory_space<vmem>>, vector<1x96xf32>
    %1508 = arith.index_cast %1503 : i32 to index
    %c0_348 = arith.constant 0 : index
    %1509 = vector.load %arg34[%1508, %c0_348] : memref<16x96xf32, #tpu.memory_space<vmem>>, vector<1x96xf32>
    %1510 = vector.extract_strided_slice %1502 {offsets = [0, 0], sizes = [1, 16], strides = [1, 1]} : vector<1x32xf32> to vector<1x16xf32>
    %1511 = vector.extract_strided_slice %1502 {offsets = [0, 16], sizes = [1, 16], strides = [1, 1]} : vector<1x32xf32> to vector<1x16xf32>
    %1512 = vector.extract_strided_slice %1507 {offsets = [0, 0], sizes = [1, 16], strides = [1, 1]} : vector<1x96xf32> to vector<1x16xf32>
    %1513 = vector.extract_strided_slice %1505 {offsets = [0, 0], sizes = [1, 16], strides = [1, 1]} : vector<1x96xf32> to vector<1x16xf32>
    %1514 = arith.addf %1512, %1513 : vector<1x16xf32>
    %1515 = arith.negf %1514 : vector<1x16xf32>
    %1516 = math.exp %1515 : vector<1x16xf32>
    %cst_349 = arith.constant 1.000000e+00 : f32
    %1517 = vector.broadcast %cst_349 : f32 to vector<1x16xf32>
    %1518 = arith.addf %1517, %1516 : vector<1x16xf32>
    %1519 = arith.divf %1517, %1518 : vector<1x16xf32>
    %1520 = vector.extract_strided_slice %1507 {offsets = [0, 16], sizes = [1, 16], strides = [1, 1]} : vector<1x96xf32> to vector<1x16xf32>
    %1521 = vector.extract_strided_slice %1505 {offsets = [0, 16], sizes = [1, 16], strides = [1, 1]} : vector<1x96xf32> to vector<1x16xf32>
    %1522 = arith.addf %1520, %1521 : vector<1x16xf32>
    %1523 = arith.negf %1522 : vector<1x16xf32>
    %1524 = math.exp %1523 : vector<1x16xf32>
    %cst_350 = arith.constant 1.000000e+00 : f32
    %1525 = vector.broadcast %cst_350 : f32 to vector<1x16xf32>
    %1526 = arith.addf %1525, %1524 : vector<1x16xf32>
    %1527 = arith.divf %1525, %1526 : vector<1x16xf32>
    %1528 = vector.extract_strided_slice %1507 {offsets = [0, 32], sizes = [1, 16], strides = [1, 1]} : vector<1x96xf32> to vector<1x16xf32>
    %1529 = vector.extract_strided_slice %1505 {offsets = [0, 32], sizes = [1, 16], strides = [1, 1]} : vector<1x96xf32> to vector<1x16xf32>
    %1530 = arith.mulf %1519, %1529 : vector<1x16xf32>
    %1531 = arith.addf %1528, %1530 : vector<1x16xf32>
    %1532 = math.tanh %1531 : vector<1x16xf32>
    %cst_351 = arith.constant 1.000000e+00 : f32
    %1533 = vector.broadcast %cst_351 : f32 to vector<1x16xf32>
    %1534 = arith.subf %1533, %1527 : vector<1x16xf32>
    %1535 = arith.mulf %1534, %1532 : vector<1x16xf32>
    %1536 = arith.mulf %1527, %1510 : vector<1x16xf32>
    %1537 = arith.addf %1535, %1536 : vector<1x16xf32>
    %1538 = vector.extract_strided_slice %1509 {offsets = [0, 48], sizes = [1, 16], strides = [1, 1]} : vector<1x96xf32> to vector<1x16xf32>
    %1539 = vector.extract_strided_slice %1505 {offsets = [0, 48], sizes = [1, 16], strides = [1, 1]} : vector<1x96xf32> to vector<1x16xf32>
    %1540 = arith.addf %1538, %1539 : vector<1x16xf32>
    %1541 = arith.negf %1540 : vector<1x16xf32>
    %1542 = math.exp %1541 : vector<1x16xf32>
    %cst_352 = arith.constant 1.000000e+00 : f32
    %1543 = vector.broadcast %cst_352 : f32 to vector<1x16xf32>
    %1544 = arith.addf %1543, %1542 : vector<1x16xf32>
    %1545 = arith.divf %1543, %1544 : vector<1x16xf32>
    %1546 = vector.extract_strided_slice %1509 {offsets = [0, 64], sizes = [1, 16], strides = [1, 1]} : vector<1x96xf32> to vector<1x16xf32>
    %1547 = vector.extract_strided_slice %1505 {offsets = [0, 64], sizes = [1, 16], strides = [1, 1]} : vector<1x96xf32> to vector<1x16xf32>
    %1548 = arith.addf %1546, %1547 : vector<1x16xf32>
    %1549 = arith.negf %1548 : vector<1x16xf32>
    %1550 = math.exp %1549 : vector<1x16xf32>
    %cst_353 = arith.constant 1.000000e+00 : f32
    %1551 = vector.broadcast %cst_353 : f32 to vector<1x16xf32>
    %1552 = arith.addf %1551, %1550 : vector<1x16xf32>
    %1553 = arith.divf %1551, %1552 : vector<1x16xf32>
    %1554 = vector.extract_strided_slice %1509 {offsets = [0, 80], sizes = [1, 16], strides = [1, 1]} : vector<1x96xf32> to vector<1x16xf32>
    %1555 = vector.extract_strided_slice %1505 {offsets = [0, 80], sizes = [1, 16], strides = [1, 1]} : vector<1x96xf32> to vector<1x16xf32>
    %1556 = arith.mulf %1545, %1555 : vector<1x16xf32>
    %1557 = arith.addf %1554, %1556 : vector<1x16xf32>
    %1558 = math.tanh %1557 : vector<1x16xf32>
    %cst_354 = arith.constant 1.000000e+00 : f32
    %1559 = vector.broadcast %cst_354 : f32 to vector<1x16xf32>
    %1560 = arith.subf %1559, %1553 : vector<1x16xf32>
    %1561 = arith.mulf %1560, %1558 : vector<1x16xf32>
    %1562 = arith.mulf %1553, %1511 : vector<1x16xf32>
    %1563 = arith.addf %1561, %1562 : vector<1x16xf32>
    %1564 = arith.index_cast %c5_i32_344 : i32 to index
    %c0_355 = arith.constant 0 : index
    %1565 = vector.load %arg35[%1564, %c0_355] : memref<16x16xf32, #tpu.memory_space<vmem>>, vector<1x16xf32>
    tpu.vector_store %arg35[%1564, %c0_355], %1537 {strides = array<i32>} : memref<16x16xf32, #tpu.memory_space<vmem>>, vector<1x16xf32>,
    %1566 = arith.index_cast %1503 : i32 to index
    %c0_356 = arith.constant 0 : index
    %1567 = vector.load %arg36[%1566, %c0_356] : memref<16x16xf32, #tpu.memory_space<vmem>>, vector<1x16xf32>
    tpu.vector_store %arg36[%1566, %c0_356], %1563 {strides = array<i32>} : memref<16x16xf32, #tpu.memory_space<vmem>>, vector<1x16xf32>,
    %1568 = tpu.concatenate %1537, %1563 in 1 : vector<1x16xf32>, vector<1x16xf32> -> vector<1x32xf32>
    %c6_i32_357 = arith.constant 6 : i32
    %c15_i32_358 = arith.constant 15 : i32
    %1569 = arith.subi %c15_i32_358, %c6_i32_357 : i32
    %cst_359 = arith.constant dense<0.000000e+00> : vector<1x96xf32>
    %1570 = tpu.matmul %1568, %1170, %cst_359 {dimension_numbers = #tpu.dot_dimension_numbers<[1], [0], [0], [1], [0, 0, 1, 1], [], []>} : vector<1x32xf32>, vector<32x96xf32>, vector<1x96xf32> -> vector<1x96xf32>
    %1571 = arith.addf %1570, %1171 : vector<1x96xf32>
    %1572 = arith.index_cast %c6_i32_357 : i32 to index
    %c0_360 = arith.constant 0 : index
    %1573 = vector.load %arg34[%1572, %c0_360] : memref<16x96xf32, #tpu.memory_space<vmem>>, vector<1x96xf32>
    %1574 = arith.index_cast %1569 : i32 to index
    %c0_361 = arith.constant 0 : index
    %1575 = vector.load %arg34[%1574, %c0_361] : memref<16x96xf32, #tpu.memory_space<vmem>>, vector<1x96xf32>
    %1576 = vector.extract_strided_slice %1568 {offsets = [0, 0], sizes = [1, 16], strides = [1, 1]} : vector<1x32xf32> to vector<1x16xf32>
    %1577 = vector.extract_strided_slice %1568 {offsets = [0, 16], sizes = [1, 16], strides = [1, 1]} : vector<1x32xf32> to vector<1x16xf32>
    %1578 = vector.extract_strided_slice %1573 {offsets = [0, 0], sizes = [1, 16], strides = [1, 1]} : vector<1x96xf32> to vector<1x16xf32>
    %1579 = vector.extract_strided_slice %1571 {offsets = [0, 0], sizes = [1, 16], strides = [1, 1]} : vector<1x96xf32> to vector<1x16xf32>
    %1580 = arith.addf %1578, %1579 : vector<1x16xf32>
    %1581 = arith.negf %1580 : vector<1x16xf32>
    %1582 = math.exp %1581 : vector<1x16xf32>
    %cst_362 = arith.constant 1.000000e+00 : f32
    %1583 = vector.broadcast %cst_362 : f32 to vector<1x16xf32>
    %1584 = arith.addf %1583, %1582 : vector<1x16xf32>
    %1585 = arith.divf %1583, %1584 : vector<1x16xf32>
    %1586 = vector.extract_strided_slice %1573 {offsets = [0, 16], sizes = [1, 16], strides = [1, 1]} : vector<1x96xf32> to vector<1x16xf32>
    %1587 = vector.extract_strided_slice %1571 {offsets = [0, 16], sizes = [1, 16], strides = [1, 1]} : vector<1x96xf32> to vector<1x16xf32>
    %1588 = arith.addf %1586, %1587 : vector<1x16xf32>
    %1589 = arith.negf %1588 : vector<1x16xf32>
    %1590 = math.exp %1589 : vector<1x16xf32>
    %cst_363 = arith.constant 1.000000e+00 : f32
    %1591 = vector.broadcast %cst_363 : f32 to vector<1x16xf32>
    %1592 = arith.addf %1591, %1590 : vector<1x16xf32>
    %1593 = arith.divf %1591, %1592 : vector<1x16xf32>
    %1594 = vector.extract_strided_slice %1573 {offsets = [0, 32], sizes = [1, 16], strides = [1, 1]} : vector<1x96xf32> to vector<1x16xf32>
    %1595 = vector.extract_strided_slice %1571 {offsets = [0, 32], sizes = [1, 16], strides = [1, 1]} : vector<1x96xf32> to vector<1x16xf32>
    %1596 = arith.mulf %1585, %1595 : vector<1x16xf32>
    %1597 = arith.addf %1594, %1596 : vector<1x16xf32>
    %1598 = math.tanh %1597 : vector<1x16xf32>
    %cst_364 = arith.constant 1.000000e+00 : f32
    %1599 = vector.broadcast %cst_364 : f32 to vector<1x16xf32>
    %1600 = arith.subf %1599, %1593 : vector<1x16xf32>
    %1601 = arith.mulf %1600, %1598 : vector<1x16xf32>
    %1602 = arith.mulf %1593, %1576 : vector<1x16xf32>
    %1603 = arith.addf %1601, %1602 : vector<1x16xf32>
    %1604 = vector.extract_strided_slice %1575 {offsets = [0, 48], sizes = [1, 16], strides = [1, 1]} : vector<1x96xf32> to vector<1x16xf32>
    %1605 = vector.extract_strided_slice %1571 {offsets = [0, 48], sizes = [1, 16], strides = [1, 1]} : vector<1x96xf32> to vector<1x16xf32>
    %1606 = arith.addf %1604, %1605 : vector<1x16xf32>
    %1607 = arith.negf %1606 : vector<1x16xf32>
    %1608 = math.exp %1607 : vector<1x16xf32>
    %cst_365 = arith.constant 1.000000e+00 : f32
    %1609 = vector.broadcast %cst_365 : f32 to vector<1x16xf32>
    %1610 = arith.addf %1609, %1608 : vector<1x16xf32>
    %1611 = arith.divf %1609, %1610 : vector<1x16xf32>
    %1612 = vector.extract_strided_slice %1575 {offsets = [0, 64], sizes = [1, 16], strides = [1, 1]} : vector<1x96xf32> to vector<1x16xf32>
    %1613 = vector.extract_strided_slice %1571 {offsets = [0, 64], sizes = [1, 16], strides = [1, 1]} : vector<1x96xf32> to vector<1x16xf32>
    %1614 = arith.addf %1612, %1613 : vector<1x16xf32>
    %1615 = arith.negf %1614 : vector<1x16xf32>
    %1616 = math.exp %1615 : vector<1x16xf32>
    %cst_366 = arith.constant 1.000000e+00 : f32
    %1617 = vector.broadcast %cst_366 : f32 to vector<1x16xf32>
    %1618 = arith.addf %1617, %1616 : vector<1x16xf32>
    %1619 = arith.divf %1617, %1618 : vector<1x16xf32>
    %1620 = vector.extract_strided_slice %1575 {offsets = [0, 80], sizes = [1, 16], strides = [1, 1]} : vector<1x96xf32> to vector<1x16xf32>
    %1621 = vector.extract_strided_slice %1571 {offsets = [0, 80], sizes = [1, 16], strides = [1, 1]} : vector<1x96xf32> to vector<1x16xf32>
    %1622 = arith.mulf %1611, %1621 : vector<1x16xf32>
    %1623 = arith.addf %1620, %1622 : vector<1x16xf32>
    %1624 = math.tanh %1623 : vector<1x16xf32>
    %cst_367 = arith.constant 1.000000e+00 : f32
    %1625 = vector.broadcast %cst_367 : f32 to vector<1x16xf32>
    %1626 = arith.subf %1625, %1619 : vector<1x16xf32>
    %1627 = arith.mulf %1626, %1624 : vector<1x16xf32>
    %1628 = arith.mulf %1619, %1577 : vector<1x16xf32>
    %1629 = arith.addf %1627, %1628 : vector<1x16xf32>
    %1630 = arith.index_cast %c6_i32_357 : i32 to index
    %c0_368 = arith.constant 0 : index
    %1631 = vector.load %arg35[%1630, %c0_368] : memref<16x16xf32, #tpu.memory_space<vmem>>, vector<1x16xf32>
    tpu.vector_store %arg35[%1630, %c0_368], %1603 {strides = array<i32>} : memref<16x16xf32, #tpu.memory_space<vmem>>, vector<1x16xf32>,
    %1632 = arith.index_cast %1569 : i32 to index
    %c0_369 = arith.constant 0 : index
    %1633 = vector.load %arg36[%1632, %c0_369] : memref<16x16xf32, #tpu.memory_space<vmem>>, vector<1x16xf32>
    tpu.vector_store %arg36[%1632, %c0_369], %1629 {strides = array<i32>} : memref<16x16xf32, #tpu.memory_space<vmem>>, vector<1x16xf32>,
    %1634 = tpu.concatenate %1603, %1629 in 1 : vector<1x16xf32>, vector<1x16xf32> -> vector<1x32xf32>
    %c7_i32_370 = arith.constant 7 : i32
    %c15_i32_371 = arith.constant 15 : i32
    %1635 = arith.subi %c15_i32_371, %c7_i32_370 : i32
    %cst_372 = arith.constant dense<0.000000e+00> : vector<1x96xf32>
    %1636 = tpu.matmul %1634, %1170, %cst_372 {dimension_numbers = #tpu.dot_dimension_numbers<[1], [0], [0], [1], [0, 0, 1, 1], [], []>} : vector<1x32xf32>, vector<32x96xf32>, vector<1x96xf32> -> vector<1x96xf32>
    %1637 = arith.addf %1636, %1171 : vector<1x96xf32>
    %1638 = arith.index_cast %c7_i32_370 : i32 to index
    %c0_373 = arith.constant 0 : index
    %1639 = vector.load %arg34[%1638, %c0_373] : memref<16x96xf32, #tpu.memory_space<vmem>>, vector<1x96xf32>
    %1640 = arith.index_cast %1635 : i32 to index
    %c0_374 = arith.constant 0 : index
    %1641 = vector.load %arg34[%1640, %c0_374] : memref<16x96xf32, #tpu.memory_space<vmem>>, vector<1x96xf32>
    %1642 = vector.extract_strided_slice %1634 {offsets = [0, 0], sizes = [1, 16], strides = [1, 1]} : vector<1x32xf32> to vector<1x16xf32>
    %1643 = vector.extract_strided_slice %1634 {offsets = [0, 16], sizes = [1, 16], strides = [1, 1]} : vector<1x32xf32> to vector<1x16xf32>
    %1644 = vector.extract_strided_slice %1639 {offsets = [0, 0], sizes = [1, 16], strides = [1, 1]} : vector<1x96xf32> to vector<1x16xf32>
    %1645 = vector.extract_strided_slice %1637 {offsets = [0, 0], sizes = [1, 16], strides = [1, 1]} : vector<1x96xf32> to vector<1x16xf32>
    %1646 = arith.addf %1644, %1645 : vector<1x16xf32>
    %1647 = arith.negf %1646 : vector<1x16xf32>
    %1648 = math.exp %1647 : vector<1x16xf32>
    %cst_375 = arith.constant 1.000000e+00 : f32
    %1649 = vector.broadcast %cst_375 : f32 to vector<1x16xf32>
    %1650 = arith.addf %1649, %1648 : vector<1x16xf32>
    %1651 = arith.divf %1649, %1650 : vector<1x16xf32>
    %1652 = vector.extract_strided_slice %1639 {offsets = [0, 16], sizes = [1, 16], strides = [1, 1]} : vector<1x96xf32> to vector<1x16xf32>
    %1653 = vector.extract_strided_slice %1637 {offsets = [0, 16], sizes = [1, 16], strides = [1, 1]} : vector<1x96xf32> to vector<1x16xf32>
    %1654 = arith.addf %1652, %1653 : vector<1x16xf32>
    %1655 = arith.negf %1654 : vector<1x16xf32>
    %1656 = math.exp %1655 : vector<1x16xf32>
    %cst_376 = arith.constant 1.000000e+00 : f32
    %1657 = vector.broadcast %cst_376 : f32 to vector<1x16xf32>
    %1658 = arith.addf %1657, %1656 : vector<1x16xf32>
    %1659 = arith.divf %1657, %1658 : vector<1x16xf32>
    %1660 = vector.extract_strided_slice %1639 {offsets = [0, 32], sizes = [1, 16], strides = [1, 1]} : vector<1x96xf32> to vector<1x16xf32>
    %1661 = vector.extract_strided_slice %1637 {offsets = [0, 32], sizes = [1, 16], strides = [1, 1]} : vector<1x96xf32> to vector<1x16xf32>
    %1662 = arith.mulf %1651, %1661 : vector<1x16xf32>
    %1663 = arith.addf %1660, %1662 : vector<1x16xf32>
    %1664 = math.tanh %1663 : vector<1x16xf32>
    %cst_377 = arith.constant 1.000000e+00 : f32
    %1665 = vector.broadcast %cst_377 : f32 to vector<1x16xf32>
    %1666 = arith.subf %1665, %1659 : vector<1x16xf32>
    %1667 = arith.mulf %1666, %1664 : vector<1x16xf32>
    %1668 = arith.mulf %1659, %1642 : vector<1x16xf32>
    %1669 = arith.addf %1667, %1668 : vector<1x16xf32>
    %1670 = vector.extract_strided_slice %1641 {offsets = [0, 48], sizes = [1, 16], strides = [1, 1]} : vector<1x96xf32> to vector<1x16xf32>
    %1671 = vector.extract_strided_slice %1637 {offsets = [0, 48], sizes = [1, 16], strides = [1, 1]} : vector<1x96xf32> to vector<1x16xf32>
    %1672 = arith.addf %1670, %1671 : vector<1x16xf32>
    %1673 = arith.negf %1672 : vector<1x16xf32>
    %1674 = math.exp %1673 : vector<1x16xf32>
    %cst_378 = arith.constant 1.000000e+00 : f32
    %1675 = vector.broadcast %cst_378 : f32 to vector<1x16xf32>
    %1676 = arith.addf %1675, %1674 : vector<1x16xf32>
    %1677 = arith.divf %1675, %1676 : vector<1x16xf32>
    %1678 = vector.extract_strided_slice %1641 {offsets = [0, 64], sizes = [1, 16], strides = [1, 1]} : vector<1x96xf32> to vector<1x16xf32>
    %1679 = vector.extract_strided_slice %1637 {offsets = [0, 64], sizes = [1, 16], strides = [1, 1]} : vector<1x96xf32> to vector<1x16xf32>
    %1680 = arith.addf %1678, %1679 : vector<1x16xf32>
    %1681 = arith.negf %1680 : vector<1x16xf32>
    %1682 = math.exp %1681 : vector<1x16xf32>
    %cst_379 = arith.constant 1.000000e+00 : f32
    %1683 = vector.broadcast %cst_379 : f32 to vector<1x16xf32>
    %1684 = arith.addf %1683, %1682 : vector<1x16xf32>
    %1685 = arith.divf %1683, %1684 : vector<1x16xf32>
    %1686 = vector.extract_strided_slice %1641 {offsets = [0, 80], sizes = [1, 16], strides = [1, 1]} : vector<1x96xf32> to vector<1x16xf32>
    %1687 = vector.extract_strided_slice %1637 {offsets = [0, 80], sizes = [1, 16], strides = [1, 1]} : vector<1x96xf32> to vector<1x16xf32>
    %1688 = arith.mulf %1677, %1687 : vector<1x16xf32>
    %1689 = arith.addf %1686, %1688 : vector<1x16xf32>
    %1690 = math.tanh %1689 : vector<1x16xf32>
    %cst_380 = arith.constant 1.000000e+00 : f32
    %1691 = vector.broadcast %cst_380 : f32 to vector<1x16xf32>
    %1692 = arith.subf %1691, %1685 : vector<1x16xf32>
    %1693 = arith.mulf %1692, %1690 : vector<1x16xf32>
    %1694 = arith.mulf %1685, %1643 : vector<1x16xf32>
    %1695 = arith.addf %1693, %1694 : vector<1x16xf32>
    %1696 = arith.index_cast %c7_i32_370 : i32 to index
    %c0_381 = arith.constant 0 : index
    %1697 = vector.load %arg35[%1696, %c0_381] : memref<16x16xf32, #tpu.memory_space<vmem>>, vector<1x16xf32>
    tpu.vector_store %arg35[%1696, %c0_381], %1669 {strides = array<i32>} : memref<16x16xf32, #tpu.memory_space<vmem>>, vector<1x16xf32>,
    %1698 = arith.index_cast %1635 : i32 to index
    %c0_382 = arith.constant 0 : index
    %1699 = vector.load %arg36[%1698, %c0_382] : memref<16x16xf32, #tpu.memory_space<vmem>>, vector<1x16xf32>
    tpu.vector_store %arg36[%1698, %c0_382], %1695 {strides = array<i32>} : memref<16x16xf32, #tpu.memory_space<vmem>>, vector<1x16xf32>,
    %1700 = tpu.concatenate %1669, %1695 in 1 : vector<1x16xf32>, vector<1x16xf32> -> vector<1x32xf32>
    %c8_i32_383 = arith.constant 8 : i32
    %c15_i32_384 = arith.constant 15 : i32
    %1701 = arith.subi %c15_i32_384, %c8_i32_383 : i32
    %cst_385 = arith.constant dense<0.000000e+00> : vector<1x96xf32>
    %1702 = tpu.matmul %1700, %1170, %cst_385 {dimension_numbers = #tpu.dot_dimension_numbers<[1], [0], [0], [1], [0, 0, 1, 1], [], []>} : vector<1x32xf32>, vector<32x96xf32>, vector<1x96xf32> -> vector<1x96xf32>
    %1703 = arith.addf %1702, %1171 : vector<1x96xf32>
    %1704 = arith.index_cast %c8_i32_383 : i32 to index
    %c0_386 = arith.constant 0 : index
    %1705 = vector.load %arg34[%1704, %c0_386] : memref<16x96xf32, #tpu.memory_space<vmem>>, vector<1x96xf32>
    %1706 = arith.index_cast %1701 : i32 to index
    %c0_387 = arith.constant 0 : index
    %1707 = vector.load %arg34[%1706, %c0_387] : memref<16x96xf32, #tpu.memory_space<vmem>>, vector<1x96xf32>
    %1708 = vector.extract_strided_slice %1700 {offsets = [0, 0], sizes = [1, 16], strides = [1, 1]} : vector<1x32xf32> to vector<1x16xf32>
    %1709 = vector.extract_strided_slice %1700 {offsets = [0, 16], sizes = [1, 16], strides = [1, 1]} : vector<1x32xf32> to vector<1x16xf32>
    %1710 = vector.extract_strided_slice %1705 {offsets = [0, 0], sizes = [1, 16], strides = [1, 1]} : vector<1x96xf32> to vector<1x16xf32>
    %1711 = vector.extract_strided_slice %1703 {offsets = [0, 0], sizes = [1, 16], strides = [1, 1]} : vector<1x96xf32> to vector<1x16xf32>
    %1712 = arith.addf %1710, %1711 : vector<1x16xf32>
    %1713 = arith.negf %1712 : vector<1x16xf32>
    %1714 = math.exp %1713 : vector<1x16xf32>
    %cst_388 = arith.constant 1.000000e+00 : f32
    %1715 = vector.broadcast %cst_388 : f32 to vector<1x16xf32>
    %1716 = arith.addf %1715, %1714 : vector<1x16xf32>
    %1717 = arith.divf %1715, %1716 : vector<1x16xf32>
    %1718 = vector.extract_strided_slice %1705 {offsets = [0, 16], sizes = [1, 16], strides = [1, 1]} : vector<1x96xf32> to vector<1x16xf32>
    %1719 = vector.extract_strided_slice %1703 {offsets = [0, 16], sizes = [1, 16], strides = [1, 1]} : vector<1x96xf32> to vector<1x16xf32>
    %1720 = arith.addf %1718, %1719 : vector<1x16xf32>
    %1721 = arith.negf %1720 : vector<1x16xf32>
    %1722 = math.exp %1721 : vector<1x16xf32>
    %cst_389 = arith.constant 1.000000e+00 : f32
    %1723 = vector.broadcast %cst_389 : f32 to vector<1x16xf32>
    %1724 = arith.addf %1723, %1722 : vector<1x16xf32>
    %1725 = arith.divf %1723, %1724 : vector<1x16xf32>
    %1726 = vector.extract_strided_slice %1705 {offsets = [0, 32], sizes = [1, 16], strides = [1, 1]} : vector<1x96xf32> to vector<1x16xf32>
    %1727 = vector.extract_strided_slice %1703 {offsets = [0, 32], sizes = [1, 16], strides = [1, 1]} : vector<1x96xf32> to vector<1x16xf32>
    %1728 = arith.mulf %1717, %1727 : vector<1x16xf32>
    %1729 = arith.addf %1726, %1728 : vector<1x16xf32>
    %1730 = math.tanh %1729 : vector<1x16xf32>
    %cst_390 = arith.constant 1.000000e+00 : f32
    %1731 = vector.broadcast %cst_390 : f32 to vector<1x16xf32>
    %1732 = arith.subf %1731, %1725 : vector<1x16xf32>
    %1733 = arith.mulf %1732, %1730 : vector<1x16xf32>
    %1734 = arith.mulf %1725, %1708 : vector<1x16xf32>
    %1735 = arith.addf %1733, %1734 : vector<1x16xf32>
    %1736 = vector.extract_strided_slice %1707 {offsets = [0, 48], sizes = [1, 16], strides = [1, 1]} : vector<1x96xf32> to vector<1x16xf32>
    %1737 = vector.extract_strided_slice %1703 {offsets = [0, 48], sizes = [1, 16], strides = [1, 1]} : vector<1x96xf32> to vector<1x16xf32>
    %1738 = arith.addf %1736, %1737 : vector<1x16xf32>
    %1739 = arith.negf %1738 : vector<1x16xf32>
    %1740 = math.exp %1739 : vector<1x16xf32>
    %cst_391 = arith.constant 1.000000e+00 : f32
    %1741 = vector.broadcast %cst_391 : f32 to vector<1x16xf32>
    %1742 = arith.addf %1741, %1740 : vector<1x16xf32>
    %1743 = arith.divf %1741, %1742 : vector<1x16xf32>
    %1744 = vector.extract_strided_slice %1707 {offsets = [0, 64], sizes = [1, 16], strides = [1, 1]} : vector<1x96xf32> to vector<1x16xf32>
    %1745 = vector.extract_strided_slice %1703 {offsets = [0, 64], sizes = [1, 16], strides = [1, 1]} : vector<1x96xf32> to vector<1x16xf32>
    %1746 = arith.addf %1744, %1745 : vector<1x16xf32>
    %1747 = arith.negf %1746 : vector<1x16xf32>
    %1748 = math.exp %1747 : vector<1x16xf32>
    %cst_392 = arith.constant 1.000000e+00 : f32
    %1749 = vector.broadcast %cst_392 : f32 to vector<1x16xf32>
    %1750 = arith.addf %1749, %1748 : vector<1x16xf32>
    %1751 = arith.divf %1749, %1750 : vector<1x16xf32>
    %1752 = vector.extract_strided_slice %1707 {offsets = [0, 80], sizes = [1, 16], strides = [1, 1]} : vector<1x96xf32> to vector<1x16xf32>
    %1753 = vector.extract_strided_slice %1703 {offsets = [0, 80], sizes = [1, 16], strides = [1, 1]} : vector<1x96xf32> to vector<1x16xf32>
    %1754 = arith.mulf %1743, %1753 : vector<1x16xf32>
    %1755 = arith.addf %1752, %1754 : vector<1x16xf32>
    %1756 = math.tanh %1755 : vector<1x16xf32>
    %cst_393 = arith.constant 1.000000e+00 : f32
    %1757 = vector.broadcast %cst_393 : f32 to vector<1x16xf32>
    %1758 = arith.subf %1757, %1751 : vector<1x16xf32>
    %1759 = arith.mulf %1758, %1756 : vector<1x16xf32>
    %1760 = arith.mulf %1751, %1709 : vector<1x16xf32>
    %1761 = arith.addf %1759, %1760 : vector<1x16xf32>
    %1762 = arith.index_cast %c8_i32_383 : i32 to index
    %c0_394 = arith.constant 0 : index
    %1763 = vector.load %arg35[%1762, %c0_394] : memref<16x16xf32, #tpu.memory_space<vmem>>, vector<1x16xf32>
    tpu.vector_store %arg35[%1762, %c0_394], %1735 {strides = array<i32>} : memref<16x16xf32, #tpu.memory_space<vmem>>, vector<1x16xf32>,
    %1764 = arith.index_cast %1701 : i32 to index
    %c0_395 = arith.constant 0 : index
    %1765 = vector.load %arg36[%1764, %c0_395] : memref<16x16xf32, #tpu.memory_space<vmem>>, vector<1x16xf32>
    tpu.vector_store %arg36[%1764, %c0_395], %1761 {strides = array<i32>} : memref<16x16xf32, #tpu.memory_space<vmem>>, vector<1x16xf32>,
    %1766 = tpu.concatenate %1735, %1761 in 1 : vector<1x16xf32>, vector<1x16xf32> -> vector<1x32xf32>
    %c9_i32_396 = arith.constant 9 : i32
    %c15_i32_397 = arith.constant 15 : i32
    %1767 = arith.subi %c15_i32_397, %c9_i32_396 : i32
    %cst_398 = arith.constant dense<0.000000e+00> : vector<1x96xf32>
    %1768 = tpu.matmul %1766, %1170, %cst_398 {dimension_numbers = #tpu.dot_dimension_numbers<[1], [0], [0], [1], [0, 0, 1, 1], [], []>} : vector<1x32xf32>, vector<32x96xf32>, vector<1x96xf32> -> vector<1x96xf32>
    %1769 = arith.addf %1768, %1171 : vector<1x96xf32>
    %1770 = arith.index_cast %c9_i32_396 : i32 to index
    %c0_399 = arith.constant 0 : index
    %1771 = vector.load %arg34[%1770, %c0_399] : memref<16x96xf32, #tpu.memory_space<vmem>>, vector<1x96xf32>
    %1772 = arith.index_cast %1767 : i32 to index
    %c0_400 = arith.constant 0 : index
    %1773 = vector.load %arg34[%1772, %c0_400] : memref<16x96xf32, #tpu.memory_space<vmem>>, vector<1x96xf32>
    %1774 = vector.extract_strided_slice %1766 {offsets = [0, 0], sizes = [1, 16], strides = [1, 1]} : vector<1x32xf32> to vector<1x16xf32>
    %1775 = vector.extract_strided_slice %1766 {offsets = [0, 16], sizes = [1, 16], strides = [1, 1]} : vector<1x32xf32> to vector<1x16xf32>
    %1776 = vector.extract_strided_slice %1771 {offsets = [0, 0], sizes = [1, 16], strides = [1, 1]} : vector<1x96xf32> to vector<1x16xf32>
    %1777 = vector.extract_strided_slice %1769 {offsets = [0, 0], sizes = [1, 16], strides = [1, 1]} : vector<1x96xf32> to vector<1x16xf32>
    %1778 = arith.addf %1776, %1777 : vector<1x16xf32>
    %1779 = arith.negf %1778 : vector<1x16xf32>
    %1780 = math.exp %1779 : vector<1x16xf32>
    %cst_401 = arith.constant 1.000000e+00 : f32
    %1781 = vector.broadcast %cst_401 : f32 to vector<1x16xf32>
    %1782 = arith.addf %1781, %1780 : vector<1x16xf32>
    %1783 = arith.divf %1781, %1782 : vector<1x16xf32>
    %1784 = vector.extract_strided_slice %1771 {offsets = [0, 16], sizes = [1, 16], strides = [1, 1]} : vector<1x96xf32> to vector<1x16xf32>
    %1785 = vector.extract_strided_slice %1769 {offsets = [0, 16], sizes = [1, 16], strides = [1, 1]} : vector<1x96xf32> to vector<1x16xf32>
    %1786 = arith.addf %1784, %1785 : vector<1x16xf32>
    %1787 = arith.negf %1786 : vector<1x16xf32>
    %1788 = math.exp %1787 : vector<1x16xf32>
    %cst_402 = arith.constant 1.000000e+00 : f32
    %1789 = vector.broadcast %cst_402 : f32 to vector<1x16xf32>
    %1790 = arith.addf %1789, %1788 : vector<1x16xf32>
    %1791 = arith.divf %1789, %1790 : vector<1x16xf32>
    %1792 = vector.extract_strided_slice %1771 {offsets = [0, 32], sizes = [1, 16], strides = [1, 1]} : vector<1x96xf32> to vector<1x16xf32>
    %1793 = vector.extract_strided_slice %1769 {offsets = [0, 32], sizes = [1, 16], strides = [1, 1]} : vector<1x96xf32> to vector<1x16xf32>
    %1794 = arith.mulf %1783, %1793 : vector<1x16xf32>
    %1795 = arith.addf %1792, %1794 : vector<1x16xf32>
    %1796 = math.tanh %1795 : vector<1x16xf32>
    %cst_403 = arith.constant 1.000000e+00 : f32
    %1797 = vector.broadcast %cst_403 : f32 to vector<1x16xf32>
    %1798 = arith.subf %1797, %1791 : vector<1x16xf32>
    %1799 = arith.mulf %1798, %1796 : vector<1x16xf32>
    %1800 = arith.mulf %1791, %1774 : vector<1x16xf32>
    %1801 = arith.addf %1799, %1800 : vector<1x16xf32>
    %1802 = vector.extract_strided_slice %1773 {offsets = [0, 48], sizes = [1, 16], strides = [1, 1]} : vector<1x96xf32> to vector<1x16xf32>
    %1803 = vector.extract_strided_slice %1769 {offsets = [0, 48], sizes = [1, 16], strides = [1, 1]} : vector<1x96xf32> to vector<1x16xf32>
    %1804 = arith.addf %1802, %1803 : vector<1x16xf32>
    %1805 = arith.negf %1804 : vector<1x16xf32>
    %1806 = math.exp %1805 : vector<1x16xf32>
    %cst_404 = arith.constant 1.000000e+00 : f32
    %1807 = vector.broadcast %cst_404 : f32 to vector<1x16xf32>
    %1808 = arith.addf %1807, %1806 : vector<1x16xf32>
    %1809 = arith.divf %1807, %1808 : vector<1x16xf32>
    %1810 = vector.extract_strided_slice %1773 {offsets = [0, 64], sizes = [1, 16], strides = [1, 1]} : vector<1x96xf32> to vector<1x16xf32>
    %1811 = vector.extract_strided_slice %1769 {offsets = [0, 64], sizes = [1, 16], strides = [1, 1]} : vector<1x96xf32> to vector<1x16xf32>
    %1812 = arith.addf %1810, %1811 : vector<1x16xf32>
    %1813 = arith.negf %1812 : vector<1x16xf32>
    %1814 = math.exp %1813 : vector<1x16xf32>
    %cst_405 = arith.constant 1.000000e+00 : f32
    %1815 = vector.broadcast %cst_405 : f32 to vector<1x16xf32>
    %1816 = arith.addf %1815, %1814 : vector<1x16xf32>
    %1817 = arith.divf %1815, %1816 : vector<1x16xf32>
    %1818 = vector.extract_strided_slice %1773 {offsets = [0, 80], sizes = [1, 16], strides = [1, 1]} : vector<1x96xf32> to vector<1x16xf32>
    %1819 = vector.extract_strided_slice %1769 {offsets = [0, 80], sizes = [1, 16], strides = [1, 1]} : vector<1x96xf32> to vector<1x16xf32>
    %1820 = arith.mulf %1809, %1819 : vector<1x16xf32>
    %1821 = arith.addf %1818, %1820 : vector<1x16xf32>
    %1822 = math.tanh %1821 : vector<1x16xf32>
    %cst_406 = arith.constant 1.000000e+00 : f32
    %1823 = vector.broadcast %cst_406 : f32 to vector<1x16xf32>
    %1824 = arith.subf %1823, %1817 : vector<1x16xf32>
    %1825 = arith.mulf %1824, %1822 : vector<1x16xf32>
    %1826 = arith.mulf %1817, %1775 : vector<1x16xf32>
    %1827 = arith.addf %1825, %1826 : vector<1x16xf32>
    %1828 = arith.index_cast %c9_i32_396 : i32 to index
    %c0_407 = arith.constant 0 : index
    %1829 = vector.load %arg35[%1828, %c0_407] : memref<16x16xf32, #tpu.memory_space<vmem>>, vector<1x16xf32>
    tpu.vector_store %arg35[%1828, %c0_407], %1801 {strides = array<i32>} : memref<16x16xf32, #tpu.memory_space<vmem>>, vector<1x16xf32>,
    %1830 = arith.index_cast %1767 : i32 to index
    %c0_408 = arith.constant 0 : index
    %1831 = vector.load %arg36[%1830, %c0_408] : memref<16x16xf32, #tpu.memory_space<vmem>>, vector<1x16xf32>
    tpu.vector_store %arg36[%1830, %c0_408], %1827 {strides = array<i32>} : memref<16x16xf32, #tpu.memory_space<vmem>>, vector<1x16xf32>,
    %1832 = tpu.concatenate %1801, %1827 in 1 : vector<1x16xf32>, vector<1x16xf32> -> vector<1x32xf32>
    %c10_i32_409 = arith.constant 10 : i32
    %c15_i32_410 = arith.constant 15 : i32
    %1833 = arith.subi %c15_i32_410, %c10_i32_409 : i32
    %cst_411 = arith.constant dense<0.000000e+00> : vector<1x96xf32>
    %1834 = tpu.matmul %1832, %1170, %cst_411 {dimension_numbers = #tpu.dot_dimension_numbers<[1], [0], [0], [1], [0, 0, 1, 1], [], []>} : vector<1x32xf32>, vector<32x96xf32>, vector<1x96xf32> -> vector<1x96xf32>
    %1835 = arith.addf %1834, %1171 : vector<1x96xf32>
    %1836 = arith.index_cast %c10_i32_409 : i32 to index
    %c0_412 = arith.constant 0 : index
    %1837 = vector.load %arg34[%1836, %c0_412] : memref<16x96xf32, #tpu.memory_space<vmem>>, vector<1x96xf32>
    %1838 = arith.index_cast %1833 : i32 to index
    %c0_413 = arith.constant 0 : index
    %1839 = vector.load %arg34[%1838, %c0_413] : memref<16x96xf32, #tpu.memory_space<vmem>>, vector<1x96xf32>
    %1840 = vector.extract_strided_slice %1832 {offsets = [0, 0], sizes = [1, 16], strides = [1, 1]} : vector<1x32xf32> to vector<1x16xf32>
    %1841 = vector.extract_strided_slice %1832 {offsets = [0, 16], sizes = [1, 16], strides = [1, 1]} : vector<1x32xf32> to vector<1x16xf32>
    %1842 = vector.extract_strided_slice %1837 {offsets = [0, 0], sizes = [1, 16], strides = [1, 1]} : vector<1x96xf32> to vector<1x16xf32>
    %1843 = vector.extract_strided_slice %1835 {offsets = [0, 0], sizes = [1, 16], strides = [1, 1]} : vector<1x96xf32> to vector<1x16xf32>
    %1844 = arith.addf %1842, %1843 : vector<1x16xf32>
    %1845 = arith.negf %1844 : vector<1x16xf32>
    %1846 = math.exp %1845 : vector<1x16xf32>
    %cst_414 = arith.constant 1.000000e+00 : f32
    %1847 = vector.broadcast %cst_414 : f32 to vector<1x16xf32>
    %1848 = arith.addf %1847, %1846 : vector<1x16xf32>
    %1849 = arith.divf %1847, %1848 : vector<1x16xf32>
    %1850 = vector.extract_strided_slice %1837 {offsets = [0, 16], sizes = [1, 16], strides = [1, 1]} : vector<1x96xf32> to vector<1x16xf32>
    %1851 = vector.extract_strided_slice %1835 {offsets = [0, 16], sizes = [1, 16], strides = [1, 1]} : vector<1x96xf32> to vector<1x16xf32>
    %1852 = arith.addf %1850, %1851 : vector<1x16xf32>
    %1853 = arith.negf %1852 : vector<1x16xf32>
    %1854 = math.exp %1853 : vector<1x16xf32>
    %cst_415 = arith.constant 1.000000e+00 : f32
    %1855 = vector.broadcast %cst_415 : f32 to vector<1x16xf32>
    %1856 = arith.addf %1855, %1854 : vector<1x16xf32>
    %1857 = arith.divf %1855, %1856 : vector<1x16xf32>
    %1858 = vector.extract_strided_slice %1837 {offsets = [0, 32], sizes = [1, 16], strides = [1, 1]} : vector<1x96xf32> to vector<1x16xf32>
    %1859 = vector.extract_strided_slice %1835 {offsets = [0, 32], sizes = [1, 16], strides = [1, 1]} : vector<1x96xf32> to vector<1x16xf32>
    %1860 = arith.mulf %1849, %1859 : vector<1x16xf32>
    %1861 = arith.addf %1858, %1860 : vector<1x16xf32>
    %1862 = math.tanh %1861 : vector<1x16xf32>
    %cst_416 = arith.constant 1.000000e+00 : f32
    %1863 = vector.broadcast %cst_416 : f32 to vector<1x16xf32>
    %1864 = arith.subf %1863, %1857 : vector<1x16xf32>
    %1865 = arith.mulf %1864, %1862 : vector<1x16xf32>
    %1866 = arith.mulf %1857, %1840 : vector<1x16xf32>
    %1867 = arith.addf %1865, %1866 : vector<1x16xf32>
    %1868 = vector.extract_strided_slice %1839 {offsets = [0, 48], sizes = [1, 16], strides = [1, 1]} : vector<1x96xf32> to vector<1x16xf32>
    %1869 = vector.extract_strided_slice %1835 {offsets = [0, 48], sizes = [1, 16], strides = [1, 1]} : vector<1x96xf32> to vector<1x16xf32>
    %1870 = arith.addf %1868, %1869 : vector<1x16xf32>
    %1871 = arith.negf %1870 : vector<1x16xf32>
    %1872 = math.exp %1871 : vector<1x16xf32>
    %cst_417 = arith.constant 1.000000e+00 : f32
    %1873 = vector.broadcast %cst_417 : f32 to vector<1x16xf32>
    %1874 = arith.addf %1873, %1872 : vector<1x16xf32>
    %1875 = arith.divf %1873, %1874 : vector<1x16xf32>
    %1876 = vector.extract_strided_slice %1839 {offsets = [0, 64], sizes = [1, 16], strides = [1, 1]} : vector<1x96xf32> to vector<1x16xf32>
    %1877 = vector.extract_strided_slice %1835 {offsets = [0, 64], sizes = [1, 16], strides = [1, 1]} : vector<1x96xf32> to vector<1x16xf32>
    %1878 = arith.addf %1876, %1877 : vector<1x16xf32>
    %1879 = arith.negf %1878 : vector<1x16xf32>
    %1880 = math.exp %1879 : vector<1x16xf32>
    %cst_418 = arith.constant 1.000000e+00 : f32
    %1881 = vector.broadcast %cst_418 : f32 to vector<1x16xf32>
    %1882 = arith.addf %1881, %1880 : vector<1x16xf32>
    %1883 = arith.divf %1881, %1882 : vector<1x16xf32>
    %1884 = vector.extract_strided_slice %1839 {offsets = [0, 80], sizes = [1, 16], strides = [1, 1]} : vector<1x96xf32> to vector<1x16xf32>
    %1885 = vector.extract_strided_slice %1835 {offsets = [0, 80], sizes = [1, 16], strides = [1, 1]} : vector<1x96xf32> to vector<1x16xf32>
    %1886 = arith.mulf %1875, %1885 : vector<1x16xf32>
    %1887 = arith.addf %1884, %1886 : vector<1x16xf32>
    %1888 = math.tanh %1887 : vector<1x16xf32>
    %cst_419 = arith.constant 1.000000e+00 : f32
    %1889 = vector.broadcast %cst_419 : f32 to vector<1x16xf32>
    %1890 = arith.subf %1889, %1883 : vector<1x16xf32>
    %1891 = arith.mulf %1890, %1888 : vector<1x16xf32>
    %1892 = arith.mulf %1883, %1841 : vector<1x16xf32>
    %1893 = arith.addf %1891, %1892 : vector<1x16xf32>
    %1894 = arith.index_cast %c10_i32_409 : i32 to index
    %c0_420 = arith.constant 0 : index
    %1895 = vector.load %arg35[%1894, %c0_420] : memref<16x16xf32, #tpu.memory_space<vmem>>, vector<1x16xf32>
    tpu.vector_store %arg35[%1894, %c0_420], %1867 {strides = array<i32>} : memref<16x16xf32, #tpu.memory_space<vmem>>, vector<1x16xf32>,
    %1896 = arith.index_cast %1833 : i32 to index
    %c0_421 = arith.constant 0 : index
    %1897 = vector.load %arg36[%1896, %c0_421] : memref<16x16xf32, #tpu.memory_space<vmem>>, vector<1x16xf32>
    tpu.vector_store %arg36[%1896, %c0_421], %1893 {strides = array<i32>} : memref<16x16xf32, #tpu.memory_space<vmem>>, vector<1x16xf32>,
    %1898 = tpu.concatenate %1867, %1893 in 1 : vector<1x16xf32>, vector<1x16xf32> -> vector<1x32xf32>
    %c11_i32_422 = arith.constant 11 : i32
    %c15_i32_423 = arith.constant 15 : i32
    %1899 = arith.subi %c15_i32_423, %c11_i32_422 : i32
    %cst_424 = arith.constant dense<0.000000e+00> : vector<1x96xf32>
    %1900 = tpu.matmul %1898, %1170, %cst_424 {dimension_numbers = #tpu.dot_dimension_numbers<[1], [0], [0], [1], [0, 0, 1, 1], [], []>} : vector<1x32xf32>, vector<32x96xf32>, vector<1x96xf32> -> vector<1x96xf32>
    %1901 = arith.addf %1900, %1171 : vector<1x96xf32>
    %1902 = arith.index_cast %c11_i32_422 : i32 to index
    %c0_425 = arith.constant 0 : index
    %1903 = vector.load %arg34[%1902, %c0_425] : memref<16x96xf32, #tpu.memory_space<vmem>>, vector<1x96xf32>
    %1904 = arith.index_cast %1899 : i32 to index
    %c0_426 = arith.constant 0 : index
    %1905 = vector.load %arg34[%1904, %c0_426] : memref<16x96xf32, #tpu.memory_space<vmem>>, vector<1x96xf32>
    %1906 = vector.extract_strided_slice %1898 {offsets = [0, 0], sizes = [1, 16], strides = [1, 1]} : vector<1x32xf32> to vector<1x16xf32>
    %1907 = vector.extract_strided_slice %1898 {offsets = [0, 16], sizes = [1, 16], strides = [1, 1]} : vector<1x32xf32> to vector<1x16xf32>
    %1908 = vector.extract_strided_slice %1903 {offsets = [0, 0], sizes = [1, 16], strides = [1, 1]} : vector<1x96xf32> to vector<1x16xf32>
    %1909 = vector.extract_strided_slice %1901 {offsets = [0, 0], sizes = [1, 16], strides = [1, 1]} : vector<1x96xf32> to vector<1x16xf32>
    %1910 = arith.addf %1908, %1909 : vector<1x16xf32>
    %1911 = arith.negf %1910 : vector<1x16xf32>
    %1912 = math.exp %1911 : vector<1x16xf32>
    %cst_427 = arith.constant 1.000000e+00 : f32
    %1913 = vector.broadcast %cst_427 : f32 to vector<1x16xf32>
    %1914 = arith.addf %1913, %1912 : vector<1x16xf32>
    %1915 = arith.divf %1913, %1914 : vector<1x16xf32>
    %1916 = vector.extract_strided_slice %1903 {offsets = [0, 16], sizes = [1, 16], strides = [1, 1]} : vector<1x96xf32> to vector<1x16xf32>
    %1917 = vector.extract_strided_slice %1901 {offsets = [0, 16], sizes = [1, 16], strides = [1, 1]} : vector<1x96xf32> to vector<1x16xf32>
    %1918 = arith.addf %1916, %1917 : vector<1x16xf32>
    %1919 = arith.negf %1918 : vector<1x16xf32>
    %1920 = math.exp %1919 : vector<1x16xf32>
    %cst_428 = arith.constant 1.000000e+00 : f32
    %1921 = vector.broadcast %cst_428 : f32 to vector<1x16xf32>
    %1922 = arith.addf %1921, %1920 : vector<1x16xf32>
    %1923 = arith.divf %1921, %1922 : vector<1x16xf32>
    %1924 = vector.extract_strided_slice %1903 {offsets = [0, 32], sizes = [1, 16], strides = [1, 1]} : vector<1x96xf32> to vector<1x16xf32>
    %1925 = vector.extract_strided_slice %1901 {offsets = [0, 32], sizes = [1, 16], strides = [1, 1]} : vector<1x96xf32> to vector<1x16xf32>
    %1926 = arith.mulf %1915, %1925 : vector<1x16xf32>
    %1927 = arith.addf %1924, %1926 : vector<1x16xf32>
    %1928 = math.tanh %1927 : vector<1x16xf32>
    %cst_429 = arith.constant 1.000000e+00 : f32
    %1929 = vector.broadcast %cst_429 : f32 to vector<1x16xf32>
    %1930 = arith.subf %1929, %1923 : vector<1x16xf32>
    %1931 = arith.mulf %1930, %1928 : vector<1x16xf32>
    %1932 = arith.mulf %1923, %1906 : vector<1x16xf32>
    %1933 = arith.addf %1931, %1932 : vector<1x16xf32>
    %1934 = vector.extract_strided_slice %1905 {offsets = [0, 48], sizes = [1, 16], strides = [1, 1]} : vector<1x96xf32> to vector<1x16xf32>
    %1935 = vector.extract_strided_slice %1901 {offsets = [0, 48], sizes = [1, 16], strides = [1, 1]} : vector<1x96xf32> to vector<1x16xf32>
    %1936 = arith.addf %1934, %1935 : vector<1x16xf32>
    %1937 = arith.negf %1936 : vector<1x16xf32>
    %1938 = math.exp %1937 : vector<1x16xf32>
    %cst_430 = arith.constant 1.000000e+00 : f32
    %1939 = vector.broadcast %cst_430 : f32 to vector<1x16xf32>
    %1940 = arith.addf %1939, %1938 : vector<1x16xf32>
    %1941 = arith.divf %1939, %1940 : vector<1x16xf32>
    %1942 = vector.extract_strided_slice %1905 {offsets = [0, 64], sizes = [1, 16], strides = [1, 1]} : vector<1x96xf32> to vector<1x16xf32>
    %1943 = vector.extract_strided_slice %1901 {offsets = [0, 64], sizes = [1, 16], strides = [1, 1]} : vector<1x96xf32> to vector<1x16xf32>
    %1944 = arith.addf %1942, %1943 : vector<1x16xf32>
    %1945 = arith.negf %1944 : vector<1x16xf32>
    %1946 = math.exp %1945 : vector<1x16xf32>
    %cst_431 = arith.constant 1.000000e+00 : f32
    %1947 = vector.broadcast %cst_431 : f32 to vector<1x16xf32>
    %1948 = arith.addf %1947, %1946 : vector<1x16xf32>
    %1949 = arith.divf %1947, %1948 : vector<1x16xf32>
    %1950 = vector.extract_strided_slice %1905 {offsets = [0, 80], sizes = [1, 16], strides = [1, 1]} : vector<1x96xf32> to vector<1x16xf32>
    %1951 = vector.extract_strided_slice %1901 {offsets = [0, 80], sizes = [1, 16], strides = [1, 1]} : vector<1x96xf32> to vector<1x16xf32>
    %1952 = arith.mulf %1941, %1951 : vector<1x16xf32>
    %1953 = arith.addf %1950, %1952 : vector<1x16xf32>
    %1954 = math.tanh %1953 : vector<1x16xf32>
    %cst_432 = arith.constant 1.000000e+00 : f32
    %1955 = vector.broadcast %cst_432 : f32 to vector<1x16xf32>
    %1956 = arith.subf %1955, %1949 : vector<1x16xf32>
    %1957 = arith.mulf %1956, %1954 : vector<1x16xf32>
    %1958 = arith.mulf %1949, %1907 : vector<1x16xf32>
    %1959 = arith.addf %1957, %1958 : vector<1x16xf32>
    %1960 = arith.index_cast %c11_i32_422 : i32 to index
    %c0_433 = arith.constant 0 : index
    %1961 = vector.load %arg35[%1960, %c0_433] : memref<16x16xf32, #tpu.memory_space<vmem>>, vector<1x16xf32>
    tpu.vector_store %arg35[%1960, %c0_433], %1933 {strides = array<i32>} : memref<16x16xf32, #tpu.memory_space<vmem>>, vector<1x16xf32>,
    %1962 = arith.index_cast %1899 : i32 to index
    %c0_434 = arith.constant 0 : index
    %1963 = vector.load %arg36[%1962, %c0_434] : memref<16x16xf32, #tpu.memory_space<vmem>>, vector<1x16xf32>
    tpu.vector_store %arg36[%1962, %c0_434], %1959 {strides = array<i32>} : memref<16x16xf32, #tpu.memory_space<vmem>>, vector<1x16xf32>,
    %1964 = tpu.concatenate %1933, %1959 in 1 : vector<1x16xf32>, vector<1x16xf32> -> vector<1x32xf32>
    %c12_i32_435 = arith.constant 12 : i32
    %c15_i32_436 = arith.constant 15 : i32
    %1965 = arith.subi %c15_i32_436, %c12_i32_435 : i32
    %cst_437 = arith.constant dense<0.000000e+00> : vector<1x96xf32>
    %1966 = tpu.matmul %1964, %1170, %cst_437 {dimension_numbers = #tpu.dot_dimension_numbers<[1], [0], [0], [1], [0, 0, 1, 1], [], []>} : vector<1x32xf32>, vector<32x96xf32>, vector<1x96xf32> -> vector<1x96xf32>
    %1967 = arith.addf %1966, %1171 : vector<1x96xf32>
    %1968 = arith.index_cast %c12_i32_435 : i32 to index
    %c0_438 = arith.constant 0 : index
    %1969 = vector.load %arg34[%1968, %c0_438] : memref<16x96xf32, #tpu.memory_space<vmem>>, vector<1x96xf32>
    %1970 = arith.index_cast %1965 : i32 to index
    %c0_439 = arith.constant 0 : index
    %1971 = vector.load %arg34[%1970, %c0_439] : memref<16x96xf32, #tpu.memory_space<vmem>>, vector<1x96xf32>
    %1972 = vector.extract_strided_slice %1964 {offsets = [0, 0], sizes = [1, 16], strides = [1, 1]} : vector<1x32xf32> to vector<1x16xf32>
    %1973 = vector.extract_strided_slice %1964 {offsets = [0, 16], sizes = [1, 16], strides = [1, 1]} : vector<1x32xf32> to vector<1x16xf32>
    %1974 = vector.extract_strided_slice %1969 {offsets = [0, 0], sizes = [1, 16], strides = [1, 1]} : vector<1x96xf32> to vector<1x16xf32>
    %1975 = vector.extract_strided_slice %1967 {offsets = [0, 0], sizes = [1, 16], strides = [1, 1]} : vector<1x96xf32> to vector<1x16xf32>
    %1976 = arith.addf %1974, %1975 : vector<1x16xf32>
    %1977 = arith.negf %1976 : vector<1x16xf32>
    %1978 = math.exp %1977 : vector<1x16xf32>
    %cst_440 = arith.constant 1.000000e+00 : f32
    %1979 = vector.broadcast %cst_440 : f32 to vector<1x16xf32>
    %1980 = arith.addf %1979, %1978 : vector<1x16xf32>
    %1981 = arith.divf %1979, %1980 : vector<1x16xf32>
    %1982 = vector.extract_strided_slice %1969 {offsets = [0, 16], sizes = [1, 16], strides = [1, 1]} : vector<1x96xf32> to vector<1x16xf32>
    %1983 = vector.extract_strided_slice %1967 {offsets = [0, 16], sizes = [1, 16], strides = [1, 1]} : vector<1x96xf32> to vector<1x16xf32>
    %1984 = arith.addf %1982, %1983 : vector<1x16xf32>
    %1985 = arith.negf %1984 : vector<1x16xf32>
    %1986 = math.exp %1985 : vector<1x16xf32>
    %cst_441 = arith.constant 1.000000e+00 : f32
    %1987 = vector.broadcast %cst_441 : f32 to vector<1x16xf32>
    %1988 = arith.addf %1987, %1986 : vector<1x16xf32>
    %1989 = arith.divf %1987, %1988 : vector<1x16xf32>
    %1990 = vector.extract_strided_slice %1969 {offsets = [0, 32], sizes = [1, 16], strides = [1, 1]} : vector<1x96xf32> to vector<1x16xf32>
    %1991 = vector.extract_strided_slice %1967 {offsets = [0, 32], sizes = [1, 16], strides = [1, 1]} : vector<1x96xf32> to vector<1x16xf32>
    %1992 = arith.mulf %1981, %1991 : vector<1x16xf32>
    %1993 = arith.addf %1990, %1992 : vector<1x16xf32>
    %1994 = math.tanh %1993 : vector<1x16xf32>
    %cst_442 = arith.constant 1.000000e+00 : f32
    %1995 = vector.broadcast %cst_442 : f32 to vector<1x16xf32>
    %1996 = arith.subf %1995, %1989 : vector<1x16xf32>
    %1997 = arith.mulf %1996, %1994 : vector<1x16xf32>
    %1998 = arith.mulf %1989, %1972 : vector<1x16xf32>
    %1999 = arith.addf %1997, %1998 : vector<1x16xf32>
    %2000 = vector.extract_strided_slice %1971 {offsets = [0, 48], sizes = [1, 16], strides = [1, 1]} : vector<1x96xf32> to vector<1x16xf32>
    %2001 = vector.extract_strided_slice %1967 {offsets = [0, 48], sizes = [1, 16], strides = [1, 1]} : vector<1x96xf32> to vector<1x16xf32>
    %2002 = arith.addf %2000, %2001 : vector<1x16xf32>
    %2003 = arith.negf %2002 : vector<1x16xf32>
    %2004 = math.exp %2003 : vector<1x16xf32>
    %cst_443 = arith.constant 1.000000e+00 : f32
    %2005 = vector.broadcast %cst_443 : f32 to vector<1x16xf32>
    %2006 = arith.addf %2005, %2004 : vector<1x16xf32>
    %2007 = arith.divf %2005, %2006 : vector<1x16xf32>
    %2008 = vector.extract_strided_slice %1971 {offsets = [0, 64], sizes = [1, 16], strides = [1, 1]} : vector<1x96xf32> to vector<1x16xf32>
    %2009 = vector.extract_strided_slice %1967 {offsets = [0, 64], sizes = [1, 16], strides = [1, 1]} : vector<1x96xf32> to vector<1x16xf32>
    %2010 = arith.addf %2008, %2009 : vector<1x16xf32>
    %2011 = arith.negf %2010 : vector<1x16xf32>
    %2012 = math.exp %2011 : vector<1x16xf32>
    %cst_444 = arith.constant 1.000000e+00 : f32
    %2013 = vector.broadcast %cst_444 : f32 to vector<1x16xf32>
    %2014 = arith.addf %2013, %2012 : vector<1x16xf32>
    %2015 = arith.divf %2013, %2014 : vector<1x16xf32>
    %2016 = vector.extract_strided_slice %1971 {offsets = [0, 80], sizes = [1, 16], strides = [1, 1]} : vector<1x96xf32> to vector<1x16xf32>
    %2017 = vector.extract_strided_slice %1967 {offsets = [0, 80], sizes = [1, 16], strides = [1, 1]} : vector<1x96xf32> to vector<1x16xf32>
    %2018 = arith.mulf %2007, %2017 : vector<1x16xf32>
    %2019 = arith.addf %2016, %2018 : vector<1x16xf32>
    %2020 = math.tanh %2019 : vector<1x16xf32>
    %cst_445 = arith.constant 1.000000e+00 : f32
    %2021 = vector.broadcast %cst_445 : f32 to vector<1x16xf32>
    %2022 = arith.subf %2021, %2015 : vector<1x16xf32>
    %2023 = arith.mulf %2022, %2020 : vector<1x16xf32>
    %2024 = arith.mulf %2015, %1973 : vector<1x16xf32>
    %2025 = arith.addf %2023, %2024 : vector<1x16xf32>
    %2026 = arith.index_cast %c12_i32_435 : i32 to index
    %c0_446 = arith.constant 0 : index
    %2027 = vector.load %arg35[%2026, %c0_446] : memref<16x16xf32, #tpu.memory_space<vmem>>, vector<1x16xf32>
    tpu.vector_store %arg35[%2026, %c0_446], %1999 {strides = array<i32>} : memref<16x16xf32, #tpu.memory_space<vmem>>, vector<1x16xf32>,
    %2028 = arith.index_cast %1965 : i32 to index
    %c0_447 = arith.constant 0 : index
    %2029 = vector.load %arg36[%2028, %c0_447] : memref<16x16xf32, #tpu.memory_space<vmem>>, vector<1x16xf32>
    tpu.vector_store %arg36[%2028, %c0_447], %2025 {strides = array<i32>} : memref<16x16xf32, #tpu.memory_space<vmem>>, vector<1x16xf32>,
    %2030 = tpu.concatenate %1999, %2025 in 1 : vector<1x16xf32>, vector<1x16xf32> -> vector<1x32xf32>
    %c13_i32_448 = arith.constant 13 : i32
    %c15_i32_449 = arith.constant 15 : i32
    %2031 = arith.subi %c15_i32_449, %c13_i32_448 : i32
    %cst_450 = arith.constant dense<0.000000e+00> : vector<1x96xf32>
    %2032 = tpu.matmul %2030, %1170, %cst_450 {dimension_numbers = #tpu.dot_dimension_numbers<[1], [0], [0], [1], [0, 0, 1, 1], [], []>} : vector<1x32xf32>, vector<32x96xf32>, vector<1x96xf32> -> vector<1x96xf32>
    %2033 = arith.addf %2032, %1171 : vector<1x96xf32>
    %2034 = arith.index_cast %c13_i32_448 : i32 to index
    %c0_451 = arith.constant 0 : index
    %2035 = vector.load %arg34[%2034, %c0_451] : memref<16x96xf32, #tpu.memory_space<vmem>>, vector<1x96xf32>
    %2036 = arith.index_cast %2031 : i32 to index
    %c0_452 = arith.constant 0 : index
    %2037 = vector.load %arg34[%2036, %c0_452] : memref<16x96xf32, #tpu.memory_space<vmem>>, vector<1x96xf32>
    %2038 = vector.extract_strided_slice %2030 {offsets = [0, 0], sizes = [1, 16], strides = [1, 1]} : vector<1x32xf32> to vector<1x16xf32>
    %2039 = vector.extract_strided_slice %2030 {offsets = [0, 16], sizes = [1, 16], strides = [1, 1]} : vector<1x32xf32> to vector<1x16xf32>
    %2040 = vector.extract_strided_slice %2035 {offsets = [0, 0], sizes = [1, 16], strides = [1, 1]} : vector<1x96xf32> to vector<1x16xf32>
    %2041 = vector.extract_strided_slice %2033 {offsets = [0, 0], sizes = [1, 16], strides = [1, 1]} : vector<1x96xf32> to vector<1x16xf32>
    %2042 = arith.addf %2040, %2041 : vector<1x16xf32>
    %2043 = arith.negf %2042 : vector<1x16xf32>
    %2044 = math.exp %2043 : vector<1x16xf32>
    %cst_453 = arith.constant 1.000000e+00 : f32
    %2045 = vector.broadcast %cst_453 : f32 to vector<1x16xf32>
    %2046 = arith.addf %2045, %2044 : vector<1x16xf32>
    %2047 = arith.divf %2045, %2046 : vector<1x16xf32>
    %2048 = vector.extract_strided_slice %2035 {offsets = [0, 16], sizes = [1, 16], strides = [1, 1]} : vector<1x96xf32> to vector<1x16xf32>
    %2049 = vector.extract_strided_slice %2033 {offsets = [0, 16], sizes = [1, 16], strides = [1, 1]} : vector<1x96xf32> to vector<1x16xf32>
    %2050 = arith.addf %2048, %2049 : vector<1x16xf32>
    %2051 = arith.negf %2050 : vector<1x16xf32>
    %2052 = math.exp %2051 : vector<1x16xf32>
    %cst_454 = arith.constant 1.000000e+00 : f32
    %2053 = vector.broadcast %cst_454 : f32 to vector<1x16xf32>
    %2054 = arith.addf %2053, %2052 : vector<1x16xf32>
    %2055 = arith.divf %2053, %2054 : vector<1x16xf32>
    %2056 = vector.extract_strided_slice %2035 {offsets = [0, 32], sizes = [1, 16], strides = [1, 1]} : vector<1x96xf32> to vector<1x16xf32>
    %2057 = vector.extract_strided_slice %2033 {offsets = [0, 32], sizes = [1, 16], strides = [1, 1]} : vector<1x96xf32> to vector<1x16xf32>
    %2058 = arith.mulf %2047, %2057 : vector<1x16xf32>
    %2059 = arith.addf %2056, %2058 : vector<1x16xf32>
    %2060 = math.tanh %2059 : vector<1x16xf32>
    %cst_455 = arith.constant 1.000000e+00 : f32
    %2061 = vector.broadcast %cst_455 : f32 to vector<1x16xf32>
    %2062 = arith.subf %2061, %2055 : vector<1x16xf32>
    %2063 = arith.mulf %2062, %2060 : vector<1x16xf32>
    %2064 = arith.mulf %2055, %2038 : vector<1x16xf32>
    %2065 = arith.addf %2063, %2064 : vector<1x16xf32>
    %2066 = vector.extract_strided_slice %2037 {offsets = [0, 48], sizes = [1, 16], strides = [1, 1]} : vector<1x96xf32> to vector<1x16xf32>
    %2067 = vector.extract_strided_slice %2033 {offsets = [0, 48], sizes = [1, 16], strides = [1, 1]} : vector<1x96xf32> to vector<1x16xf32>
    %2068 = arith.addf %2066, %2067 : vector<1x16xf32>
    %2069 = arith.negf %2068 : vector<1x16xf32>
    %2070 = math.exp %2069 : vector<1x16xf32>
    %cst_456 = arith.constant 1.000000e+00 : f32
    %2071 = vector.broadcast %cst_456 : f32 to vector<1x16xf32>
    %2072 = arith.addf %2071, %2070 : vector<1x16xf32>
    %2073 = arith.divf %2071, %2072 : vector<1x16xf32>
    %2074 = vector.extract_strided_slice %2037 {offsets = [0, 64], sizes = [1, 16], strides = [1, 1]} : vector<1x96xf32> to vector<1x16xf32>
    %2075 = vector.extract_strided_slice %2033 {offsets = [0, 64], sizes = [1, 16], strides = [1, 1]} : vector<1x96xf32> to vector<1x16xf32>
    %2076 = arith.addf %2074, %2075 : vector<1x16xf32>
    %2077 = arith.negf %2076 : vector<1x16xf32>
    %2078 = math.exp %2077 : vector<1x16xf32>
    %cst_457 = arith.constant 1.000000e+00 : f32
    %2079 = vector.broadcast %cst_457 : f32 to vector<1x16xf32>
    %2080 = arith.addf %2079, %2078 : vector<1x16xf32>
    %2081 = arith.divf %2079, %2080 : vector<1x16xf32>
    %2082 = vector.extract_strided_slice %2037 {offsets = [0, 80], sizes = [1, 16], strides = [1, 1]} : vector<1x96xf32> to vector<1x16xf32>
    %2083 = vector.extract_strided_slice %2033 {offsets = [0, 80], sizes = [1, 16], strides = [1, 1]} : vector<1x96xf32> to vector<1x16xf32>
    %2084 = arith.mulf %2073, %2083 : vector<1x16xf32>
    %2085 = arith.addf %2082, %2084 : vector<1x16xf32>
    %2086 = math.tanh %2085 : vector<1x16xf32>
    %cst_458 = arith.constant 1.000000e+00 : f32
    %2087 = vector.broadcast %cst_458 : f32 to vector<1x16xf32>
    %2088 = arith.subf %2087, %2081 : vector<1x16xf32>
    %2089 = arith.mulf %2088, %2086 : vector<1x16xf32>
    %2090 = arith.mulf %2081, %2039 : vector<1x16xf32>
    %2091 = arith.addf %2089, %2090 : vector<1x16xf32>
    %2092 = arith.index_cast %c13_i32_448 : i32 to index
    %c0_459 = arith.constant 0 : index
    %2093 = vector.load %arg35[%2092, %c0_459] : memref<16x16xf32, #tpu.memory_space<vmem>>, vector<1x16xf32>
    tpu.vector_store %arg35[%2092, %c0_459], %2065 {strides = array<i32>} : memref<16x16xf32, #tpu.memory_space<vmem>>, vector<1x16xf32>,
    %2094 = arith.index_cast %2031 : i32 to index
    %c0_460 = arith.constant 0 : index
    %2095 = vector.load %arg36[%2094, %c0_460] : memref<16x16xf32, #tpu.memory_space<vmem>>, vector<1x16xf32>
    tpu.vector_store %arg36[%2094, %c0_460], %2091 {strides = array<i32>} : memref<16x16xf32, #tpu.memory_space<vmem>>, vector<1x16xf32>,
    %2096 = tpu.concatenate %2065, %2091 in 1 : vector<1x16xf32>, vector<1x16xf32> -> vector<1x32xf32>
    %c14_i32_461 = arith.constant 14 : i32
    %c15_i32_462 = arith.constant 15 : i32
    %2097 = arith.subi %c15_i32_462, %c14_i32_461 : i32
    %cst_463 = arith.constant dense<0.000000e+00> : vector<1x96xf32>
    %2098 = tpu.matmul %2096, %1170, %cst_463 {dimension_numbers = #tpu.dot_dimension_numbers<[1], [0], [0], [1], [0, 0, 1, 1], [], []>} : vector<1x32xf32>, vector<32x96xf32>, vector<1x96xf32> -> vector<1x96xf32>
    %2099 = arith.addf %2098, %1171 : vector<1x96xf32>
    %2100 = arith.index_cast %c14_i32_461 : i32 to index
    %c0_464 = arith.constant 0 : index
    %2101 = vector.load %arg34[%2100, %c0_464] : memref<16x96xf32, #tpu.memory_space<vmem>>, vector<1x96xf32>
    %2102 = arith.index_cast %2097 : i32 to index
    %c0_465 = arith.constant 0 : index
    %2103 = vector.load %arg34[%2102, %c0_465] : memref<16x96xf32, #tpu.memory_space<vmem>>, vector<1x96xf32>
    %2104 = vector.extract_strided_slice %2096 {offsets = [0, 0], sizes = [1, 16], strides = [1, 1]} : vector<1x32xf32> to vector<1x16xf32>
    %2105 = vector.extract_strided_slice %2096 {offsets = [0, 16], sizes = [1, 16], strides = [1, 1]} : vector<1x32xf32> to vector<1x16xf32>
    %2106 = vector.extract_strided_slice %2101 {offsets = [0, 0], sizes = [1, 16], strides = [1, 1]} : vector<1x96xf32> to vector<1x16xf32>
    %2107 = vector.extract_strided_slice %2099 {offsets = [0, 0], sizes = [1, 16], strides = [1, 1]} : vector<1x96xf32> to vector<1x16xf32>
    %2108 = arith.addf %2106, %2107 : vector<1x16xf32>
    %2109 = arith.negf %2108 : vector<1x16xf32>
    %2110 = math.exp %2109 : vector<1x16xf32>
    %cst_466 = arith.constant 1.000000e+00 : f32
    %2111 = vector.broadcast %cst_466 : f32 to vector<1x16xf32>
    %2112 = arith.addf %2111, %2110 : vector<1x16xf32>
    %2113 = arith.divf %2111, %2112 : vector<1x16xf32>
    %2114 = vector.extract_strided_slice %2101 {offsets = [0, 16], sizes = [1, 16], strides = [1, 1]} : vector<1x96xf32> to vector<1x16xf32>
    %2115 = vector.extract_strided_slice %2099 {offsets = [0, 16], sizes = [1, 16], strides = [1, 1]} : vector<1x96xf32> to vector<1x16xf32>
    %2116 = arith.addf %2114, %2115 : vector<1x16xf32>
    %2117 = arith.negf %2116 : vector<1x16xf32>
    %2118 = math.exp %2117 : vector<1x16xf32>
    %cst_467 = arith.constant 1.000000e+00 : f32
    %2119 = vector.broadcast %cst_467 : f32 to vector<1x16xf32>
    %2120 = arith.addf %2119, %2118 : vector<1x16xf32>
    %2121 = arith.divf %2119, %2120 : vector<1x16xf32>
    %2122 = vector.extract_strided_slice %2101 {offsets = [0, 32], sizes = [1, 16], strides = [1, 1]} : vector<1x96xf32> to vector<1x16xf32>
    %2123 = vector.extract_strided_slice %2099 {offsets = [0, 32], sizes = [1, 16], strides = [1, 1]} : vector<1x96xf32> to vector<1x16xf32>
    %2124 = arith.mulf %2113, %2123 : vector<1x16xf32>
    %2125 = arith.addf %2122, %2124 : vector<1x16xf32>
    %2126 = math.tanh %2125 : vector<1x16xf32>
    %cst_468 = arith.constant 1.000000e+00 : f32
    %2127 = vector.broadcast %cst_468 : f32 to vector<1x16xf32>
    %2128 = arith.subf %2127, %2121 : vector<1x16xf32>
    %2129 = arith.mulf %2128, %2126 : vector<1x16xf32>
    %2130 = arith.mulf %2121, %2104 : vector<1x16xf32>
    %2131 = arith.addf %2129, %2130 : vector<1x16xf32>
    %2132 = vector.extract_strided_slice %2103 {offsets = [0, 48], sizes = [1, 16], strides = [1, 1]} : vector<1x96xf32> to vector<1x16xf32>
    %2133 = vector.extract_strided_slice %2099 {offsets = [0, 48], sizes = [1, 16], strides = [1, 1]} : vector<1x96xf32> to vector<1x16xf32>
    %2134 = arith.addf %2132, %2133 : vector<1x16xf32>
    %2135 = arith.negf %2134 : vector<1x16xf32>
    %2136 = math.exp %2135 : vector<1x16xf32>
    %cst_469 = arith.constant 1.000000e+00 : f32
    %2137 = vector.broadcast %cst_469 : f32 to vector<1x16xf32>
    %2138 = arith.addf %2137, %2136 : vector<1x16xf32>
    %2139 = arith.divf %2137, %2138 : vector<1x16xf32>
    %2140 = vector.extract_strided_slice %2103 {offsets = [0, 64], sizes = [1, 16], strides = [1, 1]} : vector<1x96xf32> to vector<1x16xf32>
    %2141 = vector.extract_strided_slice %2099 {offsets = [0, 64], sizes = [1, 16], strides = [1, 1]} : vector<1x96xf32> to vector<1x16xf32>
    %2142 = arith.addf %2140, %2141 : vector<1x16xf32>
    %2143 = arith.negf %2142 : vector<1x16xf32>
    %2144 = math.exp %2143 : vector<1x16xf32>
    %cst_470 = arith.constant 1.000000e+00 : f32
    %2145 = vector.broadcast %cst_470 : f32 to vector<1x16xf32>
    %2146 = arith.addf %2145, %2144 : vector<1x16xf32>
    %2147 = arith.divf %2145, %2146 : vector<1x16xf32>
    %2148 = vector.extract_strided_slice %2103 {offsets = [0, 80], sizes = [1, 16], strides = [1, 1]} : vector<1x96xf32> to vector<1x16xf32>
    %2149 = vector.extract_strided_slice %2099 {offsets = [0, 80], sizes = [1, 16], strides = [1, 1]} : vector<1x96xf32> to vector<1x16xf32>
    %2150 = arith.mulf %2139, %2149 : vector<1x16xf32>
    %2151 = arith.addf %2148, %2150 : vector<1x16xf32>
    %2152 = math.tanh %2151 : vector<1x16xf32>
    %cst_471 = arith.constant 1.000000e+00 : f32
    %2153 = vector.broadcast %cst_471 : f32 to vector<1x16xf32>
    %2154 = arith.subf %2153, %2147 : vector<1x16xf32>
    %2155 = arith.mulf %2154, %2152 : vector<1x16xf32>
    %2156 = arith.mulf %2147, %2105 : vector<1x16xf32>
    %2157 = arith.addf %2155, %2156 : vector<1x16xf32>
    %2158 = arith.index_cast %c14_i32_461 : i32 to index
    %c0_472 = arith.constant 0 : index
    %2159 = vector.load %arg35[%2158, %c0_472] : memref<16x16xf32, #tpu.memory_space<vmem>>, vector<1x16xf32>
    tpu.vector_store %arg35[%2158, %c0_472], %2131 {strides = array<i32>} : memref<16x16xf32, #tpu.memory_space<vmem>>, vector<1x16xf32>,
    %2160 = arith.index_cast %2097 : i32 to index
    %c0_473 = arith.constant 0 : index
    %2161 = vector.load %arg36[%2160, %c0_473] : memref<16x16xf32, #tpu.memory_space<vmem>>, vector<1x16xf32>
    tpu.vector_store %arg36[%2160, %c0_473], %2157 {strides = array<i32>} : memref<16x16xf32, #tpu.memory_space<vmem>>, vector<1x16xf32>,
    %2162 = tpu.concatenate %2131, %2157 in 1 : vector<1x16xf32>, vector<1x16xf32> -> vector<1x32xf32>
    %c15_i32_474 = arith.constant 15 : i32
    %c15_i32_475 = arith.constant 15 : i32
    %2163 = arith.subi %c15_i32_475, %c15_i32_474 : i32
    %cst_476 = arith.constant dense<0.000000e+00> : vector<1x96xf32>
    %2164 = tpu.matmul %2162, %1170, %cst_476 {dimension_numbers = #tpu.dot_dimension_numbers<[1], [0], [0], [1], [0, 0, 1, 1], [], []>} : vector<1x32xf32>, vector<32x96xf32>, vector<1x96xf32> -> vector<1x96xf32>
    %2165 = arith.addf %2164, %1171 : vector<1x96xf32>
    %2166 = arith.index_cast %c15_i32_474 : i32 to index
    %c0_477 = arith.constant 0 : index
    %2167 = vector.load %arg34[%2166, %c0_477] : memref<16x96xf32, #tpu.memory_space<vmem>>, vector<1x96xf32>
    %2168 = arith.index_cast %2163 : i32 to index
    %c0_478 = arith.constant 0 : index
    %2169 = vector.load %arg34[%2168, %c0_478] : memref<16x96xf32, #tpu.memory_space<vmem>>, vector<1x96xf32>
    %2170 = vector.extract_strided_slice %2162 {offsets = [0, 0], sizes = [1, 16], strides = [1, 1]} : vector<1x32xf32> to vector<1x16xf32>
    %2171 = vector.extract_strided_slice %2162 {offsets = [0, 16], sizes = [1, 16], strides = [1, 1]} : vector<1x32xf32> to vector<1x16xf32>
    %2172 = vector.extract_strided_slice %2167 {offsets = [0, 0], sizes = [1, 16], strides = [1, 1]} : vector<1x96xf32> to vector<1x16xf32>
    %2173 = vector.extract_strided_slice %2165 {offsets = [0, 0], sizes = [1, 16], strides = [1, 1]} : vector<1x96xf32> to vector<1x16xf32>
    %2174 = arith.addf %2172, %2173 : vector<1x16xf32>
    %2175 = arith.negf %2174 : vector<1x16xf32>
    %2176 = math.exp %2175 : vector<1x16xf32>
    %cst_479 = arith.constant 1.000000e+00 : f32
    %2177 = vector.broadcast %cst_479 : f32 to vector<1x16xf32>
    %2178 = arith.addf %2177, %2176 : vector<1x16xf32>
    %2179 = arith.divf %2177, %2178 : vector<1x16xf32>
    %2180 = vector.extract_strided_slice %2167 {offsets = [0, 16], sizes = [1, 16], strides = [1, 1]} : vector<1x96xf32> to vector<1x16xf32>
    %2181 = vector.extract_strided_slice %2165 {offsets = [0, 16], sizes = [1, 16], strides = [1, 1]} : vector<1x96xf32> to vector<1x16xf32>
    %2182 = arith.addf %2180, %2181 : vector<1x16xf32>
    %2183 = arith.negf %2182 : vector<1x16xf32>
    %2184 = math.exp %2183 : vector<1x16xf32>
    %cst_480 = arith.constant 1.000000e+00 : f32
    %2185 = vector.broadcast %cst_480 : f32 to vector<1x16xf32>
    %2186 = arith.addf %2185, %2184 : vector<1x16xf32>
    %2187 = arith.divf %2185, %2186 : vector<1x16xf32>
    %2188 = vector.extract_strided_slice %2167 {offsets = [0, 32], sizes = [1, 16], strides = [1, 1]} : vector<1x96xf32> to vector<1x16xf32>
    %2189 = vector.extract_strided_slice %2165 {offsets = [0, 32], sizes = [1, 16], strides = [1, 1]} : vector<1x96xf32> to vector<1x16xf32>
    %2190 = arith.mulf %2179, %2189 : vector<1x16xf32>
    %2191 = arith.addf %2188, %2190 : vector<1x16xf32>
    %2192 = math.tanh %2191 : vector<1x16xf32>
    %cst_481 = arith.constant 1.000000e+00 : f32
    %2193 = vector.broadcast %cst_481 : f32 to vector<1x16xf32>
    %2194 = arith.subf %2193, %2187 : vector<1x16xf32>
    %2195 = arith.mulf %2194, %2192 : vector<1x16xf32>
    %2196 = arith.mulf %2187, %2170 : vector<1x16xf32>
    %2197 = arith.addf %2195, %2196 : vector<1x16xf32>
    %2198 = vector.extract_strided_slice %2169 {offsets = [0, 48], sizes = [1, 16], strides = [1, 1]} : vector<1x96xf32> to vector<1x16xf32>
    %2199 = vector.extract_strided_slice %2165 {offsets = [0, 48], sizes = [1, 16], strides = [1, 1]} : vector<1x96xf32> to vector<1x16xf32>
    %2200 = arith.addf %2198, %2199 : vector<1x16xf32>
    %2201 = arith.negf %2200 : vector<1x16xf32>
    %2202 = math.exp %2201 : vector<1x16xf32>
    %cst_482 = arith.constant 1.000000e+00 : f32
    %2203 = vector.broadcast %cst_482 : f32 to vector<1x16xf32>
    %2204 = arith.addf %2203, %2202 : vector<1x16xf32>
    %2205 = arith.divf %2203, %2204 : vector<1x16xf32>
    %2206 = vector.extract_strided_slice %2169 {offsets = [0, 64], sizes = [1, 16], strides = [1, 1]} : vector<1x96xf32> to vector<1x16xf32>
    %2207 = vector.extract_strided_slice %2165 {offsets = [0, 64], sizes = [1, 16], strides = [1, 1]} : vector<1x96xf32> to vector<1x16xf32>
    %2208 = arith.addf %2206, %2207 : vector<1x16xf32>
    %2209 = arith.negf %2208 : vector<1x16xf32>
    %2210 = math.exp %2209 : vector<1x16xf32>
    %cst_483 = arith.constant 1.000000e+00 : f32
    %2211 = vector.broadcast %cst_483 : f32 to vector<1x16xf32>
    %2212 = arith.addf %2211, %2210 : vector<1x16xf32>
    %2213 = arith.divf %2211, %2212 : vector<1x16xf32>
    %2214 = vector.extract_strided_slice %2169 {offsets = [0, 80], sizes = [1, 16], strides = [1, 1]} : vector<1x96xf32> to vector<1x16xf32>
    %2215 = vector.extract_strided_slice %2165 {offsets = [0, 80], sizes = [1, 16], strides = [1, 1]} : vector<1x96xf32> to vector<1x16xf32>
    %2216 = arith.mulf %2205, %2215 : vector<1x16xf32>
    %2217 = arith.addf %2214, %2216 : vector<1x16xf32>
    %2218 = math.tanh %2217 : vector<1x16xf32>
    %cst_484 = arith.constant 1.000000e+00 : f32
    %2219 = vector.broadcast %cst_484 : f32 to vector<1x16xf32>
    %2220 = arith.subf %2219, %2213 : vector<1x16xf32>
    %2221 = arith.mulf %2220, %2218 : vector<1x16xf32>
    %2222 = arith.mulf %2213, %2171 : vector<1x16xf32>
    %2223 = arith.addf %2221, %2222 : vector<1x16xf32>
    %2224 = arith.index_cast %c15_i32_474 : i32 to index
    %c0_485 = arith.constant 0 : index
    %2225 = vector.load %arg35[%2224, %c0_485] : memref<16x16xf32, #tpu.memory_space<vmem>>, vector<1x16xf32>
    tpu.vector_store %arg35[%2224, %c0_485], %2197 {strides = array<i32>} : memref<16x16xf32, #tpu.memory_space<vmem>>, vector<1x16xf32>,
    %2226 = arith.index_cast %2163 : i32 to index
    %c0_486 = arith.constant 0 : index
    %2227 = vector.load %arg36[%2226, %c0_486] : memref<16x16xf32, #tpu.memory_space<vmem>>, vector<1x16xf32>
    tpu.vector_store %arg36[%2226, %c0_486], %2223 {strides = array<i32>} : memref<16x16xf32, #tpu.memory_space<vmem>>, vector<1x16xf32>,
    %2228 = tpu.concatenate %2197, %2223 in 1 : vector<1x16xf32>, vector<1x16xf32> -> vector<1x32xf32>
    %c16_i32_487 = arith.constant 16 : i32
    %c0_488 = arith.constant 0 : index
    %c0_489 = arith.constant 0 : index
    %2229 = vector.load %arg35[%c0_488, %c0_489] : memref<16x16xf32, #tpu.memory_space<vmem>>, vector<16x16xf32>
    %c0_490 = arith.constant 0 : index
    %c0_491 = arith.constant 0 : index
    %2230 = vector.load %arg36[%c0_490, %c0_491] : memref<16x16xf32, #tpu.memory_space<vmem>>, vector<16x16xf32>
    %2231 = tpu.concatenate %2229, %2230 in 1 : vector<16x16xf32>, vector<16x16xf32> -> vector<16x32xf32>
    %cst_492 = arith.constant dense<0.000000e+00> : vector<16xf32>
    %2232 = vector.multi_reduction <add>, %2231, %cst_492 [1] : vector<16x32xf32> to vector<16xf32>
    %2233 = vector.shape_cast %2232 : vector<16xf32> to vector<16x1xf32>
    %cst_493 = arith.constant 3.200000e+01 : f32
    %2234 = vector.broadcast %cst_493 : f32 to vector<16x1xf32>
    %2235 = arith.divf %2233, %2234 : vector<16x1xf32>
    %2236 = vector.broadcast %2235 : vector<16x1xf32> to vector<16x32xf32>
    %2237 = arith.subf %2231, %2236 : vector<16x32xf32>
    %2238 = arith.mulf %2237, %2237 : vector<16x32xf32>
    %cst_494 = arith.constant dense<0.000000e+00> : vector<16xf32>
    %2239 = vector.multi_reduction <add>, %2238, %cst_494 [1] : vector<16x32xf32> to vector<16xf32>
    %2240 = vector.shape_cast %2239 : vector<16xf32> to vector<16x1xf32>
    %cst_495 = arith.constant 3.200000e+01 : f32
    %2241 = vector.broadcast %cst_495 : f32 to vector<16x1xf32>
    %2242 = arith.divf %2240, %2241 : vector<16x1xf32>
    %cst_496 = arith.constant 9.99999974E-6 : f32
    %2243 = vector.broadcast %cst_496 : f32 to vector<16x1xf32>
    %2244 = arith.addf %2242, %2243 : vector<16x1xf32>
    %2245 = math.rsqrt %2244 : vector<16x1xf32>
    %2246 = vector.broadcast %2245 : vector<16x1xf32> to vector<16x32xf32>
    %2247 = arith.mulf %2237, %2246 : vector<16x32xf32>
    %c0_497 = arith.constant 0 : index
    %c0_498 = arith.constant 0 : index
    %2248 = vector.load %arg22[%c0_497, %c0_498] : memref<1x32xf32, #tpu.memory_space<vmem>>, vector<1x32xf32>
    %2249 = vector.broadcast %2248 : vector<1x32xf32> to vector<16x32xf32>
    %2250 = arith.mulf %2247, %2249 : vector<16x32xf32>
    %c0_499 = arith.constant 0 : index
    %c0_500 = arith.constant 0 : index
    %2251 = vector.load %arg23[%c0_499, %c0_500] : memref<1x32xf32, #tpu.memory_space<vmem>>, vector<1x32xf32>
    %2252 = vector.broadcast %2251 : vector<1x32xf32> to vector<16x32xf32>
    %2253 = arith.addf %2250, %2252 : vector<16x32xf32>
    %c0_501 = arith.constant 0 : index
    %c0_502 = arith.constant 0 : index
    %2254 = vector.load %arg24[%c0_501, %c0_502] : memref<32x32xf32, #tpu.memory_space<vmem>>, vector<32x32xf32>
    %cst_503 = arith.constant dense<0.000000e+00> : vector<16x32xf32>
    %2255 = tpu.matmul %2253, %2254, %cst_503 {dimension_numbers = #tpu.dot_dimension_numbers<[1], [0], [0], [1], [0, 0, 1, 1], [], []>} : vector<16x32xf32>, vector<32x32xf32>, vector<16x32xf32> -> vector<16x32xf32>
    %c0_504 = arith.constant 0 : index
    %c0_505 = arith.constant 0 : index
    %2256 = vector.load %arg25[%c0_504, %c0_505] : memref<1x32xf32, #tpu.memory_space<vmem>>, vector<1x32xf32>
    %2257 = vector.broadcast %2256 : vector<1x32xf32> to vector<16x32xf32>
    %2258 = arith.addf %2255, %2257 : vector<16x32xf32>
    %cst_506 = arith.constant 0.000000e+00 : f32
    %2259 = vector.broadcast %cst_506 : f32 to vector<16x32xf32>
    %2260 = arith.maximumf %2258, %2259 : vector<16x32xf32>
    %cst_507 = arith.constant dense<0.000000e+00> : vector<16xf32>
    %2261 = vector.multi_reduction <add>, %2260, %cst_507 [1] : vector<16x32xf32> to vector<16xf32>
    %2262 = vector.shape_cast %2261 : vector<16xf32> to vector<16x1xf32>
    %cst_508 = arith.constant 3.200000e+01 : f32
    %2263 = vector.broadcast %cst_508 : f32 to vector<16x1xf32>
    %2264 = arith.divf %2262, %2263 : vector<16x1xf32>
    %2265 = vector.broadcast %2264 : vector<16x1xf32> to vector<16x32xf32>
    %2266 = arith.subf %2260, %2265 : vector<16x32xf32>
    %2267 = arith.mulf %2266, %2266 : vector<16x32xf32>
    %cst_509 = arith.constant dense<0.000000e+00> : vector<16xf32>
    %2268 = vector.multi_reduction <add>, %2267, %cst_509 [1] : vector<16x32xf32> to vector<16xf32>
    %2269 = vector.shape_cast %2268 : vector<16xf32> to vector<16x1xf32>
    %cst_510 = arith.constant 3.200000e+01 : f32
    %2270 = vector.broadcast %cst_510 : f32 to vector<16x1xf32>
    %2271 = arith.divf %2269, %2270 : vector<16x1xf32>
    %cst_511 = arith.constant 9.99999974E-6 : f32
    %2272 = vector.broadcast %cst_511 : f32 to vector<16x1xf32>
    %2273 = arith.addf %2271, %2272 : vector<16x1xf32>
    %2274 = math.rsqrt %2273 : vector<16x1xf32>
    %2275 = vector.broadcast %2274 : vector<16x1xf32> to vector<16x32xf32>
    %2276 = arith.mulf %2266, %2275 : vector<16x32xf32>
    %c0_512 = arith.constant 0 : index
    %c0_513 = arith.constant 0 : index
    %2277 = vector.load %arg26[%c0_512, %c0_513] : memref<1x32xf32, #tpu.memory_space<vmem>>, vector<1x32xf32>
    %2278 = vector.broadcast %2277 : vector<1x32xf32> to vector<16x32xf32>
    %2279 = arith.mulf %2276, %2278 : vector<16x32xf32>
    %c0_514 = arith.constant 0 : index
    %c0_515 = arith.constant 0 : index
    %2280 = vector.load %arg27[%c0_514, %c0_515] : memref<1x32xf32, #tpu.memory_space<vmem>>, vector<1x32xf32>
    %2281 = vector.broadcast %2280 : vector<1x32xf32> to vector<16x32xf32>
    %2282 = arith.addf %2279, %2281 : vector<16x32xf32>
    %c0_516 = arith.constant 0 : index
    %c0_517 = arith.constant 0 : index
    %2283 = vector.load %arg28[%c0_516, %c0_517] : memref<32x32xf32, #tpu.memory_space<vmem>>, vector<32x32xf32>
    %cst_518 = arith.constant dense<0.000000e+00> : vector<16x32xf32>
    %2284 = tpu.matmul %2282, %2283, %cst_518 {dimension_numbers = #tpu.dot_dimension_numbers<[1], [0], [0], [1], [0, 0, 1, 1], [], []>} : vector<16x32xf32>, vector<32x32xf32>, vector<16x32xf32> -> vector<16x32xf32>
    %c0_519 = arith.constant 0 : index
    %c0_520 = arith.constant 0 : index
    %2285 = vector.load %arg29[%c0_519, %c0_520] : memref<1x32xf32, #tpu.memory_space<vmem>>, vector<1x32xf32>
    %2286 = vector.broadcast %2285 : vector<1x32xf32> to vector<16x32xf32>
    %2287 = arith.addf %2284, %2286 : vector<16x32xf32>
    %c0_521 = arith.constant 0 : index
    %c0_522 = arith.constant 0 : index
    %2288 = vector.load %arg30[%c0_521, %c0_522] : memref<32x32xf32, #tpu.memory_space<vmem>>, vector<32x32xf32>
    %cst_523 = arith.constant dense<0.000000e+00> : vector<16x32xf32>
    %2289 = tpu.matmul %2287, %2288, %cst_523 {dimension_numbers = #tpu.dot_dimension_numbers<[1], [0], [0], [1], [0, 0, 1, 1], [], []>} : vector<16x32xf32>, vector<32x32xf32>, vector<16x32xf32> -> vector<16x32xf32>
    %c0_524 = arith.constant 0 : index
    %c0_525 = arith.constant 0 : index
    %2290 = vector.load %arg31[%c0_524, %c0_525] : memref<32x32xf32, #tpu.memory_space<vmem>>, vector<32x32xf32>
    %cst_526 = arith.constant dense<0.000000e+00> : vector<16x32xf32>
    %2291 = tpu.matmul %94, %2290, %cst_526 {dimension_numbers = #tpu.dot_dimension_numbers<[1], [0], [0], [1], [0, 0, 1, 1], [], []>} : vector<16x32xf32>, vector<32x32xf32>, vector<16x32xf32> -> vector<16x32xf32>
    %2292 = arith.addf %2289, %2291 : vector<16x32xf32>
    %c0_527 = arith.constant 0 : index
    %c0_528 = arith.constant 0 : index
    %2293 = vector.load %arg32[%c0_527, %c0_528] : memref<1x32xf32, #tpu.memory_space<vmem>>, vector<1x32xf32>
    %2294 = vector.broadcast %2293 : vector<1x32xf32> to vector<16x32xf32>
    %2295 = arith.addf %2292, %2294 : vector<16x32xf32>
    %c0_529 = arith.constant 0 : index
    %c0_530 = arith.constant 0 : index
    %2296 = vector.load %arg33[%c0_529, %c0_530] : memref<16x32xf32, #tpu.memory_space<vmem>>, vector<16x32xf32>
    tpu.vector_store %arg33[%c0_529, %c0_530], %2295 {strides = array<i32>} : memref<16x32xf32, #tpu.memory_space<vmem>>, vector<16x32xf32>,
    return
  }
}

</mosaic_0001>

<bundles_post_ra>
// kernel: hybrid_gnn_forward.1
= control target key start
LH: loop header
LB: loop body
LE: loop exit
PB: predicated region body
PF: predicated region fallthrough
CT: control target
= control target key end

     0   :  { %s9338_s6 = smov 1   ;;  %s9339_s10 = smov 2   ;;  %s10821_s0 = inlined_call_operand.smem [shape: u32[34], index: -1, kind: input, shape index: {}] }
   0x1   :  { %s9419_s5 = sld [smem:[%s10821_s0]]   ;;  %s9340_s14 = smov 3  }
   0x2   :  { %s9424_s9 = sld [smem:[%s10821_s0 + %s9338_s6]]   ;;  %s9341_s18 = smov 4  }
   0x3   :  { %s9429_s13 = sld [smem:[%s10821_s0 + %s9339_s10]]   ;;  %s9342_s22 = smov 5  }
   0x4   :  { %s9434_s17 = sld [smem:[%s10821_s0 + %s9340_s14]]   ;;  %s9343_s26 = smov 6  }
   0x5   :  { %s9439_s21 = sld [smem:[%s10821_s0 + %s9341_s18]]   ;;  %s9344_s30 = smov 7  }
   0x6   :  { %s9444_s25 = sld [smem:[%s10821_s0 + %s9342_s22]]   ;;  %s9345_s4 = smov 8  }
   0x7   :  { %10837 = sst [smem:[#allocation63_spill]] %s9419_s5  ;;  %s9346_s10 = smov 9  }
   0x8   :  { %10838 = sst [smem:[#allocation64_spill]] %s9424_s9  ;;  %s9347_s15 = smov 10  }
   0x9   :  { %s9449_s29 = sld [smem:[%s10821_s0 + %s9343_s26]]   ;;  %s9348_s20 = smov 11  }
   0xa   :  { %10839 = sst [smem:[#allocation65_spill]] %s9434_s17  ;;  %s9349_s26 = smov 12  }
   0xb   :  { %s9454_s3 = sld [smem:[%s10821_s0 + %s9344_s30]]   ;;  %s9350_s1 = smov 13  }
   0xc   :  { %s9459_s8 = sld [smem:[%s10821_s0 + %s9345_s4]]   ;;  %s9351_s7 = smov 14  }
   0xd   :  { %s9464_s14 = sld [smem:[%s10821_s0 + %s9346_s10]]   ;;  %s9353_s22 = smov 16  }
   0xe   :  { %s9469_s19 = sld [smem:[%s10821_s0 + %s9347_s15]]   ;;  %s9352_s15 = smov 15  }
   0xf   :  { %s9474_s24 = sld [smem:[%s10821_s0 + %s9348_s20]]   ;;  %s9354_s28 = smov 17  }
  0x10   :  { %s9479_s30 = sld [smem:[%s10821_s0 + %s9349_s26]]  }
  0x11   :  { %10840 = sst [smem:[#allocation66_spill]] %s9454_s3 }
  0x12   :  { %s9484_s6 = sld [smem:[%s10821_s0 + %s9350_s1]]  }
  0x13   :  { %10841 = sst [smem:[#allocation67_spill]] %s9464_s14 }
  0x14   :  { %10842 = sst [smem:[#allocation68_spill]] %s9469_s19 }
  0x15   :  { %10843 = sst [smem:[#allocation69_spill]] %s9474_s24 }
  0x16   :  { %10844 = sst [smem:[#allocation70_spill]] %s9479_s30 }
  0x17   :  { %s9489_s12 = sld [smem:[%s10821_s0 + %s9351_s7]]   ;;  %s9355_s7 = smov 18  }
  0x18   :  { %s9494_s20 = sld [smem:[%s10821_s0 + %s9352_s15]]   ;;  %s9356_s15 = smov 19  }
  0x19   :  { %s9499_s27 = sld [smem:[%s10821_s0 + %s9353_s22]]   ;;  %s9357_s22 = smov 20  }
  0x1a   :  { %s9504_s4 = sld [smem:[%s10821_s0 + %s9354_s28]]   ;;  %s9358_s28 = smov 21  }
  0x1b   :  { %s9509_s24 = sld [smem:[%s10821_s0 + %s9355_s7]]   ;;  %s9359_s7 = smov 22  }
  0x1c   :  { %s9514_s19 = sld [smem:[%s10821_s0 + %s9356_s15]]   ;;  %s9360_s15 = smov 23  }
  0x1d   :  { %10845 = sst [smem:[#allocation71_spill]] %s9489_s12 }
  0x1e   :  { %s9519_s30 = sld [smem:[%s10821_s0 + %s9357_s22]]   ;;  %s9361_s22 = smov 24  }
  0x1f   :  { %10846 = sst [smem:[#allocation72_spill]] %s9499_s27 }
  0x20   :  { %s9524_s9 = sld [smem:[%s10821_s0 + %s9358_s28]]   ;;  %s9362_s28 = smov 25  }
  0x21   :  { %10847 = sst [smem:[#allocation73_spill]] %s9509_s24 }
  0x22   :  { %s9529_s17 = sld [smem:[%s10821_s0 + %s9359_s7]]   ;;  %s9363_s7 = smov 26  }
  0x23   :  { %s9534_s5 = sld [smem:[%s10821_s0 + %s9360_s15]]   ;;  %s9364_s15 = smov 27  }
  0x24   :  { %10848 = sst [smem:[#allocation74_spill]] %s9519_s30 }
  0x25   :  { %s9539_s30 = sld [smem:[%s10821_s0 + %s9361_s22]]   ;;  %s9365_s22 = smov 28  }
  0x26   :  { %s9544_s24 = sld [smem:[%s10821_s0 + %s9362_s28]]   ;;  %s9366_s28 = smov 29  }
  0x27   :  { %s9554_s27 = sld [smem:[%s10821_s0 + %s9364_s15]]   ;;  %s9368_s15 = smov 31  }
  0x28   :  { %10849 = sst [smem:[#allocation75_spill]] %s9529_s17 }
  0x29   :  { %s9549_s17 = sld [smem:[%s10821_s0 + %s9363_s7]]   ;;  %s9367_s7 = smov 30  }
  0x2a   :  { %s9564_s12 = sld [smem:[%s10821_s0 + %s9366_s28]]   ;;  %s9370_s28 = smov 33  }
  0x2b   :  { %10850 = sst [smem:[#allocation76_spill]] %s9539_s30 }
  0x2c   :  { %s9559_s30 = sld [smem:[%s10821_s0 + %s9365_s22]]   ;;  %s9369_s22 = smov 32  }
  0x2d   :  { %s9574_s14 = sld [smem:[%s10821_s0 + %s9368_s15]]  }
  0x2e   :  { %s9584_s3 = sld [smem:[%s10821_s0 + %s9370_s28]]  }
  0x2f   :  { %10851 = sst [smem:[#allocation77_spill]] %s9549_s17 }
  0x30   :  { %s9569_s17 = sld [smem:[%s10821_s0 + %s9367_s7]]  }
  0x32   :  { %10852 = sst [smem:[#allocation78_spill]] %s9559_s30 }
  0x33   :  { %s9579_s30 = sld [smem:[%s10821_s0 + %s9369_s22]]  }
  0x34   :  { %72 = vsyncpa [#allocation6], 0 }
  0x35   :  { %73 = vsyncpa [#allocation9], 0 }
  0x36   :  { %74 = vsyncpa [#allocation12], 0 }
  0x37   :  { %75 = vsyncpa [#allocation15], 0 }
  0x38   :  { %76 = vsyncpa [#allocation18], 0 }
  0x39   :  { %77 = vsyncpa [#allocation21], 0 }
  0x3a   :  { %78 = vsyncpa [#allocation24], 0 }
  0x3b   :  { %79 = vsyncpa [#allocation27], 0 }
  0x3c   :  { %80 = vsyncpa [#allocation30], 0 }
  0x3d   :  { %81 = vsyncpa [#allocation33], 0 }
  0x3e   :  { %82 = vsyncpa [#allocation36], 0 }
  0x3f   :  { %83 = vsyncpa [#allocation39], 0 }
  0x40   :  { %84 = vsyncpa [#allocation42], 0 }
  0x41   :  { %85 = vsyncpa [#allocation45], 0 }
  0x42   :  { %86 = vsyncpa [#allocation7], 0  ;;  %s9371_s0 = smov [#allocation8]   ;;  %s9372_s10 = smov [#allocation11]  }
  0x43   :  { %s110_s7 = sshll.u32 %s9371_s0, 4  ;;  %s134_s11 = sshll.u32 %s9372_s10, 4  ;;  %s111_s7 = int_to_ptr.vmem [resolvable:$true] %s110_s7  ;;  %s9586_s11 = int_to_ptr.vmem [resolvable:$true] %s134_s11 }
  0x44   :  { %s8692_s15 = scalar_lea.hbm %s9439_s21, 256 }
  0x45   :  { %p8693_p0 = scmp.ne.s32.totalorder %s9439_s21, %s8692_s15  ;;  %p8696_p1 = scmp.lt.u32.totalorder %s8692_s15, %s9439_s21 }
  0x47   :  { %p8698_p2 = pnand %p8696_p1, %p8693_p0 }
  0x49   :  { %8701 = shalt.err (!%p8698_p2)
}
  0x4a   :  { %s8702_s16 = scalar_lea.vmem %s111_s7, 256  ;;  %p8707_p4 = scmp.lt.s32.totalorder %s111_s7, %s111_s7 }
  0x4b   :  { %p8703_p3 = scmp.ne.s32.totalorder %s111_s7, %s8702_s16  ;;  %p8708_p5 = scmp.lt.s32.totalorder %s8702_s16, %s8702_s16 }
  0x4d   :  { %p8709_p6 = por %p8708_p5, %p8707_p4 }
  0x4f   :  { %p8710_p7 = pnand %p8709_p6, %p8703_p3 }
  0x51   :  { %8713 = shalt.err (!%p8710_p7)
}
  0x52   :  { %s9373_s18 = smov 128   ;;  %s9374_s22 = smov 8  }
  0x53   :  { %116 = dma.hbm_to_vmem [thread:$0]  %s9439_s21, 256, %s111_s7, [#allocation9], %s9373_s18, %s9373_s18, %s9374_s22  }
  0x54   :  { %s8714_s23 = scalar_lea.hbm %s9449_s29, 256 }
  0x55   :  { %p8715_p8 = scmp.ne.s32.totalorder %s9449_s29, %s8714_s23  ;;  %p8718_p9 = scmp.lt.u32.totalorder %s8714_s23, %s9449_s29 }
  0x57   :  { %p8720_p10 = pnand %p8718_p9, %p8715_p8 }
  0x59   :  { %8723 = shalt.err (!%p8720_p10)
}
  0x5a   :  { %s8724_s26 = scalar_lea.vmem %s9586_s11, 256  ;;  %p8729_p12 = scmp.lt.s32.totalorder %s9586_s11, %s9586_s11 }
  0x5b   :  { %p8725_p11 = scmp.ne.s32.totalorder %s9586_s11, %s8724_s26  ;;  %p8730_p13 = scmp.lt.s32.totalorder %s8724_s26, %s8724_s26 }
  0x5d   :  { %p8731_p0 = por %p8730_p13, %p8729_p12 }
  0x5f   :  { %p8732_p1 = pnand %p8731_p0, %p8725_p11 }
  0x61   :  { %8735 = shalt.err (!%p8732_p1)
}
  0x62   :  { %140 = dma.hbm_to_vmem [thread:$0]  %s9449_s29, 256, %s9586_s11, [#allocation12], %s9373_s18, %s9373_s18, %s9374_s22  }
  0x63   :  { %s9375_s21 = smov [#allocation14]   ;;  %s9376_s1 = smov [#allocation17]  }
  0x64   :  { %s157_s28 = sshll.u32 %s9375_s21, 4  ;;  %s183_s2 = sshll.u32 %s9376_s1, 4  ;;  %s158_s28 = int_to_ptr.vmem [resolvable:$true] %s157_s28  ;;  %s184_s2 = int_to_ptr.vmem [resolvable:$true] %s183_s2 }
  0x65   :  { %s8736_s0 = scalar_lea.hbm %s9459_s8, 16 }
  0x66   :  { %p8737_p2 = scmp.ne.s32.totalorder %s9459_s8, %s8736_s0  ;;  %p8740_p3 = scmp.lt.u32.totalorder %s8736_s0, %s9459_s8 }
  0x68   :  { %p8742_p4 = pnand %p8740_p3, %p8737_p2 }
  0x6a   :  { %8745 = shalt.err (!%p8742_p4)
}
  0x6b   :  { %s8746_s7 = scalar_lea.vmem %s158_s28, 16  ;;  %s8750_s10 = scalar_lea.vmem %s158_s28, 32 }
  0x6c   :  { %p8747_p5 = scmp.ne.s32.totalorder %s158_s28, %s8746_s7  ;;  %p8751_p6 = scmp.lt.s32.totalorder %s158_s28, %s158_s28 }
  0x6d   :  { %p8752_p7 = scmp.lt.s32.totalorder %s8750_s10, %s8746_s7 }
  0x6f   :  { %p8753_p8 = por %p8752_p7, %p8751_p6 }
  0x71   :  { %p8754_p9 = pnand %p8753_p8, %p8747_p5 }
  0x73   :  { %8757 = shalt.err (!%p8754_p9)
}
  0x74   :  { %160 = dma.hbm_to_vmem [thread:$0]  %s9459_s8, 16, %s158_s28, [#allocation15]  }
  0x75   :  { %s8758_s29 = scalar_lea.hbm %s9484_s6, 16 }
  0x76   :  { %p8759_p10 = scmp.ne.s32.totalorder %s9484_s6, %s8758_s29  ;;  %p8762_p11 = scmp.lt.u32.totalorder %s8758_s29, %s9484_s6 }
  0x78   :  { %p8764_p12 = pnand %p8762_p11, %p8759_p10 }
  0x7a   :  { %8767 = shalt.err (!%p8764_p12)
}
  0x7b   :  { %s8768_s11 = scalar_lea.vmem %s184_s2, 16  ;;  %s8772_s15 = scalar_lea.vmem %s184_s2, 32 }
  0x7c   :  { %p8769_p13 = scmp.ne.s32.totalorder %s184_s2, %s8768_s11  ;;  %p8773_p0 = scmp.lt.s32.totalorder %s184_s2, %s184_s2 }
  0x7d   :  { %p8774_p1 = scmp.lt.s32.totalorder %s8772_s15, %s8768_s11 }
  0x7f   :  { %p8775_p2 = por %p8774_p1, %p8773_p0 }
  0x81   :  { %p8776_p3 = pnand %p8775_p2, %p8769_p13 }
  0x83   :  { %8779 = shalt.err (!%p8776_p3)
}
  0x84   :  { %186 = dma.hbm_to_vmem [thread:$0]  %s9484_s6, 16, %s184_s2, [#allocation18]  }
  0x85   :  { %s9377_s16 = smov [#allocation20]   ;;  %s9378_s23 = smov [#allocation23]  }
  0x86   :  { %s205_s8 = sshll.u32 %s9377_s16, 4  ;;  %s227_s26 = sshll.u32 %s9378_s23, 4  ;;  %s206_s8 = int_to_ptr.vmem [resolvable:$true] %s205_s8  ;;  %s228_s26 = int_to_ptr.vmem [resolvable:$true] %s227_s26 }
  0x87   :  { %s8780_s21 = scalar_lea.hbm %s9494_s20, 16 }
  0x88   :  { %p8781_p4 = scmp.ne.s32.totalorder %s9494_s20, %s8780_s21  ;;  %p8784_p5 = scmp.lt.u32.totalorder %s8780_s21, %s9494_s20 }
  0x8a   :  { %p8786_p6 = pnand %p8784_p5, %p8781_p4 }
  0x8c   :  { %8789 = shalt.err (!%p8786_p6)
}
  0x8d   :  { %s8790_s28 = scalar_lea.vmem %s206_s8, 16  ;;  %s8794_s1 = scalar_lea.vmem %s206_s8, 32 }
  0x8e   :  { %p8791_p7 = scmp.ne.s32.totalorder %s206_s8, %s8790_s28  ;;  %p8795_p8 = scmp.lt.s32.totalorder %s206_s8, %s206_s8 }
  0x8f   :  { %p8796_p9 = scmp.lt.s32.totalorder %s8794_s1, %s8790_s28 }
  0x91   :  { %p8797_p10 = por %p8796_p9, %p8795_p8 }
  0x93   :  { %p8798_p11 = pnand %p8797_p10, %p8791_p7 }
  0x95   :  { %8801 = shalt.err (!%p8798_p11)
}
  0x96   :  { %208 = dma.hbm_to_vmem [thread:$0]  %s9494_s20, 16, %s206_s8, [#allocation21]  }
  0x97   :  { %s8802_s6 = scalar_lea.hbm %s9504_s4, 16 }
  0x98   :  { %p8803_p12 = scmp.ne.s32.totalorder %s9504_s4, %s8802_s6  ;;  %p8806_p13 = scmp.lt.u32.totalorder %s8802_s6, %s9504_s4 }
  0x9a   :  { %p8808_p0 = pnand %p8806_p13, %p8803_p12 }
  0x9c   :  { %8811 = shalt.err (!%p8808_p0)
}
  0x9d   :  { %s8812_s2 = scalar_lea.vmem %s228_s26, 16  ;;  %s8816_s0 = scalar_lea.vmem %s228_s26, 32 }
  0x9e   :  { %p8813_p1 = scmp.ne.s32.totalorder %s228_s26, %s8812_s2  ;;  %p8817_p2 = scmp.lt.s32.totalorder %s228_s26, %s228_s26 }
  0x9f   :  { %p8818_p3 = scmp.lt.s32.totalorder %s8816_s0, %s8812_s2 }
  0xa1   :  { %p8819_p4 = por %p8818_p3, %p8817_p2 }
  0xa3   :  { %p8820_p5 = pnand %p8819_p4, %p8813_p1 }
  0xa5   :  { %8823 = shalt.err (!%p8820_p5)
}
  0xa6   :  { %230 = dma.hbm_to_vmem [thread:$0]  %s9504_s4, 16, %s228_s26, [#allocation24]  }
  0xa7   :  { %s9379_s7 = smov [#allocation26]   ;;  %s9380_s10 = smov [#allocation29]  }
  0xa8   :  { %s249_s20 = sshll.u32 %s9379_s7, 4  ;;  %s271_s29 = sshll.u32 %s9380_s10, 4  ;;  %s250_s20 = int_to_ptr.vmem [resolvable:$true] %s249_s20  ;;  %s272_s29 = int_to_ptr.vmem [resolvable:$true] %s271_s29 }
  0xa9   :  { %s8824_s11 = scalar_lea.hbm %s9514_s19, 16 }
  0xaa   :  { %p8825_p6 = scmp.ne.s32.totalorder %s9514_s19, %s8824_s11  ;;  %p8828_p7 = scmp.lt.u32.totalorder %s8824_s11, %s9514_s19 }
  0xac   :  { %p8830_p8 = pnand %p8828_p7, %p8825_p6 }
  0xae   :  { %8833 = shalt.err (!%p8830_p8)
}
  0xaf   :  { %s8834_s15 = scalar_lea.vmem %s250_s20, 16  ;;  %s8838_s16 = scalar_lea.vmem %s250_s20, 32 }
  0xb0   :  { %p8835_p9 = scmp.ne.s32.totalorder %s250_s20, %s8834_s15  ;;  %p8839_p10 = scmp.lt.s32.totalorder %s250_s20, %s250_s20 }
  0xb1   :  { %p8840_p11 = scmp.lt.s32.totalorder %s8838_s16, %s8834_s15 }
  0xb3   :  { %p8841_p12 = por %p8840_p11, %p8839_p10 }
  0xb5   :  { %p8842_p13 = pnand %p8841_p12, %p8835_p9 }
  0xb7   :  { %8845 = shalt.err (!%p8842_p13)
}
  0xb8   :  { %252 = dma.hbm_to_vmem [thread:$0]  %s9514_s19, 16, %s250_s20, [#allocation27]  }
  0xb9   :  { %s8846_s4 = scalar_lea.hbm %s9524_s9, 16 }
  0xba   :  { %p8847_p0 = scmp.ne.s32.totalorder %s9524_s9, %s8846_s4  ;;  %p8850_p1 = scmp.lt.u32.totalorder %s8846_s4, %s9524_s9 }
  0xbc   :  { %p8852_p2 = pnand %p8850_p1, %p8847_p0 }
  0xbe   :  { %8855 = shalt.err (!%p8852_p2)
}
  0xbf   :  { %s8856_s8 = scalar_lea.vmem %s272_s29, 16  ;;  %s8860_s23 = scalar_lea.vmem %s272_s29, 32 }
  0xc0   :  { %p8857_p3 = scmp.ne.s32.totalorder %s272_s29, %s8856_s8  ;;  %p8861_p4 = scmp.lt.s32.totalorder %s272_s29, %s272_s29 }
  0xc1   :  { %p8862_p5 = scmp.lt.s32.totalorder %s8860_s23, %s8856_s8 }
  0xc3   :  { %p8863_p6 = por %p8862_p5, %p8861_p4 }
  0xc5   :  { %p8864_p7 = pnand %p8863_p6, %p8857_p3 }
  0xc7   :  { %8867 = shalt.err (!%p8864_p7)
}
  0xc8   :  { %274 = dma.hbm_to_vmem [thread:$0]  %s9524_s9, 16, %s272_s29, [#allocation30]  }
  0xc9   :  { %s9381_s26 = smov [#allocation32]   ;;  %s9382_s21 = smov [#allocation35]  }
  0xca   :  { %s291_s19 = sshll.u32 %s9381_s26, 4  ;;  %s313_s28 = sshll.u32 %s9382_s21, 4  ;;  %s292_s19 = int_to_ptr.vmem [resolvable:$true] %s291_s19  ;;  %s314_s28 = int_to_ptr.vmem [resolvable:$true] %s313_s28 }
  0xcb   :  { %s8868_s1 = scalar_lea.hbm %s9534_s5, 16 }
  0xcc   :  { %p8869_p8 = scmp.ne.s32.totalorder %s9534_s5, %s8868_s1  ;;  %p8872_p9 = scmp.lt.u32.totalorder %s8868_s1, %s9534_s5 }
  0xce   :  { %p8874_p10 = pnand %p8872_p9, %p8869_p8 }
  0xd0   :  { %8877 = shalt.err (!%p8874_p10)
}
  0xd1   :  { %s8878_s6 = scalar_lea.vmem %s292_s19, 16  ;;  %s8882_s2 = scalar_lea.vmem %s292_s19, 32 }
  0xd2   :  { %p8879_p11 = scmp.ne.s32.totalorder %s292_s19, %s8878_s6  ;;  %p8883_p12 = scmp.lt.s32.totalorder %s292_s19, %s292_s19 }
  0xd3   :  { %p8884_p13 = scmp.lt.s32.totalorder %s8882_s2, %s8878_s6 }
  0xd5   :  { %p8885_p0 = por %p8884_p13, %p8883_p12 }
  0xd7   :  { %p8886_p1 = pnand %p8885_p0, %p8879_p11 }
  0xd9   :  { %8889 = shalt.err (!%p8886_p1)
}
  0xda   :  { %294 = dma.hbm_to_vmem [thread:$0]  %s9534_s5, 16, %s292_s19, [#allocation33]  }
  0xdb   :  { %s8890_s9 = scalar_lea.hbm %s9544_s24, 16 }
  0xdc   :  { %p8891_p2 = scmp.ne.s32.totalorder %s9544_s24, %s8890_s9  ;;  %p8894_p3 = scmp.lt.u32.totalorder %s8890_s9, %s9544_s24 }
  0xde   :  { %p8896_p4 = pnand %p8894_p3, %p8891_p2 }
  0xe0   :  { %8899 = shalt.err (!%p8896_p4)
}
  0xe1   :  { %s8900_s0 = scalar_lea.vmem %s314_s28, 16  ;;  %s8904_s7 = scalar_lea.vmem %s314_s28, 32 }
  0xe2   :  { %p8901_p5 = scmp.ne.s32.totalorder %s314_s28, %s8900_s0  ;;  %p8905_p6 = scmp.lt.s32.totalorder %s314_s28, %s314_s28 }
  0xe3   :  { %p8906_p7 = scmp.lt.s32.totalorder %s8904_s7, %s8900_s0 }
  0xe5   :  { %p8907_p8 = por %p8906_p7, %p8905_p6 }
  0xe7   :  { %p8908_p9 = pnand %p8907_p8, %p8901_p5 }
  0xe9   :  { %8911 = shalt.err (!%p8908_p9)
}
  0xea   :  { %316 = dma.hbm_to_vmem [thread:$0]  %s9544_s24, 16, %s314_s28, [#allocation36]  }
  0xeb   :  { %s9383_s20 = smov [#allocation38]   ;;  %s9384_s10 = smov [#allocation41]  }
  0xec   :  { %s333_s5 = sshll.u32 %s9383_s20, 4  ;;  %s355_s29 = sshll.u32 %s9384_s10, 4  ;;  %s334_s5 = int_to_ptr.vmem [resolvable:$true] %s333_s5  ;;  %s356_s29 = int_to_ptr.vmem [resolvable:$true] %s355_s29 }
  0xed   :  { %s8912_s11 = scalar_lea.hbm %s9554_s27, 16 }
  0xee   :  { %p8913_p10 = scmp.ne.s32.totalorder %s9554_s27, %s8912_s11  ;;  %p8916_p11 = scmp.lt.u32.totalorder %s8912_s11, %s9554_s27 }
  0xf0   :  { %p8918_p12 = pnand %p8916_p11, %p8913_p10 }
  0xf2   :  { %8921 = shalt.err (!%p8918_p12)
}
  0xf3   :  { %s8922_s15 = scalar_lea.vmem %s334_s5, 16  ;;  %s8926_s16 = scalar_lea.vmem %s334_s5, 32 }
  0xf4   :  { %p8923_p13 = scmp.ne.s32.totalorder %s334_s5, %s8922_s15  ;;  %p8927_p0 = scmp.lt.s32.totalorder %s334_s5, %s334_s5 }
  0xf5   :  { %p8928_p1 = scmp.lt.s32.totalorder %s8926_s16, %s8922_s15 }
  0xf7   :  { %p8929_p2 = por %p8928_p1, %p8927_p0 }
  0xf9   :  { %p8930_p3 = pnand %p8929_p2, %p8923_p13 }
  0xfb   :  { %8933 = shalt.err (!%p8930_p3)
}
  0xfc   :  { %336 = dma.hbm_to_vmem [thread:$0]  %s9554_s27, 16, %s334_s5, [#allocation39]  }
  0xfd   :  { %s8934_s24 = scalar_lea.hbm %s9564_s12, 16 }
  0xfe   :  { %p8935_p4 = scmp.ne.s32.totalorder %s9564_s12, %s8934_s24  ;;  %p8938_p5 = scmp.lt.u32.totalorder %s8934_s24, %s9564_s12 }
 0x100   :  { %p8940_p6 = pnand %p8938_p5, %p8935_p4 }
 0x102   :  { %8943 = shalt.err (!%p8940_p6)
}
 0x103   :  { %s8944_s4 = scalar_lea.vmem %s356_s29, 16  ;;  %s8948_s8 = scalar_lea.vmem %s356_s29, 32 }
 0x104   :  { %p8945_p7 = scmp.ne.s32.totalorder %s356_s29, %s8944_s4  ;;  %p8949_p8 = scmp.lt.s32.totalorder %s356_s29, %s356_s29 }
 0x105   :  { %p8950_p9 = scmp.lt.s32.totalorder %s8948_s8, %s8944_s4 }
 0x107   :  { %p8951_p10 = por %p8950_p9, %p8949_p8 }
 0x109   :  { %p8952_p11 = pnand %p8951_p10, %p8945_p7 }
 0x10b   :  { %8955 = shalt.err (!%p8952_p11)
}
 0x10c   :  { %358 = dma.hbm_to_vmem [thread:$0]  %s9564_s12, 16, %s356_s29, [#allocation42]  }
 0x10d   :  { %s9385_s23 = smov [#allocation44]   ;;  %s9386_s26 = smov [#allocation5]  }
 0x10e   :  { %s376_s27 = sshll.u32 %s9385_s23, 4  ;;  %s96_s19 = sshll.u32 %s9386_s26, 4  ;;  %s377_s27 = int_to_ptr.vmem [resolvable:$true] %s376_s27  ;;  %s9647_s19 = int_to_ptr.vmem [resolvable:$true] %s96_s19 }
 0x10f   :  { %s8956_s21 = scalar_lea.hbm %s9574_s14, 512 }
 0x110   :  { %p8957_p12 = scmp.ne.s32.totalorder %s9574_s14, %s8956_s21  ;;  %p8960_p13 = scmp.lt.u32.totalorder %s8956_s21, %s9574_s14 }
 0x112   :  { %p8962_p0 = pnand %p8960_p13, %p8957_p12 }
 0x114   :  { %8965 = shalt.err (!%p8962_p0)
}
 0x115   :  { %s8966_s28 = scalar_lea.vmem %s377_s27, 512  ;;  %p8971_p2 = scmp.lt.s32.totalorder %s377_s27, %s377_s27 }
 0x116   :  { %p8967_p1 = scmp.ne.s32.totalorder %s377_s27, %s8966_s28  ;;  %p8972_p3 = scmp.lt.s32.totalorder %s8966_s28, %s8966_s28 }
 0x118   :  { %p8973_p4 = por %p8972_p3, %p8971_p2 }
 0x11a   :  { %p8974_p5 = pnand %p8973_p4, %p8967_p1 }
 0x11c   :  { %8977 = shalt.err (!%p8974_p5)
}
 0x11d   :  { %382 = dma.hbm_to_vmem [thread:$0]  %s9574_s14, 512, %s377_s27, [#allocation45], %s9373_s18, %s9373_s18, %s9374_s22  }
 0x11e   :  { %s8978_s12 = scalar_lea.hbm %s9429_s13, 256 }
 0x11f   :  { %p8979_p6 = scmp.ne.s32.totalorder %s9429_s13, %s8978_s12  ;;  %p8982_p7 = scmp.lt.u32.totalorder %s8978_s12, %s9429_s13 }
 0x121   :  { %p8984_p8 = pnand %p8982_p7, %p8979_p6 }
 0x123   :  { %8987 = shalt.err (!%p8984_p8)
}
 0x124   :  { %s8988_s1 = scalar_lea.vmem %s9647_s19, 256  ;;  %p8993_p10 = scmp.lt.s32.totalorder %s9647_s19, %s9647_s19 }
 0x125   :  { %p8989_p9 = scmp.ne.s32.totalorder %s9647_s19, %s8988_s1  ;;  %p8994_p11 = scmp.lt.s32.totalorder %s8988_s1, %s8988_s1 }
 0x127   :  { %p8995_p12 = por %p8994_p11, %p8993_p10 }
 0x129   :  { %p8996_p13 = pnand %p8995_p12, %p8989_p9 }
 0x12b   :  { %8999 = shalt.err (!%p8996_p13)
}
 0x12c   :  { %102 = dma.hbm_to_vmem [thread:$0]  %s9429_s13, 256, %s9647_s19, [#allocation6], %s9373_s18, %s9373_s18, %s9374_s22  }
 0x12d   :  { %s9387_s14 = smov [#allocation10]   ;;  %s9388_s2 = smov [#allocation13]  }
 0x12e   :  { %s122_s6 = sshll.u32 %s9387_s14, 4  ;;  %s147_s9 = sshll.u32 %s9388_s2, 4  ;;  %s123_s6 = int_to_ptr.vmem [resolvable:$true] %s122_s6  ;;  %s148_s9 = int_to_ptr.vmem [resolvable:$true] %s147_s9 }
 0x12f   :  { %s9000_s0 = scalar_lea.hbm %s9444_s25, 256 }
 0x130   :  { %p9001_p0 = scmp.ne.s32.totalorder %s9444_s25, %s9000_s0  ;;  %p9004_p1 = scmp.lt.u32.totalorder %s9000_s0, %s9444_s25 }
 0x132   :  { %p9006_p2 = pnand %p9004_p1, %p9001_p0 }
 0x134   :  { %9009 = shalt.err (!%p9006_p2)
}
 0x135   :  { %s9010_s7 = scalar_lea.vmem %s123_s6, 256  ;;  %p9015_p4 = scmp.lt.s32.totalorder %s123_s6, %s123_s6 }
 0x136   :  { %p9011_p3 = scmp.ne.s32.totalorder %s123_s6, %s9010_s7  ;;  %p9016_p5 = scmp.lt.s32.totalorder %s9010_s7, %s9010_s7 }
 0x138   :  { %p9017_p6 = por %p9016_p5, %p9015_p4 }
 0x13a   :  { %p9018_p7 = pnand %p9017_p6, %p9011_p3 }
 0x13c   :  { %9021 = shalt.err (!%p9018_p7)
}
 0x13d   :  { %s10853_s13 = sld [smem:[#allocation66_spill]] }
 0x13e   :  { %128 = dma.hbm_to_vmem [thread:$0]  %s9444_s25, 256, %s123_s6, [#allocation9], %s9373_s18, %s9373_s18, %s9374_s22  }
 0x143   :  { %s9022_s20 = scalar_lea.hbm %s10853_s13, 16 }
 0x144   :  { %p9023_p8 = scmp.ne.s32.totalorder %s10853_s13, %s9022_s20  ;;  %p9026_p9 = scmp.lt.u32.totalorder %s9022_s20, %s10853_s13 }
 0x146   :  { %p9028_p10 = pnand %p9026_p9, %p9023_p8 }
 0x148   :  { %9031 = shalt.err (!%p9028_p10)
}
 0x149   :  { %s9032_s5 = scalar_lea.vmem %s148_s9, 16  ;;  %s9036_s10 = scalar_lea.vmem %s148_s9, 32 }
 0x14a   :  { %p9033_p11 = scmp.ne.s32.totalorder %s148_s9, %s9032_s5  ;;  %p9037_p12 = scmp.lt.s32.totalorder %s148_s9, %s148_s9 }
 0x14b   :  { %p9038_p13 = scmp.lt.s32.totalorder %s9036_s10, %s9032_s5 }
 0x14d   :  { %p9039_p0 = por %p9038_p13, %p9037_p12 }
 0x14f   :  { %p9040_p1 = pnand %p9039_p0, %p9033_p11 }
 0x151   :  { %9043 = shalt.err (!%p9040_p1)
}
 0x152   :  { %s10854_s29 = sld [smem:[#allocation67_spill]]  ;;  %s9389_s11 = smov [#allocation16]  }
 0x153   :  { %150 = dma.hbm_to_vmem [thread:$0]  %s10853_s13, 16, %s148_s9, [#allocation12]  }
 0x154   :  { %s167_s25 = sshll.u32 %s9389_s11, 4  ;;  %s9390_s15 = smov [#allocation19]   ;;  %s168_s25 = int_to_ptr.vmem [resolvable:$true] %s167_s25 }
 0x155   :  { %s192_s16 = sshll.u32 %s9390_s15, 4  ;;  %s9679_s16 = int_to_ptr.vmem [resolvable:$true] %s192_s16 }
 0x158   :  { %s9044_s24 = scalar_lea.hbm %s10854_s29, 16 }
 0x159   :  { %p9045_p2 = scmp.ne.s32.totalorder %s10854_s29, %s9044_s24  ;;  %p9048_p3 = scmp.lt.u32.totalorder %s9044_s24, %s10854_s29 }
 0x15b   :  { %p9050_p4 = pnand %p9048_p3, %p9045_p2 }
 0x15d   :  { %9053 = shalt.err (!%p9050_p4)
}
 0x15e   :  { %s9054_s4 = scalar_lea.vmem %s168_s25, 16  ;;  %s9058_s8 = scalar_lea.vmem %s168_s25, 32 }
 0x15f   :  { %p9055_p5 = scmp.ne.s32.totalorder %s168_s25, %s9054_s4  ;;  %p9059_p6 = scmp.lt.s32.totalorder %s168_s25, %s168_s25 }
 0x160   :  { %p9060_p7 = scmp.lt.s32.totalorder %s9058_s8, %s9054_s4 }
 0x162   :  { %p9061_p8 = por %p9060_p7, %p9059_p6 }
 0x164   :  { %p9062_p9 = pnand %p9061_p8, %p9055_p5 }
 0x166   :  { %9065 = shalt.err (!%p9062_p9)
}
 0x167   :  { %s10855_s23 = sld [smem:[#allocation71_spill]] }
 0x168   :  { %170 = dma.hbm_to_vmem [thread:$0]  %s10854_s29, 16, %s168_s25, [#allocation15]  }
 0x16d   :  { %s9066_s27 = scalar_lea.hbm %s10855_s23, 256 }
 0x16e   :  { %p9067_p10 = scmp.ne.s32.totalorder %s10855_s23, %s9066_s27  ;;  %p9070_p11 = scmp.lt.u32.totalorder %s9066_s27, %s10855_s23 }
 0x170   :  { %p9072_p12 = pnand %p9070_p11, %p9067_p10 }
 0x172   :  { %9075 = shalt.err (!%p9072_p12)
}
 0x173   :  { %s9076_s26 = scalar_lea.vmem %s9679_s16, 256  ;;  %p9081_p0 = scmp.lt.s32.totalorder %s9679_s16, %s9679_s16 }
 0x174   :  { %p9077_p13 = scmp.ne.s32.totalorder %s9679_s16, %s9076_s26  ;;  %p9082_p1 = scmp.lt.s32.totalorder %s9076_s26, %s9076_s26 }
 0x176   :  { %p9083_p2 = por %p9082_p1, %p9081_p0 }
 0x178   :  { %p9084_p3 = pnand %p9083_p2, %p9077_p13 }
 0x17a   :  { %9087 = shalt.err (!%p9084_p3)
}
 0x17b   :  { %s10856_s19 = sld [smem:[#allocation72_spill]]  ;;  %s9391_s21 = smov [#allocation22]  }
 0x17c   :  { %198 = dma.hbm_to_vmem [thread:$0]  %s10855_s23, 256, %s9679_s16, [#allocation18], %s9373_s18, %s9373_s18, %s9374_s22  }
 0x17d   :  { %s214_s28 = sshll.u32 %s9391_s21, 4  ;;  %s9392_s12 = smov [#allocation25]   ;;  %s215_s28 = int_to_ptr.vmem [resolvable:$true] %s214_s28 }
 0x17e   :  { %s236_s1 = sshll.u32 %s9392_s12, 4  ;;  %s9697_s1 = int_to_ptr.vmem [resolvable:$true] %s236_s1 }
 0x181   :  { %s9088_s14 = scalar_lea.hbm %s10856_s19, 512 }
 0x182   :  { %p9089_p4 = scmp.ne.s32.totalorder %s10856_s19, %s9088_s14  ;;  %p9092_p5 = scmp.lt.u32.totalorder %s9088_s14, %s10856_s19 }
 0x184   :  { %p9094_p6 = pnand %p9092_p5, %p9089_p4 }
 0x186   :  { %9097 = shalt.err (!%p9094_p6)
}
 0x187   :  { %s9098_s6 = scalar_lea.vmem %s215_s28, 512  ;;  %p9103_p8 = scmp.lt.s32.totalorder %s215_s28, %s215_s28 }
 0x188   :  { %p9099_p7 = scmp.ne.s32.totalorder %s215_s28, %s9098_s6  ;;  %p9104_p9 = scmp.lt.s32.totalorder %s9098_s6, %s9098_s6 }
 0x18a   :  { %p9105_p10 = por %p9104_p9, %p9103_p8 }
 0x18c   :  { %p9106_p11 = pnand %p9105_p10, %p9099_p7 }
 0x18e   :  { %9109 = shalt.err (!%p9106_p11)
}
 0x18f   :  { %s10857_s2 = sld [smem:[#allocation73_spill]] }
 0x190   :  { %220 = dma.hbm_to_vmem [thread:$0]  %s10856_s19, 512, %s215_s28, [#allocation21], %s9373_s18, %s9373_s18, %s9374_s22  }
 0x195   :  { %s9110_s9 = scalar_lea.hbm %s10857_s2, 512 }
 0x196   :  { %p9111_p12 = scmp.ne.s32.totalorder %s10857_s2, %s9110_s9  ;;  %p9114_p13 = scmp.lt.u32.totalorder %s9110_s9, %s10857_s2 }
 0x198   :  { %p9116_p0 = pnand %p9114_p13, %p9111_p12 }
 0x19a   :  { %9119 = shalt.err (!%p9116_p0)
}
 0x19b   :  { %s9120_s0 = scalar_lea.vmem %s9697_s1, 512  ;;  %p9125_p2 = scmp.lt.s32.totalorder %s9697_s1, %s9697_s1 }
 0x19c   :  { %p9121_p1 = scmp.ne.s32.totalorder %s9697_s1, %s9120_s0  ;;  %p9126_p3 = scmp.lt.s32.totalorder %s9120_s0, %s9120_s0 }
 0x19e   :  { %p9127_p4 = por %p9126_p3, %p9125_p2 }
 0x1a0   :  { %p9128_p5 = pnand %p9127_p4, %p9121_p1 }
 0x1a2   :  { %9131 = shalt.err (!%p9128_p5)
}
 0x1a3   :  { %s10858_s7 = sld [smem:[#allocation74_spill]]  ;;  %s9393_s13 = smov [#allocation28]  }
 0x1a4   :  { %242 = dma.hbm_to_vmem [thread:$0]  %s10857_s2, 512, %s9697_s1, [#allocation24], %s9373_s18, %s9373_s18, %s9374_s22  }
 0x1a5   :  { %s258_s20 = sshll.u32 %s9393_s13, 4  ;;  %s9394_s5 = smov [#allocation31]   ;;  %s259_s20 = int_to_ptr.vmem [resolvable:$true] %s258_s20 }
 0x1a6   :  { %s281_s10 = sshll.u32 %s9394_s5, 4  ;;  %s282_s10 = int_to_ptr.vmem [resolvable:$true] %s281_s10 }
 0x1a9   :  { %s9132_s29 = scalar_lea.hbm %s10858_s7, 512 }
 0x1aa   :  { %p9133_p6 = scmp.ne.s32.totalorder %s10858_s7, %s9132_s29  ;;  %p9136_p7 = scmp.lt.u32.totalorder %s9132_s29, %s10858_s7 }
 0x1ac   :  { %p9138_p8 = pnand %p9136_p7, %p9133_p6 }
 0x1ae   :  { %9141 = shalt.err (!%p9138_p8)
}
 0x1af   :  { %s9142_s11 = scalar_lea.vmem %s259_s20, 512  ;;  %p9147_p10 = scmp.lt.s32.totalorder %s259_s20, %s259_s20 }
 0x1b0   :  { %p9143_p9 = scmp.ne.s32.totalorder %s259_s20, %s9142_s11  ;;  %p9148_p11 = scmp.lt.s32.totalorder %s9142_s11, %s9142_s11 }
 0x1b2   :  { %p9149_p12 = por %p9148_p11, %p9147_p10 }
 0x1b4   :  { %p9150_p13 = pnand %p9149_p12, %p9143_p9 }
 0x1b6   :  { %9153 = shalt.err (!%p9150_p13)
}
 0x1b7   :  { %s10859_s25 = sld [smem:[#allocation75_spill]] }
 0x1b8   :  { %264 = dma.hbm_to_vmem [thread:$0]  %s10858_s7, 512, %s259_s20, [#allocation27], %s9373_s18, %s9373_s18, %s9374_s22  }
 0x1bd   :  { %s9154_s15 = scalar_lea.hbm %s10859_s25, 16 }
 0x1be   :  { %p9155_p0 = scmp.ne.s32.totalorder %s10859_s25, %s9154_s15  ;;  %p9158_p1 = scmp.lt.u32.totalorder %s9154_s15, %s10859_s25 }
 0x1c0   :  { %p9160_p2 = pnand %p9158_p1, %p9155_p0 }
 0x1c2   :  { %9163 = shalt.err (!%p9160_p2)
}
 0x1c3   :  { %s9164_s16 = scalar_lea.vmem %s282_s10, 16  ;;  %s9168_s24 = scalar_lea.vmem %s282_s10, 32 }
 0x1c4   :  { %p9165_p3 = scmp.ne.s32.totalorder %s282_s10, %s9164_s16  ;;  %p9169_p4 = scmp.lt.s32.totalorder %s282_s10, %s282_s10 }
 0x1c5   :  { %p9170_p5 = scmp.lt.s32.totalorder %s9168_s24, %s9164_s16 }
 0x1c7   :  { %p9171_p6 = por %p9170_p5, %p9169_p4 }
 0x1c9   :  { %p9172_p7 = pnand %p9171_p6, %p9165_p3 }
 0x1cb   :  { %9175 = shalt.err (!%p9172_p7)
}
 0x1cc   :  { %s10860_s4 = sld [smem:[#allocation76_spill]]  ;;  %s9395_s8 = smov [#allocation34]  }
 0x1cd   :  { %284 = dma.hbm_to_vmem [thread:$0]  %s10859_s25, 16, %s282_s10, [#allocation30]  }
 0x1ce   :  { %s300_s23 = sshll.u32 %s9395_s8, 4  ;;  %s9396_s27 = smov [#allocation37]   ;;  %s301_s23 = int_to_ptr.vmem [resolvable:$true] %s300_s23 }
 0x1cf   :  { %s323_s26 = sshll.u32 %s9396_s27, 4  ;;  %s324_s26 = int_to_ptr.vmem [resolvable:$true] %s323_s26 }
 0x1d2   :  { %s9176_s19 = scalar_lea.hbm %s10860_s4, 512 }
 0x1d3   :  { %p9177_p8 = scmp.ne.s32.totalorder %s10860_s4, %s9176_s19  ;;  %p9180_p9 = scmp.lt.u32.totalorder %s9176_s19, %s10860_s4 }
 0x1d5   :  { %p9182_p10 = pnand %p9180_p9, %p9177_p8 }
 0x1d7   :  { %9185 = shalt.err (!%p9182_p10)
}
 0x1d8   :  { %s9186_s21 = scalar_lea.vmem %s301_s23, 512  ;;  %p9191_p12 = scmp.lt.s32.totalorder %s301_s23, %s301_s23 }
 0x1d9   :  { %p9187_p11 = scmp.ne.s32.totalorder %s301_s23, %s9186_s21  ;;  %p9192_p13 = scmp.lt.s32.totalorder %s9186_s21, %s9186_s21 }
 0x1db   :  { %p9193_p0 = por %p9192_p13, %p9191_p12 }
 0x1dd   :  { %p9194_p1 = pnand %p9193_p0, %p9187_p11 }
 0x1df   :  { %9197 = shalt.err (!%p9194_p1)
}
 0x1e0   :  { %s10861_s28 = sld [smem:[#allocation77_spill]] }
 0x1e1   :  { %306 = dma.hbm_to_vmem [thread:$0]  %s10860_s4, 512, %s301_s23, [#allocation33], %s9373_s18, %s9373_s18, %s9374_s22  }
 0x1e6   :  { %s9198_s12 = scalar_lea.hbm %s10861_s28, 16 }
 0x1e7   :  { %p9199_p2 = scmp.ne.s32.totalorder %s10861_s28, %s9198_s12  ;;  %p9202_p3 = scmp.lt.u32.totalorder %s9198_s12, %s10861_s28 }
 0x1e9   :  { %p9204_p4 = pnand %p9202_p3, %p9199_p2 }
 0x1eb   :  { %9207 = shalt.err (!%p9204_p4)
}
 0x1ec   :  { %s9208_s1 = scalar_lea.vmem %s324_s26, 16  ;;  %s9212_s14 = scalar_lea.vmem %s324_s26, 32 }
 0x1ed   :  { %p9209_p5 = scmp.ne.s32.totalorder %s324_s26, %s9208_s1  ;;  %p9213_p6 = scmp.lt.s32.totalorder %s324_s26, %s324_s26 }
 0x1ee   :  { %p9214_p7 = scmp.lt.s32.totalorder %s9212_s14, %s9208_s1 }
 0x1f0   :  { %p9215_p8 = por %p9214_p7, %p9213_p6 }
 0x1f2   :  { %p9216_p9 = pnand %p9215_p8, %p9209_p5 }
 0x1f4   :  { %9219 = shalt.err (!%p9216_p9)
}
 0x1f5   :  { %s10862_s6 = sld [smem:[#allocation78_spill]]  ;;  %s9397_s2 = smov [#allocation40]  }
 0x1f6   :  { %326 = dma.hbm_to_vmem [thread:$0]  %s10861_s28, 16, %s324_s26, [#allocation36]  }
 0x1f7   :  { %s342_s9 = sshll.u32 %s9397_s2, 4  ;;  %s9398_s0 = smov [#allocation43]   ;;  %s343_s9 = int_to_ptr.vmem [resolvable:$true] %s342_s9 }
 0x1f8   :  { %s364_s7 = sshll.u32 %s9398_s0, 4  ;;  %s9740_s7 = int_to_ptr.vmem [resolvable:$true] %s364_s7 }
 0x1fb   :  { %s9220_s13 = scalar_lea.hbm %s10862_s6, 512 }
 0x1fc   :  { %p9221_p10 = scmp.ne.s32.totalorder %s10862_s6, %s9220_s13  ;;  %p9224_p11 = scmp.lt.u32.totalorder %s9220_s13, %s10862_s6 }
 0x1fe   :  { %p9226_p12 = pnand %p9224_p11, %p9221_p10 }
 0x200   :  { %9229 = shalt.err (!%p9226_p12)
}
 0x201   :  { %s9230_s20 = scalar_lea.vmem %s343_s9, 512  ;;  %p9235_p0 = scmp.lt.s32.totalorder %s343_s9, %s343_s9 }
 0x202   :  { %p9231_p13 = scmp.ne.s32.totalorder %s343_s9, %s9230_s20  ;;  %p9236_p1 = scmp.lt.s32.totalorder %s9230_s20, %s9230_s20 }
 0x204   :  { %p9237_p2 = por %p9236_p1, %p9235_p0 }
 0x206   :  { %p9238_p3 = pnand %p9237_p2, %p9231_p13 }
 0x208   :  { %9241 = shalt.err (!%p9238_p3)
}
 0x209   :  { %348 = dma.hbm_to_vmem [thread:$0]  %s10862_s6, 512, %s343_s9, [#allocation39], %s9373_s18, %s9373_s18, %s9374_s22  }
 0x20a   :  { %s9242_s5 = scalar_lea.hbm %s9569_s17, 512 }
 0x20b   :  { %p9243_p4 = scmp.ne.s32.totalorder %s9569_s17, %s9242_s5  ;;  %p9246_p5 = scmp.lt.u32.totalorder %s9242_s5, %s9569_s17 }
 0x20d   :  { %p9248_p6 = pnand %p9246_p5, %p9243_p4 }
 0x20f   :  { %9251 = shalt.err (!%p9248_p6)
}
 0x210   :  { %s9252_s10 = scalar_lea.vmem %s9740_s7, 512  ;;  %p9257_p8 = scmp.lt.s32.totalorder %s9740_s7, %s9740_s7 }
 0x211   :  { %p9253_p7 = scmp.ne.s32.totalorder %s9740_s7, %s9252_s10  ;;  %p9258_p9 = scmp.lt.s32.totalorder %s9252_s10, %s9252_s10 }
 0x213   :  { %p9259_p10 = por %p9258_p9, %p9257_p8 }
 0x215   :  { %p9260_p11 = pnand %p9259_p10, %p9253_p7 }
 0x217   :  { %9263 = shalt.err (!%p9260_p11)
}
 0x218   :  { %370 = dma.hbm_to_vmem [thread:$0]  %s9569_s17, 512, %s9740_s7, [#allocation42], %s9373_s18, %s9373_s18, %s9374_s22  }
 0x219   :  { %s9399_s29 = smov [#allocation46]   ;;  %s9264_s25 = scalar_lea.hbm %s9579_s30, 16 }
 0x21a   :  { %s389_s11 = sshll.u32 %s9399_s29, 4  ;;  %p9265_p12 = scmp.ne.s32.totalorder %s9579_s30, %s9264_s25  ;;  %s390_s11 = int_to_ptr.vmem [resolvable:$true] %s389_s11 }
 0x21b   :  { %p9268_p13 = scmp.lt.u32.totalorder %s9264_s25, %s9579_s30 }
 0x21d   :  { %p9270_p0 = pnand %p9268_p13, %p9265_p12 }
 0x21f   :  { %9273 = shalt.err (!%p9270_p0)
}
 0x220   :  { %s9274_s15 = scalar_lea.vmem %s390_s11, 16  ;;  %s9278_s16 = scalar_lea.vmem %s390_s11, 32 }
 0x221   :  { %p9275_p1 = scmp.ne.s32.totalorder %s390_s11, %s9274_s15  ;;  %p9279_p2 = scmp.lt.s32.totalorder %s390_s11, %s390_s11 }
 0x222   :  { %p9280_p3 = scmp.lt.s32.totalorder %s9278_s16, %s9274_s15 }
 0x224   :  { %p9281_p4 = por %p9280_p3, %p9279_p2 }
 0x226   :  { %p9282_p5 = pnand %p9281_p4, %p9275_p1 }
 0x228   :  { %9285 = shalt.err (!%p9282_p5)
}
 0x229   :  { %392 = dma.hbm_to_vmem [thread:$0]  %s9579_s30, 16, %s390_s11, [#allocation45]  }
 0x22a   :  { %9308 = dma.done.wait [#allocation6], 256  }
 0x22b   :  { %9309 = vsyncadd [#allocation6], 4294967040 }
 0x22c   :  { %9310 = dma.done.wait [#allocation9], 512  }
 0x22d   :  { %9311 = vsyncadd [#allocation9], 4294966784 }
 0x22e   :  { %9312 = dma.done.wait [#allocation12], 272  }
 0x22f   :  { %9313 = vsyncadd [#allocation12], 4294967024 }
 0x230   :  { %9314 = dma.done.wait [#allocation15], 32  }
 0x231   :  { %9315 = vsyncadd [#allocation15], 4294967264 }
 0x232   :  { %9316 = dma.done.wait [#allocation18], 272  }
 0x233   :  { %9317 = vsyncadd [#allocation18], 4294967024 }
 0x234   :  { %9318 = dma.done.wait [#allocation21], 528  }
 0x235   :  { %9319 = vsyncadd [#allocation21], 4294966768 }
 0x236   :  { %9320 = dma.done.wait [#allocation24], 528  }
 0x237   :  { %9321 = vsyncadd [#allocation24], 4294966768 }
 0x238   :  { %9322 = dma.done.wait [#allocation27], 528  }
 0x239   :  { %9323 = vsyncadd [#allocation27], 4294966768 }
 0x23a   :  { %9324 = dma.done.wait [#allocation30], 32  }
 0x23b   :  { %9325 = vsyncadd [#allocation30], 4294967264 }
 0x23c   :  { %9326 = dma.done.wait [#allocation33], 528  }
 0x23d   :  { %9327 = vsyncadd [#allocation33], 4294966768 }
 0x23e   :  { %9328 = dma.done.wait [#allocation36], 32  }
 0x23f   :  { %9329 = vsyncadd [#allocation36], 4294967264 }
 0x240   :  { %9330 = dma.done.wait [#allocation39], 528  }
 0x241   :  { %9331 = vsyncadd [#allocation39], 4294966768 }
 0x242   :  { %9332 = dma.done.wait [#allocation42], 528  }
 0x243   :  { %9333 = vsyncadd [#allocation42], 4294966768 }
 0x244   :  { %9334 = dma.done.wait [#allocation45], 528  }
 0x245   :  { %9335 = vsyncadd [#allocation45], 4294966768  ;;  %s10863_s17 = sld [smem:[#allocation63_spill]]  ;;  %v9400_v0 = vmov 0.0|0.0   ;;  %vm9401_vm0 = vmmov 0   ;;  %v9402_v1 = vmov 0.0  }
 0x246   :  { %7910 = vmatprep.subr.bf16.mxu0 %v9400_v0  ;;  %7337 = vmatprep.mubr.msk.f32.mxu0 %vm9401_vm0, %v9402_v1  ;;  %s10864_s30 = sld [smem:[#allocation65_spill]]  ;;  %v477_v2 = vld [vmem:[#allocation5] sm:$0xff]  ;;  %v478_v3 = vld [vmem:[#allocation5 + $0x8] sm:$0xff]  ;;  %vm486_vm1 = vcmask 130048   ;;  %s10865_s24 = sld [smem:[#allocation64_spill]]  ;;  %vm582_vm2 = vcmask 195584  }
 0x247   :  { %8188 = vmatprep.subr.bf16.mxu1 %v9400_v0  ;;  %7358 = vmatprep.mubr.msk.f32.mxu1 %vm9401_vm0, %v9402_v1  ;;  %v7911_v4 = vpack.c.bf16 %v478_v3, %v477_v2  ;;  %s9403_s4 = smov 112   ;;  %v777_v25 = vld [vmem:[#allocation11] sm:$0xff]  ;;  %v778_v26 = vld [vmem:[#allocation11 + $0x8] sm:$0xff]  ;;  %v979_v29 = vld [vmem:[#allocation10] sm:$0xff]  ;;  %s9404_s8 = smov 96   ;;  %vm960_vm3 = vcmask 261120  }
 0x248   :  { %v7920_v27 = vpack.c.bf16 %v778_v26, %v777_v25  ;;  %v980_v30 = vld [vmem:[#allocation10 + $0x8] sm:$0xff]  ;;  %v866_v36 = vld [vmem:[#allocation8] sm:$0xff]  ;;  %v867_v37 = vld [vmem:[#allocation8 + $0x8] sm:$0xff]  ;;  %s10866_s23 = sld [smem:[#allocation70_spill]]  ;;  %s10867_s27 = sld [smem:[#allocation68_spill]]  ;;  %vm1711_vm4 = vcmask 785408  }
 0x249   :  { %7912 = vmatpush3.bf16.msra.mxu0 %v7911_v4  ;;  %v7926_v31 = vpack.c.bf16 %v980_v30, %v979_v29  ;;  %v7923_v40 = vpack.c.bf16 %v867_v37, %v866_v36  ;;  %v6931_v48 = vld [vmem:[#allocation13] ss:$0 sm:$0xff]  ;;  %s10868_s26 = sld [smem:[#allocation69_spill]]  ;;  %s9405_s19 = smov 32   ;;  %vm1846_vm5 = vcmask 122880  }
 0x24a   :  { %7913 = vmatprep.subr.bf16.mxu0 %v9400_v0  ;;  %s9406_s21 = smov 80   ;;  %s9407_s28 = smov 16  }
 0x24b   :  { %v9772_v5 = vld [vmem:[%s10863_s17] sm:$0xff]  ;;  %v9780_v6 = vld [vmem:[%s10863_s17 + $0x8] sm:$0xff]  ;;  %v476_v7 = vld [vmem:[%s10863_s17 + $0x10] sm:$0xff]  ;;  %s9408_s12 = smov 48   ;;  %s9409_s1 = smov 64  }
 0x24c   :  { %7338 = vmatmul.mubr.msk.f32.vlgmr.msra.gmra.mrb[0].mxu0 %vm486_vm1, %v9772_v5  ;;  %v6918_v8 = vld [vmem:[%s10864_s30] ss:$0 sm:$0xff]  ;;  %v9798_v24 = vld [vmem:[%s10865_s24 + $0x10] sm:$0xff]  ;;  %v9806_v28 = vld [vmem:[%s10865_s24 + $0x8] sm:$0xff]  ;;  %s9410_s14 = smov [#allocation47]  }
 0x24d   :  { %7340 = vmatprep.mubr.msk.f32.mxu0 %vm9401_vm0, %v9402_v1  ;;  %v9794_v23 = vld [vmem:[%s10865_s24] sm:$0xff]  ;;  %v9833_v39 = vld [vmem:[%s10865_s24 + $0x18] sm:$0xff]  ;;  %v9849_v42 = vld [vmem:[%s10865_s24 + $0x28] sm:$0xff]  ;;  %s6860_s6 = sshll.u32 %s9410_s14, 4  ;;  %s6861_s6 = int_to_ptr.vmem [resolvable:$true] %s6860_s6 }
 0x24e   :  { %v9841_v41 = vld [vmem:[%s10865_s24 + $0x20] sm:$0xff]  ;;  %s9286_s2 = scalar_lea.vmem %s6861_s6, 256  ;;  %p9291_p7 = scmp.lt.s32.totalorder %s6861_s6, %s6861_s6 }
 0x24f   :  { %p9287_p6 = scmp.ne.s32.totalorder %s6861_s6, %s9286_s2  ;;  %p9292_p8 = scmp.lt.s32.totalorder %s9286_s2, %s9286_s2 }
 0x250   :  { %7341 = vmatmul.mubr.msk.f32.gmra.mrb[2].mxu0 %vm486_vm1, %v9780_v6 }
 0x251   :  { %7343 = vmatprep.mubr.msk.f32.mxu0 %vm9401_vm0, %v9402_v1  ;;  %p9293_p9 = por %p9292_p8, %p9291_p7 }
 0x253   :  { %p9294_p10 = pnand %p9293_p9, %p9287_p6 }
 0x254   :  { %7344 = vmatmul.mubr.msk.f32.gmra.mrb[4].mxu0 %vm486_vm1, %v476_v7 }
 0x255   :  { %7352 = vmatprep.mubr.msk.f32.mxu0 %vm9401_vm0, %v9402_v1 }
 0x31f   :  { %v562_v9 = vpop.f32.mrb[0].mxu0 }
 0x320   :  { %v7339_v10 = vpop.f32.mrb[1].mxu0  ;;  %v563_v11 = vadd.f32 %v6918_v8, %v562_v9 }
 0x322   :  { %v576_v15 = vmax.f32 %v563_v11, 0.0 }
 0x323   :  { %v567_v12 = vpop.f32.mrb[2].mxu0 }
 0x324   :  { %v568_v13 = vadd.f32 %v6918_v8, %v567_v12  ;;  %v7342_v14 = vpop.f32.mrb[3].mxu0 }
 0x326   :  { %v577_v16 = vmax.f32 %v568_v13, 0.0 }
 0x327   :  { %v572_v17 = vpop.f32.mrb[4].mxu0 }
 0x328   :  { %v7914_v18 = vpack.c.bf16 %v577_v16, %v576_v15  ;;  %v573_v19 = vadd.f32 %v6918_v8, %v572_v17  ;;  %v8275_v20 = vpack.i.bf16 %v577_v16, %v576_v15  ;;  %v7345_v21 = vpop.f32.mrb[5].mxu0 }
 0x32a   :  { %v578_v22 = vmax.f32 %v573_v19, 0.0  ;;  %8276 = vrot.lane.b32.xlu0 %v8275_v20, %s9403_s4  ;;  %7915 = vmatpush3.bf16.msra.mxu0 %v7914_v18 }
 0x32b   :  { %8190 = vmatpush3.bf16.msra.mxu1 %v7914_v18  ;;  %7350 = vmatprep.subr.mxu0 %v9402_v1 }
 0x32c   :  { %8189 = vmatprep.subr.mxu1 %v9402_v1 }
 0x32e   :  { %7351 = vmatpush3.msra.mxu0 %v578_v22  ;;  %683 = vrot.lane.b32.xlu0 %v578_v22, %s9403_s4 }
 0x32f   :  { %7353 = vmatmul.mubr.msk.f32.vlgmr.msra.gmra.mrb[6].mxu0 %vm582_vm2, %v9794_v23  ;;  %8191 = vmatpush3.msra.mxu1 %v578_v22 }
 0x330   :  { %7355 = vmatprep.mubr.msk.f32.mxu0 %vm9401_vm0, %v9402_v1  ;;  %7359 = vmatmul.mubr.msk.f32.vlgmr.msra.gmra.mrb[0].mxu1 %vm582_vm2, %v9798_v24 }
 0x331   :  { %7916 = vmatprep.subr.bf16.mxu0 %v9400_v0  ;;  %7919 = vmatprep.subr.bf16.mxu1 %v9400_v0 }
 0x332   :  { %7921 = vmatpush3.bf16.msra.mxu1 %v7920_v27  ;;  %7380 = vmatprep.mubr.msk.f32.mxu1 %vm9401_vm0, %v9402_v1 }
 0x333   :  { %7356 = vmatmul.mubr.msk.f32.gmra.mrb[8].mxu0 %vm582_vm2, %v9806_v28  ;;  %7925 = vmatprep.subr.bf16.mxu1 %v9400_v0 }
 0x334   :  { %7367 = vmatprep.mubr.msk.f32.mxu0 %vm9401_vm0, %v9402_v1 }
 0x335   :  { %7381 = vmatmul.mubr.msk.f32.vlgmr.msra.gmra.mrb[2].mxu1 %vm486_vm1, %v9772_v5 }
 0x336   :  { %7383 = vmatprep.mubr.msk.f32.mxu1 %vm9401_vm0, %v9402_v1  ;;  %7927 = vmatpush3.bf16.msra.mxu1 %v7926_v31 }
 0x337   :  { %7931 = vmatprep.subr.bf16.mxu1 %v9400_v0 }
 0x339   :  { %7384 = vmatmul.mubr.msk.f32.gmra.mrb[4].mxu1 %vm486_vm1, %v9780_v6 }
 0x33a   :  { %7386 = vmatprep.mubr.msk.f32.mxu1 %vm9401_vm0, %v9402_v1 }
 0x33d   :  { %7387 = vmatmul.mubr.msk.f32.gmra.mrb[6].mxu1 %vm486_vm1, %v476_v7 }
 0x33e   :  { %7406 = vmatprep.mubr.msk.f32.mxu1 %vm9401_vm0, %v9402_v1 }
 0x39c   :  { %v8277_v32 = vpop.permute.xlu0 %8276 }
 0x39d   :  { %v8279_v33 = vunpack.i.h.bf16 %v8277_v32  ;;  %v8278_v34 = vunpack.i.l.bf16 %v8277_v32 }
 0x39f   :  { %v7917_v35 = vpack.c.bf16 %v8279_v33, %v8278_v34 }
 0x3a0   :  { %v684_v38 = vpop.permute.xlu0 %683 }
 0x3a1   :  { %7918 = vmatpush3.bf16.msra.mxu0 %v7917_v35 }
 0x3a2   :  { %7365 = vmatprep.subr.mxu0 %v9402_v1 }
 0x3a5   :  { %7366 = vmatpush3.msra.mxu0 %v684_v38 }
 0x3a6   :  { %7368 = vmatmul.mubr.msk.f32.vlgmr.msra.gmra.mrb[10].mxu0 %vm582_vm2, %v9833_v39  ;;  %7922 = vmatprep.subr.bf16.mxu0 %v9400_v0 }
 0x3a7   :  { %7370 = vmatprep.mubr.msk.f32.mxu0 %vm9401_vm0, %v9402_v1  ;;  %7924 = vmatpush3.bf16.msra.mxu0 %v7923_v40 }
 0x3a8   :  { %7928 = vmatprep.subr.bf16.mxu0 %v9400_v0 }
 0x3aa   :  { %7371 = vmatmul.mubr.msk.f32.gmra.mrb[12].mxu0 %vm582_vm2, %v9841_v41 }
 0x3ab   :  { %7373 = vmatprep.mubr.msk.f32.mxu0 %vm9401_vm0, %v9402_v1 }
 0x3ae   :  { %7374 = vmatmul.mubr.msk.f32.gmra.mrb[14].mxu0 %vm582_vm2, %v9849_v42 }
 0x3af   :  { %7393 = vmatprep.mubr.msk.f32.mxu0 %vm9401_vm0, %v9402_v1 }
 0x402   :  { %v658_v43 = vpop.f32.mrb[6].mxu0 }
 0x403   :  { %7394 = vmatmul.mubr.msk.f32.vlgmr.msra.gmra.mrb[16].mxu0 %vm486_vm1, %v658_v43  ;;  %v7354_v44 = vpop.f32.mrb[7].mxu0  ;;  %v668_v45 = vpop.f32.mrb[0].mxu1 }
 0x404   :  { %7396 = vmatprep.mubr.msk.f32.mxu0 %vm9401_vm0, %v9402_v1  ;;  %v7360_v46 = vpop.f32.mrb[1].mxu1 }
 0x406   :  { %v663_v47 = vpop.f32.mrb[8].mxu0 }
 0x407   :  { %7397 = vmatmul.mubr.msk.f32.gmra.mrb[18].mxu0 %vm486_vm1, %v663_v47  ;;  %v7357_v49 = vpop.f32.mrb[9].mxu0 }
 0x408   :  { %7399 = vmatprep.mubr.msk.f32.mxu0 %vm9401_vm0, %v9402_v1  ;;  %v852_v50 = vpop.f32.mrb[2].mxu1 }
 0x409   :  { %v853_v51 = vadd.f32 %v6931_v48, %v852_v50  ;;  %v7382_v52 = vpop.f32.mrb[3].mxu1 }
 0x40b   :  { %7400 = vmatmul.mubr.msk.f32.gmra.mrb[20].mxu0 %vm486_vm1, %v668_v45  ;;  %984 = vrot.lane.b32.xlu1 %v853_v51, %s9404_s8 }
 0x40c   :  { %v857_v53 = vpop.f32.mrb[4].mxu1  ;;  %7421 = vmatprep.mubr.msk.f32.mxu0 %vm9401_vm0, %v9402_v1 }
 0x40d   :  { %v858_v54 = vadd.f32 %v6931_v48, %v857_v53  ;;  %v7385_v55 = vpop.f32.mrb[5].mxu1 }
 0x40f   :  { %986 = vrot.lane.b32.xlu1 %v858_v54, %s9404_s8 }
 0x410   :  { %v862_v56 = vpop.f32.mrb[6].mxu1 }
 0x411   :  { %v863_v57 = vadd.f32 %v6931_v48, %v862_v56  ;;  %v7388_v58 = vpop.f32.mrb[7].mxu1 }
 0x413   :  { %988 = vrot.lane.b32.xlu0 %v863_v57, %s9404_s8 }
 0x479   :  { %v763_v59 = vpop.f32.mrb[10].mxu0 }
 0x47a   :  { %v7369_v60 = vpop.f32.mrb[11].mxu0  ;;  %7407 = vmatmul.mubr.msk.f32.vlgmr.msra.gmra.mrb[8].mxu1 %vm486_vm1, %v763_v59 }
 0x47b   :  { %7409 = vmatprep.mubr.msk.f32.mxu1 %vm9401_vm0, %v9402_v1 }
 0x47d   :  { %v768_v61 = vpop.f32.mrb[12].mxu0  ;;  %v985_v17 = vpop.permute.xlu1 %984 }
 0x47e   :  { %v7372_v62 = vpop.f32.mrb[13].mxu0  ;;  %7410 = vmatmul.mubr.msk.f32.gmra.mrb[10].mxu1 %vm486_vm1, %v768_v61 }
 0x47f   :  { %7412 = vmatprep.mubr.msk.f32.mxu1 %vm9401_vm0, %v9402_v1 }
 0x481   :  { %v773_v63 = vpop.f32.mrb[14].mxu0  ;;  %v987_v22 = vpop.permute.xlu1 %986 }
 0x482   :  { %7413 = vmatmul.mubr.msk.f32.gmra.mrb[12].mxu1 %vm486_vm1, %v773_v63  ;;  %v7375_v2 = vpop.f32.mrb[15].mxu0 }
 0x483   :  { %7436 = vmatprep.mubr.msk.f32.mxu1 %vm9401_vm0, %v9402_v1 }
 0x485   :  { %v989_v32 = vpop.permute.xlu0 %988 }
 0x4d6   :  { %v943_v3 = vpop.f32.mrb[16].mxu0 }
 0x4d7   :  { %v944_v4 = vadd.f32 %v943_v3, %v853_v51  ;;  %v7395_v7 = vpop.f32.mrb[17].mxu0 }
 0x4d9   :  { %v957_v8 = vmul.f32 %v944_v4, %v944_v4 }
 0x4da   :  { %v948_v9 = vpop.f32.mrb[18].mxu0 }
 0x4db   :  { %v949_v10 = vadd.f32 %v948_v9, %v858_v54  ;;  %v961_v11 = vsel %vm960_vm3, %v957_v8, 0.0  ;;  %v7398_v12 = vpop.f32.mrb[19].mxu0 }
 0x4dc   :  { %962 = vadd.xlane.f32.xlu1 %v961_v11 }
 0x4dd   :  { %v958_v13 = vmul.f32 %v949_v10, %v949_v10 }
 0x4de   :  { %v953_v14 = vpop.f32.mrb[20].mxu0 }
 0x4df   :  { %v964_v15 = vsel %vm960_vm3, %v958_v13, 0.0  ;;  %v7401_v16 = vpop.f32.mrb[21].mxu0  ;;  %v954_v19 = vadd.f32 %v953_v14, %v863_v57 }
 0x4e0   :  { %965 = vadd.xlane.f32.xlu0 %v964_v15 }
 0x4e1   :  { %v959_v31 = vmul.f32 %v954_v19, %v954_v19 }
 0x4e3   :  { %v967_v37 = vsel %vm960_vm3, %v959_v31, 0.0 }
 0x54d   :  { %v1068_v18 = vpop.f32.mrb[8].mxu1 }
 0x54e   :  { %v1069_v20 = vadd.f32 %v1068_v18, %v985_v17  ;;  %v7408_v21 = vpop.f32.mrb[9].mxu1 }
 0x550   :  { %v1082_v25 = vmul.f32 %v1069_v20, %v1069_v20 }
 0x551   :  { %v1073_v26 = vpop.f32.mrb[10].mxu1 }
 0x552   :  { %v1074_v27 = vadd.f32 %v1073_v26, %v987_v22  ;;  %v7411_v29 = vpop.f32.mrb[11].mxu1  ;;  %v1085_v30 = vsel %vm960_vm3, %v1082_v25, 0.0 }
 0x553   :  { %1086 = vadd.xlane.f32.xlu0 %v1085_v30 }
 0x554   :  { %v1083_v33 = vmul.f32 %v1074_v27, %v1074_v27 }
 0x555   :  { %v1078_v34 = vpop.f32.mrb[12].mxu1 }
 0x556   :  { %v1079_v35 = vadd.f32 %v1078_v34, %v989_v32  ;;  %v1088_v36 = vsel %vm960_vm3, %v1083_v33, 0.0  ;;  %v7414_v38 = vpop.f32.mrb[13].mxu1 }
 0x557   :  { %1089 = vadd.xlane.f32.xlu1 %v1088_v36  ;;  %968 = vadd.xlane.f32.xlu0 %v967_v37 }
 0x558   :  { %v1084_v40 = vmul.f32 %v1079_v35, %v1079_v35 }
 0x55a   :  { %v1091_v43 = vsel %vm960_vm3, %v1084_v40, 0.0 }
 0x55b   :  { %1092 = vadd.xlane.f32.xlu1 %v1091_v43 }
 0x569   :  { %v963_v44 = vpop.xlane.xlu1 %962 }
 0x56a   :  { %v970_v46 = vmax.f32 %v963_v44, 1e-24 }
 0x56c   :  { %8280 = vrsqrt.f32 %v970_v46 }
 0x56d   :  { %v966_v45 = vpop.xlane.xlu0 %965 }
 0x56e   :  { %v971_v48 = vmax.f32 %v966_v45, 1e-24 }
 0x576   :  { %v8281_v56 = vpop.eup %8280 }
 0x577   :  { %v976_v58 = vmul.f32 %v8281_v56, %v944_v4  ;;  %v6942_v56 = vld [vmem:[#allocation16] ss:$0 sm:$0xff] }
 0x5e0   :  { %v1087_v47 = vpop.xlane.xlu0 %1086 }
 0x5e1   :  { %v1094_v49 = vmax.f32 %v1087_v47, 1e-24 }
 0x5e3   :  { %8282 = vrsqrt.f32 %v1094_v49 }
 0x5e4   :  { %v1090_v50 = vpop.xlane.xlu1 %1089  ;;  %v969_v51 = vpop.xlane.xlu0 %968  ;;  %8284 = vrsqrt.f32 %v971_v48 }
 0x5e5   :  { %v1095_v52 = vmax.f32 %v1090_v50, 1e-24  ;;  %v972_v53 = vmax.f32 %v969_v51, 1e-24 }
 0x5e7   :  { %8286 = vrsqrt.f32 %v1095_v52  ;;  %v6941_v52 = vld [vmem:[#allocation14] ss:$0 sm:$0xff] }
 0x5e8   :  { %v1093_v54 = vpop.xlane.xlu1 %1092  ;;  %8288 = vrsqrt.f32 %v972_v53 }
 0x5e9   :  { %v1096_v55 = vmax.f32 %v1093_v54, 1e-24 }
 0x5eb   :  { %8290 = vrsqrt.f32 %v1096_v55 }
 0x5ed   :  { %v8283_v57 = vpop.eup %8282 }
 0x5ee   :  { %v1100_v59 = vmul.f32 %v8283_v57, %v1069_v20  ;;  %v8285_v60 = vpop.eup %8284 }
 0x5ef   :  { %v977_v2 = vmul.f32 %v8285_v60, %v949_v10 }
 0x5f0   :  { %v1103_v61 = vadd.f32 %v1100_v59, %v976_v58 }
 0x5f1   :  { %v8287_v62 = vpop.eup %8286 }
 0x5f2   :  { %v1106_v63 = vmul.f32 0.5, %v1103_v61  ;;  %v1101_v3 = vmul.f32 %v8287_v62, %v1074_v27  ;;  %v8289_v7 = vpop.eup %8288 }
 0x5f3   :  { %v978_v14 = vmul.f32 %v8289_v7, %v954_v19 }
 0x5f4   :  { %v1109_v8 = vmax.f32 %v1106_v63, 0.0  ;;  %v1104_v9 = vadd.f32 %v1101_v3, %v977_v2  ;;  %v1332_v2 = vld [vmem:[%s10866_s23] sm:$0xff]  ;;  %v1333_v3 = vld [vmem:[%s10866_s23 + $0x8] sm:$0xff] }
 0x5f5   :  { %v8291_v11 = vpop.eup %8290 }
 0x5f6   :  { %v1112_v12 = vsel %vm960_vm3, %v1109_v8, 0.0  ;;  %v1107_v13 = vmul.f32 0.5, %v1104_v9  ;;  %v1102_v15 = vmul.f32 %v8291_v11, %v1079_v35  ;;  %v1431_v9 = vld [vmem:[%s10867_s27] sm:$0xff]  ;;  %v1432_v11 = vld [vmem:[%s10867_s27 + $0x8] sm:$0xff] }
 0x5f7   :  { %1113 = vadd.xlane.f32.xlu0 %v1112_v12  ;;  %v1334_v12 = vld [vmem:[%s10866_s23 + $0x10] sm:$0xff] }
 0x5f8   :  { %v1110_v16 = vmax.f32 %v1107_v13, 0.0  ;;  %v1105_v17 = vadd.f32 %v1102_v15, %v978_v14  ;;  %v1335_v13 = vld [vmem:[%s10866_s23 + $0x18] sm:$0xff]  ;;  %v1628_v15 = vld [vmem:[#allocation19 + $0x8] sm:$0xff] }
 0x5f9   :  { %v1627_v14 = vld [vmem:[#allocation19] sm:$0xff] }
 0x5fa   :  { %v1115_v4 = vsel %vm960_vm3, %v1110_v16, 0.0  ;;  %v1108_v18 = vmul.f32 0.5, %v1105_v17  ;;  %v7938_v17 = vpack.c.bf16 %v1335_v13, %v1334_v12 }
 0x5fb   :  { %1116 = vadd.xlane.f32.xlu1 %v1115_v4  ;;  %v1433_v4 = vld [vmem:[%s10867_s27 + $0x10] sm:$0xff] }
 0x5fc   :  { %v1111_v20 = vmax.f32 %v1108_v18, 0.0  ;;  %v1434_v18 = vld [vmem:[%s10867_s27 + $0x18] sm:$0xff] }
 0x5fe   :  { %v1118_v10 = vsel %vm960_vm3, %v1111_v20, 0.0 }
 0x5ff   :  { %1119 = vadd.xlane.f32.xlu0 %v1118_v10 }
 0x684   :  { %v1114_v21 = vpop.xlane.xlu0 %1113 }
 0x685   :  { %v1122_v22 = vmul.f32 0.03125, %v1114_v21 }
 0x687   :  { %v1125_v25 = vsub.f32 %v1109_v8, %v1122_v22  ;;  %v7935_v8 = vpack.c.bf16 %v1333_v3, %v1332_v2  ;;  %v1525_v22 = vld [vmem:[%s10868_s26 + $0x10] sm:$0xff] }
 0x688   :  { %v1117_v26 = vpop.xlane.xlu1 %1116 }
 0x689   :  { %v1123_v27 = vmul.f32 0.03125, %v1117_v26  ;;  %v1128_v29 = vmul.f32 %v1125_v25, %v1125_v25 }
 0x68b   :  { %v1126_v30 = vsub.f32 %v1110_v16, %v1123_v27  ;;  %v1131_v19 = vsel %vm960_vm3, %v1128_v29, 0.0  ;;  %v7941_v16 = vpack.c.bf16 %v1432_v11, %v1431_v9 }
 0x68c   :  { %1132 = vadd.xlane.f32.xlu1 %v1131_v19  ;;  %v1120_v31 = vpop.xlane.xlu0 %1119 }
 0x68d   :  { %v1124_v32 = vmul.f32 0.03125, %v1120_v31  ;;  %v1129_v33 = vmul.f32 %v1126_v30, %v1126_v30 }
 0x68f   :  { %v1127_v34 = vsub.f32 %v1111_v20, %v1124_v32  ;;  %v1134_v35 = vsel %vm960_vm3, %v1129_v33, 0.0  ;;  %v7952_v20 = vpack.c.bf16 %v1628_v15, %v1627_v14 }
 0x690   :  { %1135 = vadd.xlane.f32.xlu0 %v1134_v35 }
 0x691   :  { %v1130_v36 = vmul.f32 %v1127_v34, %v1127_v34 }
 0x693   :  { %v1137_v37 = vsel %vm960_vm3, %v1130_v36, 0.0 }
 0x694   :  { %1138 = vadd.xlane.f32.xlu1 %v1137_v37 }
 0x719   :  { %v1133_v38 = vpop.xlane.xlu1 %1132 }
 0x71a   :  { %v1140_v40 = vmul.f32 0.03125, %v1133_v38 }
 0x71c   :  { %v1143_v43 = vadd.f32 1e-05, %v1140_v40 }
 0x71d   :  { %v1136_v44 = vpop.xlane.xlu0 %1135 }
 0x71e   :  { %8292 = vrsqrt.f32 %v1143_v43  ;;  %v1141_v45 = vmul.f32 0.03125, %v1136_v44 }
 0x720   :  { %v1144_v46 = vadd.f32 1e-05, %v1141_v45 }
 0x721   :  { %v1139_v47 = vpop.xlane.xlu1 %1138 }
 0x722   :  { %8294 = vrsqrt.f32 %v1144_v46  ;;  %v1142_v48 = vmul.f32 0.03125, %v1139_v47  ;;  %v6959_v46 = vld [vmem:[#allocation20] ss:$0 sm:$0xff] }
 0x724   :  { %v1145_v49 = vadd.f32 1e-05, %v1142_v48 }
 0x726   :  { %8296 = vrsqrt.f32 %v1145_v49 }
 0x728   :  { %v8293_v50 = vpop.eup %8292 }
 0x729   :  { %v1149_v51 = vmul.f32 %v8293_v50, %v1125_v25  ;;  %v1526_v25 = vld [vmem:[%s10868_s26 + $0x18] sm:$0xff] }
 0x72a   :  { %v7950_v29 = vpack.c.bf16 %v1526_v25, %v1525_v22 }
 0x72b   :  { %v1159_v55 = vmul.f32 %v6941_v52, %v1149_v51 }
 0x72c   :  { %v8295_v53 = vpop.eup %8294 }
 0x72d   :  { %v1150_v54 = vmul.f32 %v8295_v53, %v1126_v30  ;;  %v1169_v59 = vadd.f32 %v6942_v56, %v1159_v55  ;;  %v9988_v53 = vld [vmem:[#allocation23] sm:$0x1] }
 0x72f   :  { %v1160_v57 = vmul.f32 %v6941_v52, %v1150_v54 }
 0x730   :  { %v8297_v58 = vpop.eup %8296 }
 0x731   :  { %v1170_v60 = vadd.f32 %v6942_v56, %v1160_v57  ;;  %v1151_v61 = vmul.f32 %v8297_v58, %v1127_v34 }
 0x733   :  { %v7929_v62 = vpack.c.bf16 %v1170_v60, %v1169_v59  ;;  %v1161_v63 = vmul.f32 %v6941_v52, %v1151_v61 }
 0x735   :  { %7930 = vmatpush3.bf16.msra.mxu0 %v7929_v62  ;;  %7933 = vmatpush3.bf16.msra.mxu1 %v7929_v62  ;;  %v1171_v7 = vadd.f32 %v6942_v56, %v1161_v63 }
 0x736   :  { %7419 = vmatprep.subr.mxu0 %v9402_v1  ;;  %7434 = vmatprep.subr.mxu1 %v9402_v1 }
 0x739   :  { %7420 = vmatpush3.msra.mxu0 %v1171_v7  ;;  %7435 = vmatpush3.msra.mxu1 %v1171_v7 }
 0x73a   :  { %7422 = vmatmul.mubr.msk.f32.vlgmr.msra.gmra.mrb[22].mxu0 %vm582_vm2, %v9794_v23  ;;  %7934 = vmatprep.subr.bf16.mxu0 %v9400_v0  ;;  %v7944_v23 = vpack.c.bf16 %v1434_v18, %v1433_v4 }
 0x73b   :  { %7424 = vmatprep.mubr.msk.f32.mxu0 %vm9401_vm0, %v9402_v1  ;;  %7936 = vmatpush3.bf16.msra.mxu0 %v7935_v8 }
 0x73c   :  { %7937 = vmatprep.subr.bf16.mxu0 %v9400_v0  ;;  %7437 = vmatmul.mubr.msk.f32.vlgmr.msra.gmra.mrb[14].mxu1 %vm582_vm2, %v9833_v39 }
 0x73d   :  { %7439 = vmatprep.mubr.msk.f32.mxu1 %vm9401_vm0, %v9402_v1  ;;  %7940 = vmatprep.subr.bf16.mxu1 %v9400_v0 }
 0x73e   :  { %7425 = vmatmul.mubr.msk.f32.gmra.mrb[24].mxu0 %vm582_vm2, %v9806_v28  ;;  %7942 = vmatpush3.bf16.msra.mxu1 %v7941_v16  ;;  %v1715_v28 = vld [vmem:[#allocation22 + $0x8] sm:$0xff] }
 0x73f   :  { %7427 = vmatprep.mubr.msk.f32.mxu0 %vm9401_vm0, %v9402_v1  ;;  %7939 = vmatpush3.bf16.msra.mxu0 %v7938_v17 }
 0x740   :  { %7440 = vmatmul.mubr.msk.f32.gmra.mrb[16].mxu1 %vm582_vm2, %v9841_v41  ;;  %7953 = vmatprep.subr.bf16.mxu0 %v7952_v20  ;;  %v1716_v41 = vld [vmem:[#allocation22 + $0x10] sm:$0xff] }
 0x741   :  { %7442 = vmatprep.mubr.msk.f32.mxu1 %vm9401_vm0, %v9402_v1  ;;  %7943 = vmatprep.subr.bf16.mxu1 %v9400_v0 }
 0x742   :  { %7428 = vmatmul.mubr.msk.f32.gmra.mrb[26].mxu0 %vm582_vm2, %v9798_v24  ;;  %7945 = vmatpush3.bf16.msra.mxu1 %v7944_v23  ;;  %v1714_v24 = vld [vmem:[#allocation22] sm:$0xff] }
 0x743   :  { %7453 = vmatprep.mubr.msk.f32.mxu0 %vm9401_vm0, %v9402_v1  ;;  %7946 = vmatprep.subr.bf16.mxu1 %v9400_v0  ;;  %v9937_v39 = vpack.c.bf16 %v1715_v28, %v1714_v24 }
 0x744   :  { %7443 = vmatmul.mubr.msk.f32.gmra.mrb[18].mxu1 %vm582_vm2, %v9849_v42  ;;  %v1717_v42 = vld [vmem:[#allocation22 + $0x18] sm:$0xff] }
 0x745   :  { %7470 = vmatprep.mubr.msk.f32.mxu1 %vm9401_vm0, %v9402_v1  ;;  %v9942_v10 = vpack.c.bf16 %v1717_v42, %v1716_v41 }
 0x746   :  { %7454 = vmatmul.mubr.msk.f32.vlgmr.msra.gmra.mrb[28].mxu0 %vm960_vm3, %v1169_v59 }
 0x747   :  { %7456 = vmatprep.mubr.msk.f32.mxu0 %vm9401_vm0, %v9402_v1  ;;  %7955 = vmatpush3.bf16.msra.mxu0 %v7952_v20 }
 0x748   :  { %7956 = vmatprep.subr.bf16.mxu0 %v9400_v0 }
 0x74a   :  { %7457 = vmatmul.mubr.msk.f32.gmra.mrb[30].mxu0 %vm960_vm3, %v1170_v60 }
 0x74b   :  { %7459 = vmatprep.mubr.msk.f32.mxu0 %vm9401_vm0, %v9402_v1 }
 0x74e   :  { %7460 = vmatmul.mubr.msk.f32.gmra.mrb[32].mxu0 %vm960_vm3, %v1171_v7 }
 0x74f   :  { %7500 = vmatprep.mubr.msk.f32.mxu0 %vm486_vm1, %v9772_v5  ;;  %v1523_v5 = vld [vmem:[%s10868_s26] sm:$0xff] }
 0x752   :  { %7501 = vmatmul.mubr.msk.f32.vlgmr.msra.gmra.mrb[34].mxu0 %vm486_vm1, %v9780_v6  ;;  %v1524_v6 = vld [vmem:[%s10868_s26 + $0x8] sm:$0xff] }
 0x753   :  { %7958 = vmatpush3.bf16.msra.mxu0 %v9937_v39  ;;  %7511 = vmatprep.mubr.msk.f32.mxu0 %vm9401_vm0, %v9402_v1  ;;  %v7947_v21 = vpack.c.bf16 %v1524_v6, %v1523_v5 }
 0x754   :  { %7959 = vmatprep.subr.bf16.mxu0 %v9400_v0 }
 0x757   :  { %7961 = vmatpush3.bf16.msra.mxu0 %v9942_v10 }
 0x758   :  { %7968 = vmatprep.subr.bf16.mxu0 %v9400_v0 }
 0x75a   :  { %7512 = vmatmul.mubr.f32.vlgmr.msra.gmra.mrb[36].mxu0 %v9402_v1 }
 0x75b   :  { %7970 = vmatpush3.bf16.msra.mxu0 %v9937_v39  ;;  %7533 = vmatprep.mubr.msk.f32.mxu0 %vm9401_vm0, %v9402_v1 }
 0x75c   :  { %7971 = vmatprep.subr.bf16.mxu0 %v9400_v0 }
 0x75f   :  { %7973 = vmatpush3.bf16.msra.mxu0 %v9942_v10 }
 0x760   :  { %7980 = vmatprep.subr.bf16.mxu0 %v9400_v0 }
 0x80d   :  { %v1238_v26 = vpop.f32.mrb[22].mxu0 }
 0x80e   :  { %7471 = vmatmul.mubr.msk.f32.vlgmr.msra.gmra.mrb[20].mxu1 %vm960_vm3, %v1238_v26  ;;  %v7423_v27 = vpop.f32.mrb[23].mxu0 }
 0x80f   :  { %7473 = vmatprep.mubr.msk.f32.mxu1 %vm9401_vm0, %v9402_v1  ;;  %7948 = vmatpush3.bf16.msra.mxu1 %v7947_v21  ;;  %v1318_v30 = vpop.f32.mrb[14].mxu1 }
 0x810   :  { %7949 = vmatprep.subr.bf16.mxu1 %v9400_v0  ;;  %v7438_v19 = vpop.f32.mrb[15].mxu1 }
 0x811   :  { %v1243_v31 = vpop.f32.mrb[24].mxu0 }
 0x812   :  { %7474 = vmatmul.mubr.msk.f32.gmra.mrb[22].mxu1 %vm960_vm3, %v1243_v31  ;;  %v7426_v32 = vpop.f32.mrb[25].mxu0 }
 0x813   :  { %7476 = vmatprep.mubr.msk.f32.mxu1 %vm9401_vm0, %v9402_v1  ;;  %7951 = vmatpush3.bf16.msra.mxu1 %v7950_v29  ;;  %v1323_v33 = vpop.f32.mrb[16].mxu1 }
 0x814   :  { %v7441_v34 = vpop.f32.mrb[17].mxu1  ;;  %7962 = vmatprep.subr.bf16.mxu1 %v9400_v0 }
 0x815   :  { %v1248_v35 = vpop.f32.mrb[26].mxu0 }
 0x816   :  { %7477 = vmatmul.mubr.msk.f32.gmra.mrb[24].mxu1 %vm960_vm3, %v1248_v35  ;;  %v7429_v36 = vpop.f32.mrb[27].mxu0 }
 0x817   :  { %7487 = vmatprep.mubr.msk.f32.mxu1 %vm9401_vm0, %v9402_v1  ;;  %v1328_v51 = vpop.f32.mrb[18].mxu1 }
 0x818   :  { %v7444_v52 = vpop.f32.mrb[19].mxu1 }
 0x819   :  { %v9971_v37 = vpop.f32.mrb[28].mxu0 }
 0x81a   :  { %v7455_v38 = vpop.f32.mrb[29].mxu0  ;;  %7488 = vmatmul.mubr.msk.f32.vlgmr.msra.gmra.mrb[20].mxu1 %vm960_vm3, %v1318_v30 }
 0x81b   :  { %7490 = vmatprep.mubr.msk.f32.mxu1 %vm9401_vm0, %v9402_v1  ;;  %7964 = vmatpush3.bf16.msra.mxu1 %v9937_v39 }
 0x81c   :  { %7965 = vmatprep.subr.bf16.mxu1 %v9400_v0 }
 0x81d   :  { %v9978_v40 = vpop.f32.mrb[30].mxu0 }
 0x81e   :  { %v7458_v43 = vpop.f32.mrb[31].mxu0  ;;  %7491 = vmatmul.mubr.msk.f32.gmra.mrb[22].mxu1 %vm960_vm3, %v1323_v33 }
 0x81f   :  { %7493 = vmatprep.mubr.msk.f32.mxu1 %vm9401_vm0, %v9402_v1  ;;  %7967 = vmatpush3.bf16.msra.mxu1 %v9942_v10 }
 0x820   :  { %7974 = vmatprep.subr.bf16.mxu1 %v9400_v0 }
 0x821   :  { %v1428_v44 = vpop.f32.mrb[32].mxu0 }
 0x822   :  { %v7461_v45 = vpop.f32.mrb[33].mxu0  ;;  %7494 = vmatmul.mubr.msk.f32.gmra.mrb[26].mxu1 %vm960_vm3, %v1328_v51 }
 0x823   :  { %7522 = vmatprep.mubr.msk.f32.mxu1 %vm9401_vm0, %v9402_v1 }
 0x825   :  { %v7502_v47 = vpop.f32.mrb[34].mxu0 }
 0x826   :  { %v1708_v48 = vadd.f32 %v7502_v47, %v6959_v46  ;;  %v1702_v49 = vpop.f32.mrb[35].mxu0 }
 0x827   :  { %v1703_v50 = vadd.f32 %v6959_v46, %v1702_v49 }
 0x828   :  { %1713 = vst.msk [vmem:[#allocation2 + $0x8] sm:$0xff] %vm1711_vm4, %v1708_v48 }
 0x829   :  { %1712 = vst.msk [vmem:[#allocation2] sm:$0xff] %vm1711_vm4, %v1703_v50 }
 0x82d   :  { %v1788_v54 = vpop.f32.mrb[36].mxu0 }
 0x82e   :  { %v1789_v55 = vadd.f32 %v1788_v54, %v9988_v53  ;;  %v7513_v56 = vpop.f32.mrb[37].mxu0 }
 0x82f   :  { %v1793_v59 = vld [vmem:[#allocation2 + $0xf] sm:$0x1]  ;;  %v1931_v45 = vld [vmem:[#allocation2 + $0xe] sm:$0x1] }
 0x830   :  { %1802 = vrot.lane.b32.xlu0 %v1789_v55, %s9404_s8  ;;  %v1792_v57 = vld [vmem:[#allocation2] sm:$0x1]  ;;  %v1820_v61 = vadd.f32 %v1793_v59, %v1789_v55  ;;  %v1930_v44 = vld [vmem:[#allocation2 + $0x1] sm:$0x1] }
 0x831   :  { %v1794_v58 = vadd.f32 %v1792_v57, %v1789_v55 }
 0x832   :  { %v6963_v62 = vmul.f32 -1.442695, %v1820_v61 }
 0x833   :  { %v6962_v60 = vmul.f32 -1.442695, %v1794_v58 }
 0x835   :  { %8298 = vpow2.f32 %v6962_v60 }
 0x836   :  { %8300 = vpow2.f32 %v6963_v62 }
 0x83f   :  { %v8299_v63 = vpop.eup %8298 }
 0x840   :  { %v1798_v2 = vadd.f32 1.0, %v8299_v63  ;;  %v8301_v3 = vpop.eup %8300 }
 0x841   :  { %v1824_v7 = vadd.f32 1.0, %v8301_v3 }
 0x842   :  { %8302 = vrcp.f32 %v1798_v2 }
 0x843   :  { %8304 = vrcp.f32 %v1824_v7 }
 0x84c   :  { %v8303_v8 = vpop.eup %8302 }
 0x84d   :  { %v8305_v12 = vpop.eup %8304  ;;  %v1812_v21 = vsub.f32 1.0, %v8303_v8  ;;  %v1818_v25 = vmul.f32 0.0, %v8303_v8 }
 0x84e   :  { %v1834_v29 = vsub.f32 1.0, %v8305_v12  ;;  %v1840_v19 = vmul.f32 0.0, %v8305_v12 }
 0x8a2   :  { %v1803_v9 = vpop.permute.xlu0 %1802 }
 0x8a3   :  { %v1805_v11 = vmul.f32 %v8303_v8, %v1803_v9  ;;  %v1827_v13 = vmul.f32 %v8305_v12, %v1803_v9 }
 0x8a5   :  { %1807 = vrot.lane.b32.xlu1 %v1805_v11, %s9405_s19 }
 0x8a9   :  { %1829 = vrot.lane.b32.xlu1 %v1827_v13, %s9405_s19 }
 0x8e9   :  { %v1520_v14 = vpop.f32.mrb[24].mxu1 }
 0x8ea   :  { %v7478_v15 = vpop.f32.mrb[25].mxu1 }
 0x8ed   :  { %v9996_v16 = vpop.f32.mrb[20].mxu1 }
 0x8ee   :  { %v7489_v17 = vpop.f32.mrb[21].mxu1 }
 0x8f1   :  { %v9998_v4 = vpop.f32.mrb[22].mxu1 }
 0x8f2   :  { %v7492_v18 = vpop.f32.mrb[23].mxu1 }
 0x8f5   :  { %v1620_v20 = vpop.f32.mrb[26].mxu1 }
 0x8f6   :  { %v7495_v23 = vpop.f32.mrb[27].mxu1 }
 0x917   :  { %v1808_v24 = vpop.permute.xlu1 %1807 }
 0x918   :  { %v1810_v28 = vadd.f32 %v1808_v24, %v1792_v57 }
 0x91a   :  { %8306 = vtanh.f32 %v1810_v28 }
 0x91b   :  { %v1830_v41 = vpop.permute.xlu1 %1829 }
 0x91c   :  { %v1832_v42 = vadd.f32 %v1830_v41, %v1793_v59 }
 0x91e   :  { %8308 = vtanh.f32 %v1832_v42 }
 0x924   :  { %v8307_v5 = vpop.eup %8306 }
 0x925   :  { %1814 = vrot.lane.b32.xlu0 %v8307_v5, %s9403_s4 }
 0x928   :  { %v8309_v6 = vpop.eup %8308 }
 0x929   :  { %1836 = vrot.lane.b32.xlu1 %v8309_v6, %s9403_s4 }
 0x997   :  { %v1815_v22 = vpop.permute.xlu0 %1814 }
 0x998   :  { %v1817_v26 = vmul.f32 %v1815_v22, %v1812_v21  ;;  %v2073_v21 = vld [vmem:[#allocation2 + $0x2] sm:$0x1]  ;;  %v2074_v22 = vld [vmem:[#allocation2 + $0xd] sm:$0x1] }
 0x99a   :  { %v1819_v27 = vadd.f32 %v1818_v25, %v1817_v26 }
 0x99b   :  { %v1837_v30 = vpop.permute.xlu1 %1836 }
 0x99c   :  { %v1839_v31 = vmul.f32 %v1837_v30, %v1834_v29  ;;  %1843 = vrot.lane.b32.xlu0 %v1819_v27, %s9403_s4 }
 0x99e   :  { %v10003_v32 = vadd.f32 %v1840_v19, %v1839_v31 }
 0x9a0   :  { %1853 = vrot.lane.b32.xlu1 %v10003_v32, %s9406_s21 }
 0xa0e   :  { %v1844_v33 = vpop.permute.xlu0 %1843 }
 0xa0f   :  { %1847 = vst.msk [vmem:[#allocation3] sm:$0x1] %vm1846_vm5, %v1844_v33 }
 0xa12   :  { %v1854_v34 = vpop.permute.xlu1 %1853 }
 0xa13   :  { %v1856_v35 = vsel %vm486_vm1, %v1844_v33, %v1854_v34 }
 0xa14   :  { %7523 = vmatmul.mubr.msk.f32.vlgmr.msra.gmra.mrb[28].mxu1 %vm960_vm3, %v1856_v35 }
 0xa15   :  { %7976 = vmatpush3.bf16.msra.mxu1 %v9937_v39  ;;  %7544 = vmatprep.mubr.msk.f32.mxu1 %vm9401_vm0, %v9402_v1 }
 0xa16   :  { %7977 = vmatprep.subr.bf16.mxu1 %v9400_v0 }
 0xa19   :  { %7979 = vmatpush3.bf16.msra.mxu1 %v9942_v10 }
 0xa1a   :  { %7986 = vmatprep.subr.bf16.mxu1 %v9400_v0 }
 0xae7   :  { %v1926_v36 = vpop.f32.mrb[28].mxu1 }
 0xae8   :  { %v1927_v38 = vadd.f32 %v1926_v36, %v9988_v53  ;;  %v7524_v43 = vpop.f32.mrb[29].mxu1 }
 0xaea   :  { %1940 = vrot.lane.b32.xlu0 %v1927_v38, %s9404_s8  ;;  %v1932_v46 = vadd.f32 %v1930_v44, %v1927_v38  ;;  %v1961_v47 = vadd.f32 %v1931_v45, %v1927_v38 }
 0xaec   :  { %v6965_v48 = vmul.f32 -1.442695, %v1932_v46  ;;  %v6966_v49 = vmul.f32 -1.442695, %v1961_v47 }
 0xaee   :  { %8310 = vpow2.f32 %v6965_v48 }
 0xaef   :  { %8312 = vpow2.f32 %v6966_v49 }
 0xaf8   :  { %v8311_v50 = vpop.eup %8310 }
 0xaf9   :  { %v8313_v51 = vpop.eup %8312  ;;  %v1936_v52 = vadd.f32 1.0, %v8311_v50 }
 0xafa   :  { %v1965_v54 = vadd.f32 1.0, %v8313_v51 }
 0xafb   :  { %8314 = vrcp.f32 %v1936_v52 }
 0xafc   :  { %8316 = vrcp.f32 %v1965_v54 }
 0xb05   :  { %v8315_v55 = vpop.eup %8314 }
 0xb06   :  { %v8317_v56 = vpop.eup %8316  ;;  %v1950_v8 = vsub.f32 1.0, %v8315_v55 }
 0xb07   :  { %v1975_v15 = vsub.f32 1.0, %v8317_v56 }
 0xb5c   :  { %v1941_v57 = vpop.permute.xlu0 %1940 }
 0xb5d   :  { %v1943_v58 = vmul.f32 %v8315_v55, %v1941_v57  ;;  %v1968_v59 = vmul.f32 %v8317_v56, %v1941_v57 }
 0xb5f   :  { %1970 = vrot.lane.b32.xlu0 %v1968_v59, %s9405_s19  ;;  %1945 = vrot.lane.b32.xlu1 %v1943_v58, %s9405_s19 }
 0xb63   :  { %1956 = vrot.lane.b32.xlu0 %v1856_v35, %s9407_s28 }
 0xb67   :  { %1981 = vrot.lane.b32.xlu0 %v1856_v35, %s9408_s12 }
 0xbd1   :  { %v1946_v60 = vpop.permute.xlu1 %1945  ;;  %v1971_v61 = vpop.permute.xlu0 %1970 }
 0xbd2   :  { %v1948_v62 = vadd.f32 %v1946_v60, %v1930_v44  ;;  %v1973_v63 = vadd.f32 %v1971_v61, %v1931_v45 }
 0xbd4   :  { %8318 = vtanh.f32 %v1948_v62 }
 0xbd5   :  { %8320 = vtanh.f32 %v1973_v63  ;;  %v1957_v7 = vpop.permute.xlu0 %1956 }
 0xbd6   :  { %v1959_v11 = vmul.f32 %v8315_v55, %v1957_v7 }
 0xbd9   :  { %v1982_v13 = vpop.permute.xlu0 %1981 }
 0xbda   :  { %v1984_v18 = vmul.f32 %v8317_v56, %v1982_v13 }
 0xbde   :  { %v8319_v2 = vpop.eup %8318 }
 0xbdf   :  { %1952 = vrot.lane.b32.xlu1 %v8319_v2, %s9403_s4  ;;  %v8321_v3 = vpop.eup %8320 }
 0xbe3   :  { %1977 = vrot.lane.b32.xlu1 %v8321_v3, %s9403_s4 }
 0xc51   :  { %v1953_v9 = vpop.permute.xlu1 %1952 }
 0xc52   :  { %v1955_v12 = vmul.f32 %v1953_v9, %v1950_v8 }
 0xc54   :  { %v1960_v14 = vadd.f32 %v1959_v11, %v1955_v12  ;;  %v2216_v11 = vld [vmem:[#allocation2 + $0x3] sm:$0x1]  ;;  %v2217_v12 = vld [vmem:[#allocation2 + $0xc] sm:$0x1] }
 0xc55   :  { %v1978_v17 = vpop.permute.xlu1 %1977 }
 0xc56   :  { %v1980_v20 = vmul.f32 %v1978_v17, %v1975_v15  ;;  %1987 = vrot.lane.b32.xlu1 %v1960_v14, %s9403_s4 }
 0xc58   :  { %v10025_v23 = vadd.f32 %v1984_v18, %v1980_v20 }
 0xc5a   :  { %1996 = vrot.lane.b32.xlu0 %v10025_v23, %s9406_s21 }
 0xcc8   :  { %v1988_v24 = vpop.permute.xlu1 %1987 }
 0xcc9   :  { %1990 = vst.msk [vmem:[#allocation3 + $0x1] sm:$0x1] %vm1846_vm5, %v1988_v24 }
 0xccc   :  { %v1997_v28 = vpop.permute.xlu0 %1996 }
 0xccd   :  { %v1999_v41 = vsel %vm486_vm1, %v1988_v24, %v1997_v28 }
 0xcce   :  { %7534 = vmatmul.mubr.msk.f32.vlgmr.msra.gmra.mrb[38].mxu0 %vm960_vm3, %v1999_v41 }
 0xccf   :  { %7982 = vmatpush3.bf16.msra.mxu0 %v9937_v39  ;;  %7555 = vmatprep.mubr.msk.f32.mxu0 %vm9401_vm0, %v9402_v1 }
 0xcd0   :  { %7983 = vmatprep.subr.bf16.mxu0 %v9400_v0 }
 0xcd3   :  { %7985 = vmatpush3.bf16.msra.mxu0 %v9942_v10 }
 0xcd4   :  { %7992 = vmatprep.subr.bf16.mxu0 %v9400_v0 }
 0xda1   :  { %v2069_v42 = vpop.f32.mrb[38].mxu0 }
 0xda2   :  { %v2070_v5 = vadd.f32 %v2069_v42, %v9988_v53  ;;  %v7535_v6 = vpop.f32.mrb[39].mxu0 }
 0xda4   :  { %2083 = vrot.lane.b32.xlu1 %v2070_v5, %s9404_s8  ;;  %v2075_v25 = vadd.f32 %v2073_v21, %v2070_v5  ;;  %v2104_v26 = vadd.f32 %v2074_v22, %v2070_v5 }
 0xda6   :  { %v6968_v27 = vmul.f32 -1.442695, %v2075_v25  ;;  %v6969_v29 = vmul.f32 -1.442695, %v2104_v26 }
 0xda8   :  { %8322 = vpow2.f32 %v6968_v27 }
 0xda9   :  { %8324 = vpow2.f32 %v6969_v29 }
 0xdb2   :  { %v8323_v30 = vpop.eup %8322 }
 0xdb3   :  { %v8325_v19 = vpop.eup %8324  ;;  %v2079_v31 = vadd.f32 1.0, %v8323_v30 }
 0xdb4   :  { %v2108_v33 = vadd.f32 1.0, %v8325_v19 }
 0xdb5   :  { %8326 = vrcp.f32 %v2079_v31 }
 0xdb6   :  { %8328 = vrcp.f32 %v2108_v33 }
 0xdbf   :  { %v8327_v34 = vpop.eup %8326 }
 0xdc0   :  { %v8329_v35 = vpop.eup %8328  ;;  %v2093_v51 = vsub.f32 1.0, %v8327_v34 }
 0xdc1   :  { %v2118_v58 = vsub.f32 1.0, %v8329_v35 }
 0xe16   :  { %v2084_v36 = vpop.permute.xlu1 %2083 }
 0xe17   :  { %v2086_v38 = vmul.f32 %v8327_v34, %v2084_v36  ;;  %v2111_v43 = vmul.f32 %v8329_v35, %v2084_v36 }
 0xe19   :  { %2113 = vrot.lane.b32.xlu1 %v2111_v43, %s9405_s19  ;;  %2088 = vrot.lane.b32.xlu0 %v2086_v38, %s9405_s19 }
 0xe1d   :  { %2099 = vrot.lane.b32.xlu1 %v1999_v41, %s9407_s28 }
 0xe21   :  { %2124 = vrot.lane.b32.xlu1 %v1999_v41, %s9408_s12 }
 0xe8b   :  { %v2089_v44 = vpop.permute.xlu0 %2088  ;;  %v2114_v45 = vpop.permute.xlu1 %2113 }
 0xe8c   :  { %v2091_v46 = vadd.f32 %v2089_v44, %v2073_v21  ;;  %v2116_v47 = vadd.f32 %v2114_v45, %v2074_v22 }
 0xe8e   :  { %8330 = vtanh.f32 %v2091_v46 }
 0xe8f   :  { %8332 = vtanh.f32 %v2116_v47  ;;  %v2100_v50 = vpop.permute.xlu1 %2099 }
 0xe90   :  { %v2102_v54 = vmul.f32 %v8327_v34, %v2100_v50 }
 0xe93   :  { %v2125_v56 = vpop.permute.xlu1 %2124 }
 0xe94   :  { %v2127_v60 = vmul.f32 %v8329_v35, %v2125_v56  ;;  %v2360_v56 = vld [vmem:[#allocation2 + $0xb] sm:$0x1] }
 0xe98   :  { %v8331_v48 = vpop.eup %8330 }
 0xe99   :  { %2095 = vrot.lane.b32.xlu0 %v8331_v48, %s9403_s4  ;;  %v8333_v49 = vpop.eup %8332 }
 0xe9d   :  { %2120 = vrot.lane.b32.xlu0 %v8333_v49, %s9403_s4 }
 0xf0b   :  { %v2096_v52 = vpop.permute.xlu0 %2095 }
 0xf0c   :  { %v2098_v55 = vmul.f32 %v2096_v52, %v2093_v51 }
 0xf0e   :  { %v2103_v57 = vadd.f32 %v2102_v54, %v2098_v55  ;;  %v2359_v55 = vld [vmem:[#allocation2 + $0x4] sm:$0x1] }
 0xf0f   :  { %v2121_v59 = vpop.permute.xlu0 %2120 }
 0xf10   :  { %v2123_v61 = vmul.f32 %v2121_v59, %v2118_v58  ;;  %2130 = vrot.lane.b32.xlu0 %v2103_v57, %s9403_s4 }
 0xf12   :  { %v10047_v62 = vadd.f32 %v2127_v60, %v2123_v61 }
 0xf14   :  { %2139 = vrot.lane.b32.xlu1 %v10047_v62, %s9406_s21 }
 0xf82   :  { %v2131_v63 = vpop.permute.xlu0 %2130 }
 0xf83   :  { %2133 = vst.msk [vmem:[#allocation3 + $0x2] sm:$0x1] %vm1846_vm5, %v2131_v63 }
 0xf86   :  { %v2140_v2 = vpop.permute.xlu1 %2139 }
 0xf87   :  { %v2142_v3 = vsel %vm486_vm1, %v2131_v63, %v2140_v2 }
 0xf88   :  { %7545 = vmatmul.mubr.msk.f32.vlgmr.msra.gmra.mrb[30].mxu1 %vm960_vm3, %v2142_v3 }
 0xf89   :  { %7988 = vmatpush3.bf16.msra.mxu1 %v9937_v39  ;;  %7566 = vmatprep.mubr.msk.f32.mxu1 %vm9401_vm0, %v9402_v1 }
 0xf8a   :  { %7989 = vmatprep.subr.bf16.mxu1 %v9400_v0 }
 0xf8d   :  { %7991 = vmatpush3.bf16.msra.mxu1 %v9942_v10 }
 0xf8e   :  { %7998 = vmatprep.subr.bf16.mxu1 %v9400_v0 }
0x105b   :  { %v2212_v7 = vpop.f32.mrb[30].mxu1 }
0x105c   :  { %v2213_v8 = vadd.f32 %v2212_v7, %v9988_v53  ;;  %v7546_v9 = vpop.f32.mrb[31].mxu1 }
0x105e   :  { %2226 = vrot.lane.b32.xlu0 %v2213_v8, %s9404_s8  ;;  %v2218_v13 = vadd.f32 %v2216_v11, %v2213_v8  ;;  %v2247_v14 = vadd.f32 %v2217_v12, %v2213_v8 }
0x1060   :  { %v6971_v15 = vmul.f32 -1.442695, %v2218_v13  ;;  %v6972_v17 = vmul.f32 -1.442695, %v2247_v14 }
0x1062   :  { %8334 = vpow2.f32 %v6971_v15 }
0x1063   :  { %8336 = vpow2.f32 %v6972_v17 }
0x106c   :  { %v8335_v18 = vpop.eup %8334 }
0x106d   :  { %v8337_v20 = vpop.eup %8336  ;;  %v2222_v24 = vadd.f32 1.0, %v8335_v18 }
0x106e   :  { %v2251_v28 = vadd.f32 1.0, %v8337_v20 }
0x106f   :  { %8338 = vrcp.f32 %v2222_v24 }
0x1070   :  { %8340 = vrcp.f32 %v2251_v28 }
0x1079   :  { %v8339_v41 = vpop.eup %8338 }
0x107a   :  { %v8341_v42 = vpop.eup %8340  ;;  %v2236_v31 = vsub.f32 1.0, %v8339_v41 }
0x107b   :  { %v2261_v43 = vsub.f32 1.0, %v8341_v42 }
0x10d0   :  { %v2227_v5 = vpop.permute.xlu0 %2226 }
0x10d1   :  { %v2229_v6 = vmul.f32 %v8339_v41, %v2227_v5  ;;  %v2254_v21 = vmul.f32 %v8341_v42, %v2227_v5 }
0x10d3   :  { %2256 = vrot.lane.b32.xlu0 %v2254_v21, %s9405_s19  ;;  %2231 = vrot.lane.b32.xlu1 %v2229_v6, %s9405_s19 }
0x10d7   :  { %2242 = vrot.lane.b32.xlu0 %v2142_v3, %s9407_s28 }
0x10db   :  { %2267 = vrot.lane.b32.xlu0 %v2142_v3, %s9408_s12 }
0x1145   :  { %v2232_v22 = vpop.permute.xlu1 %2231  ;;  %v2257_v25 = vpop.permute.xlu0 %2256 }
0x1146   :  { %v2234_v26 = vadd.f32 %v2232_v22, %v2216_v11  ;;  %v2259_v27 = vadd.f32 %v2257_v25, %v2217_v12 }
0x1148   :  { %8342 = vtanh.f32 %v2234_v26 }
0x1149   :  { %8344 = vtanh.f32 %v2259_v27  ;;  %v2243_v19 = vpop.permute.xlu0 %2242 }
0x114a   :  { %v2245_v34 = vmul.f32 %v8339_v41, %v2243_v19 }
0x114d   :  { %v2268_v36 = vpop.permute.xlu0 %2267 }
0x114e   :  { %v2270_v45 = vmul.f32 %v8341_v42, %v2268_v36  ;;  %v2502_v36 = vld [vmem:[#allocation2 + $0x5] sm:$0x1] }
0x1152   :  { %v8343_v29 = vpop.eup %8342 }
0x1153   :  { %2238 = vrot.lane.b32.xlu1 %v8343_v29, %s9403_s4  ;;  %v8345_v30 = vpop.eup %8344 }
0x1157   :  { %2263 = vrot.lane.b32.xlu1 %v8345_v30, %s9403_s4 }
0x11c5   :  { %v2239_v33 = vpop.permute.xlu1 %2238 }
0x11c6   :  { %v2241_v35 = vmul.f32 %v2239_v33, %v2236_v31 }
0x11c8   :  { %v2246_v38 = vadd.f32 %v2245_v34, %v2241_v35 }
0x11c9   :  { %v2264_v44 = vpop.permute.xlu1 %2263 }
0x11ca   :  { %v2266_v46 = vmul.f32 %v2264_v44, %v2261_v43  ;;  %2273 = vrot.lane.b32.xlu1 %v2246_v38, %s9403_s4  ;;  %v2503_v38 = vld [vmem:[#allocation2 + $0xa] sm:$0x1] }
0x11cc   :  { %v10069_v47 = vadd.f32 %v2270_v45, %v2266_v46 }
0x11ce   :  { %2282 = vrot.lane.b32.xlu0 %v10069_v47, %s9406_s21 }
0x123c   :  { %v2274_v48 = vpop.permute.xlu1 %2273 }
0x123d   :  { %2276 = vst.msk [vmem:[#allocation3 + $0x3] sm:$0x1] %vm1846_vm5, %v2274_v48 }
0x1240   :  { %v2283_v49 = vpop.permute.xlu0 %2282 }
0x1241   :  { %v2285_v50 = vsel %vm486_vm1, %v2274_v48, %v2283_v49 }
0x1242   :  { %7556 = vmatmul.mubr.msk.f32.vlgmr.msra.gmra.mrb[40].mxu0 %vm960_vm3, %v2285_v50 }
0x1243   :  { %7994 = vmatpush3.bf16.msra.mxu0 %v9937_v39  ;;  %7577 = vmatprep.mubr.msk.f32.mxu0 %vm9401_vm0, %v9402_v1 }
0x1244   :  { %7995 = vmatprep.subr.bf16.mxu0 %v9400_v0 }
0x1247   :  { %7997 = vmatpush3.bf16.msra.mxu0 %v9942_v10 }
0x1248   :  { %8004 = vmatprep.subr.bf16.mxu0 %v9400_v0 }
0x1315   :  { %v2355_v51 = vpop.f32.mrb[40].mxu0 }
0x1316   :  { %v2356_v52 = vadd.f32 %v2355_v51, %v9988_v53  ;;  %v7557_v54 = vpop.f32.mrb[41].mxu0 }
0x1318   :  { %2369 = vrot.lane.b32.xlu1 %v2356_v52, %s9404_s8  ;;  %v2361_v57 = vadd.f32 %v2359_v55, %v2356_v52  ;;  %v2390_v58 = vadd.f32 %v2360_v56, %v2356_v52 }
0x131a   :  { %v6974_v59 = vmul.f32 -1.442695, %v2361_v57  ;;  %v6975_v60 = vmul.f32 -1.442695, %v2390_v58 }
0x131c   :  { %8346 = vpow2.f32 %v6974_v59 }
0x131d   :  { %8348 = vpow2.f32 %v6975_v60 }
0x1326   :  { %v8347_v61 = vpop.eup %8346 }
0x1327   :  { %v8349_v63 = vpop.eup %8348  ;;  %v2365_v2 = vadd.f32 1.0, %v8347_v61 }
0x1328   :  { %v2394_v3 = vadd.f32 1.0, %v8349_v63 }
0x1329   :  { %8350 = vrcp.f32 %v2365_v2 }
0x132a   :  { %8352 = vrcp.f32 %v2394_v3 }
0x1333   :  { %v8351_v7 = vpop.eup %8350 }
0x1334   :  { %v8353_v8 = vpop.eup %8352  ;;  %v2379_v28 = vsub.f32 1.0, %v8351_v7 }
0x1335   :  { %v2404_v22 = vsub.f32 1.0, %v8353_v8 }
0x138a   :  { %v2370_v9 = vpop.permute.xlu1 %2369 }
0x138b   :  { %v2372_v11 = vmul.f32 %v8351_v7, %v2370_v9  ;;  %v2397_v12 = vmul.f32 %v8353_v8, %v2370_v9 }
0x138d   :  { %2399 = vrot.lane.b32.xlu1 %v2397_v12, %s9405_s19  ;;  %2374 = vrot.lane.b32.xlu0 %v2372_v11, %s9405_s19 }
0x1391   :  { %2385 = vrot.lane.b32.xlu1 %v2285_v50, %s9407_s28 }
0x1395   :  { %2410 = vrot.lane.b32.xlu1 %v2285_v50, %s9408_s12 }
0x13ff   :  { %v2375_v13 = vpop.permute.xlu0 %2374  ;;  %v2400_v14 = vpop.permute.xlu1 %2399 }
0x1400   :  { %v2377_v15 = vadd.f32 %v2375_v13, %v2359_v55  ;;  %v2402_v17 = vadd.f32 %v2400_v14, %v2360_v56 }
0x1402   :  { %8354 = vtanh.f32 %v2377_v15 }
0x1403   :  { %8356 = vtanh.f32 %v2402_v17  ;;  %v2386_v24 = vpop.permute.xlu1 %2385 }
0x1404   :  { %v2388_v42 = vmul.f32 %v8351_v7, %v2386_v24 }
0x1407   :  { %v2411_v6 = vpop.permute.xlu1 %2410 }
0x1408   :  { %v2413_v26 = vmul.f32 %v8353_v8, %v2411_v6 }
0x140c   :  { %v8355_v18 = vpop.eup %8354 }
0x140d   :  { %2381 = vrot.lane.b32.xlu0 %v8355_v18, %s9403_s4  ;;  %v8357_v20 = vpop.eup %8356 }
0x1411   :  { %2406 = vrot.lane.b32.xlu0 %v8357_v20, %s9403_s4 }
0x147f   :  { %v2382_v41 = vpop.permute.xlu0 %2381 }
0x1480   :  { %v2384_v5 = vmul.f32 %v2382_v41, %v2379_v28 }
0x1482   :  { %v2389_v21 = vadd.f32 %v2388_v42, %v2384_v5 }
0x1483   :  { %v2407_v25 = vpop.permute.xlu0 %2406 }
0x1484   :  { %v2409_v27 = vmul.f32 %v2407_v25, %v2404_v22  ;;  %2416 = vrot.lane.b32.xlu0 %v2389_v21, %s9403_s4  ;;  %v2645_v21 = vld [vmem:[#allocation2 + $0x6] sm:$0x1]  ;;  %v2646_v22 = vld [vmem:[#allocation2 + $0x9] sm:$0x1] }
0x1486   :  { %v10091_v29 = vadd.f32 %v2413_v26, %v2409_v27 }
0x1488   :  { %2425 = vrot.lane.b32.xlu1 %v10091_v29, %s9406_s21 }
0x14f6   :  { %v2417_v30 = vpop.permute.xlu0 %2416 }
0x14f7   :  { %2419 = vst.msk [vmem:[#allocation3 + $0x4] sm:$0x1] %vm1846_vm5, %v2417_v30 }
0x14fa   :  { %v2426_v19 = vpop.permute.xlu1 %2425 }
0x14fb   :  { %v2428_v31 = vsel %vm486_vm1, %v2417_v30, %v2426_v19 }
0x14fc   :  { %7567 = vmatmul.mubr.msk.f32.vlgmr.msra.gmra.mrb[32].mxu1 %vm960_vm3, %v2428_v31 }
0x14fd   :  { %8000 = vmatpush3.bf16.msra.mxu1 %v9937_v39  ;;  %7588 = vmatprep.mubr.msk.f32.mxu1 %vm9401_vm0, %v9402_v1 }
0x14fe   :  { %8001 = vmatprep.subr.bf16.mxu1 %v9400_v0 }
0x1501   :  { %8003 = vmatpush3.bf16.msra.mxu1 %v9942_v10 }
0x1502   :  { %8010 = vmatprep.subr.bf16.mxu1 %v9400_v0 }
0x15cf   :  { %v2498_v33 = vpop.f32.mrb[32].mxu1 }
0x15d0   :  { %v2499_v34 = vadd.f32 %v2498_v33, %v9988_v53  ;;  %v7568_v35 = vpop.f32.mrb[33].mxu1 }
0x15d2   :  { %2512 = vrot.lane.b32.xlu0 %v2499_v34, %s9404_s8  ;;  %v2504_v43 = vadd.f32 %v2502_v36, %v2499_v34  ;;  %v2533_v44 = vadd.f32 %v2503_v38, %v2499_v34 }
0x15d4   :  { %v6977_v45 = vmul.f32 -1.442695, %v2504_v43  ;;  %v6978_v46 = vmul.f32 -1.442695, %v2533_v44 }
0x15d6   :  { %8358 = vpow2.f32 %v6977_v45 }
0x15d7   :  { %8360 = vpow2.f32 %v6978_v46 }
0x15e0   :  { %v8359_v48 = vpop.eup %8358 }
0x15e1   :  { %v8361_v49 = vpop.eup %8360  ;;  %v2508_v50 = vadd.f32 1.0, %v8359_v48 }
0x15e2   :  { %v2537_v51 = vadd.f32 1.0, %v8361_v49 }
0x15e3   :  { %8362 = vrcp.f32 %v2508_v50 }
0x15e4   :  { %8364 = vrcp.f32 %v2537_v51 }
0x15ed   :  { %v8363_v52 = vpop.eup %8362 }
0x15ee   :  { %v8365_v54 = vpop.eup %8364  ;;  %v2522_v7 = vsub.f32 1.0, %v8363_v52 }
0x15ef   :  { %v2547_v14 = vsub.f32 1.0, %v8365_v54 }
0x1644   :  { %v2513_v55 = vpop.permute.xlu0 %2512 }
0x1645   :  { %v2515_v56 = vmul.f32 %v8363_v52, %v2513_v55  ;;  %v2540_v57 = vmul.f32 %v8365_v54, %v2513_v55 }
0x1647   :  { %2542 = vrot.lane.b32.xlu0 %v2540_v57, %s9405_s19  ;;  %2517 = vrot.lane.b32.xlu1 %v2515_v56, %s9405_s19 }
0x164b   :  { %2528 = vrot.lane.b32.xlu0 %v2428_v31, %s9407_s28 }
0x164f   :  { %2553 = vrot.lane.b32.xlu0 %v2428_v31, %s9408_s12 }
0x16b9   :  { %v2518_v58 = vpop.permute.xlu1 %2517  ;;  %v2543_v59 = vpop.permute.xlu0 %2542 }
0x16ba   :  { %v2520_v60 = vadd.f32 %v2518_v58, %v2502_v36  ;;  %v2545_v61 = vadd.f32 %v2543_v59, %v2503_v38 }
0x16bc   :  { %8366 = vtanh.f32 %v2520_v60 }
0x16bd   :  { %8368 = vtanh.f32 %v2545_v61  ;;  %v2529_v3 = vpop.permute.xlu0 %2528 }
0x16be   :  { %v2531_v9 = vmul.f32 %v8363_v52, %v2529_v3 }
0x16c1   :  { %v2554_v12 = vpop.permute.xlu0 %2553 }
0x16c2   :  { %v2556_v17 = vmul.f32 %v8365_v54, %v2554_v12 }
0x16c6   :  { %v8367_v63 = vpop.eup %8366 }
0x16c7   :  { %2524 = vrot.lane.b32.xlu1 %v8367_v63, %s9403_s4  ;;  %v8369_v2 = vpop.eup %8368 }
0x16cb   :  { %2549 = vrot.lane.b32.xlu1 %v8369_v2, %s9403_s4 }
0x1739   :  { %v2525_v8 = vpop.permute.xlu1 %2524 }
0x173a   :  { %v2527_v11 = vmul.f32 %v2525_v8, %v2522_v7 }
0x173c   :  { %v2532_v13 = vadd.f32 %v2531_v9, %v2527_v11 }
0x173d   :  { %v2550_v15 = vpop.permute.xlu1 %2549 }
0x173e   :  { %v2552_v18 = vmul.f32 %v2550_v15, %v2547_v14  ;;  %2559 = vrot.lane.b32.xlu1 %v2532_v13, %s9403_s4  ;;  %v2788_v14 = vld [vmem:[#allocation2 + $0x7] sm:$0x1]  ;;  %v2789_v15 = vld [vmem:[#allocation2 + $0x8] sm:$0x1] }
0x1740   :  { %v10113_v20 = vadd.f32 %v2556_v17, %v2552_v18 }
0x1742   :  { %2568 = vrot.lane.b32.xlu0 %v10113_v20, %s9406_s21 }
0x17b0   :  { %v2560_v24 = vpop.permute.xlu1 %2559 }
0x17b1   :  { %2562 = vst.msk [vmem:[#allocation3 + $0x5] sm:$0x1] %vm1846_vm5, %v2560_v24 }
0x17b4   :  { %v2569_v28 = vpop.permute.xlu0 %2568 }
0x17b5   :  { %v2571_v41 = vsel %vm486_vm1, %v2560_v24, %v2569_v28 }
0x17b6   :  { %7578 = vmatmul.mubr.msk.f32.vlgmr.msra.gmra.mrb[42].mxu0 %vm960_vm3, %v2571_v41 }
0x17b7   :  { %8006 = vmatpush3.bf16.msra.mxu0 %v9937_v39  ;;  %7599 = vmatprep.mubr.msk.f32.mxu0 %vm9401_vm0, %v9402_v1 }
0x17b8   :  { %8007 = vmatprep.subr.bf16.mxu0 %v9400_v0 }
0x17bb   :  { %8009 = vmatpush3.bf16.msra.mxu0 %v9942_v10 }
0x17bc   :  { %8016 = vmatprep.subr.bf16.mxu0 %v9400_v0 }
0x1889   :  { %v2641_v42 = vpop.f32.mrb[42].mxu0 }
0x188a   :  { %v2642_v5 = vadd.f32 %v2641_v42, %v9988_v53  ;;  %v7579_v6 = vpop.f32.mrb[43].mxu0 }
0x188c   :  { %2655 = vrot.lane.b32.xlu1 %v2642_v5, %s9404_s8  ;;  %v2647_v25 = vadd.f32 %v2645_v21, %v2642_v5  ;;  %v2676_v26 = vadd.f32 %v2646_v22, %v2642_v5 }
0x188e   :  { %v6980_v27 = vmul.f32 -1.442695, %v2647_v25  ;;  %v6981_v30 = vmul.f32 -1.442695, %v2676_v26 }
0x1890   :  { %8370 = vpow2.f32 %v6980_v27 }
0x1891   :  { %8372 = vpow2.f32 %v6981_v30 }
0x189a   :  { %v8371_v19 = vpop.eup %8370 }
0x189b   :  { %v8373_v31 = vpop.eup %8372  ;;  %v2651_v33 = vadd.f32 1.0, %v8371_v19 }
0x189c   :  { %v2680_v34 = vadd.f32 1.0, %v8373_v31 }
0x189d   :  { %8374 = vrcp.f32 %v2651_v33 }
0x189e   :  { %8376 = vrcp.f32 %v2680_v34 }
0x18a7   :  { %v8375_v35 = vpop.eup %8374 }
0x18a8   :  { %v8377_v36 = vpop.eup %8376  ;;  %v2665_v54 = vsub.f32 1.0, %v8375_v35 }
0x18a9   :  { %v2690_v60 = vsub.f32 1.0, %v8377_v36 }
0x18fe   :  { %v2656_v38 = vpop.permute.xlu1 %2655 }
0x18ff   :  { %v2658_v43 = vmul.f32 %v8375_v35, %v2656_v38  ;;  %v2683_v44 = vmul.f32 %v8377_v36, %v2656_v38 }
0x1901   :  { %2685 = vrot.lane.b32.xlu1 %v2683_v44, %s9405_s19  ;;  %2660 = vrot.lane.b32.xlu0 %v2658_v43, %s9405_s19 }
0x1905   :  { %2671 = vrot.lane.b32.xlu1 %v2571_v41, %s9407_s28 }
0x1909   :  { %2696 = vrot.lane.b32.xlu1 %v2571_v41, %s9408_s12 }
0x1973   :  { %v2661_v45 = vpop.permute.xlu0 %2660  ;;  %v2686_v46 = vpop.permute.xlu1 %2685 }
0x1974   :  { %v2663_v48 = vadd.f32 %v2661_v45, %v2645_v21  ;;  %v2688_v49 = vadd.f32 %v2686_v46, %v2646_v22 }
0x1976   :  { %8378 = vtanh.f32 %v2663_v48 }
0x1977   :  { %8380 = vtanh.f32 %v2688_v49  ;;  %v2672_v52 = vpop.permute.xlu1 %2671 }
0x1978   :  { %v2674_v56 = vmul.f32 %v8375_v35, %v2672_v52 }
0x197b   :  { %v2697_v58 = vpop.permute.xlu1 %2696 }
0x197c   :  { %v2699_v63 = vmul.f32 %v8377_v36, %v2697_v58 }
0x1980   :  { %v8379_v50 = vpop.eup %8378 }
0x1981   :  { %2667 = vrot.lane.b32.xlu0 %v8379_v50, %s9403_s4  ;;  %v8381_v51 = vpop.eup %8380 }
0x1985   :  { %2692 = vrot.lane.b32.xlu0 %v8381_v51, %s9403_s4 }
0x19f3   :  { %v2668_v55 = vpop.permute.xlu0 %2667 }
0x19f4   :  { %v2670_v57 = vmul.f32 %v2668_v55, %v2665_v54 }
0x19f6   :  { %v2675_v59 = vadd.f32 %v2674_v56, %v2670_v57 }
0x19f7   :  { %v2693_v61 = vpop.permute.xlu0 %2692 }
0x19f8   :  { %v2695_v2 = vmul.f32 %v2693_v61, %v2690_v60  ;;  %2702 = vrot.lane.b32.xlu0 %v2675_v59, %s9403_s4  ;;  %v2931_v61 = vld [vmem:[#allocation2 + $0x8] sm:$0x1] }
0x19fa   :  { %v10135_v3 = vadd.f32 %v2699_v63, %v2695_v2  ;;  %v2932_v63 = vld [vmem:[#allocation2 + $0x7] sm:$0x1] }
0x19fc   :  { %2711 = vrot.lane.b32.xlu1 %v10135_v3, %s9406_s21 }
0x1a6a   :  { %v2703_v7 = vpop.permute.xlu0 %2702 }
0x1a6b   :  { %2705 = vst.msk [vmem:[#allocation3 + $0x6] sm:$0x1] %vm1846_vm5, %v2703_v7 }
0x1a6e   :  { %v2712_v8 = vpop.permute.xlu1 %2711 }
0x1a6f   :  { %v2714_v9 = vsel %vm486_vm1, %v2703_v7, %v2712_v8 }
0x1a70   :  { %7589 = vmatmul.mubr.msk.f32.vlgmr.msra.gmra.mrb[34].mxu1 %vm960_vm3, %v2714_v9 }
0x1a71   :  { %8012 = vmatpush3.bf16.msra.mxu1 %v9937_v39  ;;  %7610 = vmatprep.mubr.msk.f32.mxu1 %vm9401_vm0, %v9402_v1 }
0x1a72   :  { %8013 = vmatprep.subr.bf16.mxu1 %v9400_v0 }
0x1a75   :  { %8015 = vmatpush3.bf16.msra.mxu1 %v9942_v10 }
0x1a76   :  { %8022 = vmatprep.subr.bf16.mxu1 %v9400_v0 }
0x1b43   :  { %v2784_v11 = vpop.f32.mrb[34].mxu1 }
0x1b44   :  { %v2785_v12 = vadd.f32 %v2784_v11, %v9988_v53  ;;  %v7590_v13 = vpop.f32.mrb[35].mxu1 }
0x1b46   :  { %2798 = vrot.lane.b32.xlu0 %v2785_v12, %s9404_s8  ;;  %v2790_v17 = vadd.f32 %v2788_v14, %v2785_v12  ;;  %v2819_v18 = vadd.f32 %v2789_v15, %v2785_v12 }
0x1b48   :  { %v6983_v24 = vmul.f32 -1.442695, %v2790_v17  ;;  %v6984_v28 = vmul.f32 -1.442695, %v2819_v18 }
0x1b4a   :  { %8382 = vpow2.f32 %v6983_v24 }
0x1b4b   :  { %8384 = vpow2.f32 %v6984_v28 }
0x1b54   :  { %v8383_v41 = vpop.eup %8382 }
0x1b55   :  { %v8385_v42 = vpop.eup %8384  ;;  %v2794_v5 = vadd.f32 1.0, %v8383_v41 }
0x1b56   :  { %v2823_v6 = vadd.f32 1.0, %v8385_v42 }
0x1b57   :  { %8386 = vrcp.f32 %v2794_v5 }
0x1b58   :  { %8388 = vrcp.f32 %v2823_v6 }
0x1b61   :  { %v8387_v21 = vpop.eup %8386 }
0x1b62   :  { %v8389_v22 = vpop.eup %8388  ;;  %v2808_v38 = vsub.f32 1.0, %v8387_v21 }
0x1b63   :  { %v2833_v49 = vsub.f32 1.0, %v8389_v22 }
0x1bb8   :  { %v2799_v25 = vpop.permute.xlu0 %2798 }
0x1bb9   :  { %v2801_v26 = vmul.f32 %v8387_v21, %v2799_v25  ;;  %v2826_v27 = vmul.f32 %v8389_v22, %v2799_v25 }
0x1bbb   :  { %2828 = vrot.lane.b32.xlu0 %v2826_v27, %s9405_s19  ;;  %2803 = vrot.lane.b32.xlu1 %v2801_v26, %s9405_s19 }
0x1bbf   :  { %2814 = vrot.lane.b32.xlu0 %v2714_v9, %s9407_s28 }
0x1bc3   :  { %2839 = vrot.lane.b32.xlu0 %v2714_v9, %s9408_s12 }
0x1c2d   :  { %v2804_v30 = vpop.permute.xlu1 %2803  ;;  %v2829_v19 = vpop.permute.xlu0 %2828 }
0x1c2e   :  { %v2806_v31 = vadd.f32 %v2804_v30, %v2788_v14  ;;  %v2831_v33 = vadd.f32 %v2829_v19, %v2789_v15 }
0x1c30   :  { %8390 = vtanh.f32 %v2806_v31 }
0x1c31   :  { %8392 = vtanh.f32 %v2831_v33  ;;  %v2815_v36 = vpop.permute.xlu0 %2814 }
0x1c32   :  { %v2817_v44 = vmul.f32 %v8387_v21, %v2815_v36 }
0x1c35   :  { %v2840_v46 = vpop.permute.xlu0 %2839 }
0x1c36   :  { %v2842_v51 = vmul.f32 %v8389_v22, %v2840_v46 }
0x1c3a   :  { %v8391_v34 = vpop.eup %8390 }
0x1c3b   :  { %2810 = vrot.lane.b32.xlu1 %v8391_v34, %s9403_s4  ;;  %v8393_v35 = vpop.eup %8392 }
0x1c3f   :  { %2835 = vrot.lane.b32.xlu1 %v8393_v35, %s9403_s4 }
0x1cad   :  { %v2811_v43 = vpop.permute.xlu1 %2810 }
0x1cae   :  { %v2813_v45 = vmul.f32 %v2811_v43, %v2808_v38 }
0x1cb0   :  { %v2818_v48 = vadd.f32 %v2817_v44, %v2813_v45 }
0x1cb1   :  { %v2836_v50 = vpop.permute.xlu1 %2835 }
0x1cb2   :  { %v2838_v52 = vmul.f32 %v2836_v50, %v2833_v49  ;;  %2845 = vrot.lane.b32.xlu1 %v2818_v48, %s9403_s4  ;;  %v10192_v48 = vld [vmem:[#allocation23] sm:$0x1] }
0x1cb4   :  { %v10157_v54 = vadd.f32 %v2842_v51, %v2838_v52  ;;  %v3074_v51 = vld [vmem:[#allocation2 + $0x9] sm:$0x1]  ;;  %v3075_v52 = vld [vmem:[#allocation2 + $0x6] sm:$0x1] }
0x1cb6   :  { %2854 = vrot.lane.b32.xlu0 %v10157_v54, %s9406_s21 }
0x1d24   :  { %v2846_v55 = vpop.permute.xlu1 %2845 }
0x1d25   :  { %2848 = vst.msk [vmem:[#allocation3 + $0x7] sm:$0x1] %vm1846_vm5, %v2846_v55 }
0x1d28   :  { %v2855_v56 = vpop.permute.xlu0 %2854 }
0x1d29   :  { %v2857_v57 = vsel %vm486_vm1, %v2846_v55, %v2855_v56 }
0x1d2a   :  { %7600 = vmatmul.mubr.msk.f32.vlgmr.msra.gmra.mrb[44].mxu0 %vm960_vm3, %v2857_v57 }
0x1d2b   :  { %8018 = vmatpush3.bf16.msra.mxu0 %v9937_v39  ;;  %7621 = vmatprep.mubr.msk.f32.mxu0 %vm9401_vm0, %v9402_v1 }
0x1d2c   :  { %8019 = vmatprep.subr.bf16.mxu0 %v9400_v0 }
0x1d2f   :  { %8021 = vmatpush3.bf16.msra.mxu0 %v9942_v10 }
0x1d30   :  { %8028 = vmatprep.subr.bf16.mxu0 %v9400_v0 }
0x1dfd   :  { %v2927_v58 = vpop.f32.mrb[44].mxu0 }
0x1dfe   :  { %v2928_v59 = vadd.f32 %v2927_v58, %v9988_v53  ;;  %v7601_v60 = vpop.f32.mrb[45].mxu0 }
0x1e00   :  { %2941 = vrot.lane.b32.xlu1 %v2928_v59, %s9404_s8  ;;  %v2933_v2 = vadd.f32 %v2931_v61, %v2928_v59  ;;  %v2962_v7 = vadd.f32 %v2932_v63, %v2928_v59 }
0x1e02   :  { %v6986_v8 = vmul.f32 -1.442695, %v2933_v2  ;;  %v6987_v9 = vmul.f32 -1.442695, %v2962_v7 }
0x1e04   :  { %8394 = vpow2.f32 %v6986_v8 }
0x1e05   :  { %8396 = vpow2.f32 %v6987_v9 }
0x1e0e   :  { %v8395_v11 = vpop.eup %8394 }
0x1e0f   :  { %v8397_v12 = vpop.eup %8396  ;;  %v2937_v13 = vadd.f32 1.0, %v8395_v11 }
0x1e10   :  { %v2966_v14 = vadd.f32 1.0, %v8397_v12 }
0x1e11   :  { %8398 = vrcp.f32 %v2937_v13 }
0x1e12   :  { %8400 = vrcp.f32 %v2966_v14 }
0x1e1b   :  { %v8399_v15 = vpop.eup %8398 }
0x1e1c   :  { %v8401_v17 = vpop.eup %8400  ;;  %v2951_v25 = vsub.f32 1.0, %v8399_v15 }
0x1e1d   :  { %v2976_v33 = vsub.f32 1.0, %v8401_v17 }
0x1e72   :  { %v2942_v53 = vpop.permute.xlu1 %2941 }
0x1e73   :  { %v2944_v18 = vmul.f32 %v8399_v15, %v2942_v53  ;;  %v2969_v24 = vmul.f32 %v8401_v17, %v2942_v53 }
0x1e75   :  { %2971 = vrot.lane.b32.xlu1 %v2969_v24, %s9405_s19  ;;  %2946 = vrot.lane.b32.xlu0 %v2944_v18, %s9405_s19 }
0x1e79   :  { %2957 = vrot.lane.b32.xlu1 %v2857_v57, %s9407_s28 }
0x1e7d   :  { %2982 = vrot.lane.b32.xlu1 %v2857_v57, %s9408_s12 }
0x1ee7   :  { %v2947_v28 = vpop.permute.xlu0 %2946  ;;  %v2972_v41 = vpop.permute.xlu1 %2971 }
0x1ee8   :  { %v2949_v42 = vadd.f32 %v2947_v28, %v2931_v61  ;;  %v2974_v5 = vadd.f32 %v2972_v41, %v2932_v63 }
0x1eea   :  { %8402 = vtanh.f32 %v2949_v42 }
0x1eeb   :  { %8404 = vtanh.f32 %v2974_v5  ;;  %v2958_v22 = vpop.permute.xlu1 %2957 }
0x1eec   :  { %v2960_v27 = vmul.f32 %v8399_v15, %v2958_v22 }
0x1eef   :  { %v2983_v19 = vpop.permute.xlu1 %2982 }
0x1ef0   :  { %v2985_v35 = vmul.f32 %v8401_v17, %v2983_v19 }
0x1ef4   :  { %v8403_v6 = vpop.eup %8402 }
0x1ef5   :  { %2953 = vrot.lane.b32.xlu0 %v8403_v6, %s9403_s4  ;;  %v8405_v21 = vpop.eup %8404 }
0x1ef9   :  { %2978 = vrot.lane.b32.xlu0 %v8405_v21, %s9403_s4 }
0x1f67   :  { %v2954_v26 = vpop.permute.xlu0 %2953 }
0x1f68   :  { %v2956_v30 = vmul.f32 %v2954_v26, %v2951_v25 }
0x1f6a   :  { %v2961_v31 = vadd.f32 %v2960_v27, %v2956_v30 }
0x1f6b   :  { %v2979_v34 = vpop.permute.xlu0 %2978 }
0x1f6c   :  { %v2981_v36 = vmul.f32 %v2979_v34, %v2976_v33  ;;  %2988 = vrot.lane.b32.xlu0 %v2961_v31, %s9403_s4 }
0x1f6e   :  { %v10179_v38 = vadd.f32 %v2985_v35, %v2981_v36  ;;  %v3217_v36 = vld [vmem:[#allocation2 + $0xa] sm:$0x1] }
0x1f70   :  { %2997 = vrot.lane.b32.xlu1 %v10179_v38, %s9406_s21 }
0x1fde   :  { %v2989_v43 = vpop.permute.xlu0 %2988 }
0x1fdf   :  { %2991 = vst.msk [vmem:[#allocation3 + $0x8] sm:$0x1] %vm1846_vm5, %v2989_v43 }
0x1fe2   :  { %v2998_v44 = vpop.permute.xlu1 %2997 }
0x1fe3   :  { %v3000_v45 = vsel %vm486_vm1, %v2989_v43, %v2998_v44  ;;  %v3218_v43 = vld [vmem:[#allocation2 + $0x5] sm:$0x1] }
0x1fe4   :  { %7611 = vmatmul.mubr.msk.f32.vlgmr.msra.gmra.mrb[36].mxu1 %vm960_vm3, %v3000_v45 }
0x1fe5   :  { %8024 = vmatpush3.bf16.msra.mxu1 %v9937_v39  ;;  %7632 = vmatprep.mubr.msk.f32.mxu1 %vm9401_vm0, %v9402_v1 }
0x1fe6   :  { %8025 = vmatprep.subr.bf16.mxu1 %v9400_v0 }
0x1fe9   :  { %8027 = vmatpush3.bf16.msra.mxu1 %v9942_v10 }
0x1fea   :  { %8034 = vmatprep.subr.bf16.mxu1 %v9400_v0 }
0x20b7   :  { %v3070_v46 = vpop.f32.mrb[36].mxu1 }
0x20b8   :  { %v3071_v49 = vadd.f32 %v10192_v48, %v3070_v46  ;;  %v7612_v50 = vpop.f32.mrb[37].mxu1 }
0x20ba   :  { %3084 = vrot.lane.b32.xlu0 %v3071_v49, %s9404_s8  ;;  %v3076_v55 = vadd.f32 %v3074_v51, %v3071_v49  ;;  %v3105_v56 = vadd.f32 %v3075_v52, %v3071_v49 }
0x20bc   :  { %v6989_v57 = vmul.f32 -1.442695, %v3076_v55  ;;  %v6990_v58 = vmul.f32 -1.442695, %v3105_v56 }
0x20be   :  { %8406 = vpow2.f32 %v6989_v57 }
0x20bf   :  { %8408 = vpow2.f32 %v6990_v58 }
0x20c8   :  { %v8407_v59 = vpop.eup %8406 }
0x20c9   :  { %v8409_v60 = vpop.eup %8408  ;;  %v3080_v61 = vadd.f32 1.0, %v8407_v59 }
0x20ca   :  { %v3109_v63 = vadd.f32 1.0, %v8409_v60 }
0x20cb   :  { %8410 = vrcp.f32 %v3080_v61 }
0x20cc   :  { %8412 = vrcp.f32 %v3109_v63 }
0x20d5   :  { %v8411_v2 = vpop.eup %8410 }
0x20d6   :  { %v8413_v7 = vpop.eup %8412  ;;  %v3094_v24 = vsub.f32 1.0, %v8411_v2 }
0x20d7   :  { %v3119_v21 = vsub.f32 1.0, %v8413_v7 }
0x212c   :  { %v3085_v8 = vpop.permute.xlu0 %3084 }
0x212d   :  { %v3087_v9 = vmul.f32 %v8411_v2, %v3085_v8  ;;  %v3112_v11 = vmul.f32 %v8413_v7, %v3085_v8 }
0x212f   :  { %3114 = vrot.lane.b32.xlu0 %v3112_v11, %s9405_s19  ;;  %3089 = vrot.lane.b32.xlu1 %v3087_v9, %s9405_s19 }
0x2133   :  { %3100 = vrot.lane.b32.xlu0 %v3000_v45, %s9407_s28 }
0x2137   :  { %3125 = vrot.lane.b32.xlu0 %v3000_v45, %s9408_s12 }
0x21a1   :  { %v3090_v12 = vpop.permute.xlu1 %3089  ;;  %v3115_v13 = vpop.permute.xlu0 %3114 }
0x21a2   :  { %v3092_v14 = vadd.f32 %v3090_v12, %v3074_v51  ;;  %v3117_v15 = vadd.f32 %v3115_v13, %v3075_v52 }
0x21a4   :  { %8414 = vtanh.f32 %v3092_v14 }
0x21a5   :  { %8416 = vtanh.f32 %v3117_v15  ;;  %v3101_v18 = vpop.permute.xlu0 %3100 }
0x21a6   :  { %v3103_v41 = vmul.f32 %v8411_v2, %v3101_v18 }
0x21a9   :  { %v3126_v5 = vpop.permute.xlu0 %3125 }
0x21aa   :  { %v3128_v25 = vmul.f32 %v8413_v7, %v3126_v5 }
0x21ae   :  { %v8415_v17 = vpop.eup %8414 }
0x21af   :  { %3096 = vrot.lane.b32.xlu1 %v8415_v17, %s9403_s4  ;;  %v8417_v53 = vpop.eup %8416 }
0x21b3   :  { %3121 = vrot.lane.b32.xlu1 %v8417_v53, %s9403_s4 }
0x2221   :  { %v3097_v28 = vpop.permute.xlu1 %3096 }
0x2222   :  { %v3099_v42 = vmul.f32 %v3097_v28, %v3094_v24 }
0x2224   :  { %v3104_v6 = vadd.f32 %v3103_v41, %v3099_v42 }
0x2225   :  { %v3122_v22 = vpop.permute.xlu1 %3121 }
0x2226   :  { %v3124_v26 = vmul.f32 %v3122_v22, %v3119_v21  ;;  %3131 = vrot.lane.b32.xlu1 %v3104_v6, %s9403_s4 }
0x2228   :  { %v10203_v27 = vadd.f32 %v3128_v25, %v3124_v26 }
0x222a   :  { %3140 = vrot.lane.b32.xlu0 %v10203_v27, %s9406_s21 }
0x2298   :  { %v3132_v30 = vpop.permute.xlu1 %3131 }
0x2299   :  { %3134 = vst.msk [vmem:[#allocation3 + $0x9] sm:$0x1] %vm1846_vm5, %v3132_v30 }
0x229c   :  { %v3141_v19 = vpop.permute.xlu0 %3140 }
0x229d   :  { %v3143_v31 = vsel %vm486_vm1, %v3132_v30, %v3141_v19  ;;  %v3360_v30 = vld [vmem:[#allocation2 + $0xb] sm:$0x1]  ;;  %v3361_v19 = vld [vmem:[#allocation2 + $0x4] sm:$0x1] }
0x229e   :  { %7622 = vmatmul.mubr.msk.f32.vlgmr.msra.gmra.mrb[46].mxu0 %vm960_vm3, %v3143_v31 }
0x229f   :  { %8030 = vmatpush3.bf16.msra.mxu0 %v9937_v39  ;;  %7643 = vmatprep.mubr.msk.f32.mxu0 %vm9401_vm0, %v9402_v1 }
0x22a0   :  { %8031 = vmatprep.subr.bf16.mxu0 %v9400_v0 }
0x22a3   :  { %8033 = vmatpush3.bf16.msra.mxu0 %v9942_v10 }
0x22a4   :  { %8040 = vmatprep.subr.bf16.mxu0 %v9400_v0 }
0x2371   :  { %v3213_v33 = vpop.f32.mrb[46].mxu0 }
0x2372   :  { %v3214_v34 = vadd.f32 %v10192_v48, %v3213_v33  ;;  %v7623_v35 = vpop.f32.mrb[47].mxu0 }
0x2374   :  { %3227 = vrot.lane.b32.xlu1 %v3214_v34, %s9404_s8  ;;  %v3219_v44 = vadd.f32 %v3217_v36, %v3214_v34  ;;  %v3248_v45 = vadd.f32 %v3218_v43, %v3214_v34 }
0x2376   :  { %v6992_v46 = vmul.f32 -1.442695, %v3219_v44  ;;  %v6993_v49 = vmul.f32 -1.442695, %v3248_v45 }
0x2378   :  { %8418 = vpow2.f32 %v6992_v46 }
0x2379   :  { %8420 = vpow2.f32 %v6993_v49 }
0x2382   :  { %v8419_v50 = vpop.eup %8418 }
0x2383   :  { %v8421_v51 = vpop.eup %8420  ;;  %v3223_v52 = vadd.f32 1.0, %v8419_v50 }
0x2384   :  { %v3252_v55 = vadd.f32 1.0, %v8421_v51 }
0x2385   :  { %8422 = vrcp.f32 %v3223_v52 }
0x2386   :  { %8424 = vrcp.f32 %v3252_v55 }
0x238f   :  { %v8423_v56 = vpop.eup %8422 }
0x2390   :  { %v8425_v57 = vpop.eup %8424  ;;  %v3237_v12 = vsub.f32 1.0, %v8423_v56 }
0x2391   :  { %v3262_v18 = vsub.f32 1.0, %v8425_v57 }
0x23e6   :  { %v3228_v58 = vpop.permute.xlu1 %3227 }
0x23e7   :  { %v3230_v59 = vmul.f32 %v8423_v56, %v3228_v58  ;;  %v3255_v60 = vmul.f32 %v8425_v57, %v3228_v58 }
0x23e9   :  { %3257 = vrot.lane.b32.xlu1 %v3255_v60, %s9405_s19  ;;  %3232 = vrot.lane.b32.xlu0 %v3230_v59, %s9405_s19 }
0x23ed   :  { %3243 = vrot.lane.b32.xlu1 %v3143_v31, %s9407_s28 }
0x23f1   :  { %3268 = vrot.lane.b32.xlu1 %v3143_v31, %s9408_s12 }
0x245b   :  { %v3233_v61 = vpop.permute.xlu0 %3232  ;;  %v3258_v63 = vpop.permute.xlu1 %3257 }
0x245c   :  { %v3235_v2 = vadd.f32 %v3233_v61, %v3217_v36  ;;  %v3260_v7 = vadd.f32 %v3258_v63, %v3218_v43 }
0x245e   :  { %8426 = vtanh.f32 %v3235_v2 }
0x245f   :  { %8428 = vtanh.f32 %v3260_v7  ;;  %v3244_v11 = vpop.permute.xlu1 %3243 }
0x2460   :  { %v3246_v14 = vmul.f32 %v8423_v56, %v3244_v11 }
0x2463   :  { %v3269_v17 = vpop.permute.xlu1 %3268 }
0x2464   :  { %v3271_v28 = vmul.f32 %v8425_v57, %v3269_v17 }
0x2468   :  { %v8427_v8 = vpop.eup %8426 }
0x2469   :  { %3239 = vrot.lane.b32.xlu0 %v8427_v8, %s9403_s4  ;;  %v8429_v9 = vpop.eup %8428 }
0x246d   :  { %3264 = vrot.lane.b32.xlu0 %v8429_v9, %s9403_s4 }
0x24db   :  { %v3240_v13 = vpop.permute.xlu0 %3239 }
0x24dc   :  { %v3242_v15 = vmul.f32 %v3240_v13, %v3237_v12 }
0x24de   :  { %v3247_v53 = vadd.f32 %v3246_v14, %v3242_v15 }
0x24df   :  { %v3265_v24 = vpop.permute.xlu0 %3264 }
0x24e0   :  { %v3267_v41 = vmul.f32 %v3265_v24, %v3262_v18  ;;  %3274 = vrot.lane.b32.xlu0 %v3247_v53, %s9403_s4 }
0x24e2   :  { %v10225_v42 = vadd.f32 %v3271_v28, %v3267_v41 }
0x24e4   :  { %3283 = vrot.lane.b32.xlu1 %v10225_v42, %s9406_s21 }
0x2552   :  { %v3275_v5 = vpop.permute.xlu0 %3274 }
0x2553   :  { %3277 = vst.msk [vmem:[#allocation3 + $0xa] sm:$0x1] %vm1846_vm5, %v3275_v5 }
0x2556   :  { %v3284_v6 = vpop.permute.xlu1 %3283 }
0x2557   :  { %v3286_v21 = vsel %vm486_vm1, %v3275_v5, %v3284_v6  ;;  %v3503_v6 = vld [vmem:[#allocation2 + $0xc] sm:$0x1] }
0x2558   :  { %7633 = vmatmul.mubr.msk.f32.vlgmr.msra.gmra.mrb[38].mxu1 %vm960_vm3, %v3286_v21 }
0x2559   :  { %8036 = vmatpush3.bf16.msra.mxu1 %v9937_v39  ;;  %7654 = vmatprep.mubr.msk.f32.mxu1 %vm9401_vm0, %v9402_v1 }
0x255a   :  { %8037 = vmatprep.subr.bf16.mxu1 %v9400_v0 }
0x255d   :  { %8039 = vmatpush3.bf16.msra.mxu1 %v9942_v10 }
0x255e   :  { %8046 = vmatprep.subr.bf16.mxu1 %v9400_v0 }
0x262b   :  { %v3356_v22 = vpop.f32.mrb[38].mxu1 }
0x262c   :  { %v3357_v25 = vadd.f32 %v10192_v48, %v3356_v22  ;;  %v7634_v26 = vpop.f32.mrb[39].mxu1 }
0x262e   :  { %3370 = vrot.lane.b32.xlu0 %v3357_v25, %s9404_s8  ;;  %v3362_v31 = vadd.f32 %v3360_v30, %v3357_v25  ;;  %v3391_v33 = vadd.f32 %v3361_v19, %v3357_v25 }
0x2630   :  { %v6995_v34 = vmul.f32 -1.442695, %v3362_v31  ;;  %v6996_v35 = vmul.f32 -1.442695, %v3391_v33 }
0x2632   :  { %8430 = vpow2.f32 %v6995_v34 }
0x2633   :  { %8432 = vpow2.f32 %v6996_v35 }
0x263c   :  { %v8431_v36 = vpop.eup %8430 }
0x263d   :  { %v8433_v43 = vpop.eup %8432  ;;  %v3366_v44 = vadd.f32 1.0, %v8431_v36 }
0x263e   :  { %v3395_v45 = vadd.f32 1.0, %v8433_v43 }
0x263f   :  { %8434 = vrcp.f32 %v3366_v44 }
0x2640   :  { %8436 = vrcp.f32 %v3395_v45 }
0x2649   :  { %v8435_v46 = vpop.eup %8434 }
0x264a   :  { %v8437_v49 = vpop.eup %8436  ;;  %v3380_v63 = vsub.f32 1.0, %v8435_v46 }
0x264b   :  { %v3405_v12 = vsub.f32 1.0, %v8437_v49 }
0x26a0   :  { %v3371_v50 = vpop.permute.xlu0 %3370 }
0x26a1   :  { %v3373_v51 = vmul.f32 %v8435_v46, %v3371_v50  ;;  %v3398_v52 = vmul.f32 %v8437_v49, %v3371_v50 }
0x26a3   :  { %3400 = vrot.lane.b32.xlu0 %v3398_v52, %s9405_s19  ;;  %3375 = vrot.lane.b32.xlu1 %v3373_v51, %s9405_s19 }
0x26a7   :  { %3386 = vrot.lane.b32.xlu0 %v3286_v21, %s9407_s28 }
0x26ab   :  { %3411 = vrot.lane.b32.xlu0 %v3286_v21, %s9408_s12  ;;  %v3504_v21 = vld [vmem:[#allocation2 + $0x3] sm:$0x1] }
0x2715   :  { %v3376_v55 = vpop.permute.xlu1 %3375  ;;  %v3401_v56 = vpop.permute.xlu0 %3400 }
0x2716   :  { %v3378_v57 = vadd.f32 %v3376_v55, %v3360_v30  ;;  %v3403_v58 = vadd.f32 %v3401_v56, %v3361_v19 }
0x2718   :  { %8438 = vtanh.f32 %v3378_v57 }
0x2719   :  { %8440 = vtanh.f32 %v3403_v58  ;;  %v3387_v61 = vpop.permute.xlu0 %3386 }
0x271a   :  { %v3389_v7 = vmul.f32 %v8435_v46, %v3387_v61 }
0x271d   :  { %v3412_v9 = vpop.permute.xlu0 %3411 }
0x271e   :  { %v3414_v14 = vmul.f32 %v8437_v49, %v3412_v9 }
0x2722   :  { %v8439_v59 = vpop.eup %8438 }
0x2723   :  { %3382 = vrot.lane.b32.xlu1 %v8439_v59, %s9403_s4  ;;  %v8441_v60 = vpop.eup %8440 }
0x2727   :  { %3407 = vrot.lane.b32.xlu1 %v8441_v60, %s9403_s4 }
0x2795   :  { %v3383_v2 = vpop.permute.xlu1 %3382 }
0x2796   :  { %v3385_v8 = vmul.f32 %v3383_v2, %v3380_v63 }
0x2798   :  { %v3390_v11 = vadd.f32 %v3389_v7, %v3385_v8 }
0x2799   :  { %v3408_v13 = vpop.permute.xlu1 %3407 }
0x279a   :  { %v3410_v15 = vmul.f32 %v3408_v13, %v3405_v12  ;;  %3417 = vrot.lane.b32.xlu1 %v3390_v11, %s9403_s4 }
0x279c   :  { %v10247_v17 = vadd.f32 %v3414_v14, %v3410_v15 }
0x279e   :  { %3426 = vrot.lane.b32.xlu0 %v10247_v17, %s9406_s21 }
0x280c   :  { %v3418_v53 = vpop.permute.xlu1 %3417 }
0x280d   :  { %3420 = vst.msk [vmem:[#allocation3 + $0xb] sm:$0x1] %vm1846_vm5, %v3418_v53 }
0x2810   :  { %v3427_v18 = vpop.permute.xlu0 %3426 }
0x2811   :  { %v3429_v24 = vsel %vm486_vm1, %v3418_v53, %v3427_v18 }
0x2812   :  { %7644 = vmatmul.mubr.msk.f32.vlgmr.msra.gmra.mrb[48].mxu0 %vm960_vm3, %v3429_v24 }
0x2813   :  { %8042 = vmatpush3.bf16.msra.mxu0 %v9937_v39  ;;  %7665 = vmatprep.mubr.msk.f32.mxu0 %vm9401_vm0, %v9402_v1 }
0x2814   :  { %8043 = vmatprep.subr.bf16.mxu0 %v9400_v0 }
0x2817   :  { %8045 = vmatpush3.bf16.msra.mxu0 %v9942_v10 }
0x28e5   :  { %v3499_v28 = vpop.f32.mrb[48].mxu0 }
0x28e6   :  { %v3500_v41 = vadd.f32 %v10192_v48, %v3499_v28  ;;  %v7645_v5 = vpop.f32.mrb[49].mxu0  ;;  %v3647_v28 = vld [vmem:[#allocation2 + $0x2] sm:$0x1] }
0x28e8   :  { %3513 = vrot.lane.b32.xlu1 %v3500_v41, %s9404_s8  ;;  %v3505_v22 = vadd.f32 %v3503_v6, %v3500_v41  ;;  %v3534_v25 = vadd.f32 %v3504_v21, %v3500_v41 }
0x28ea   :  { %v6998_v26 = vmul.f32 -1.442695, %v3505_v22  ;;  %v6999_v30 = vmul.f32 -1.442695, %v3534_v25 }
0x28ec   :  { %8442 = vpow2.f32 %v6998_v26 }
0x28ed   :  { %8444 = vpow2.f32 %v6999_v30 }
0x28f6   :  { %v8443_v19 = vpop.eup %8442 }
0x28f7   :  { %v8445_v31 = vpop.eup %8444  ;;  %v3509_v33 = vadd.f32 1.0, %v8443_v19 }
0x28f8   :  { %v3538_v34 = vadd.f32 1.0, %v8445_v31 }
0x28f9   :  { %8446 = vrcp.f32 %v3509_v33 }
0x28fa   :  { %8448 = vrcp.f32 %v3538_v34 }
0x2903   :  { %v8447_v35 = vpop.eup %8446 }
0x2904   :  { %v8449_v36 = vpop.eup %8448  ;;  %v3523_v57 = vsub.f32 1.0, %v8447_v35 }
0x2905   :  { %v3548_v2 = vsub.f32 1.0, %v8449_v36 }
0x295a   :  { %v3514_v43 = vpop.permute.xlu1 %3513 }
0x295b   :  { %v3516_v44 = vmul.f32 %v8447_v35, %v3514_v43  ;;  %v3541_v45 = vmul.f32 %v8449_v36, %v3514_v43 }
0x295d   :  { %3543 = vrot.lane.b32.xlu1 %v3541_v45, %s9405_s19  ;;  %3518 = vrot.lane.b32.xlu0 %v3516_v44, %s9405_s19 }
0x2961   :  { %3529 = vrot.lane.b32.xlu1 %v3429_v24, %s9407_s28 }
0x2965   :  { %3554 = vrot.lane.b32.xlu1 %v3429_v24, %s9408_s12  ;;  %v3646_v24 = vld [vmem:[#allocation2 + $0xd] sm:$0x1] }
0x29cf   :  { %v3519_v46 = vpop.permute.xlu0 %3518  ;;  %v3544_v49 = vpop.permute.xlu1 %3543 }
0x29d0   :  { %v3521_v50 = vadd.f32 %v3519_v46, %v3503_v6  ;;  %v3546_v51 = vadd.f32 %v3544_v49, %v3504_v21 }
0x29d2   :  { %8450 = vtanh.f32 %v3521_v50 }
0x29d3   :  { %8452 = vtanh.f32 %v3546_v51  ;;  %v3530_v56 = vpop.permute.xlu1 %3529 }
0x29d4   :  { %v3532_v59 = vmul.f32 %v8447_v35, %v3530_v56 }
0x29d7   :  { %v3555_v61 = vpop.permute.xlu1 %3554 }
0x29d8   :  { %v3557_v8 = vmul.f32 %v8449_v36, %v3555_v61 }
0x29dc   :  { %v8451_v52 = vpop.eup %8450 }
0x29dd   :  { %3525 = vrot.lane.b32.xlu0 %v8451_v52, %s9403_s4  ;;  %v8453_v55 = vpop.eup %8452 }
0x29e1   :  { %3550 = vrot.lane.b32.xlu0 %v8453_v55, %s9403_s4 }
0x2a4f   :  { %v3526_v58 = vpop.permute.xlu0 %3525 }
0x2a50   :  { %v3528_v60 = vmul.f32 %v3526_v58, %v3523_v57 }
0x2a52   :  { %v3533_v63 = vadd.f32 %v3532_v59, %v3528_v60 }
0x2a53   :  { %v3551_v7 = vpop.permute.xlu0 %3550 }
0x2a54   :  { %v3553_v9 = vmul.f32 %v3551_v7, %v3548_v2  ;;  %3560 = vrot.lane.b32.xlu0 %v3533_v63, %s9403_s4 }
0x2a56   :  { %v10268_v11 = vadd.f32 %v3557_v8, %v3553_v9 }
0x2a58   :  { %3569 = vrot.lane.b32.xlu1 %v10268_v11, %s9406_s21 }
0x2ac6   :  { %v3561_v12 = vpop.permute.xlu0 %3560 }
0x2ac7   :  { %3563 = vst.msk [vmem:[#allocation3 + $0xc] sm:$0x1] %vm1846_vm5, %v3561_v12 }
0x2aca   :  { %v3570_v13 = vpop.permute.xlu1 %3569 }
0x2acb   :  { %v3572_v14 = vsel %vm486_vm1, %v3561_v12, %v3570_v13  ;;  %v3789_v13 = vld [vmem:[#allocation2 + $0xe] sm:$0x1] }
0x2acc   :  { %7655 = vmatmul.mubr.msk.f32.vlgmr.msra.gmra.mrb[40].mxu1 %vm960_vm3, %v3572_v14 }
0x2acd   :  { %8048 = vmatpush3.bf16.msra.mxu1 %v9937_v39  ;;  %7676 = vmatprep.mubr.msk.f32.mxu1 %vm9401_vm0, %v9402_v1 }
0x2ace   :  { %8049 = vmatprep.subr.bf16.mxu1 %v9400_v0 }
0x2ad1   :  { %8051 = vmatpush3.bf16.msra.mxu1 %v9942_v10 }
0x2ad2   :  { %8060 = vmatprep.subr.bf16.mxu1 %v9400_v0 }
0x2b9f   :  { %v3642_v15 = vpop.f32.mrb[40].mxu1 }
0x2ba0   :  { %v3643_v53 = vadd.f32 %v10192_v48, %v3642_v15  ;;  %v7656_v18 = vpop.f32.mrb[41].mxu1 }
0x2ba2   :  { %3656 = vrot.lane.b32.xlu0 %v3643_v53, %s9404_s8  ;;  %v3648_v41 = vadd.f32 %v3646_v24, %v3643_v53  ;;  %v3677_v5 = vadd.f32 %v3647_v28, %v3643_v53 }
0x2ba4   :  { %v7001_v39 = vmul.f32 -1.442695, %v3648_v41  ;;  %v7002_v6 = vmul.f32 -1.442695, %v3677_v5 }
0x2ba6   :  { %8454 = vpow2.f32 %v7001_v39 }
0x2ba7   :  { %8456 = vpow2.f32 %v7002_v6 }
0x2bb0   :  { %v8455_v21 = vpop.eup %8454 }
0x2bb1   :  { %v8457_v22 = vpop.eup %8456  ;;  %v3652_v25 = vadd.f32 1.0, %v8455_v21 }
0x2bb2   :  { %v3681_v10 = vadd.f32 1.0, %v8457_v22 }
0x2bb3   :  { %8458 = vrcp.f32 %v3652_v25 }
0x2bb4   :  { %8460 = vrcp.f32 %v3681_v10 }
0x2bbd   :  { %v8459_v26 = vpop.eup %8458 }
0x2bbe   :  { %v8461_v30 = vpop.eup %8460  ;;  %v3666_v49 = vsub.f32 1.0, %v8459_v26 }
0x2bbf   :  { %v3691_v57 = vsub.f32 1.0, %v8461_v30 }
0x2c14   :  { %v3657_v19 = vpop.permute.xlu0 %3656 }
0x2c15   :  { %v3659_v31 = vmul.f32 %v8459_v26, %v3657_v19  ;;  %v3684_v33 = vmul.f32 %v8461_v30, %v3657_v19 }
0x2c17   :  { %3686 = vrot.lane.b32.xlu0 %v3684_v33, %s9405_s19  ;;  %3661 = vrot.lane.b32.xlu1 %v3659_v31, %s9405_s19 }
0x2c1b   :  { %3672 = vrot.lane.b32.xlu0 %v3572_v14, %s9407_s28 }
0x2c1f   :  { %3697 = vrot.lane.b32.xlu0 %v3572_v14, %s9408_s12  ;;  %v3790_v14 = vld [vmem:[#allocation2 + $0x1] sm:$0x1] }
0x2c89   :  { %v3662_v34 = vpop.permute.xlu1 %3661  ;;  %v3687_v35 = vpop.permute.xlu0 %3686 }
0x2c8a   :  { %v3664_v36 = vadd.f32 %v3662_v34, %v3646_v24  ;;  %v3689_v43 = vadd.f32 %v3687_v35, %v3647_v28 }
0x2c8c   :  { %8462 = vtanh.f32 %v3664_v36 }
0x2c8d   :  { %8464 = vtanh.f32 %v3689_v43  ;;  %v3673_v46 = vpop.permute.xlu0 %3672 }
0x2c8e   :  { %v3675_v51 = vmul.f32 %v8459_v26, %v3673_v46 }
0x2c91   :  { %v3698_v55 = vpop.permute.xlu0 %3697 }
0x2c92   :  { %v3700_v59 = vmul.f32 %v8461_v30, %v3698_v55 }
0x2c96   :  { %v8463_v44 = vpop.eup %8462 }
0x2c97   :  { %3668 = vrot.lane.b32.xlu1 %v8463_v44, %s9403_s4  ;;  %v8465_v45 = vpop.eup %8464 }
0x2c9b   :  { %3693 = vrot.lane.b32.xlu1 %v8465_v45, %s9403_s4 }
0x2d09   :  { %v3669_v50 = vpop.permute.xlu1 %3668 }
0x2d0a   :  { %v3671_v52 = vmul.f32 %v3669_v50, %v3666_v49 }
0x2d0c   :  { %v3676_v56 = vadd.f32 %v3675_v51, %v3671_v52 }
0x2d0d   :  { %v3694_v58 = vpop.permute.xlu1 %3693 }
0x2d0e   :  { %v3696_v60 = vmul.f32 %v3694_v58, %v3691_v57  ;;  %3703 = vrot.lane.b32.xlu1 %v3676_v56, %s9403_s4 }
0x2d10   :  { %v10290_v61 = vadd.f32 %v3700_v59, %v3696_v60 }
0x2d12   :  { %3712 = vrot.lane.b32.xlu0 %v10290_v61, %s9406_s21 }
0x2d80   :  { %v3704_v63 = vpop.permute.xlu1 %3703 }
0x2d81   :  { %3706 = vst.msk [vmem:[#allocation3 + $0xd] sm:$0x1] %vm1846_vm5, %v3704_v63 }
0x2d84   :  { %v3713_v2 = vpop.permute.xlu0 %3712 }
0x2d85   :  { %v3715_v7 = vsel %vm486_vm1, %v3704_v63, %v3713_v2 }
0x2d86   :  { %7666 = vmatmul.mubr.msk.f32.vlgmr.msra.gmra.mrb[50].mxu0 %vm960_vm3, %v3715_v7 }
0x2e59   :  { %v3785_v8 = vpop.f32.mrb[50].mxu0 }
0x2e5a   :  { %v3786_v9 = vadd.f32 %v10192_v48, %v3785_v8  ;;  %v7667_v12 = vpop.f32.mrb[51].mxu0  ;;  %v3933_v8 = vld [vmem:[#allocation2] sm:$0x1] }
0x2e5c   :  { %3799 = vrot.lane.b32.xlu1 %v3786_v9, %s9404_s8  ;;  %v3791_v15 = vadd.f32 %v3789_v13, %v3786_v9  ;;  %v3820_v53 = vadd.f32 %v3790_v14, %v3786_v9 }
0x2e5e   :  { %v7004_v18 = vmul.f32 -1.442695, %v3791_v15  ;;  %v7005_v24 = vmul.f32 -1.442695, %v3820_v53 }
0x2e60   :  { %8466 = vpow2.f32 %v7004_v18 }
0x2e61   :  { %8468 = vpow2.f32 %v7005_v24 }
0x2e6a   :  { %v8467_v28 = vpop.eup %8466 }
0x2e6b   :  { %v8469_v41 = vpop.eup %8468  ;;  %v3795_v5 = vadd.f32 1.0, %v8467_v28 }
0x2e6c   :  { %v3824_v39 = vadd.f32 1.0, %v8469_v41 }
0x2e6d   :  { %8470 = vrcp.f32 %v3795_v5 }
0x2e6e   :  { %8472 = vrcp.f32 %v3824_v39 }
0x2e77   :  { %v8471_v6 = vpop.eup %8470 }
0x2e78   :  { %v8473_v21 = vpop.eup %8472  ;;  %v3809_v36 = vsub.f32 1.0, %v8471_v6 }
0x2e79   :  { %v3834_v50 = vsub.f32 1.0, %v8473_v21 }
0x2ece   :  { %v3800_v22 = vpop.permute.xlu1 %3799 }
0x2ecf   :  { %v3802_v25 = vmul.f32 %v8471_v6, %v3800_v22  ;;  %v3827_v10 = vmul.f32 %v8473_v21, %v3800_v22 }
0x2ed1   :  { %3829 = vrot.lane.b32.xlu1 %v3827_v10, %s9405_s19  ;;  %3804 = vrot.lane.b32.xlu0 %v3802_v25, %s9405_s19 }
0x2ed5   :  { %3815 = vrot.lane.b32.xlu1 %v3715_v7, %s9407_s28 }
0x2ed9   :  { %3840 = vrot.lane.b32.xlu1 %v3715_v7, %s9408_s12  ;;  %v3932_v7 = vld [vmem:[#allocation2 + $0xf] sm:$0x1] }
0x2f43   :  { %v3805_v26 = vpop.permute.xlu0 %3804  ;;  %v3830_v30 = vpop.permute.xlu1 %3829 }
0x2f44   :  { %v3807_v19 = vadd.f32 %v3805_v26, %v3789_v13  ;;  %v3832_v31 = vadd.f32 %v3830_v30, %v3790_v14 }
0x2f46   :  { %8474 = vtanh.f32 %v3807_v19 }
0x2f47   :  { %8476 = vtanh.f32 %v3832_v31  ;;  %v3816_v35 = vpop.permute.xlu1 %3815 }
0x2f48   :  { %v3818_v44 = vmul.f32 %v8471_v6, %v3816_v35 }
0x2f4b   :  { %v3841_v46 = vpop.permute.xlu1 %3840 }
0x2f4c   :  { %v3843_v52 = vmul.f32 %v8473_v21, %v3841_v46  ;;  %v4109_v46 = vld [vmem:[#allocation28 + $0x18] sm:$0xff] }
0x2f50   :  { %v8475_v33 = vpop.eup %8474 }
0x2f51   :  { %3811 = vrot.lane.b32.xlu0 %v8475_v33, %s9403_s4  ;;  %v8477_v34 = vpop.eup %8476 }
0x2f55   :  { %3836 = vrot.lane.b32.xlu0 %v8477_v34, %s9403_s4 }
0x2fc3   :  { %v3812_v43 = vpop.permute.xlu0 %3811 }
0x2fc4   :  { %v3814_v45 = vmul.f32 %v3812_v43, %v3809_v36  ;;  %v4106_v36 = vld [vmem:[#allocation28] sm:$0xff]  ;;  %v4107_v43 = vld [vmem:[#allocation28 + $0x8] sm:$0xff] }
0x2fc6   :  { %v3819_v49 = vadd.f32 %v3818_v44, %v3814_v45  ;;  %v4108_v44 = vld [vmem:[#allocation28 + $0x10] sm:$0xff]  ;;  %v10371_v45 = vpack.c.bf16 %v4107_v43, %v4106_v36 }
0x2fc7   :  { %v3837_v51 = vpop.permute.xlu0 %3836 }
0x2fc8   :  { %v3839_v55 = vmul.f32 %v3837_v51, %v3834_v50  ;;  %3846 = vrot.lane.b32.xlu0 %v3819_v49, %s9403_s4  ;;  %v4012_v49 = vld [vmem:[#allocation25] sm:$0xff]  ;;  %v10374_v51 = vpack.c.bf16 %v4109_v46, %v4108_v44 }
0x2fca   :  { %v10306_v56 = vadd.f32 %v3843_v52, %v3839_v55 }
0x2fcc   :  { %3855 = vrot.lane.b32.xlu1 %v10306_v56, %s9406_s21 }
0x303a   :  { %v3847_v57 = vpop.permute.xlu0 %3846 }
0x303b   :  { %3849 = vst.msk [vmem:[#allocation3 + $0xe] sm:$0x1] %vm1846_vm5, %v3847_v57 }
0x303e   :  { %v3856_v58 = vpop.permute.xlu1 %3855 }
0x303f   :  { %v3858_v59 = vsel %vm486_vm1, %v3847_v57, %v3856_v58 }
0x3040   :  { %7677 = vmatmul.mubr.msk.f32.vlgmr.msra.gmra.mrb[42].mxu1 %vm960_vm3, %v3858_v59 }
0x3041   :  { %7698 = vmatprep.mubr.msk.f32.mxu1 %vm9401_vm0, %v9402_v1  ;;  %8062 = vmatpush3.bf16.msra.mxu1 %v10371_v45 }
0x3042   :  { %8063 = vmatprep.subr.bf16.mxu1 %v9400_v0 }
0x3045   :  { %8065 = vmatpush3.bf16.msra.mxu1 %v10374_v51 }
0x3046   :  { %8072 = vmatprep.subr.bf16.mxu1 %v9400_v0 }
0x3048   :  { %7699 = vmatmul.mubr.f32.vlgmr.msra.gmra.mrb[44].mxu1 %v9402_v1 }
0x3049   :  { %8074 = vmatpush3.bf16.msra.mxu1 %v10371_v45  ;;  %7720 = vmatprep.mubr.msk.f32.mxu1 %vm9401_vm0, %v9402_v1 }
0x304a   :  { %8075 = vmatprep.subr.bf16.mxu1 %v9400_v0 }
0x304d   :  { %8077 = vmatpush3.bf16.msra.mxu1 %v10374_v51 }
0x304e   :  { %8084 = vmatprep.subr.bf16.mxu1 %v9400_v0 }
0x3113   :  { %v3928_v60 = vpop.f32.mrb[42].mxu1 }
0x3114   :  { %v3929_v63 = vadd.f32 %v10192_v48, %v3928_v60  ;;  %v7678_v2 = vpop.f32.mrb[43].mxu1 }
0x3115   :  { %v4015_v2 = vld [vmem:[#allocation25 + $0x18] sm:$0xff] }
0x3116   :  { %3942 = vrot.lane.b32.xlu0 %v3929_v63, %s9404_s8  ;;  %v3934_v9 = vadd.f32 %v3932_v7, %v3929_v63  ;;  %v3963_v12 = vadd.f32 %v3933_v8, %v3929_v63  ;;  %v4014_v63 = vld [vmem:[#allocation25 + $0x10] sm:$0xff] }
0x3118   :  { %v7007_v13 = vmul.f32 -1.442695, %v3934_v9  ;;  %v7008_v14 = vmul.f32 -1.442695, %v3963_v12 }
0x311a   :  { %8478 = vpow2.f32 %v7007_v13 }
0x311b   :  { %8480 = vpow2.f32 %v7008_v14 }
0x3124   :  { %v8479_v15 = vpop.eup %8478 }
0x3125   :  { %v8481_v53 = vpop.eup %8480  ;;  %v3938_v18 = vadd.f32 1.0, %v8479_v15  ;;  %v3998_v15 = vld [vmem:[#allocation3] sm:$0xff] }
0x3126   :  { %v3967_v24 = vadd.f32 1.0, %v8481_v53 }
0x3127   :  { %8482 = vrcp.f32 %v3938_v18 }
0x3128   :  { %8484 = vrcp.f32 %v3967_v24  ;;  %v10399_v24 = vld [vmem:[#allocation29] sm:$0x1] }
0x3131   :  { %v10317_v28 = vpop.eup %8482 }
0x3132   :  { %v8485_v48 = vpop.eup %8484  ;;  %v3952_v55 = vsub.f32 1.0, %v10317_v28 }
0x3188   :  { %v3943_v41 = vpop.permute.xlu0 %3942 }
0x3189   :  { %v3945_v5 = vmul.f32 %v10317_v28, %v3943_v41  ;;  %v3970_v39 = vmul.f32 %v8485_v48, %v3943_v41 }
0x318b   :  { %3972 = vrot.lane.b32.xlu1 %v3970_v39, %s9405_s19  ;;  %3947 = vrot.lane.b32.xlu0 %v3945_v5, %s9405_s19 }
0x318f   :  { %3983 = vrot.lane.b32.xlu0 %v3858_v59, %s9408_s12 }
0x3193   :  { %3958 = vrot.lane.b32.xlu0 %v3858_v59, %s9407_s28 }
0x3197   :  { %3136 = vrot.lane.b32.xlu0 %v10203_v27, %s9409_s1 }
0x319b   :  { %3422 = vrot.lane.b32.xlu0 %v10247_v17, %s9409_s1 }
0x319f   :  { %3708 = vrot.lane.b32.xlu0 %v10290_v61, %s9409_s1 }
0x31a3   :  { %1992 = vrot.lane.b32.xlu0 %v10025_v23, %s9409_s1 }
0x31a7   :  { %2278 = vrot.lane.b32.xlu0 %v10069_v47, %s9409_s1 }
0x31ab   :  { %2564 = vrot.lane.b32.xlu0 %v10113_v20, %s9409_s1 }
0x31fd   :  { %v3973_v6 = vpop.permute.xlu1 %3972  ;;  %v3948_v21 = vpop.permute.xlu0 %3947 }
0x31fe   :  { %v3975_v22 = vadd.f32 %v3973_v6, %v3933_v8  ;;  %v3950_v26 = vadd.f32 %v3948_v21, %v3932_v7  ;;  %v8056_v7 = vpack.c.bf16 %v4015_v2, %v4014_v63  ;;  %v7009_v21 = vld [vmem:[#allocation26] ss:$0 sm:$0xff] }
0x3200   :  { %8486 = vtanh.f32 %v3975_v22 }
0x3201   :  { %v3984_v27 = vpop.permute.xlu0 %3983  ;;  %8488 = vtanh.f32 %v3950_v26 }
0x3202   :  { %v3986_v19 = vmul.f32 %v8485_v48, %v3984_v27 }
0x3205   :  { %v10336_v25 = vpop.permute.xlu0 %3958 }
0x3206   :  { %v3961_v57 = vmul.f32 %v10317_v28, %v10336_v25  ;;  %v4177_v28 = vpop.f32.mrb[44].mxu1 }
0x3207   :  { %v4178_v5 = vadd.f32 %v4177_v28, %v10399_v24  ;;  %v7700_v39 = vpop.f32.mrb[45].mxu1 }
0x3209   :  { %v3137_v17 = vpop.permute.xlu0 %3136 }
0x320a   :  { %v8487_v10 = vpop.eup %8486  ;;  %3139 = vst.msk [vmem:[#allocation4 + $0x6] sm:$0x1] %vm1846_vm5, %v3137_v17 }
0x320b   :  { %3979 = vrot.lane.b32.xlu1 %v8487_v10, %s9403_s4 }
0x320d   :  { %v3423_v23 = vpop.permute.xlu0 %3422 }
0x320e   :  { %3425 = vst.msk [vmem:[#allocation4 + $0x4] sm:$0x1] %vm1846_vm5, %v3423_v23 }
0x320f   :  { %2993 = vrot.lane.b32.xlu1 %v10179_v38, %s9409_s1 }
0x3211   :  { %v3709_v47 = vpop.permute.xlu0 %3708 }
0x3212   :  { %3711 = vst.msk [vmem:[#allocation4 + $0x2] sm:$0x1] %vm1846_vm5, %v3709_v47 }
0x3213   :  { %3279 = vrot.lane.b32.xlu1 %v10225_v42, %s9409_s1  ;;  %v8489_v42 = vpop.eup %8488 }
0x3215   :  { %v1993_v20 = vpop.permute.xlu0 %1992 }
0x3216   :  { %1995 = vst.msk [vmem:[#allocation4 + $0xe] sm:$0x1] %vm1846_vm5, %v1993_v20 }
0x3217   :  { %3565 = vrot.lane.b32.xlu1 %v10268_v11, %s9409_s1  ;;  %v3977_v11 = vsub.f32 1.0, %v8485_v48 }
0x3219   :  { %v2279_v61 = vpop.permute.xlu0 %2278 }
0x321a   :  { %2281 = vst.msk [vmem:[#allocation4 + $0xc] sm:$0x1] %vm1846_vm5, %v2279_v61 }
0x321b   :  { %3851 = vrot.lane.b32.xlu1 %v10306_v56, %s9409_s1 }
0x321d   :  { %v2565_v38 = vpop.permute.xlu0 %2564 }
0x321e   :  { %2567 = vst.msk [vmem:[#allocation4 + $0xa] sm:$0x1] %vm1846_vm5, %v2565_v38 }
0x321f   :  { %1849 = vrot.lane.b32.xlu1 %v10003_v32, %s9409_s1 }
0x3223   :  { %2135 = vrot.lane.b32.xlu1 %v10047_v62, %s9409_s1 }
0x3227   :  { %2421 = vrot.lane.b32.xlu1 %v10091_v29, %s9409_s1 }
0x322b   :  { %3954 = vrot.lane.b32.xlu1 %v8489_v42, %s9403_s4 }
0x322f   :  { %2707 = vrot.lane.b32.xlu1 %v10135_v3, %s9409_s1 }
0x327d   :  { %v3980_v30 = vpop.permute.xlu1 %3979 }
0x327e   :  { %v3982_v31 = vmul.f32 %v3980_v30, %v3977_v11 }
0x3280   :  { %v3987_v33 = vadd.f32 %v3986_v19, %v3982_v31 }
0x3281   :  { %v2994_v34 = vpop.permute.xlu1 %2993 }
0x3282   :  { %2996 = vst.msk [vmem:[#allocation4 + $0x7] sm:$0x1] %vm1846_vm5, %v2994_v34  ;;  %3994 = vrot.lane.b32.xlu0 %v3987_v33, %s9409_s1 }
0x3285   :  { %v3280_v32 = vpop.permute.xlu1 %3279 }
0x3286   :  { %3282 = vst.msk [vmem:[#allocation4 + $0x5] sm:$0x1] %vm1846_vm5, %v3280_v32  ;;  %2850 = vrot.lane.b32.xlu0 %v10157_v54, %s9409_s1  ;;  %v4013_v54 = vld [vmem:[#allocation25 + $0x8] sm:$0xff] }
0x3287   :  { %v8052_v50 = vpack.c.bf16 %v4013_v54, %v4012_v49 }
0x3289   :  { %v3566_v62 = vpop.permute.xlu1 %3565  ;;  %8053 = vmatprep.subr.bf16.mxu0 %v8052_v50 }
0x328a   :  { %3568 = vst.msk [vmem:[#allocation4 + $0x3] sm:$0x1] %vm1846_vm5, %v3566_v62  ;;  %8055 = vmatpush3.bf16.msra.mxu0 %v8052_v50 }
0x328b   :  { %8057 = vmatprep.subr.bf16.mxu0 %v8056_v7 }
0x328d   :  { %v3852_v29 = vpop.permute.xlu1 %3851 }
0x328e   :  { %3854 = vst.msk [vmem:[#allocation4 + $0x1] sm:$0x1] %vm1846_vm5, %v3852_v29  ;;  %8059 = vmatpush3.bf16.msra.mxu0 %v8056_v7 }
0x328f   :  { %8066 = vmatprep.subr.bf16.mxu0 %v9400_v0 }
0x3291   :  { %v1850_v3 = vpop.permute.xlu1 %1849 }
0x3292   :  { %1852 = vst.msk [vmem:[#allocation4 + $0xf] sm:$0x1] %vm1846_vm5, %v1850_v3 }
0x3295   :  { %v2136_v35 = vpop.permute.xlu1 %2135 }
0x3296   :  { %2138 = vst.msk [vmem:[#allocation4 + $0xd] sm:$0x1] %vm1846_vm5, %v2136_v35 }
0x3299   :  { %v2422_v52 = vpop.permute.xlu1 %2421 }
0x329a   :  { %2424 = vst.msk [vmem:[#allocation4 + $0xb] sm:$0x1] %vm1846_vm5, %v2422_v52 }
0x329d   :  { %v3955_v56 = vpop.permute.xlu1 %3954 }
0x329e   :  { %v3957_v58 = vmul.f32 %v3955_v56, %v3952_v55 }
0x32a0   :  { %v3962_v59 = vadd.f32 %v3961_v57, %v3957_v58 }
0x32a1   :  { %v2708_v60 = vpop.permute.xlu1 %2707 }
0x32a2   :  { %2710 = vst.msk [vmem:[#allocation4 + $0x9] sm:$0x1] %vm1846_vm5, %v2708_v60  ;;  %3989 = vrot.lane.b32.xlu1 %v3962_v59, %s9403_s4 }
0x32f4   :  { %v3995_v8 = vpop.permute.xlu0 %3994 }
0x32f5   :  { %3997 = vst.msk [vmem:[#allocation4] sm:$0x1] %vm1846_vm5, %v3995_v8 }
0x32f8   :  { %v2851_v9 = vpop.permute.xlu0 %2850 }
0x32f9   :  { %2853 = vst.msk [vmem:[#allocation4 + $0x8] sm:$0x1] %vm1846_vm5, %v2851_v9 }
0x32fc   :  { %v4000_v12 = vld [vmem:[#allocation4] sm:$0xff] }
0x32fd   :  { %4004 = vrot.lane.b32.xlu0 %v4000_v12, %s9407_s28 }
0x3300   :  { %v4001_v13 = vld [vmem:[#allocation4 + $0x8] sm:$0xff] }
0x3301   :  { %4006 = vrot.lane.b32.xlu1 %v4001_v13, %s9407_s28  ;;  %4191 = vrot.lane.b32.xlu0 %v4178_v5, %s9404_s8 }
0x3314   :  { %v3990_v14 = vpop.permute.xlu1 %3989 }
0x3315   :  { %3992 = vst.msk [vmem:[#allocation3 + $0xf] sm:$0x1] %vm1846_vm5, %v3990_v14 }
0x331c   :  { %v3999_v48 = vld [vmem:[#allocation3 + $0x8] sm:$0xff] }
0x336f   :  { %v4005_v53 = vpop.permute.xlu0 %4004 }
0x3370   :  { %v4010_v18 = vsel %vm486_vm1, %v3998_v15, %v4005_v53 }
0x3371   :  { %7687 = vmatprep.mubr.msk.f32.mxu0 %vm960_vm3, %v4010_v18 }
0x3373   :  { %v4007_v41 = vpop.permute.xlu1 %4006  ;;  %v4192_v19 = vpop.permute.xlu0 %4191 }
0x3374   :  { %v4011_v6 = vsel %vm486_vm1, %v3999_v48, %v4007_v41 }
0x3375   :  { %7688 = vmatmul.mubr.msk.f32.vlgmr.msra.gmra.mrb[52].mxu0 %vm960_vm3, %v4011_v6 }
0x3376   :  { %8068 = vmatpush3.bf16.msra.mxu0 %v10371_v45  ;;  %7709 = vmatprep.mubr.msk.f32.mxu0 %vm9401_vm0, %v9402_v1 }
0x3377   :  { %8069 = vmatprep.subr.bf16.mxu0 %v9400_v0 }
0x337a   :  { %8071 = vmatpush3.bf16.msra.mxu0 %v10374_v51 }
0x337b   :  { %8078 = vmatprep.subr.bf16.mxu0 %v9400_v0 }
0x3448   :  { %v7689_v22 = vpop.f32.mrb[52].mxu0 }
0x3449   :  { %v4101_v27 = vadd.f32 %v7689_v22, %v7009_v21  ;;  %v4095_v25 = vpop.f32.mrb[53].mxu0 }
0x344a   :  { %v4096_v17 = vadd.f32 %v7009_v21, %v4095_v25 }
0x344b   :  { %4105 = vst.msk [vmem:[#allocation2 + $0x8] sm:$0xff] %vm1711_vm4, %v4101_v27 }
0x344c   :  { %4104 = vst.msk [vmem:[#allocation2] sm:$0xff] %vm1711_vm4, %v4096_v17 }
0x3452   :  { %v4182_v10 = vld [vmem:[#allocation2 + $0xf] sm:$0x1]  ;;  %v4319_v12 = vld [vmem:[#allocation2 + $0xe] sm:$0x1] }
0x3453   :  { %v4181_v23 = vld [vmem:[#allocation2] sm:$0x1]  ;;  %v4209_v47 = vadd.f32 %v4182_v10, %v4178_v5  ;;  %v4318_v9 = vld [vmem:[#allocation2 + $0x1] sm:$0x1] }
0x3454   :  { %v4183_v20 = vadd.f32 %v4181_v23, %v4178_v5 }
0x3455   :  { %v7013_v61 = vmul.f32 -1.442695, %v4209_v47 }
0x3456   :  { %v7012_v26 = vmul.f32 -1.442695, %v4183_v20 }
0x3457   :  { %8490 = vpow2.f32 %v7013_v61 }
0x3458   :  { %8492 = vpow2.f32 %v7012_v26 }
0x3461   :  { %v8491_v38 = vpop.eup %8490 }
0x3462   :  { %v8493_v42 = vpop.eup %8492  ;;  %v4213_v11 = vadd.f32 1.0, %v8491_v38 }
0x3463   :  { %v4187_v30 = vadd.f32 1.0, %v8493_v42 }
0x3464   :  { %8494 = vrcp.f32 %v4213_v11 }
0x3465   :  { %8496 = vrcp.f32 %v4187_v30 }
0x346e   :  { %v8495_v31 = vpop.eup %8494 }
0x346f   :  { %v8497_v33 = vpop.eup %8496  ;;  %v4216_v34 = vmul.f32 %v8495_v31, %v4192_v19  ;;  %v4223_v44 = vsub.f32 1.0, %v8495_v31  ;;  %v4229_v54 = vmul.f32 0.0, %v8495_v31 }
0x3470   :  { %v4194_v32 = vmul.f32 %v8497_v33, %v4192_v19  ;;  %v4201_v49 = vsub.f32 1.0, %v8497_v33  ;;  %v4207_v55 = vmul.f32 0.0, %v8497_v33 }
0x3471   :  { %4218 = vrot.lane.b32.xlu0 %v4216_v34, %s9405_s19 }
0x3472   :  { %4196 = vrot.lane.b32.xlu1 %v4194_v32, %s9405_s19 }
0x34e3   :  { %v4219_v62 = vpop.permute.xlu0 %4218 }
0x34e4   :  { %v4221_v29 = vadd.f32 %v4219_v62, %v4182_v10  ;;  %v4197_v3 = vpop.permute.xlu1 %4196 }
0x34e5   :  { %v4199_v35 = vadd.f32 %v4197_v3, %v4181_v23 }
0x34e6   :  { %8498 = vtanh.f32 %v4221_v29 }
0x34e7   :  { %8500 = vtanh.f32 %v4199_v35 }
0x34f0   :  { %v8499_v36 = vpop.eup %8498 }
0x34f1   :  { %v8501_v43 = vpop.eup %8500  ;;  %4225 = vrot.lane.b32.xlu0 %v8499_v36, %s9403_s4 }
0x34f2   :  { %4203 = vrot.lane.b32.xlu1 %v8501_v43, %s9403_s4 }
0x3563   :  { %v4226_v46 = vpop.permute.xlu0 %4225 }
0x3564   :  { %v4228_v50 = vmul.f32 %v4226_v46, %v4223_v44  ;;  %v4204_v52 = vpop.permute.xlu1 %4203  ;;  %v4461_v44 = vld [vmem:[#allocation2 + $0x2] sm:$0x1]  ;;  %v4462_v46 = vld [vmem:[#allocation2 + $0xd] sm:$0x1] }
0x3565   :  { %v4206_v56 = vmul.f32 %v4204_v52, %v4201_v49 }
0x3566   :  { %v10418_v57 = vadd.f32 %v4229_v54, %v4228_v50 }
0x3567   :  { %v4208_v58 = vadd.f32 %v4207_v55, %v4206_v56 }
0x3568   :  { %4241 = vrot.lane.b32.xlu0 %v10418_v57, %s9406_s21 }
0x3569   :  { %4232 = vrot.lane.b32.xlu1 %v4208_v58, %s9403_s4 }
0x35da   :  { %v4242_v59 = vpop.permute.xlu0 %4241 }
0x35db   :  { %v4233_v60 = vpop.permute.xlu1 %4232 }
0x35dc   :  { %4235 = vst.msk [vmem:[#allocation3] sm:$0x1] %vm1846_vm5, %v4233_v60  ;;  %v4244_v63 = vsel %vm486_vm1, %v4233_v60, %v4242_v59 }
0x35dd   :  { %7710 = vmatmul.mubr.msk.f32.vlgmr.msra.gmra.mrb[54].mxu0 %vm960_vm3, %v4244_v63 }
0x35de   :  { %8080 = vmatpush3.bf16.msra.mxu0 %v10371_v45  ;;  %7731 = vmatprep.mubr.msk.f32.mxu0 %vm9401_vm0, %v9402_v1 }
0x35df   :  { %8081 = vmatprep.subr.bf16.mxu0 %v9400_v0 }
0x35e2   :  { %8083 = vmatpush3.bf16.msra.mxu0 %v10374_v51 }
0x35e3   :  { %8090 = vmatprep.subr.bf16.mxu0 %v9400_v0 }
0x36b0   :  { %v4314_v2 = vpop.f32.mrb[54].mxu0 }
0x36b1   :  { %v4315_v7 = vadd.f32 %v4314_v2, %v10399_v24  ;;  %v7711_v8 = vpop.f32.mrb[55].mxu0 }
0x36b3   :  { %4328 = vrot.lane.b32.xlu1 %v4315_v7, %s9404_s8  ;;  %v4320_v13 = vadd.f32 %v4318_v9, %v4315_v7  ;;  %v4349_v14 = vadd.f32 %v4319_v12, %v4315_v7 }
0x36b5   :  { %v7015_v15 = vmul.f32 -1.442695, %v4320_v13  ;;  %v7016_v53 = vmul.f32 -1.442695, %v4349_v14 }
0x36b7   :  { %8502 = vpow2.f32 %v7015_v15 }
0x36b8   :  { %8504 = vpow2.f32 %v7016_v53 }
0x36c1   :  { %v8503_v18 = vpop.eup %8502 }
0x36c2   :  { %v8505_v28 = vpop.eup %8504  ;;  %v4324_v48 = vadd.f32 1.0, %v8503_v18 }
0x36c3   :  { %v4353_v41 = vadd.f32 1.0, %v8505_v28 }
0x36c4   :  { %8506 = vrcp.f32 %v4324_v48 }
0x36c5   :  { %8508 = vrcp.f32 %v4353_v41 }
0x36ce   :  { %v8507_v5 = vpop.eup %8506 }
0x36cf   :  { %v8509_v39 = vpop.eup %8508  ;;  %v4338_v61 = vsub.f32 1.0, %v8507_v5 }
0x36d0   :  { %v4363_v19 = vsub.f32 1.0, %v8509_v39 }
0x3725   :  { %v4329_v6 = vpop.permute.xlu1 %4328 }
0x3726   :  { %v4331_v21 = vmul.f32 %v8507_v5, %v4329_v6  ;;  %v4356_v22 = vmul.f32 %v8509_v39, %v4329_v6 }
0x3728   :  { %4358 = vrot.lane.b32.xlu1 %v4356_v22, %s9405_s19  ;;  %4333 = vrot.lane.b32.xlu0 %v4331_v21, %s9405_s19 }
0x372c   :  { %4344 = vrot.lane.b32.xlu1 %v4244_v63, %s9407_s28 }
0x3730   :  { %4369 = vrot.lane.b32.xlu1 %v4244_v63, %s9408_s12 }
0x379a   :  { %v4334_v27 = vpop.permute.xlu0 %4333  ;;  %v4359_v25 = vpop.permute.xlu1 %4358 }
0x379b   :  { %v4336_v17 = vadd.f32 %v4334_v27, %v4318_v9  ;;  %v4361_v10 = vadd.f32 %v4359_v25, %v4319_v12 }
0x379d   :  { %8510 = vtanh.f32 %v4336_v17 }
0x379e   :  { %8512 = vtanh.f32 %v4361_v10  ;;  %v4345_v20 = vpop.permute.xlu1 %4344 }
0x379f   :  { %v4347_v38 = vmul.f32 %v8507_v5, %v4345_v20 }
0x37a2   :  { %v4370_v11 = vpop.permute.xlu1 %4369 }
0x37a3   :  { %v4372_v33 = vmul.f32 %v8509_v39, %v4370_v11 }
0x37a7   :  { %v8511_v23 = vpop.eup %8510 }
0x37a8   :  { %4340 = vrot.lane.b32.xlu0 %v8511_v23, %s9403_s4  ;;  %v8513_v47 = vpop.eup %8512 }
0x37ac   :  { %4365 = vrot.lane.b32.xlu0 %v8513_v47, %s9403_s4 }
0x381a   :  { %v4341_v26 = vpop.permute.xlu0 %4340 }
0x381b   :  { %v4343_v42 = vmul.f32 %v4341_v26, %v4338_v61 }
0x381d   :  { %v4348_v30 = vadd.f32 %v4347_v38, %v4343_v42  ;;  %v4604_v38 = vld [vmem:[#allocation2 + $0x3] sm:$0x1]  ;;  %v4605_v42 = vld [vmem:[#allocation2 + $0xc] sm:$0x1] }
0x381e   :  { %v4366_v31 = vpop.permute.xlu0 %4365 }
0x381f   :  { %v4368_v34 = vmul.f32 %v4366_v31, %v4363_v19  ;;  %4375 = vrot.lane.b32.xlu0 %v4348_v30, %s9403_s4 }
0x3821   :  { %v10441_v32 = vadd.f32 %v4372_v33, %v4368_v34 }
0x3823   :  { %4384 = vrot.lane.b32.xlu1 %v10441_v32, %s9406_s21 }
0x3891   :  { %v4376_v62 = vpop.permute.xlu0 %4375 }
0x3892   :  { %4378 = vst.msk [vmem:[#allocation3 + $0x1] sm:$0x1] %vm1846_vm5, %v4376_v62 }
0x3895   :  { %v4385_v29 = vpop.permute.xlu1 %4384 }
0x3896   :  { %v4387_v3 = vsel %vm486_vm1, %v4376_v62, %v4385_v29 }
0x3897   :  { %7721 = vmatmul.mubr.msk.f32.vlgmr.msra.gmra.mrb[46].mxu1 %vm960_vm3, %v4387_v3 }
0x3898   :  { %8086 = vmatpush3.bf16.msra.mxu1 %v10371_v45  ;;  %7742 = vmatprep.mubr.msk.f32.mxu1 %vm9401_vm0, %v9402_v1 }
0x3899   :  { %8087 = vmatprep.subr.bf16.mxu1 %v9400_v0 }
0x389c   :  { %8089 = vmatpush3.bf16.msra.mxu1 %v10374_v51 }
0x389d   :  { %8096 = vmatprep.subr.bf16.mxu1 %v9400_v0 }
0x396a   :  { %v4457_v35 = vpop.f32.mrb[46].mxu1 }
0x396b   :  { %v4458_v36 = vadd.f32 %v4457_v35, %v10399_v24  ;;  %v7722_v43 = vpop.f32.mrb[47].mxu1 }
0x396d   :  { %4471 = vrot.lane.b32.xlu0 %v4458_v36, %s9404_s8  ;;  %v4463_v49 = vadd.f32 %v4461_v44, %v4458_v36  ;;  %v4492_v54 = vadd.f32 %v4462_v46, %v4458_v36 }
0x396f   :  { %v7018_v50 = vmul.f32 -1.442695, %v4463_v49  ;;  %v7019_v52 = vmul.f32 -1.442695, %v4492_v54 }
0x3971   :  { %8514 = vpow2.f32 %v7018_v50 }
0x3972   :  { %8516 = vpow2.f32 %v7019_v52 }
0x397b   :  { %v8515_v55 = vpop.eup %8514 }
0x397c   :  { %v8517_v56 = vpop.eup %8516  ;;  %v4467_v58 = vadd.f32 1.0, %v8515_v55 }
0x397d   :  { %v4496_v59 = vadd.f32 1.0, %v8517_v56 }
0x397e   :  { %8518 = vrcp.f32 %v4467_v58 }
0x397f   :  { %8520 = vrcp.f32 %v4496_v59 }
0x3988   :  { %v8519_v60 = vpop.eup %8518 }
0x3989   :  { %v8521_v63 = vpop.eup %8520  ;;  %v4481_v28 = vsub.f32 1.0, %v8519_v60 }
0x398a   :  { %v4506_v21 = vsub.f32 1.0, %v8521_v63 }
0x39df   :  { %v4472_v2 = vpop.permute.xlu0 %4471 }
0x39e0   :  { %v4474_v7 = vmul.f32 %v8519_v60, %v4472_v2  ;;  %v4499_v8 = vmul.f32 %v8521_v63, %v4472_v2 }
0x39e2   :  { %4501 = vrot.lane.b32.xlu0 %v4499_v8, %s9405_s19  ;;  %4476 = vrot.lane.b32.xlu1 %v4474_v7, %s9405_s19 }
0x39e6   :  { %4487 = vrot.lane.b32.xlu0 %v4387_v3, %s9407_s28 }
0x39ea   :  { %4512 = vrot.lane.b32.xlu0 %v4387_v3, %s9408_s12 }
0x3a54   :  { %v4477_v9 = vpop.permute.xlu1 %4476  ;;  %v4502_v12 = vpop.permute.xlu0 %4501 }
0x3a55   :  { %v4479_v13 = vadd.f32 %v4477_v9, %v4461_v44  ;;  %v4504_v14 = vadd.f32 %v4502_v12, %v4462_v46 }
0x3a57   :  { %8522 = vtanh.f32 %v4479_v13 }
0x3a58   :  { %8524 = vtanh.f32 %v4504_v14  ;;  %v4488_v18 = vpop.permute.xlu0 %4487 }
0x3a59   :  { %v4490_v41 = vmul.f32 %v8519_v60, %v4488_v18 }
0x3a5c   :  { %v4513_v39 = vpop.permute.xlu0 %4512 }
0x3a5d   :  { %v4515_v27 = vmul.f32 %v8521_v63, %v4513_v39  ;;  %v4748_v39 = vld [vmem:[#allocation2 + $0xb] sm:$0x1] }
0x3a61   :  { %v8523_v15 = vpop.eup %8522 }
0x3a62   :  { %4483 = vrot.lane.b32.xlu1 %v8523_v15, %s9403_s4  ;;  %v8525_v53 = vpop.eup %8524 }
0x3a66   :  { %4508 = vrot.lane.b32.xlu1 %v8525_v53, %s9403_s4 }
0x3ad4   :  { %v4484_v48 = vpop.permute.xlu1 %4483 }
0x3ad5   :  { %v4486_v5 = vmul.f32 %v4484_v48, %v4481_v28 }
0x3ad7   :  { %v4491_v6 = vadd.f32 %v4490_v41, %v4486_v5  ;;  %v4747_v5 = vld [vmem:[#allocation2 + $0x4] sm:$0x1] }
0x3ad8   :  { %v4509_v22 = vpop.permute.xlu1 %4508 }
0x3ad9   :  { %v4511_v25 = vmul.f32 %v4509_v22, %v4506_v21  ;;  %4518 = vrot.lane.b32.xlu1 %v4491_v6, %s9403_s4 }
0x3adb   :  { %v10463_v17 = vadd.f32 %v4515_v27, %v4511_v25 }
0x3add   :  { %4527 = vrot.lane.b32.xlu0 %v10463_v17, %s9406_s21 }
0x3b4b   :  { %v4519_v10 = vpop.permute.xlu1 %4518 }
0x3b4c   :  { %4521 = vst.msk [vmem:[#allocation3 + $0x2] sm:$0x1] %vm1846_vm5, %v4519_v10 }
0x3b4f   :  { %v4528_v23 = vpop.permute.xlu0 %4527 }
0x3b50   :  { %v4530_v47 = vsel %vm486_vm1, %v4519_v10, %v4528_v23 }
0x3b51   :  { %7732 = vmatmul.mubr.msk.f32.vlgmr.msra.gmra.mrb[56].mxu0 %vm960_vm3, %v4530_v47 }
0x3b52   :  { %8092 = vmatpush3.bf16.msra.mxu0 %v10371_v45  ;;  %7753 = vmatprep.mubr.msk.f32.mxu0 %vm9401_vm0, %v9402_v1 }
0x3b53   :  { %8093 = vmatprep.subr.bf16.mxu0 %v9400_v0 }
0x3b56   :  { %8095 = vmatpush3.bf16.msra.mxu0 %v10374_v51 }
0x3b57   :  { %8102 = vmatprep.subr.bf16.mxu0 %v9400_v0 }
0x3c24   :  { %v4600_v20 = vpop.f32.mrb[56].mxu0 }
0x3c25   :  { %v4601_v61 = vadd.f32 %v4600_v20, %v10399_v24  ;;  %v7733_v26 = vpop.f32.mrb[57].mxu0 }
0x3c27   :  { %4614 = vrot.lane.b32.xlu1 %v4601_v61, %s9404_s8  ;;  %v4606_v11 = vadd.f32 %v4604_v38, %v4601_v61  ;;  %v4635_v30 = vadd.f32 %v4605_v42, %v4601_v61 }
0x3c29   :  { %v7021_v19 = vmul.f32 -1.442695, %v4606_v11  ;;  %v7022_v31 = vmul.f32 -1.442695, %v4635_v30 }
0x3c2b   :  { %8526 = vpow2.f32 %v7021_v19 }
0x3c2c   :  { %8528 = vpow2.f32 %v7022_v31 }
0x3c35   :  { %v8527_v33 = vpop.eup %8526 }
0x3c36   :  { %v8529_v34 = vpop.eup %8528  ;;  %v4610_v62 = vadd.f32 1.0, %v8527_v33 }
0x3c37   :  { %v4639_v29 = vadd.f32 1.0, %v8529_v34 }
0x3c38   :  { %8530 = vrcp.f32 %v4610_v62 }
0x3c39   :  { %8532 = vrcp.f32 %v4639_v29 }
0x3c42   :  { %v8531_v3 = vpop.eup %8530 }
0x3c43   :  { %v8533_v35 = vpop.eup %8532  ;;  %v4624_v58 = vsub.f32 1.0, %v8531_v3 }
0x3c44   :  { %v4649_v8 = vsub.f32 1.0, %v8533_v35 }
0x3c99   :  { %v4615_v36 = vpop.permute.xlu1 %4614 }
0x3c9a   :  { %v4617_v43 = vmul.f32 %v8531_v3, %v4615_v36  ;;  %v4642_v44 = vmul.f32 %v8533_v35, %v4615_v36 }
0x3c9c   :  { %4644 = vrot.lane.b32.xlu1 %v4642_v44, %s9405_s19  ;;  %4619 = vrot.lane.b32.xlu0 %v4617_v43, %s9405_s19 }
0x3ca0   :  { %4630 = vrot.lane.b32.xlu1 %v4530_v47, %s9407_s28 }
0x3ca4   :  { %4655 = vrot.lane.b32.xlu1 %v4530_v47, %s9408_s12 }
0x3d0e   :  { %v4620_v46 = vpop.permute.xlu0 %4619  ;;  %v4645_v49 = vpop.permute.xlu1 %4644 }
0x3d0f   :  { %v4622_v54 = vadd.f32 %v4620_v46, %v4604_v38  ;;  %v4647_v50 = vadd.f32 %v4645_v49, %v4605_v42 }
0x3d11   :  { %8534 = vtanh.f32 %v4622_v54 }
0x3d12   :  { %8536 = vtanh.f32 %v4647_v50  ;;  %v4631_v56 = vpop.permute.xlu1 %4630 }
0x3d13   :  { %v4633_v60 = vmul.f32 %v8531_v3, %v4631_v56 }
0x3d16   :  { %v4656_v2 = vpop.permute.xlu1 %4655 }
0x3d17   :  { %v4658_v12 = vmul.f32 %v8533_v35, %v4656_v2  ;;  %v4890_v2 = vld [vmem:[#allocation2 + $0x5] sm:$0x1] }
0x3d1b   :  { %v8535_v52 = vpop.eup %8534 }
0x3d1c   :  { %4626 = vrot.lane.b32.xlu0 %v8535_v52, %s9403_s4  ;;  %v8537_v55 = vpop.eup %8536 }
0x3d20   :  { %4651 = vrot.lane.b32.xlu0 %v8537_v55, %s9403_s4 }
0x3d8e   :  { %v4627_v59 = vpop.permute.xlu0 %4626 }
0x3d8f   :  { %v4629_v63 = vmul.f32 %v4627_v59, %v4624_v58 }
0x3d91   :  { %v4634_v7 = vadd.f32 %v4633_v60, %v4629_v63 }
0x3d92   :  { %v4652_v9 = vpop.permute.xlu0 %4651 }
0x3d93   :  { %v4654_v13 = vmul.f32 %v4652_v9, %v4649_v8  ;;  %4661 = vrot.lane.b32.xlu0 %v4634_v7, %s9403_s4  ;;  %v4891_v7 = vld [vmem:[#allocation2 + $0xa] sm:$0x1] }
0x3d95   :  { %v10485_v14 = vadd.f32 %v4658_v12, %v4654_v13 }
0x3d97   :  { %4670 = vrot.lane.b32.xlu1 %v10485_v14, %s9406_s21 }
0x3e05   :  { %v4662_v15 = vpop.permute.xlu0 %4661 }
0x3e06   :  { %4664 = vst.msk [vmem:[#allocation3 + $0x3] sm:$0x1] %vm1846_vm5, %v4662_v15 }
0x3e09   :  { %v4671_v53 = vpop.permute.xlu1 %4670 }
0x3e0a   :  { %v4673_v18 = vsel %vm486_vm1, %v4662_v15, %v4671_v53 }
0x3e0b   :  { %7743 = vmatmul.mubr.msk.f32.vlgmr.msra.gmra.mrb[48].mxu1 %vm960_vm3, %v4673_v18 }
0x3e0c   :  { %8098 = vmatpush3.bf16.msra.mxu1 %v10371_v45  ;;  %7764 = vmatprep.mubr.msk.f32.mxu1 %vm9401_vm0, %v9402_v1 }
0x3e0d   :  { %8099 = vmatprep.subr.bf16.mxu1 %v9400_v0 }
0x3e10   :  { %8101 = vmatpush3.bf16.msra.mxu1 %v10374_v51 }
0x3e11   :  { %8108 = vmatprep.subr.bf16.mxu1 %v9400_v0 }
0x3ede   :  { %v4743_v28 = vpop.f32.mrb[48].mxu1 }
0x3edf   :  { %v4744_v48 = vadd.f32 %v4743_v28, %v10399_v24  ;;  %v7744_v41 = vpop.f32.mrb[49].mxu1 }
0x3ee1   :  { %4757 = vrot.lane.b32.xlu0 %v4744_v48, %s9404_s8  ;;  %v4749_v6 = vadd.f32 %v4747_v5, %v4744_v48  ;;  %v4778_v21 = vadd.f32 %v4748_v39, %v4744_v48 }
0x3ee3   :  { %v7024_v22 = vmul.f32 -1.442695, %v4749_v6  ;;  %v7025_v27 = vmul.f32 -1.442695, %v4778_v21 }
0x3ee5   :  { %8538 = vpow2.f32 %v7024_v22 }
0x3ee6   :  { %8540 = vpow2.f32 %v7025_v27 }
0x3eef   :  { %v8539_v25 = vpop.eup %8538 }
0x3ef0   :  { %v8541_v10 = vpop.eup %8540  ;;  %v4753_v23 = vadd.f32 1.0, %v8539_v25 }
0x3ef1   :  { %v4782_v47 = vadd.f32 1.0, %v8541_v10 }
0x3ef2   :  { %8542 = vrcp.f32 %v4753_v23 }
0x3ef3   :  { %8544 = vrcp.f32 %v4782_v47 }
0x3efc   :  { %v8543_v20 = vpop.eup %8542 }
0x3efd   :  { %v8545_v61 = vpop.eup %8544  ;;  %v4767_v29 = vsub.f32 1.0, %v8543_v20 }
0x3efe   :  { %v4792_v46 = vsub.f32 1.0, %v8545_v61 }
0x3f53   :  { %v4758_v26 = vpop.permute.xlu0 %4757 }
0x3f54   :  { %v4760_v38 = vmul.f32 %v8543_v20, %v4758_v26  ;;  %v4785_v42 = vmul.f32 %v8545_v61, %v4758_v26 }
0x3f56   :  { %4787 = vrot.lane.b32.xlu0 %v4785_v42, %s9405_s19  ;;  %4762 = vrot.lane.b32.xlu1 %v4760_v38, %s9405_s19 }
0x3f5a   :  { %4773 = vrot.lane.b32.xlu0 %v4673_v18, %s9407_s28 }
0x3f5e   :  { %4798 = vrot.lane.b32.xlu0 %v4673_v18, %s9408_s12 }
0x3fc8   :  { %v4763_v11 = vpop.permute.xlu1 %4762  ;;  %v4788_v30 = vpop.permute.xlu0 %4787 }
0x3fc9   :  { %v4765_v19 = vadd.f32 %v4763_v11, %v4747_v5  ;;  %v4790_v31 = vadd.f32 %v4788_v30, %v4748_v39 }
0x3fcb   :  { %8546 = vtanh.f32 %v4765_v19 }
0x3fcc   :  { %8548 = vtanh.f32 %v4790_v31  ;;  %v4774_v62 = vpop.permute.xlu0 %4773 }
0x3fcd   :  { %v4776_v35 = vmul.f32 %v8543_v20, %v4774_v62 }
0x3fd0   :  { %v4799_v43 = vpop.permute.xlu0 %4798 }
0x3fd1   :  { %v4801_v54 = vmul.f32 %v8545_v61, %v4799_v43 }
0x3fd5   :  { %v8547_v33 = vpop.eup %8546 }
0x3fd6   :  { %4769 = vrot.lane.b32.xlu1 %v8547_v33, %s9403_s4  ;;  %v8549_v34 = vpop.eup %8548 }
0x3fda   :  { %4794 = vrot.lane.b32.xlu1 %v8549_v34, %s9403_s4 }
0x4048   :  { %v4770_v3 = vpop.permute.xlu1 %4769 }
0x4049   :  { %v4772_v36 = vmul.f32 %v4770_v3, %v4767_v29 }
0x404b   :  { %v4777_v44 = vadd.f32 %v4776_v35, %v4772_v36 }
0x404c   :  { %v4795_v49 = vpop.permute.xlu1 %4794 }
0x404d   :  { %v4797_v50 = vmul.f32 %v4795_v49, %v4792_v46  ;;  %4804 = vrot.lane.b32.xlu1 %v4777_v44, %s9403_s4  ;;  %v5033_v44 = vld [vmem:[#allocation2 + $0x6] sm:$0x1]  ;;  %v5034_v46 = vld [vmem:[#allocation2 + $0x9] sm:$0x1] }
0x404f   :  { %v10507_v52 = vadd.f32 %v4801_v54, %v4797_v50 }
0x4051   :  { %4813 = vrot.lane.b32.xlu0 %v10507_v52, %s9406_s21 }
0x40bf   :  { %v4805_v55 = vpop.permute.xlu1 %4804 }
0x40c0   :  { %4807 = vst.msk [vmem:[#allocation3 + $0x4] sm:$0x1] %vm1846_vm5, %v4805_v55 }
0x40c3   :  { %v4814_v56 = vpop.permute.xlu0 %4813 }
0x40c4   :  { %v4816_v58 = vsel %vm486_vm1, %v4805_v55, %v4814_v56 }
0x40c5   :  { %7754 = vmatmul.mubr.msk.f32.vlgmr.msra.gmra.mrb[58].mxu0 %vm960_vm3, %v4816_v58 }
0x40c6   :  { %8104 = vmatpush3.bf16.msra.mxu0 %v10371_v45  ;;  %7775 = vmatprep.mubr.msk.f32.mxu0 %vm9401_vm0, %v9402_v1 }
0x40c7   :  { %8105 = vmatprep.subr.bf16.mxu0 %v9400_v0 }
0x40ca   :  { %8107 = vmatpush3.bf16.msra.mxu0 %v10374_v51 }
0x40cb   :  { %8114 = vmatprep.subr.bf16.mxu0 %v9400_v0 }
0x4198   :  { %v4886_v59 = vpop.f32.mrb[58].mxu0 }
0x4199   :  { %v4887_v60 = vadd.f32 %v4886_v59, %v10399_v24  ;;  %v7755_v63 = vpop.f32.mrb[59].mxu0 }
0x419b   :  { %4900 = vrot.lane.b32.xlu1 %v4887_v60, %s9404_s8  ;;  %v4892_v8 = vadd.f32 %v4890_v2, %v4887_v60  ;;  %v4921_v9 = vadd.f32 %v4891_v7, %v4887_v60 }
0x419d   :  { %v7027_v12 = vmul.f32 -1.442695, %v4892_v8  ;;  %v7028_v13 = vmul.f32 -1.442695, %v4921_v9 }
0x419f   :  { %8550 = vpow2.f32 %v7027_v12 }
0x41a0   :  { %8552 = vpow2.f32 %v7028_v13 }
0x41a9   :  { %v8551_v15 = vpop.eup %8550 }
0x41aa   :  { %v8553_v53 = vpop.eup %8552  ;;  %v4896_v18 = vadd.f32 1.0, %v8551_v15 }
0x41ab   :  { %v4925_v28 = vadd.f32 1.0, %v8553_v53 }
0x41ac   :  { %8554 = vrcp.f32 %v4896_v18 }
0x41ad   :  { %8556 = vrcp.f32 %v4925_v28 }
0x41b6   :  { %v8555_v48 = vpop.eup %8554 }
0x41b7   :  { %v8557_v41 = vpop.eup %8556  ;;  %v4910_v20 = vsub.f32 1.0, %v8555_v48 }
0x41b8   :  { %v4935_v30 = vsub.f32 1.0, %v8557_v41 }
0x420d   :  { %v4901_v5 = vpop.permute.xlu1 %4900 }
0x420e   :  { %v4903_v39 = vmul.f32 %v8555_v48, %v4901_v5  ;;  %v4928_v6 = vmul.f32 %v8557_v41, %v4901_v5 }
0x4210   :  { %4930 = vrot.lane.b32.xlu1 %v4928_v6, %s9405_s19  ;;  %4905 = vrot.lane.b32.xlu0 %v4903_v39, %s9405_s19 }
0x4214   :  { %4916 = vrot.lane.b32.xlu1 %v4816_v58, %s9407_s28 }
0x4218   :  { %4941 = vrot.lane.b32.xlu1 %v4816_v58, %s9408_s12 }
0x4282   :  { %v4906_v21 = vpop.permute.xlu0 %4905  ;;  %v4931_v22 = vpop.permute.xlu1 %4930 }
0x4283   :  { %v4908_v27 = vadd.f32 %v4906_v21, %v4890_v2  ;;  %v4933_v25 = vadd.f32 %v4931_v22, %v4891_v7 }
0x4285   :  { %8558 = vtanh.f32 %v4908_v27 }
0x4286   :  { %8560 = vtanh.f32 %v4933_v25  ;;  %v4917_v47 = vpop.permute.xlu1 %4916 }
0x4287   :  { %v4919_v26 = vmul.f32 %v8555_v48, %v4917_v47 }
0x428a   :  { %v4942_v42 = vpop.permute.xlu1 %4941 }
0x428b   :  { %v4944_v31 = vmul.f32 %v8557_v41, %v4942_v42 }
0x428f   :  { %v8559_v10 = vpop.eup %8558 }
0x4290   :  { %4912 = vrot.lane.b32.xlu0 %v8559_v10, %s9403_s4  ;;  %v8561_v23 = vpop.eup %8560 }
0x4294   :  { %4937 = vrot.lane.b32.xlu0 %v8561_v23, %s9403_s4 }
0x4302   :  { %v4913_v61 = vpop.permute.xlu0 %4912 }
0x4303   :  { %v4915_v38 = vmul.f32 %v4913_v61, %v4910_v20 }
0x4305   :  { %v4920_v11 = vadd.f32 %v4919_v26, %v4915_v38 }
0x4306   :  { %v4938_v19 = vpop.permute.xlu0 %4937 }
0x4307   :  { %v4940_v33 = vmul.f32 %v4938_v19, %v4935_v30  ;;  %4947 = vrot.lane.b32.xlu0 %v4920_v11, %s9403_s4  ;;  %v5176_v30 = vld [vmem:[#allocation2 + $0x7] sm:$0x1]  ;;  %v5177_v19 = vld [vmem:[#allocation2 + $0x8] sm:$0x1] }
0x4309   :  { %v10529_v34 = vadd.f32 %v4944_v31, %v4940_v33 }
0x430b   :  { %4956 = vrot.lane.b32.xlu1 %v10529_v34, %s9406_s21 }
0x4379   :  { %v4948_v62 = vpop.permute.xlu0 %4947 }
0x437a   :  { %4950 = vst.msk [vmem:[#allocation3 + $0x5] sm:$0x1] %vm1846_vm5, %v4948_v62 }
0x437d   :  { %v4957_v29 = vpop.permute.xlu1 %4956 }
0x437e   :  { %v4959_v3 = vsel %vm486_vm1, %v4948_v62, %v4957_v29 }
0x437f   :  { %7765 = vmatmul.mubr.msk.f32.vlgmr.msra.gmra.mrb[50].mxu1 %vm960_vm3, %v4959_v3 }
0x4380   :  { %8110 = vmatpush3.bf16.msra.mxu1 %v10371_v45  ;;  %7786 = vmatprep.mubr.msk.f32.mxu1 %vm9401_vm0, %v9402_v1 }
0x4381   :  { %8111 = vmatprep.subr.bf16.mxu1 %v9400_v0 }
0x4384   :  { %8113 = vmatpush3.bf16.msra.mxu1 %v10374_v51 }
0x4385   :  { %8120 = vmatprep.subr.bf16.mxu1 %v9400_v0 }
0x4452   :  { %v5029_v35 = vpop.f32.mrb[50].mxu1 }
0x4453   :  { %v5030_v36 = vadd.f32 %v5029_v35, %v10399_v24  ;;  %v7766_v43 = vpop.f32.mrb[51].mxu1 }
0x4455   :  { %5043 = vrot.lane.b32.xlu0 %v5030_v36, %s9404_s8  ;;  %v5035_v49 = vadd.f32 %v5033_v44, %v5030_v36  ;;  %v5064_v54 = vadd.f32 %v5034_v46, %v5030_v36 }
0x4457   :  { %v7030_v50 = vmul.f32 -1.442695, %v5035_v49  ;;  %v7031_v55 = vmul.f32 -1.442695, %v5064_v54 }
0x4459   :  { %8562 = vpow2.f32 %v7030_v50 }
0x445a   :  { %8564 = vpow2.f32 %v7031_v55 }
0x4463   :  { %v8563_v56 = vpop.eup %8562 }
0x4464   :  { %v8565_v58 = vpop.eup %8564  ;;  %v5039_v59 = vadd.f32 1.0, %v8563_v56 }
0x4465   :  { %v5068_v60 = vadd.f32 1.0, %v8565_v58 }
0x4466   :  { %8566 = vrcp.f32 %v5039_v59 }
0x4467   :  { %8568 = vrcp.f32 %v5068_v60 }
0x4470   :  { %v8567_v63 = vpop.eup %8566 }
0x4471   :  { %v8569_v2 = vpop.eup %8568  ;;  %v5053_v41 = vsub.f32 1.0, %v8567_v63 }
0x4472   :  { %v5078_v27 = vsub.f32 1.0, %v8569_v2 }
0x44c7   :  { %v5044_v7 = vpop.permute.xlu0 %5043 }
0x44c8   :  { %v5046_v8 = vmul.f32 %v8567_v63, %v5044_v7  ;;  %v5071_v9 = vmul.f32 %v8569_v2, %v5044_v7 }
0x44ca   :  { %5073 = vrot.lane.b32.xlu0 %v5071_v9, %s9405_s19  ;;  %5048 = vrot.lane.b32.xlu1 %v5046_v8, %s9405_s19 }
0x44ce   :  { %5059 = vrot.lane.b32.xlu0 %v4959_v3, %s9407_s28 }
0x44d2   :  { %5084 = vrot.lane.b32.xlu0 %v4959_v3, %s9408_s12 }
0x453c   :  { %v5049_v12 = vpop.permute.xlu1 %5048  ;;  %v5074_v13 = vpop.permute.xlu0 %5073 }
0x453d   :  { %v5051_v15 = vadd.f32 %v5049_v12, %v5033_v44  ;;  %v5076_v53 = vadd.f32 %v5074_v13, %v5034_v46 }
0x453f   :  { %8570 = vtanh.f32 %v5051_v15 }
0x4540   :  { %8572 = vtanh.f32 %v5076_v53  ;;  %v5060_v48 = vpop.permute.xlu0 %5059 }
0x4541   :  { %v5062_v39 = vmul.f32 %v8567_v63, %v5060_v48 }
0x4544   :  { %v5085_v21 = vpop.permute.xlu0 %5084 }
0x4545   :  { %v5087_v10 = vmul.f32 %v8569_v2, %v5085_v21 }
0x4549   :  { %v8571_v18 = vpop.eup %8570 }
0x454a   :  { %5055 = vrot.lane.b32.xlu1 %v8571_v18, %s9403_s4  ;;  %v8573_v28 = vpop.eup %8572 }
0x454e   :  { %5080 = vrot.lane.b32.xlu1 %v8573_v28, %s9403_s4 }
0x45bc   :  { %v5056_v5 = vpop.permute.xlu1 %5055 }
0x45bd   :  { %v5058_v6 = vmul.f32 %v5056_v5, %v5053_v41 }
0x45bf   :  { %v5063_v22 = vadd.f32 %v5062_v39, %v5058_v6 }
0x45c0   :  { %v5081_v25 = vpop.permute.xlu1 %5080 }
0x45c1   :  { %v5083_v23 = vmul.f32 %v5081_v25, %v5078_v27  ;;  %5090 = vrot.lane.b32.xlu1 %v5063_v22, %s9403_s4  ;;  %v5319_v25 = vld [vmem:[#allocation2 + $0x8] sm:$0x1] }
0x45c3   :  { %v10551_v47 = vadd.f32 %v5087_v10, %v5083_v23  ;;  %v5320_v10 = vld [vmem:[#allocation2 + $0x7] sm:$0x1] }
0x45c5   :  { %5099 = vrot.lane.b32.xlu0 %v10551_v47, %s9406_s21 }
0x4633   :  { %v5091_v20 = vpop.permute.xlu1 %5090 }
0x4634   :  { %5093 = vst.msk [vmem:[#allocation3 + $0x6] sm:$0x1] %vm1846_vm5, %v5091_v20 }
0x4637   :  { %v5100_v61 = vpop.permute.xlu0 %5099 }
0x4638   :  { %v5102_v26 = vsel %vm486_vm1, %v5091_v20, %v5100_v61 }
0x4639   :  { %7776 = vmatmul.mubr.msk.f32.vlgmr.msra.gmra.mrb[60].mxu0 %vm960_vm3, %v5102_v26 }
0x463a   :  { %8116 = vmatpush3.bf16.msra.mxu0 %v10371_v45  ;;  %7797 = vmatprep.mubr.msk.f32.mxu0 %vm9401_vm0, %v9402_v1 }
0x463b   :  { %8117 = vmatprep.subr.bf16.mxu0 %v9400_v0 }
0x463e   :  { %8119 = vmatpush3.bf16.msra.mxu0 %v10374_v51 }
0x463f   :  { %8126 = vmatprep.subr.bf16.mxu0 %v9400_v0 }
0x470c   :  { %v5172_v38 = vpop.f32.mrb[60].mxu0 }
0x470d   :  { %v5173_v42 = vadd.f32 %v5172_v38, %v10399_v24  ;;  %v7777_v11 = vpop.f32.mrb[61].mxu0 }
0x470f   :  { %5186 = vrot.lane.b32.xlu1 %v5173_v42, %s9404_s8  ;;  %v5178_v31 = vadd.f32 %v5176_v30, %v5173_v42  ;;  %v5207_v33 = vadd.f32 %v5177_v19, %v5173_v42 }
0x4711   :  { %v7033_v62 = vmul.f32 -1.442695, %v5178_v31  ;;  %v7034_v29 = vmul.f32 -1.442695, %v5207_v33 }
0x4713   :  { %8574 = vpow2.f32 %v7033_v62 }
0x4714   :  { %8576 = vpow2.f32 %v7034_v29 }
0x471d   :  { %v8575_v3 = vpop.eup %8574 }
0x471e   :  { %v8577_v35 = vpop.eup %8576  ;;  %v5182_v36 = vadd.f32 1.0, %v8575_v3 }
0x471f   :  { %v5211_v43 = vadd.f32 1.0, %v8577_v35 }
0x4720   :  { %8578 = vrcp.f32 %v5182_v36 }
0x4721   :  { %8580 = vrcp.f32 %v5211_v43 }
0x472a   :  { %v8579_v44 = vpop.eup %8578 }
0x472b   :  { %v8581_v46 = vpop.eup %8580  ;;  %v5196_v7 = vsub.f32 1.0, %v8579_v44 }
0x472c   :  { %v5221_v53 = vsub.f32 1.0, %v8581_v46 }
0x4781   :  { %v5187_v49 = vpop.permute.xlu1 %5186 }
0x4782   :  { %v5189_v54 = vmul.f32 %v8579_v44, %v5187_v49  ;;  %v5214_v50 = vmul.f32 %v8581_v46, %v5187_v49 }
0x4784   :  { %5216 = vrot.lane.b32.xlu1 %v5214_v50, %s9405_s19  ;;  %5191 = vrot.lane.b32.xlu0 %v5189_v54, %s9405_s19 }
0x4788   :  { %5202 = vrot.lane.b32.xlu1 %v5102_v26, %s9407_s28 }
0x478c   :  { %5227 = vrot.lane.b32.xlu1 %v5102_v26, %s9408_s12 }
0x47f6   :  { %v5192_v55 = vpop.permute.xlu0 %5191  ;;  %v5217_v56 = vpop.permute.xlu1 %5216 }
0x47f7   :  { %v5194_v58 = vadd.f32 %v5192_v55, %v5176_v30  ;;  %v5219_v59 = vadd.f32 %v5217_v56, %v5177_v19 }
0x47f9   :  { %8582 = vtanh.f32 %v5194_v58 }
0x47fa   :  { %8584 = vtanh.f32 %v5219_v59  ;;  %v5203_v2 = vpop.permute.xlu1 %5202 }
0x47fb   :  { %v5205_v9 = vmul.f32 %v8579_v44, %v5203_v2 }
0x47fe   :  { %v5228_v13 = vpop.permute.xlu1 %5227 }
0x47ff   :  { %v5230_v28 = vmul.f32 %v8581_v46, %v5228_v13 }
0x4803   :  { %v8583_v60 = vpop.eup %8582 }
0x4804   :  { %5198 = vrot.lane.b32.xlu0 %v8583_v60, %s9403_s4  ;;  %v8585_v63 = vpop.eup %8584 }
0x4808   :  { %5223 = vrot.lane.b32.xlu0 %v8585_v63, %s9403_s4 }
0x4876   :  { %v5199_v8 = vpop.permute.xlu0 %5198 }
0x4877   :  { %v5201_v12 = vmul.f32 %v5199_v8, %v5196_v7 }
0x4879   :  { %v5206_v15 = vadd.f32 %v5205_v9, %v5201_v12 }
0x487a   :  { %v5224_v18 = vpop.permute.xlu0 %5223 }
0x487b   :  { %v5226_v48 = vmul.f32 %v5224_v18, %v5221_v53  ;;  %5233 = vrot.lane.b32.xlu0 %v5206_v15, %s9403_s4  ;;  %v10608_v15 = vld [vmem:[#allocation29] sm:$0x1] }
0x487d   :  { %v10573_v41 = vadd.f32 %v5230_v28, %v5226_v48  ;;  %v5462_v28 = vld [vmem:[#allocation2 + $0x9] sm:$0x1]  ;;  %v5463_v48 = vld [vmem:[#allocation2 + $0x6] sm:$0x1] }
0x487f   :  { %5242 = vrot.lane.b32.xlu1 %v10573_v41, %s9406_s21 }
0x48ed   :  { %v5234_v5 = vpop.permute.xlu0 %5233 }
0x48ee   :  { %5236 = vst.msk [vmem:[#allocation3 + $0x7] sm:$0x1] %vm1846_vm5, %v5234_v5 }
0x48f1   :  { %v5243_v39 = vpop.permute.xlu1 %5242 }
0x48f2   :  { %v5245_v6 = vsel %vm486_vm1, %v5234_v5, %v5243_v39 }
0x48f3   :  { %7787 = vmatmul.mubr.msk.f32.vlgmr.msra.gmra.mrb[52].mxu1 %vm960_vm3, %v5245_v6 }
0x48f4   :  { %8122 = vmatpush3.bf16.msra.mxu1 %v10371_v45  ;;  %7808 = vmatprep.mubr.msk.f32.mxu1 %vm9401_vm0, %v9402_v1 }
0x48f5   :  { %8123 = vmatprep.subr.bf16.mxu1 %v9400_v0 }
0x48f8   :  { %8125 = vmatpush3.bf16.msra.mxu1 %v10374_v51 }
0x48f9   :  { %8132 = vmatprep.subr.bf16.mxu1 %v9400_v0 }
0x49c6   :  { %v5315_v21 = vpop.f32.mrb[52].mxu1 }
0x49c7   :  { %v5316_v22 = vadd.f32 %v5315_v21, %v10399_v24  ;;  %v7788_v27 = vpop.f32.mrb[53].mxu1 }
0x49c9   :  { %5329 = vrot.lane.b32.xlu0 %v5316_v22, %s9404_s8  ;;  %v5321_v23 = vadd.f32 %v5319_v25, %v5316_v22  ;;  %v5350_v20 = vadd.f32 %v5320_v10, %v5316_v22 }
0x49cb   :  { %v7036_v61 = vmul.f32 -1.442695, %v5321_v23  ;;  %v7037_v26 = vmul.f32 -1.442695, %v5350_v20 }
0x49cd   :  { %8586 = vpow2.f32 %v7036_v61 }
0x49ce   :  { %8588 = vpow2.f32 %v7037_v26 }
0x49d7   :  { %v8587_v38 = vpop.eup %8586 }
0x49d8   :  { %v8589_v42 = vpop.eup %8588  ;;  %v5325_v11 = vadd.f32 1.0, %v8587_v38 }
0x49d9   :  { %v5354_v30 = vadd.f32 1.0, %v8589_v42 }
0x49da   :  { %8590 = vrcp.f32 %v5325_v11 }
0x49db   :  { %8592 = vrcp.f32 %v5354_v30 }
0x49e4   :  { %v8591_v19 = vpop.eup %8590 }
0x49e5   :  { %v8593_v31 = vpop.eup %8592  ;;  %v5339_v49 = vsub.f32 1.0, %v8591_v19 }
0x49e6   :  { %v5364_v59 = vsub.f32 1.0, %v8593_v31 }
0x4a3b   :  { %v5330_v24 = vpop.permute.xlu0 %5329 }
0x4a3c   :  { %v5332_v33 = vmul.f32 %v8591_v19, %v5330_v24  ;;  %v5357_v62 = vmul.f32 %v8593_v31, %v5330_v24 }
0x4a3e   :  { %5359 = vrot.lane.b32.xlu0 %v5357_v62, %s9405_s19  ;;  %5334 = vrot.lane.b32.xlu1 %v5332_v33, %s9405_s19 }
0x4a42   :  { %5345 = vrot.lane.b32.xlu0 %v5245_v6, %s9407_s28 }
0x4a46   :  { %5370 = vrot.lane.b32.xlu0 %v5245_v6, %s9408_s12 }
0x4ab0   :  { %v5335_v29 = vpop.permute.xlu1 %5334  ;;  %v5360_v3 = vpop.permute.xlu0 %5359 }
0x4ab1   :  { %v5337_v35 = vadd.f32 %v5335_v29, %v5319_v25  ;;  %v5362_v36 = vadd.f32 %v5360_v3, %v5320_v10 }
0x4ab3   :  { %8594 = vtanh.f32 %v5337_v35 }
0x4ab4   :  { %8596 = vtanh.f32 %v5362_v36  ;;  %v5346_v46 = vpop.permute.xlu0 %5345 }
0x4ab5   :  { %v5348_v50 = vmul.f32 %v8591_v19, %v5346_v46 }
0x4ab8   :  { %v5371_v56 = vpop.permute.xlu0 %5370 }
0x4ab9   :  { %v5373_v63 = vmul.f32 %v8593_v31, %v5371_v56 }
0x4abd   :  { %v8595_v43 = vpop.eup %8594 }
0x4abe   :  { %5341 = vrot.lane.b32.xlu1 %v8595_v43, %s9403_s4  ;;  %v8597_v44 = vpop.eup %8596 }
0x4ac2   :  { %5366 = vrot.lane.b32.xlu1 %v8597_v44, %s9403_s4 }
0x4b30   :  { %v5342_v54 = vpop.permute.xlu1 %5341 }
0x4b31   :  { %v5344_v55 = vmul.f32 %v5342_v54, %v5339_v49 }
0x4b33   :  { %v5349_v58 = vadd.f32 %v5348_v50, %v5344_v55 }
0x4b34   :  { %v5367_v60 = vpop.permute.xlu1 %5366 }
0x4b35   :  { %v5369_v2 = vmul.f32 %v5367_v60, %v5364_v59  ;;  %5376 = vrot.lane.b32.xlu1 %v5349_v58, %s9403_s4 }
0x4b37   :  { %v10595_v7 = vadd.f32 %v5373_v63, %v5369_v2  ;;  %v5605_v2 = vld [vmem:[#allocation2 + $0xa] sm:$0x1] }
0x4b39   :  { %5385 = vrot.lane.b32.xlu0 %v10595_v7, %s9406_s21 }
0x4ba7   :  { %v5377_v8 = vpop.permute.xlu1 %5376 }
0x4ba8   :  { %5379 = vst.msk [vmem:[#allocation3 + $0x8] sm:$0x1] %vm1846_vm5, %v5377_v8 }
0x4bab   :  { %v5386_v9 = vpop.permute.xlu0 %5385 }
0x4bac   :  { %v5388_v12 = vsel %vm486_vm1, %v5377_v8, %v5386_v9  ;;  %v5606_v8 = vld [vmem:[#allocation2 + $0x5] sm:$0x1] }
0x4bad   :  { %7798 = vmatmul.mubr.msk.f32.vlgmr.msra.gmra.mrb[62].mxu0 %vm960_vm3, %v5388_v12 }
0x4bae   :  { %8128 = vmatpush3.bf16.msra.mxu0 %v10371_v45  ;;  %7819 = vmatprep.mubr.msk.f32.mxu0 %vm9401_vm0, %v9402_v1 }
0x4baf   :  { %8129 = vmatprep.subr.bf16.mxu0 %v9400_v0 }
0x4bb2   :  { %8131 = vmatpush3.bf16.msra.mxu0 %v10374_v51 }
0x4bb3   :  { %8138 = vmatprep.subr.bf16.mxu0 %v9400_v0 }
0x4c80   :  { %v5458_v13 = vpop.f32.mrb[62].mxu0 }
0x4c81   :  { %v5459_v53 = vadd.f32 %v10608_v15, %v5458_v13  ;;  %v7799_v18 = vpop.f32.mrb[63].mxu0 }
0x4c83   :  { %5472 = vrot.lane.b32.xlu1 %v5459_v53, %s9404_s8  ;;  %v5464_v5 = vadd.f32 %v5462_v28, %v5459_v53  ;;  %v5493_v39 = vadd.f32 %v5463_v48, %v5459_v53 }
0x4c85   :  { %v7039_v6 = vmul.f32 -1.442695, %v5464_v5  ;;  %v7040_v21 = vmul.f32 -1.442695, %v5493_v39 }
0x4c87   :  { %8598 = vpow2.f32 %v7039_v6 }
0x4c88   :  { %8600 = vpow2.f32 %v7040_v21 }
0x4c91   :  { %v8599_v22 = vpop.eup %8598 }
0x4c92   :  { %v8601_v27 = vpop.eup %8600  ;;  %v5468_v25 = vadd.f32 1.0, %v8599_v22 }
0x4c93   :  { %v5497_v10 = vadd.f32 1.0, %v8601_v27 }
0x4c94   :  { %8602 = vrcp.f32 %v5468_v25 }
0x4c95   :  { %8604 = vrcp.f32 %v5497_v10 }
0x4c9e   :  { %v8603_v23 = vpop.eup %8602 }
0x4c9f   :  { %v8605_v20 = vpop.eup %8604  ;;  %v5482_v62 = vsub.f32 1.0, %v8603_v23 }
0x4ca0   :  { %v5507_v44 = vsub.f32 1.0, %v8605_v20 }
0x4cf5   :  { %v5473_v61 = vpop.permute.xlu1 %5472 }
0x4cf6   :  { %v5475_v26 = vmul.f32 %v8603_v23, %v5473_v61  ;;  %v5500_v38 = vmul.f32 %v8605_v20, %v5473_v61 }
0x4cf8   :  { %5502 = vrot.lane.b32.xlu1 %v5500_v38, %s9405_s19  ;;  %5477 = vrot.lane.b32.xlu0 %v5475_v26, %s9405_s19 }
0x4cfc   :  { %5488 = vrot.lane.b32.xlu1 %v5388_v12, %s9407_s28 }
0x4d00   :  { %5513 = vrot.lane.b32.xlu1 %v5388_v12, %s9408_s12 }
0x4d6a   :  { %v5478_v42 = vpop.permute.xlu0 %5477  ;;  %v5503_v11 = vpop.permute.xlu1 %5502 }
0x4d6b   :  { %v5480_v30 = vadd.f32 %v5478_v42, %v5462_v28  ;;  %v5505_v19 = vadd.f32 %v5503_v11, %v5463_v48 }
0x4d6d   :  { %8606 = vtanh.f32 %v5480_v30 }
0x4d6e   :  { %8608 = vtanh.f32 %v5505_v19  ;;  %v5489_v33 = vpop.permute.xlu1 %5488 }
0x4d6f   :  { %v5491_v3 = vmul.f32 %v8603_v23, %v5489_v33 }
0x4d72   :  { %v5514_v36 = vpop.permute.xlu1 %5513 }
0x4d73   :  { %v5516_v49 = vmul.f32 %v8605_v20, %v5514_v36 }
0x4d77   :  { %v8607_v31 = vpop.eup %8606 }
0x4d78   :  { %5484 = vrot.lane.b32.xlu0 %v8607_v31, %s9403_s4  ;;  %v8609_v24 = vpop.eup %8608 }
0x4d7c   :  { %5509 = vrot.lane.b32.xlu0 %v8609_v24, %s9403_s4 }
0x4dea   :  { %v5485_v29 = vpop.permute.xlu0 %5484 }
0x4deb   :  { %v5487_v35 = vmul.f32 %v5485_v29, %v5482_v62 }
0x4ded   :  { %v5492_v43 = vadd.f32 %v5491_v3, %v5487_v35 }
0x4dee   :  { %v5510_v46 = vpop.permute.xlu0 %5509 }
0x4def   :  { %v5512_v54 = vmul.f32 %v5510_v46, %v5507_v44  ;;  %5519 = vrot.lane.b32.xlu0 %v5492_v43, %s9403_s4 }
0x4df1   :  { %v10619_v50 = vadd.f32 %v5516_v49, %v5512_v54 }
0x4df3   :  { %5528 = vrot.lane.b32.xlu1 %v10619_v50, %s9406_s21 }
0x4e61   :  { %v5520_v55 = vpop.permute.xlu0 %5519 }
0x4e62   :  { %5522 = vst.msk [vmem:[#allocation3 + $0x9] sm:$0x1] %vm1846_vm5, %v5520_v55 }
0x4e65   :  { %v5529_v56 = vpop.permute.xlu1 %5528 }
0x4e66   :  { %v5531_v58 = vsel %vm486_vm1, %v5520_v55, %v5529_v56  ;;  %v5748_v55 = vld [vmem:[#allocation2 + $0xb] sm:$0x1]  ;;  %v5749_v56 = vld [vmem:[#allocation2 + $0x4] sm:$0x1] }
0x4e67   :  { %7809 = vmatmul.mubr.msk.f32.vlgmr.msra.gmra.mrb[54].mxu1 %vm960_vm3, %v5531_v58 }
0x4e68   :  { %8134 = vmatpush3.bf16.msra.mxu1 %v10371_v45  ;;  %7830 = vmatprep.mubr.msk.f32.mxu1 %vm9401_vm0, %v9402_v1 }
0x4e69   :  { %8135 = vmatprep.subr.bf16.mxu1 %v9400_v0 }
0x4e6c   :  { %8137 = vmatpush3.bf16.msra.mxu1 %v10374_v51 }
0x4e6d   :  { %8144 = vmatprep.subr.bf16.mxu1 %v9400_v0 }
0x4f3a   :  { %v5601_v59 = vpop.f32.mrb[54].mxu1 }
0x4f3b   :  { %v5602_v60 = vadd.f32 %v10608_v15, %v5601_v59  ;;  %v7810_v63 = vpop.f32.mrb[55].mxu1 }
0x4f3d   :  { %5615 = vrot.lane.b32.xlu0 %v5602_v60, %s9404_s8  ;;  %v5607_v9 = vadd.f32 %v5605_v2, %v5602_v60  ;;  %v5636_v12 = vadd.f32 %v5606_v8, %v5602_v60 }
0x4f3f   :  { %v7042_v13 = vmul.f32 -1.442695, %v5607_v9  ;;  %v7043_v53 = vmul.f32 -1.442695, %v5636_v12 }
0x4f41   :  { %8610 = vpow2.f32 %v7042_v13 }
0x4f42   :  { %8612 = vpow2.f32 %v7043_v53 }
0x4f4b   :  { %v8611_v18 = vpop.eup %8610 }
0x4f4c   :  { %v8613_v28 = vpop.eup %8612  ;;  %v5611_v48 = vadd.f32 1.0, %v8611_v18 }
0x4f4d   :  { %v5640_v5 = vadd.f32 1.0, %v8613_v28 }
0x4f4e   :  { %8614 = vrcp.f32 %v5611_v48 }
0x4f4f   :  { %8616 = vrcp.f32 %v5640_v5 }
0x4f58   :  { %v8615_v39 = vpop.eup %8614 }
0x4f59   :  { %v8617_v6 = vpop.eup %8616  ;;  %v5625_v42 = vsub.f32 1.0, %v8615_v39 }
0x4f5a   :  { %v5650_v33 = vsub.f32 1.0, %v8617_v6 }
0x4faf   :  { %v5616_v21 = vpop.permute.xlu0 %5615 }
0x4fb0   :  { %v5618_v22 = vmul.f32 %v8615_v39, %v5616_v21  ;;  %v5643_v27 = vmul.f32 %v8617_v6, %v5616_v21 }
0x4fb2   :  { %5645 = vrot.lane.b32.xlu0 %v5643_v27, %s9405_s19  ;;  %5620 = vrot.lane.b32.xlu1 %v5618_v22, %s9405_s19 }
0x4fb6   :  { %5631 = vrot.lane.b32.xlu0 %v5531_v58, %s9407_s28 }
0x4fba   :  { %5656 = vrot.lane.b32.xlu0 %v5531_v58, %s9408_s12 }
0x5024   :  { %v5621_v25 = vpop.permute.xlu1 %5620  ;;  %v5646_v10 = vpop.permute.xlu0 %5645 }
0x5025   :  { %v5623_v23 = vadd.f32 %v5621_v25, %v5605_v2  ;;  %v5648_v20 = vadd.f32 %v5646_v10, %v5606_v8 }
0x5027   :  { %8618 = vtanh.f32 %v5623_v23 }
0x5028   :  { %8620 = vtanh.f32 %v5648_v20  ;;  %v5632_v38 = vpop.permute.xlu0 %5631 }
0x5029   :  { %v5634_v30 = vmul.f32 %v8615_v39, %v5632_v38 }
0x502c   :  { %v5657_v31 = vpop.permute.xlu0 %5656 }
0x502d   :  { %v5659_v29 = vmul.f32 %v8617_v6, %v5657_v31 }
0x5031   :  { %v8619_v61 = vpop.eup %8618 }
0x5032   :  { %5627 = vrot.lane.b32.xlu1 %v8619_v61, %s9403_s4  ;;  %v8621_v26 = vpop.eup %8620 }
0x5036   :  { %5652 = vrot.lane.b32.xlu1 %v8621_v26, %s9403_s4 }
0x50a4   :  { %v5628_v11 = vpop.permute.xlu1 %5627 }
0x50a5   :  { %v5630_v19 = vmul.f32 %v5628_v11, %v5625_v42 }
0x50a7   :  { %v5635_v24 = vadd.f32 %v5634_v30, %v5630_v19 }
0x50a8   :  { %v5653_v62 = vpop.permute.xlu1 %5652 }
0x50a9   :  { %v5655_v3 = vmul.f32 %v5653_v62, %v5650_v33  ;;  %5662 = vrot.lane.b32.xlu1 %v5635_v24, %s9403_s4 }
0x50ab   :  { %v10641_v35 = vadd.f32 %v5659_v29, %v5655_v3 }
0x50ad   :  { %5671 = vrot.lane.b32.xlu0 %v10641_v35, %s9406_s21 }
0x511b   :  { %v5663_v36 = vpop.permute.xlu1 %5662 }
0x511c   :  { %5665 = vst.msk [vmem:[#allocation3 + $0xa] sm:$0x1] %vm1846_vm5, %v5663_v36 }
0x511f   :  { %v5672_v43 = vpop.permute.xlu0 %5671 }
0x5120   :  { %v5674_v44 = vsel %vm486_vm1, %v5663_v36, %v5672_v43  ;;  %v5891_v43 = vld [vmem:[#allocation2 + $0xc] sm:$0x1] }
0x5121   :  { %7820 = vmatmul.mubr.msk.f32.vlgmr.msra.gmra.mrb[64].mxu0 %vm960_vm3, %v5674_v44 }
0x5122   :  { %8140 = vmatpush3.bf16.msra.mxu0 %v10371_v45  ;;  %7841 = vmatprep.mubr.msk.f32.mxu0 %vm9401_vm0, %v9402_v1 }
0x5123   :  { %8141 = vmatprep.subr.bf16.mxu0 %v9400_v0 }
0x5126   :  { %8143 = vmatpush3.bf16.msra.mxu0 %v10374_v51 }
0x5127   :  { %8150 = vmatprep.subr.bf16.mxu0 %v9400_v0 }
0x51f4   :  { %v5744_v46 = vpop.f32.mrb[64].mxu0 }
0x51f5   :  { %v5745_v49 = vadd.f32 %v10608_v15, %v5744_v46  ;;  %v7821_v54 = vpop.f32.mrb[65].mxu0 }
0x51f7   :  { %5758 = vrot.lane.b32.xlu1 %v5745_v49, %s9404_s8  ;;  %v5750_v58 = vadd.f32 %v5748_v55, %v5745_v49  ;;  %v5779_v59 = vadd.f32 %v5749_v56, %v5745_v49 }
0x51f9   :  { %v7045_v60 = vmul.f32 -1.442695, %v5750_v58  ;;  %v7046_v63 = vmul.f32 -1.442695, %v5779_v59 }
0x51fb   :  { %8622 = vpow2.f32 %v7045_v60 }
0x51fc   :  { %8624 = vpow2.f32 %v7046_v63 }
0x5205   :  { %v8623_v2 = vpop.eup %8622 }
0x5206   :  { %v8625_v8 = vpop.eup %8624  ;;  %v5754_v9 = vadd.f32 1.0, %v8623_v2 }
0x5207   :  { %v5783_v12 = vadd.f32 1.0, %v8625_v8 }
0x5208   :  { %8626 = vrcp.f32 %v5754_v9 }
0x5209   :  { %8628 = vrcp.f32 %v5783_v12 }
0x5212   :  { %v8627_v13 = vpop.eup %8626 }
0x5213   :  { %v8629_v53 = vpop.eup %8628  ;;  %v5768_v10 = vsub.f32 1.0, %v8627_v13 }
0x5214   :  { %v5793_v42 = vsub.f32 1.0, %v8629_v53 }
0x5269   :  { %v5759_v18 = vpop.permute.xlu1 %5758 }
0x526a   :  { %v5761_v28 = vmul.f32 %v8627_v13, %v5759_v18  ;;  %v5786_v48 = vmul.f32 %v8629_v53, %v5759_v18 }
0x526c   :  { %5788 = vrot.lane.b32.xlu1 %v5786_v48, %s9405_s19  ;;  %5763 = vrot.lane.b32.xlu0 %v5761_v28, %s9405_s19 }
0x5270   :  { %5774 = vrot.lane.b32.xlu1 %v5674_v44, %s9407_s28 }
0x5274   :  { %5799 = vrot.lane.b32.xlu1 %v5674_v44, %s9408_s12  ;;  %v5892_v44 = vld [vmem:[#allocation2 + $0x3] sm:$0x1] }
0x52de   :  { %v5764_v5 = vpop.permute.xlu0 %5763  ;;  %v5789_v39 = vpop.permute.xlu1 %5788 }
0x52df   :  { %v5766_v6 = vadd.f32 %v5764_v5, %v5748_v55  ;;  %v5791_v21 = vadd.f32 %v5789_v39, %v5749_v56 }
0x52e1   :  { %8630 = vtanh.f32 %v5766_v6 }
0x52e2   :  { %8632 = vtanh.f32 %v5791_v21  ;;  %v5775_v25 = vpop.permute.xlu1 %5774 }
0x52e3   :  { %v5777_v20 = vmul.f32 %v8627_v13, %v5775_v25 }
0x52e6   :  { %v5800_v26 = vpop.permute.xlu1 %5799 }
0x52e7   :  { %v5802_v30 = vmul.f32 %v8629_v53, %v5800_v26 }
0x52eb   :  { %v8631_v22 = vpop.eup %8630 }
0x52ec   :  { %5770 = vrot.lane.b32.xlu0 %v8631_v22, %s9403_s4  ;;  %v8633_v27 = vpop.eup %8632 }
0x52f0   :  { %5795 = vrot.lane.b32.xlu0 %v8633_v27, %s9403_s4 }
0x535e   :  { %v5771_v23 = vpop.permute.xlu0 %5770 }
0x535f   :  { %v5773_v61 = vmul.f32 %v5771_v23, %v5768_v10 }
0x5361   :  { %v5778_v38 = vadd.f32 %v5777_v20, %v5773_v61 }
0x5362   :  { %v5796_v11 = vpop.permute.xlu0 %5795 }
0x5363   :  { %v5798_v19 = vmul.f32 %v5796_v11, %v5793_v42  ;;  %5805 = vrot.lane.b32.xlu0 %v5778_v38, %s9403_s4 }
0x5365   :  { %v10663_v31 = vadd.f32 %v5802_v30, %v5798_v19 }
0x5367   :  { %5814 = vrot.lane.b32.xlu1 %v10663_v31, %s9406_s21 }
0x53d5   :  { %v5806_v24 = vpop.permute.xlu0 %5805 }
0x53d6   :  { %5808 = vst.msk [vmem:[#allocation3 + $0xb] sm:$0x1] %vm1846_vm5, %v5806_v24 }
0x53d9   :  { %v5815_v33 = vpop.permute.xlu1 %5814 }
0x53da   :  { %v5817_v62 = vsel %vm486_vm1, %v5806_v24, %v5815_v33 }
0x53db   :  { %7831 = vmatmul.mubr.msk.f32.vlgmr.msra.gmra.mrb[56].mxu1 %vm960_vm3, %v5817_v62 }
0x53dc   :  { %8146 = vmatpush3.bf16.msra.mxu1 %v10371_v45  ;;  %7852 = vmatprep.mubr.msk.f32.mxu1 %vm9401_vm0, %v9402_v1 }
0x53dd   :  { %8147 = vmatprep.subr.bf16.mxu1 %v9400_v0 }
0x53e0   :  { %8149 = vmatpush3.bf16.msra.mxu1 %v10374_v51 }
0x54ae   :  { %v5887_v29 = vpop.f32.mrb[56].mxu1 }
0x54af   :  { %v5888_v3 = vadd.f32 %v10608_v15, %v5887_v29  ;;  %v7832_v36 = vpop.f32.mrb[57].mxu1  ;;  %v6035_v29 = vld [vmem:[#allocation2 + $0x2] sm:$0x1] }
0x54b1   :  { %5901 = vrot.lane.b32.xlu0 %v5888_v3, %s9404_s8  ;;  %v5893_v46 = vadd.f32 %v5891_v43, %v5888_v3  ;;  %v5922_v49 = vadd.f32 %v5892_v44, %v5888_v3 }
0x54b3   :  { %v7048_v54 = vmul.f32 -1.442695, %v5893_v46  ;;  %v7049_v55 = vmul.f32 -1.442695, %v5922_v49 }
0x54b5   :  { %8634 = vpow2.f32 %v7048_v54 }
0x54b6   :  { %8636 = vpow2.f32 %v7049_v55 }
0x54bf   :  { %v8635_v56 = vpop.eup %8634 }
0x54c0   :  { %v8637_v58 = vpop.eup %8636  ;;  %v5897_v59 = vadd.f32 1.0, %v8635_v56 }
0x54c1   :  { %v5926_v60 = vadd.f32 1.0, %v8637_v58 }
0x54c2   :  { %8638 = vrcp.f32 %v5897_v59 }
0x54c3   :  { %8640 = vrcp.f32 %v5926_v60 }
0x54cc   :  { %v8639_v63 = vpop.eup %8638 }
0x54cd   :  { %v8641_v2 = vpop.eup %8640  ;;  %v5911_v6 = vsub.f32 1.0, %v8639_v63 }
0x54ce   :  { %v5936_v23 = vsub.f32 1.0, %v8641_v2 }
0x5523   :  { %v5902_v8 = vpop.permute.xlu0 %5901 }
0x5524   :  { %v5904_v9 = vmul.f32 %v8639_v63, %v5902_v8  ;;  %v5929_v12 = vmul.f32 %v8641_v2, %v5902_v8 }
0x5526   :  { %5931 = vrot.lane.b32.xlu0 %v5929_v12, %s9405_s19  ;;  %5906 = vrot.lane.b32.xlu1 %v5904_v9, %s9405_s19 }
0x552a   :  { %5917 = vrot.lane.b32.xlu0 %v5817_v62, %s9407_s28 }
0x552e   :  { %5942 = vrot.lane.b32.xlu0 %v5817_v62, %s9408_s12  ;;  %v6034_v62 = vld [vmem:[#allocation2 + $0xd] sm:$0x1] }
0x5598   :  { %v5907_v13 = vpop.permute.xlu1 %5906  ;;  %v5932_v53 = vpop.permute.xlu0 %5931 }
0x5599   :  { %v5909_v18 = vadd.f32 %v5907_v13, %v5891_v43  ;;  %v5934_v28 = vadd.f32 %v5932_v53, %v5892_v44 }
0x559b   :  { %8642 = vtanh.f32 %v5909_v18 }
0x559c   :  { %8644 = vtanh.f32 %v5934_v28  ;;  %v5918_v39 = vpop.permute.xlu0 %5917 }
0x559d   :  { %v5920_v22 = vmul.f32 %v8639_v63, %v5918_v39 }
0x55a0   :  { %v5943_v25 = vpop.permute.xlu0 %5942 }
0x55a1   :  { %v5945_v61 = vmul.f32 %v8641_v2, %v5943_v25 }
0x55a5   :  { %v8643_v48 = vpop.eup %8642 }
0x55a6   :  { %5913 = vrot.lane.b32.xlu1 %v8643_v48, %s9403_s4  ;;  %v8645_v5 = vpop.eup %8644 }
0x55aa   :  { %5938 = vrot.lane.b32.xlu1 %v8645_v5, %s9403_s4 }
0x5618   :  { %v5914_v21 = vpop.permute.xlu1 %5913 }
0x5619   :  { %v5916_v27 = vmul.f32 %v5914_v21, %v5911_v6 }
0x561b   :  { %v5921_v10 = vadd.f32 %v5920_v22, %v5916_v27 }
0x561c   :  { %v5939_v20 = vpop.permute.xlu1 %5938 }
0x561d   :  { %v5941_v26 = vmul.f32 %v5939_v20, %v5936_v23  ;;  %5948 = vrot.lane.b32.xlu1 %v5921_v10, %s9403_s4 }
0x561f   :  { %v10684_v38 = vadd.f32 %v5945_v61, %v5941_v26  ;;  %v6177_v26 = vld [vmem:[#allocation2 + $0xe] sm:$0x1] }
0x5621   :  { %5957 = vrot.lane.b32.xlu0 %v10684_v38, %s9406_s21 }
0x568f   :  { %v5949_v42 = vpop.permute.xlu1 %5948 }
0x5690   :  { %5951 = vst.msk [vmem:[#allocation3 + $0xc] sm:$0x1] %vm1846_vm5, %v5949_v42 }
0x5693   :  { %v5958_v11 = vpop.permute.xlu0 %5957 }
0x5694   :  { %v5960_v30 = vsel %vm486_vm1, %v5949_v42, %v5958_v11  ;;  %v6178_v42 = vld [vmem:[#allocation2 + $0x1] sm:$0x1] }
0x5695   :  { %7842 = vmatmul.mubr.msk.f32.vlgmr.msra.gmra.mrb[66].mxu0 %vm960_vm3, %v5960_v30 }
0x5696   :  { %8152 = vmatpush3.bf16.msra.mxu0 %v10371_v45  ;;  %7863 = vmatprep.mubr.msk.f32.mxu0 %vm9401_vm0, %v9402_v1 }
0x5697   :  { %8153 = vmatprep.subr.bf16.mxu0 %v9400_v0 }
0x569a   :  { %8155 = vmatpush3.bf16.msra.mxu0 %v10374_v51 }
0x5768   :  { %v6030_v19 = vpop.f32.mrb[66].mxu0 }
0x5769   :  { %v6031_v24 = vadd.f32 %v10608_v15, %v6030_v19  ;;  %v7843_v33 = vpop.f32.mrb[67].mxu0 }
0x576b   :  { %6044 = vrot.lane.b32.xlu1 %v6031_v24, %s9404_s8  ;;  %v6036_v3 = vadd.f32 %v6034_v62, %v6031_v24  ;;  %v6065_v36 = vadd.f32 %v6035_v29, %v6031_v24 }
0x576d   :  { %v7051_v43 = vmul.f32 -1.442695, %v6036_v3  ;;  %v7052_v44 = vmul.f32 -1.442695, %v6065_v36 }
0x576f   :  { %8646 = vpow2.f32 %v7051_v43 }
0x5770   :  { %8648 = vpow2.f32 %v7052_v44 }
0x5779   :  { %v8647_v45 = vpop.eup %8646 }
0x577a   :  { %v8649_v1 = vpop.eup %8648  ;;  %v6040_v46 = vadd.f32 1.0, %v8647_v45 }
0x577b   :  { %v6069_v0 = vadd.f32 1.0, %v8649_v1 }
0x577c   :  { %8650 = vrcp.f32 %v6040_v46 }
0x577d   :  { %8652 = vrcp.f32 %v6069_v0 }
0x5786   :  { %v8651_v51 = vpop.eup %8650 }
0x5787   :  { %v8653_v49 = vpop.eup %8652  ;;  %v6054_v12 = vsub.f32 1.0, %v8651_v51 }
0x5788   :  { %v6079_v5 = vsub.f32 1.0, %v8653_v49 }
0x57dd   :  { %v6045_v54 = vpop.permute.xlu1 %6044 }
0x57de   :  { %v6047_v55 = vmul.f32 %v8651_v51, %v6045_v54  ;;  %v6072_v56 = vmul.f32 %v8653_v49, %v6045_v54 }
0x57e0   :  { %6074 = vrot.lane.b32.xlu1 %v6072_v56, %s9405_s19  ;;  %6049 = vrot.lane.b32.xlu0 %v6047_v55, %s9405_s19 }
0x57e4   :  { %6060 = vrot.lane.b32.xlu1 %v5960_v30, %s9407_s28 }
0x57e8   :  { %6085 = vrot.lane.b32.xlu1 %v5960_v30, %s9408_s12 }
0x5852   :  { %v6050_v58 = vpop.permute.xlu0 %6049  ;;  %v6075_v59 = vpop.permute.xlu1 %6074 }
0x5853   :  { %v6052_v60 = vadd.f32 %v6050_v58, %v6034_v62  ;;  %v6077_v63 = vadd.f32 %v6075_v59, %v6035_v29 }
0x5855   :  { %8654 = vtanh.f32 %v6052_v60 }
0x5856   :  { %8656 = vtanh.f32 %v6077_v63  ;;  %v6061_v9 = vpop.permute.xlu1 %6060 }
0x5857   :  { %v6063_v53 = vmul.f32 %v8651_v51, %v6061_v9 }
0x585a   :  { %v6086_v28 = vpop.permute.xlu1 %6085 }
0x585b   :  { %v6088_v6 = vmul.f32 %v8653_v49, %v6086_v28 }
0x585f   :  { %v8655_v2 = vpop.eup %8654 }
0x5860   :  { %6056 = vrot.lane.b32.xlu0 %v8655_v2, %s9403_s4  ;;  %v8657_v8 = vpop.eup %8656 }
0x5864   :  { %6081 = vrot.lane.b32.xlu0 %v8657_v8, %s9403_s4 }
0x58d2   :  { %v6057_v13 = vpop.permute.xlu0 %6056 }
0x58d3   :  { %v6059_v18 = vmul.f32 %v6057_v13, %v6054_v12 }
0x58d5   :  { %v6064_v48 = vadd.f32 %v6063_v53, %v6059_v18 }
0x58d6   :  { %v6082_v39 = vpop.permute.xlu0 %6081 }
0x58d7   :  { %v6084_v21 = vmul.f32 %v6082_v39, %v6079_v5  ;;  %6091 = vrot.lane.b32.xlu0 %v6064_v48, %s9403_s4 }
0x58d9   :  { %v10705_v22 = vadd.f32 %v6088_v6, %v6084_v21 }
0x58db   :  { %6100 = vrot.lane.b32.xlu1 %v10705_v22, %s9406_s21 }
0x5949   :  { %v6092_v27 = vpop.permute.xlu0 %6091 }
0x594a   :  { %6094 = vst.msk [vmem:[#allocation3 + $0xd] sm:$0x1] %vm1846_vm5, %v6092_v27 }
0x594d   :  { %v6101_v25 = vpop.permute.xlu1 %6100 }
0x594e   :  { %v6103_v10 = vsel %vm486_vm1, %v6092_v27, %v6101_v25  ;;  %v6320_v27 = vld [vmem:[#allocation2 + $0xf] sm:$0x1]  ;;  %v6321_v25 = vld [vmem:[#allocation2] sm:$0x1] }
0x594f   :  { %7853 = vmatmul.mubr.msk.f32.vlgmr.msra.gmra.mrb[58].mxu1 %vm960_vm3, %v6103_v10 }
0x5a22   :  { %v6173_v23 = vpop.f32.mrb[58].mxu1 }
0x5a23   :  { %v6174_v20 = vadd.f32 %v10608_v15, %v6173_v23  ;;  %v7854_v61 = vpop.f32.mrb[59].mxu1 }
0x5a25   :  { %6187 = vrot.lane.b32.xlu0 %v6174_v20, %s9404_s8  ;;  %v6179_v11 = vadd.f32 %v6177_v26, %v6174_v20  ;;  %v6208_v30 = vadd.f32 %v6178_v42, %v6174_v20 }
0x5a27   :  { %v7054_v19 = vmul.f32 -1.442695, %v6179_v11  ;;  %v7055_v24 = vmul.f32 -1.442695, %v6208_v30 }
0x5a29   :  { %8658 = vpow2.f32 %v7054_v19 }
0x5a2a   :  { %8660 = vpow2.f32 %v7055_v24 }
0x5a33   :  { %v8659_v33 = vpop.eup %8658 }
0x5a34   :  { %v8661_v62 = vpop.eup %8660  ;;  %v6183_v29 = vadd.f32 1.0, %v8659_v33 }
0x5a35   :  { %v6212_v3 = vadd.f32 1.0, %v8661_v62 }
0x5a36   :  { %8662 = vrcp.f32 %v6183_v29 }
0x5a37   :  { %8664 = vrcp.f32 %v6212_v3 }
0x5a40   :  { %v8663_v36 = vpop.eup %8662 }
0x5a41   :  { %v8665_v43 = vpop.eup %8664  ;;  %v6197_v58 = vsub.f32 1.0, %v8663_v36 }
0x5a42   :  { %v6222_v9 = vsub.f32 1.0, %v8665_v43 }
0x5a97   :  { %v6188_v44 = vpop.permute.xlu0 %6187 }
0x5a98   :  { %v6190_v45 = vmul.f32 %v8663_v36, %v6188_v44  ;;  %v6215_v1 = vmul.f32 %v8665_v43, %v6188_v44 }
0x5a9a   :  { %6217 = vrot.lane.b32.xlu0 %v6215_v1, %s9405_s19  ;;  %6192 = vrot.lane.b32.xlu1 %v6190_v45, %s9405_s19 }
0x5a9e   :  { %6203 = vrot.lane.b32.xlu0 %v6103_v10, %s9407_s28 }
0x5aa2   :  { %6228 = vrot.lane.b32.xlu0 %v6103_v10, %s9408_s12 }
0x5b0c   :  { %v6193_v46 = vpop.permute.xlu1 %6192  ;;  %v6218_v0 = vpop.permute.xlu0 %6217 }
0x5b0d   :  { %v6195_v51 = vadd.f32 %v6193_v46, %v6177_v26  ;;  %v6220_v49 = vadd.f32 %v6218_v0, %v6178_v42 }
0x5b0f   :  { %8666 = vtanh.f32 %v6195_v51 }
0x5b10   :  { %8668 = vtanh.f32 %v6220_v49  ;;  %v6204_v56 = vpop.permute.xlu0 %6203 }
0x5b11   :  { %v6206_v60 = vmul.f32 %v8663_v36, %v6204_v56 }
0x5b14   :  { %v6229_v2 = vpop.permute.xlu0 %6228 }
0x5b15   :  { %v6231_v13 = vmul.f32 %v8665_v43, %v6229_v2 }
0x5b19   :  { %v8667_v54 = vpop.eup %8666 }
0x5b1a   :  { %6199 = vrot.lane.b32.xlu1 %v8667_v54, %s9403_s4  ;;  %v8669_v55 = vpop.eup %8668 }
0x5b1e   :  { %6224 = vrot.lane.b32.xlu1 %v8669_v55, %s9403_s4 }
0x5b8c   :  { %v6200_v59 = vpop.permute.xlu1 %6199 }
0x5b8d   :  { %v6202_v63 = vmul.f32 %v6200_v59, %v6197_v58 }
0x5b8f   :  { %v6207_v8 = vadd.f32 %v6206_v60, %v6202_v63 }
0x5b90   :  { %v6225_v12 = vpop.permute.xlu1 %6224 }
0x5b91   :  { %v6227_v53 = vmul.f32 %v6225_v12, %v6222_v9  ;;  %6234 = vrot.lane.b32.xlu1 %v6207_v8, %s9403_s4 }
0x5b93   :  { %v6232_v18 = vadd.f32 %v6231_v13, %v6227_v53  ;;  %v6386_v53 = vld [vmem:[#allocation3] sm:$0xff] }
0x5b95   :  { %6243 = vrot.lane.b32.xlu0 %v6232_v18, %s9406_s21 }
0x5c03   :  { %v6235_v28 = vpop.permute.xlu1 %6234 }
0x5c04   :  { %6237 = vst.msk [vmem:[#allocation3 + $0xe] sm:$0x1] %vm1846_vm5, %v6235_v28 }
0x5c07   :  { %v6244_v48 = vpop.permute.xlu0 %6243 }
0x5c08   :  { %v6246_v5 = vsel %vm486_vm1, %v6235_v28, %v6244_v48 }
0x5c09   :  { %7864 = vmatmul.mubr.msk.f32.vlgmr.msra.gmra.mrb[68].mxu0 %vm960_vm3, %v6246_v5 }
0x5cdc   :  { %v6316_v39 = vpop.f32.mrb[68].mxu0 }
0x5cdd   :  { %v6317_v6 = vadd.f32 %v10608_v15, %v6316_v39  ;;  %v7865_v21 = vpop.f32.mrb[69].mxu0 }
0x5cdf   :  { %6330 = vrot.lane.b32.xlu1 %v6317_v6, %s9404_s8  ;;  %v6322_v10 = vadd.f32 %v6320_v27, %v6317_v6  ;;  %v6351_v23 = vadd.f32 %v6321_v25, %v6317_v6 }
0x5ce1   :  { %v7057_v20 = vmul.f32 -1.442695, %v6322_v10  ;;  %v7058_v61 = vmul.f32 -1.442695, %v6351_v23 }
0x5ce3   :  { %8670 = vpow2.f32 %v7057_v20 }
0x5ce4   :  { %8672 = vpow2.f32 %v7058_v61 }
0x5ced   :  { %v8671_v26 = vpop.eup %8670 }
0x5cee   :  { %v8673_v42 = vpop.eup %8672  ;;  %v6326_v11 = vadd.f32 1.0, %v8671_v26 }
0x5cef   :  { %v6355_v30 = vadd.f32 1.0, %v8673_v42 }
0x5cf0   :  { %8674 = vrcp.f32 %v6326_v11 }
0x5cf1   :  { %8676 = vrcp.f32 %v6355_v30 }
0x5cfa   :  { %v10727_v19 = vpop.eup %8674 }
0x5cfb   :  { %v8677_v15 = vpop.eup %8676  ;;  %v6340_v56 = vsub.f32 1.0, %v10727_v19 }
0x5d51   :  { %v6331_v24 = vpop.permute.xlu1 %6330 }
0x5d52   :  { %v6333_v33 = vmul.f32 %v10727_v19, %v6331_v24  ;;  %v6358_v62 = vmul.f32 %v8677_v15, %v6331_v24 }
0x5d54   :  { %6360 = vrot.lane.b32.xlu0 %v6358_v62, %s9405_s19  ;;  %6335 = vrot.lane.b32.xlu1 %v6333_v33, %s9405_s19  ;;  %v6446_v33 = vld [vmem:[#allocation34 + $0x10] sm:$0xff]  ;;  %v6447_v62 = vld [vmem:[#allocation34 + $0x18] sm:$0xff] }
0x5d58   :  { %6371 = vrot.lane.b32.xlu1 %v6246_v5, %s9408_s12 }
0x5d5c   :  { %6346 = vrot.lane.b32.xlu1 %v6246_v5, %s9407_s28 }
0x5d60   :  { %5524 = vrot.lane.b32.xlu1 %v10619_v50, %s9409_s1 }
0x5d64   :  { %5810 = vrot.lane.b32.xlu1 %v10663_v31, %s9409_s1 }
0x5d68   :  { %6096 = vrot.lane.b32.xlu1 %v10705_v22, %s9409_s1 }
0x5d6c   :  { %4380 = vrot.lane.b32.xlu1 %v10441_v32, %s9409_s1 }
0x5d70   :  { %4666 = vrot.lane.b32.xlu1 %v10485_v14, %s9409_s1 }
0x5d74   :  { %4952 = vrot.lane.b32.xlu1 %v10529_v34, %s9409_s1 }
0x5dc6   :  { %v6361_v29 = vpop.permute.xlu0 %6360  ;;  %v6336_v3 = vpop.permute.xlu1 %6335 }
0x5dc7   :  { %v6363_v36 = vadd.f32 %v6361_v29, %v6321_v25  ;;  %v6338_v45 = vadd.f32 %v6336_v3, %v6320_v27  ;;  %v8160_v29 = vpack.c.bf16 %v6447_v62, %v6446_v33 }
0x5dc9   :  { %8678 = vtanh.f32 %v6363_v36 }
0x5dca   :  { %v6372_v50 = vpop.permute.xlu1 %6371  ;;  %8680 = vtanh.f32 %v6338_v45 }
0x5dcb   :  { %v6374_v46 = vmul.f32 %v8677_v15, %v6372_v50 }
0x5dce   :  { %v6347_v43 = vpop.permute.xlu1 %6346 }
0x5dd2   :  { %v5525_v44 = vpop.permute.xlu1 %5524 }
0x5dd3   :  { %v8679_v31 = vpop.eup %8678  ;;  %5527 = vst.msk [vmem:[#allocation4 + $0x6] sm:$0x1] %vm1846_vm5, %v5525_v44 }
0x5dd4   :  { %6367 = vrot.lane.b32.xlu0 %v8679_v31, %s9403_s4 }
0x5dd6   :  { %v5811_v22 = vpop.permute.xlu1 %5810 }
0x5dd7   :  { %5813 = vst.msk [vmem:[#allocation4 + $0x4] sm:$0x1] %vm1846_vm5, %v5811_v22 }
0x5dd8   :  { %5381 = vrot.lane.b32.xlu0 %v10595_v7, %s9409_s1  ;;  %v8681_v7 = vpop.eup %8680 }
0x5dda   :  { %v6097_v32 = vpop.permute.xlu1 %6096 }
0x5ddb   :  { %6099 = vst.msk [vmem:[#allocation4 + $0x2] sm:$0x1] %vm1846_vm5, %v6097_v32  ;;  %v7059_v32 = vld [vmem:[#allocation31] ss:$0 sm:$0xff] }
0x5ddc   :  { %5667 = vrot.lane.b32.xlu0 %v10641_v35, %s9409_s1  ;;  %v6365_v35 = vsub.f32 1.0, %v8677_v15  ;;  %v6445_v15 = vld [vmem:[#allocation34 + $0x8] sm:$0xff] }
0x5dde   :  { %v4381_v14 = vpop.permute.xlu1 %4380 }
0x5ddf   :  { %4383 = vst.msk [vmem:[#allocation4 + $0xe] sm:$0x1] %vm1846_vm5, %v4381_v14 }
0x5de0   :  { %5953 = vrot.lane.b32.xlu0 %v10684_v38, %s9409_s1 }
0x5de2   :  { %v4667_v34 = vpop.permute.xlu1 %4666 }
0x5de3   :  { %4669 = vst.msk [vmem:[#allocation4 + $0xc] sm:$0x1] %vm1846_vm5, %v4667_v34  ;;  %v7060_v34 = vld [vmem:[#allocation32] ss:$0 sm:$0xff] }
0x5de4   :  { %6239 = vrot.lane.b32.xlu0 %v6232_v18, %s9409_s1 }
0x5de6   :  { %v4953_v1 = vpop.permute.xlu1 %4952 }
0x5de7   :  { %4955 = vst.msk [vmem:[#allocation4 + $0xa] sm:$0x1] %vm1846_vm5, %v4953_v1 }
0x5de8   :  { %4237 = vrot.lane.b32.xlu0 %v10418_v57, %s9409_s1 }
0x5dec   :  { %4523 = vrot.lane.b32.xlu0 %v10463_v17, %s9409_s1 }
0x5df0   :  { %4809 = vrot.lane.b32.xlu0 %v10507_v52, %s9409_s1 }
0x5df4   :  { %6342 = vrot.lane.b32.xlu0 %v8681_v7, %s9403_s4 }
0x5df8   :  { %5095 = vrot.lane.b32.xlu0 %v10551_v47, %s9409_s1 }
0x5e46   :  { %v6368_v38 = vpop.permute.xlu0 %6367 }
0x5e47   :  { %v6370_v0 = vmul.f32 %v6368_v38, %v6365_v35 }
0x5e49   :  { %v6375_v51 = vadd.f32 %v6374_v46, %v6370_v0  ;;  %v7061_v0 = vld [vmem:[#allocation35] ss:$0 sm:$0xff] }
0x5e4a   :  { %v5382_v49 = vpop.permute.xlu0 %5381 }
0x5e4b   :  { %5384 = vst.msk [vmem:[#allocation4 + $0x7] sm:$0x1] %vm1846_vm5, %v5382_v49  ;;  %6382 = vrot.lane.b32.xlu1 %v6375_v51, %s9409_s1 }
0x5e4e   :  { %v5668_v57 = vpop.permute.xlu0 %5667 }
0x5e4f   :  { %5670 = vst.msk [vmem:[#allocation4 + $0x5] sm:$0x1] %vm1846_vm5, %v5668_v57  ;;  %5238 = vrot.lane.b32.xlu1 %v10573_v41, %s9409_s1  ;;  %v6349_v41 = vmul.f32 %v10727_v19, %v6347_v43  ;;  %v6444_v19 = vld [vmem:[#allocation34] sm:$0xff] }
0x5e50   :  { %v8156_v24 = vpack.c.bf16 %v6445_v15, %v6444_v19 }
0x5e52   :  { %v5954_v17 = vpop.permute.xlu0 %5953  ;;  %8157 = vmatprep.subr.bf16.mxu1 %v8156_v24 }
0x5e53   :  { %5956 = vst.msk [vmem:[#allocation4 + $0x3] sm:$0x1] %vm1846_vm5, %v5954_v17  ;;  %8159 = vmatpush3.bf16.msra.mxu1 %v8156_v24 }
0x5e54   :  { %8161 = vmatprep.subr.bf16.mxu1 %v8160_v29 }
0x5e56   :  { %v6240_v52 = vpop.permute.xlu0 %6239 }
0x5e57   :  { %6242 = vst.msk [vmem:[#allocation4 + $0x1] sm:$0x1] %vm1846_vm5, %v6240_v52  ;;  %8163 = vmatpush3.bf16.msra.mxu1 %v8160_v29 }
0x5e5a   :  { %v4238_v47 = vpop.permute.xlu0 %4237 }
0x5e5b   :  { %4240 = vst.msk [vmem:[#allocation4 + $0xf] sm:$0x1] %vm1846_vm5, %v4238_v47 }
0x5e5e   :  { %v4524_v54 = vpop.permute.xlu0 %4523 }
0x5e5f   :  { %4526 = vst.msk [vmem:[#allocation4 + $0xd] sm:$0x1] %vm1846_vm5, %v4524_v54 }
0x5e62   :  { %v4810_v55 = vpop.permute.xlu0 %4809 }
0x5e63   :  { %4812 = vst.msk [vmem:[#allocation4 + $0xb] sm:$0x1] %vm1846_vm5, %v4810_v55 }
0x5e66   :  { %v6343_v58 = vpop.permute.xlu0 %6342 }
0x5e67   :  { %v6345_v59 = vmul.f32 %v6343_v58, %v6340_v56 }
0x5e69   :  { %v6350_v60 = vadd.f32 %v6349_v41, %v6345_v59 }
0x5e6a   :  { %v5096_v63 = vpop.permute.xlu0 %5095 }
0x5e6b   :  { %5098 = vst.msk [vmem:[#allocation4 + $0x9] sm:$0x1] %vm1846_vm5, %v5096_v63  ;;  %6377 = vrot.lane.b32.xlu0 %v6350_v60, %s9403_s4 }
0x5ebd   :  { %v6383_v2 = vpop.permute.xlu1 %6382 }
0x5ebe   :  { %6385 = vst.msk [vmem:[#allocation4] sm:$0x1] %vm1846_vm5, %v6383_v2 }
0x5ec1   :  { %v5239_v8 = vpop.permute.xlu1 %5238 }
0x5ec2   :  { %5241 = vst.msk [vmem:[#allocation4 + $0x8] sm:$0x1] %vm1846_vm5, %v5239_v8 }
0x5ec5   :  { %v6388_v9 = vld [vmem:[#allocation4] sm:$0xff] }
0x5ec6   :  { %6392 = vrot.lane.b32.xlu1 %v6388_v9, %s9407_s28 }
0x5ec9   :  { %v6389_v12 = vld [vmem:[#allocation4 + $0x8] sm:$0xff] }
0x5eca   :  { %6394 = vrot.lane.b32.xlu0 %v6389_v12, %s9407_s28 }
0x5edd   :  { %v6378_v13 = vpop.permute.xlu0 %6377 }
0x5ede   :  { %6380 = vst.msk [vmem:[#allocation3 + $0xf] sm:$0x1] %vm1846_vm5, %v6378_v13  ;;  %v6949_v13 = vld [vmem:[#allocation17] ss:$0 sm:$0xff] }
0x5ee5   :  { %v6387_v39 = vld [vmem:[#allocation3 + $0x8] sm:$0xff] }
0x5f38   :  { %v6393_v18 = vpop.permute.xlu1 %6392 }
0x5f39   :  { %v6398_v28 = vsel %vm486_vm1, %v6386_v53, %v6393_v18  ;;  %v1424_v53 = vadd.f32 %v6949_v13, %v9978_v40  ;;  %v6678_v18 = vld [vmem:[#allocation44] sm:$0xff]  ;;  %v6584_v40 = vld [vmem:[#allocation40 + $0x10] sm:$0xff] }
0x5f3a   :  { %v6400_v48 = vsel %vm960_vm3, %v6398_v28, 0.0 }
0x5f3b   :  { %6401 = vadd.xlane.f32.xlu1 %v6400_v48 }
0x5f3c   :  { %v6395_v5 = vpop.permute.xlu0 %6394 }
0x5f3d   :  { %v6399_v6 = vsel %vm486_vm1, %v6387_v39, %v6395_v5  ;;  %v6680_v5 = vld [vmem:[#allocation44 + $0x10] sm:$0xff]  ;;  %v6681_v39 = vld [vmem:[#allocation44 + $0x18] sm:$0xff] }
0x5f3e   :  { %v6403_v21 = vsel %vm960_vm3, %v6399_v6, 0.0 }
0x5f3f   :  { %6404 = vadd.xlane.f32.xlu0 %v6403_v21  ;;  %v8176_v21 = vpack.c.bf16 %v6681_v39, %v6680_v5 }
0x5fc8   :  { %v6402_v27 = vpop.xlane.xlu1 %6401 }
0x5fc9   :  { %v6406_v25 = vmul.f32 0.03125, %v6402_v27  ;;  %v6582_v27 = vld [vmem:[#allocation40] sm:$0xff] }
0x5fcb   :  { %v6408_v10 = vsub.f32 %v6398_v28, %v6406_v25  ;;  %v6679_v28 = vld [vmem:[#allocation44 + $0x8] sm:$0xff] }
0x5fcc   :  { %v6405_v23 = vpop.xlane.xlu0 %6404  ;;  %v8172_v48 = vpack.c.bf16 %v6679_v28, %v6678_v18  ;;  %v6583_v25 = vld [vmem:[#allocation40 + $0x8] sm:$0xff] }
0x5fcd   :  { %v6407_v20 = vmul.f32 0.03125, %v6405_v23  ;;  %v6410_v61 = vmul.f32 %v6408_v10, %v6408_v10  ;;  %v6585_v23 = vld [vmem:[#allocation40 + $0x18] sm:$0xff] }
0x5fce   :  { %8173 = vmatprep.subr.bf16.mxu1 %v8172_v48 }
0x5fcf   :  { %v6409_v26 = vsub.f32 %v6399_v6, %v6407_v20  ;;  %v6412_v42 = vsel %vm960_vm3, %v6410_v61, 0.0  ;;  %v1419_v6 = vadd.f32 %v6949_v13, %v9971_v37  ;;  %v8168_v20 = vpack.c.bf16 %v6585_v23, %v6584_v40  ;;  %v6674_v61 = vld [vmem:[#allocation43] sm:$0xff] }
0x5fd0   :  { %6413 = vadd.xlane.f32.xlu0 %v6412_v42 }
0x5fd1   :  { %v6411_v11 = vmul.f32 %v6409_v26, %v6409_v26 }
0x5fd3   :  { %v6415_v30 = vsel %vm960_vm3, %v6411_v11, 0.0 }
0x5fd4   :  { %6416 = vadd.xlane.f32.xlu1 %v6415_v30 }
0x605d   :  { %v6414_v3 = vpop.xlane.xlu0 %6413 }
0x605e   :  { %v6418_v36 = vmul.f32 0.03125, %v6414_v3 }
0x6060   :  { %v6420_v50 = vadd.f32 1e-05, %v6418_v36 }
0x6061   :  { %v6417_v43 = vpop.xlane.xlu1 %6416 }
0x6062   :  { %8682 = vrsqrt.f32 %v6420_v50  ;;  %v6419_v44 = vmul.f32 0.03125, %v6417_v43 }
0x6064   :  { %v6421_v31 = vadd.f32 1e-05, %v6419_v44 }
0x6066   :  { %8684 = vrsqrt.f32 %v6421_v31 }
0x606c   :  { %v8683_v22 = vpop.eup %8682 }
0x606d   :  { %v6424_v14 = vmul.f32 %v8683_v22, %v6408_v10  ;;  %v8164_v10 = vpack.c.bf16 %v6583_v25, %v6582_v27  ;;  %v7064_v22 = vld [vmem:[#allocation37] ss:$0 sm:$0xff] }
0x606f   :  { %v6433_v45 = vmul.f32 %v7059_v32, %v6424_v14  ;;  %8165 = vmatprep.subr.bf16.mxu0 %v8164_v10 }
0x6070   :  { %v8685_v1 = vpop.eup %8684  ;;  %8167 = vmatpush3.bf16.msra.mxu0 %v8164_v10 }
0x6071   :  { %v6425_v7 = vmul.f32 %v8685_v1, %v6409_v26  ;;  %v6442_v35 = vadd.f32 %v7060_v34, %v6433_v45  ;;  %8169 = vmatprep.subr.bf16.mxu0 %v8168_v20  ;;  %v6675_v26 = vld [vmem:[#allocation43 + $0x8] sm:$0xff]  ;;  %v7065_v1 = vld [vmem:[#allocation38] ss:$0 sm:$0xff] }
0x6072   :  { %v8180_v42 = vpack.c.bf16 %v6675_v26, %v6674_v61 }
0x6073   :  { %v6434_v38 = vmul.f32 %v7059_v32, %v6425_v7  ;;  %7874 = vmatprep.mubr.msk.f32.mxu1 %vm960_vm3, %v6442_v35 }
0x6074   :  { %8171 = vmatpush3.bf16.msra.mxu0 %v8168_v20 }
0x6075   :  { %v6443_v46 = vadd.f32 %v7060_v34, %v6434_v38 }
0x6077   :  { %7875 = vmatmul.mubr.msk.f32.vlgmr.msra.gmra.mrb[60].mxu1 %vm960_vm3, %v6443_v46 }
0x6078   :  { %8175 = vmatpush3.bf16.msra.mxu1 %v8172_v48 }
0x6079   :  { %8177 = vmatprep.subr.bf16.mxu1 %v8176_v21 }
0x607c   :  { %8179 = vmatpush3.bf16.msra.mxu1 %v8176_v21 }
0x607d   :  { %8181 = vmatprep.subr.bf16.mxu1 %v8180_v42 }
0x614a   :  { %v7876_v51 = vpop.f32.mrb[60].mxu1 }
0x614b   :  { %v6533_v49 = vadd.f32 %v7876_v51, %v7061_v0  ;;  %v6527_v57 = vpop.f32.mrb[61].mxu1 }
0x614c   :  { %v6528_v17 = vadd.f32 %v7061_v0, %v6527_v57  ;;  %v7066_v0 = vld [vmem:[#allocation41] ss:$0 sm:$0xff] }
0x614d   :  { %v6537_v52 = vmax.f32 %v6533_v49, 0.0 }
0x614e   :  { %v6536_v47 = vmax.f32 %v6528_v17, 0.0 }
0x614f   :  { %v6541_v54 = vsel %vm960_vm3, %v6537_v52, 0.0 }
0x6150   :  { %6542 = vadd.xlane.f32.xlu1 %v6541_v54  ;;  %v6538_v55 = vsel %vm960_vm3, %v6536_v47, 0.0 }
0x6151   :  { %6539 = vadd.xlane.f32.xlu0 %v6538_v55 }
0x61dd   :  { %v6543_v56 = vpop.xlane.xlu1 %6542 }
0x61de   :  { %v6545_v58 = vmul.f32 0.03125, %v6543_v56  ;;  %v6540_v41 = vpop.xlane.xlu0 %6539 }
0x61df   :  { %v6544_v59 = vmul.f32 0.03125, %v6540_v41 }
0x61e0   :  { %v6547_v60 = vsub.f32 %v6537_v52, %v6545_v58  ;;  %v7073_v52 = vld [vmem:[#allocation46] ss:$0 sm:$0xff] }
0x61e1   :  { %v6546_v63 = vsub.f32 %v6536_v47, %v6544_v59 }
0x61e2   :  { %v6549_v2 = vmul.f32 %v6547_v60, %v6547_v60 }
0x61e3   :  { %v6548_v8 = vmul.f32 %v6546_v63, %v6546_v63 }
0x61e4   :  { %v6553_v9 = vsel %vm960_vm3, %v6549_v2, 0.0 }
0x61e5   :  { %6554 = vadd.xlane.f32.xlu1 %v6553_v9  ;;  %v6550_v12 = vsel %vm960_vm3, %v6548_v8, 0.0 }
0x61e6   :  { %6551 = vadd.xlane.f32.xlu0 %v6550_v12 }
0x61f6   :  { %1531 = vrot.lane.b32.xlu1 %v1424_v53, %s9404_s8 }
0x61fc   :  { %1529 = vrot.lane.b32.xlu0 %v1419_v6, %s9404_s8 }
0x6272   :  { %v6555_v37 = vpop.xlane.xlu1 %6554 }
0x6273   :  { %v6557_v11 = vmul.f32 0.03125, %v6555_v37  ;;  %v6552_v30 = vpop.xlane.xlu0 %6551 }
0x6274   :  { %v6556_v19 = vmul.f32 0.03125, %v6552_v30 }
0x6275   :  { %v6559_v15 = vadd.f32 1e-05, %v6557_v11 }
0x6276   :  { %v6558_v24 = vadd.f32 1e-05, %v6556_v19  ;;  %v1532_v33 = vpop.permute.xlu1 %1531 }
0x6277   :  { %8686 = vrsqrt.f32 %v6559_v15  ;;  %v8194_v62 = vadd.f32 %v1532_v33, %v1424_v53  ;;  %v1530_v29 = vpop.permute.xlu0 %1529 }
0x6278   :  { %8688 = vrsqrt.f32 %v6558_v24  ;;  %v8192_v3 = vadd.f32 %v1530_v29, %v1419_v6 }
0x6279   :  { %v8195_v36 = vadd.f32 %v8194_v62, %v9998_v4  ;;  %v6677_v4 = vld [vmem:[#allocation43 + $0x18] sm:$0xff] }
0x627a   :  { %v8193_v50 = vadd.f32 %v8192_v3, %v9996_v16  ;;  %v6676_v16 = vld [vmem:[#allocation43 + $0x10] sm:$0xff] }
0x627b   :  { %v1626_v44 = vmul.f32 0.5, %v8195_v36  ;;  %v8184_v46 = vpack.c.bf16 %v6677_v4, %v6676_v16 }
0x627c   :  { %v1625_v43 = vmul.f32 0.5, %v8193_v50 }
0x627e   :  { %7896 = vmatprep.mubr.msk.f32.mxu1 %vm960_vm3, %v1625_v43 }
0x627f   :  { %7897 = vmatmul.mubr.msk.f32.vlgmr.msra.gmra.mrb[62].mxu1 %vm960_vm3, %v1626_v44 }
0x6280   :  { %8183 = vmatpush3.bf16.msra.mxu1 %v8180_v42 }
0x6281   :  { %v8687_v31 = vpop.eup %8686  ;;  %8185 = vmatprep.subr.bf16.mxu1 %v8184_v46 }
0x6282   :  { %v8689_v32 = vpop.eup %8688  ;;  %v6563_v14 = vmul.f32 %v8687_v31, %v6547_v60 }
0x6283   :  { %v6562_v34 = vmul.f32 %v8689_v32, %v6546_v63 }
0x6284   :  { %v6572_v45 = vmul.f32 %v7064_v22, %v6563_v14  ;;  %8187 = vmatpush3.bf16.msra.mxu1 %v8184_v46 }
0x6285   :  { %v6571_v7 = vmul.f32 %v7064_v22, %v6562_v34 }
0x6286   :  { %v6581_v38 = vadd.f32 %v7065_v1, %v6572_v45 }
0x6287   :  { %v6580_v35 = vadd.f32 %v7065_v1, %v6571_v7 }
0x6289   :  { %7885 = vmatprep.mubr.msk.f32.mxu0 %vm960_vm3, %v6580_v35 }
0x628a   :  { %7886 = vmatmul.mubr.msk.f32.vlgmr.msra.gmra.mrb[70].mxu0 %vm960_vm3, %v6581_v38 }
0x635d   :  { %v7887_v51 = vpop.f32.mrb[70].mxu0 }
0x635e   :  { %v6665_v49 = vpop.f32.mrb[71].mxu0  ;;  %v6671_v17 = vadd.f32 %v7887_v51, %v7066_v0 }
0x635f   :  { %v6666_v57 = vadd.f32 %v7066_v0, %v6665_v49 }
0x6361   :  { %7907 = vmatprep.mubr.msk.f32.mxu1 %vm960_vm3, %v6666_v57 }
0x6362   :  { %7908 = vmatmul.mubr.msk.f32.vlgmr.msra.gmra.mrb[62].mxu1 %vm960_vm3, %v6671_v17 }
0x6435   :  { %v7909_v47 = vpop.f32.mrb[62].mxu1 }
0x6436   :  { %v6852_v54 = vadd.f32 %v7909_v47, %v7073_v52  ;;  %v6835_v55 = vpop.f32.mrb[63].mxu1 }
0x6437   :  { %v6851_v56 = vadd.f32 %v7073_v52, %v6835_v55 }
0x6438   :  { %6854 = vst.msk [vmem:[#allocation47 + $0x8] sm:$0xff] %vm960_vm3, %v6852_v54 }
0x6439   :  { %6853 = vst.msk [vmem:[#allocation47] sm:$0xff] %vm960_vm3, %v6851_v56 }
0x643a   :  { %9297 = shalt.err (!%p9294_p10)
}
0x643b   :  { %s9298_s9 = scalar_lea.hbm %s9584_s3, 256 }
0x643c   :  { %p9299_p11 = scmp.ne.s32.totalorder %s9584_s3, %s9298_s9  ;;  %p9302_p12 = scmp.lt.u32.totalorder %s9298_s9, %s9584_s3 }
0x643e   :  { %p9304_p13 = pnand %p9302_p12, %p9299_p11 }
0x6440   :  { %9307 = shalt.err (!%p9304_p13)
}
0x6441   :  { %6866 = dma.vmem_to_hbm [thread:$0]  %s6861_s6, 256, %s9584_s3, [#allocation7], %s9373_s18, %s9373_s18, %s9374_s22  }
0x6442   :  { %9336 = dma.done.wait [#allocation7], 256  }
0x6443   :  { %9337 = vsyncadd [#allocation7], 4294967040 }
0x6444   :  { %6870 = vsyncpa [#allocation6], 1 }
0x6445   :  { %6871 = vsyncpa [#allocation9], 1 }
0x6446   :  { %6872 = vsyncpa [#allocation12], 1 }
0x6447   :  { %6873 = vsyncpa [#allocation15], 1 }
0x6448   :  { %6874 = vsyncpa [#allocation18], 1 }
0x6449   :  { %6875 = vsyncpa [#allocation21], 1 }
0x644a   :  { %6876 = vsyncpa [#allocation24], 1 }
0x644b   :  { %6877 = vsyncpa [#allocation27], 1 }
0x644c   :  { %6878 = vsyncpa [#allocation30], 1 }
0x644d   :  { %6879 = vsyncpa [#allocation33], 1 }
0x644e   :  { %6880 = vsyncpa [#allocation36], 1 }
0x644f   :  { %6881 = vsyncpa [#allocation39], 1 }
0x6450   :  { %6882 = vsyncpa [#allocation42], 1 }
0x6451   :  { %6883 = vsyncpa [#allocation45], 1 }
0x6452   :  { %6884 = vsyncpa [#allocation7], 1 }

</bundles_post_ra>
